<compile_context>
chip_gen: v6e
topology: v6e:2x2x1
jax: 0.10.0
libtpu: 0.0.40
codegen_flags: <defaults>
</compile_context>

<pallas_src>
import functools
import math

import jax
import jax.numpy as jnp
from jax.experimental import pallas as pl
from jax.experimental.pallas import tpu as pltpu

LANES = 128
BN_EPS = 1e-5
MINMAX_EPS = 1e-8


# ----------------------------- Pallas kernels ------------------------------

def _minmax_kernel(x_ref, o_ref):
    # x_ref: (N, C, H*W) in the PyTorch .view(N, C, H, W) layout, o_ref: (N, H*W)
    x = jnp.sum(x_ref[...].astype(jnp.float32), axis=1)          # sum over viewed "C"
    mx = jnp.max(x, axis=1, keepdims=True)
    mn = jnp.min(x, axis=1, keepdims=True)
    o_ref[...] = ((x - mn) / (mx - mn + MINMAX_EPS)).astype(o_ref.dtype)


def _conv_bn_relu_pool_kernel(x_ref, w_ref, s_ref, b_ref, o_ref):
    # x_ref: (rows, K) pool-fused im2col patches (bf16), one row per 2x2 pool block.
    # w_ref: (K, 4*128) bf16; column group p holds conv weights of pool phase p.
    # Epilogue: folded BN affine + ReLU (f32), then the 2x2 max pool is a max over
    # the four 128-wide lane groups -> lane-dense (rows, 128) store.
    cp = o_ref.shape[-1]
    y = jnp.dot(x_ref[...], w_ref[...], preferred_element_type=jnp.float32)
    y = jnp.maximum(y * s_ref[...] + b_ref[...], 0.0)
    pooled = jnp.maximum(jnp.maximum(y[:, 0 * cp:1 * cp], y[:, 1 * cp:2 * cp]),
                         jnp.maximum(y[:, 2 * cp:3 * cp], y[:, 3 * cp:4 * cp]))
    o_ref[...] = pooled.astype(o_ref.dtype)


def _fc_stack_kernel(x_ref, w1_ref, b1_ref, w2_ref, b2_ref, w3_ref, b3_ref, o_ref):
    # fc1 -> ReLU -> fc2 -> ReLU -> fc3 in one kernel; weights stay resident in VMEM,
    # intermediate activations never touch HBM.  bf16 MXU inputs, f32 accum/epilogue.
    h = jnp.dot(x_ref[...], w1_ref[...], preferred_element_type=jnp.float32)
    h = jnp.maximum(h + b1_ref[...], 0.0).astype(jnp.bfloat16)
    h = jnp.dot(h, w2_ref[...], preferred_element_type=jnp.float32)
    h = jnp.maximum(h + b2_ref[...], 0.0).astype(jnp.bfloat16)
    y = jnp.dot(h, w3_ref[...], preferred_element_type=jnp.float32) + b3_ref[...]
    o_ref[...] = y.astype(o_ref.dtype)


# ----------------------------- kernel wrappers ------------------------------

def minmax_map(x_view):
    """x_view: (N, C, H*W) raw-view layout -> (N, H*W) bf16 min-max normalized sum."""
    N, C, HW = x_view.shape
    return pl.pallas_call(
        _minmax_kernel,
        out_shape=jax.ShapeDtypeStruct((N, HW), jnp.bfloat16),
        grid=(1,),
        in_specs=[pl.BlockSpec((N, C, HW), lambda i: (0, 0, 0))],
        out_specs=pl.BlockSpec((N, HW), lambda i: (0, 0)),
    )(x_view)


def conv_bn_relu_pool(patches, wmat, scale4, bias4):
    """Fused conv (as pool-fused matmul) + BN + ReLU + 2x2 max pool.

    Row tiling is adaptive: split into two 8-aligned "parallel" tiles when the
    row count allows it (feeds both v7x TensorCores), otherwise take the whole
    array as a single block -- either way no row padding or output slicing.
    """
    m, kdim = patches.shape
    cp4 = wmat.shape[1]
    cp = cp4 // 4
    if m % 16 == 0:
        nblk, blk = 2, m // 2          # two 8-aligned tiles, megacore-friendly
    else:
        nblk, blk = 1, m               # full-array block (always legal)
    cost = pl.CostEstimate(
        flops=2 * m * kdim * cp4,
        transcendentals=0,
        bytes_accessed=m * kdim * 2 + kdim * cp4 * 2 + 2 * cp4 * 4 + m * cp * 2,
    )
    return pl.pallas_call(
        _conv_bn_relu_pool_kernel,
        out_shape=jax.ShapeDtypeStruct((m, cp), jnp.bfloat16),
        grid=(nblk,),
        in_specs=[
            pl.BlockSpec((blk, kdim), lambda i: (i, 0)),
            pl.BlockSpec((kdim, cp4), lambda i: (0, 0)),
            pl.BlockSpec((1, cp4), lambda i: (0, 0)),
            pl.BlockSpec((1, cp4), lambda i: (0, 0)),
        ],
        out_specs=pl.BlockSpec((blk, cp), lambda i: (i, 0)),
        compiler_params=pltpu.CompilerParams(dimension_semantics=("parallel",)),
        cost_estimate=cost,
    )(patches, wmat, scale4, bias4)


def fc_stack(x, w1, b1, w2, b2, w3, b3):
    n, d0 = x.shape
    h1 = w1.shape[1]
    h2 = w2.shape[1]
    cp = w3.shape[1]
    cost = pl.CostEstimate(
        flops=2 * n * (d0 * h1 + h1 * h2 + h2 * cp),
        transcendentals=0,
        bytes_accessed=(n * d0 * 2 + d0 * h1 * 2 + h1 * h2 * 2 + h2 * cp * 2
                        + (h1 + h2 + cp) * 4 + n * cp * 4),
    )
    return pl.pallas_call(
        _fc_stack_kernel,
        out_shape=jax.ShapeDtypeStruct((n, cp), jnp.float32),
        grid=(1,),
        in_specs=[
            pl.BlockSpec(x.shape, lambda i: (0, 0)),
            pl.BlockSpec(w1.shape, lambda i: (0, 0)),
            pl.BlockSpec(b1.shape, lambda i: (0, 0)),
            pl.BlockSpec(w2.shape, lambda i: (0, 0)),
            pl.BlockSpec(b2.shape, lambda i: (0, 0)),
            pl.BlockSpec(w3.shape, lambda i: (0, 0)),
            pl.BlockSpec(b3.shape, lambda i: (0, 0)),
        ],
        out_specs=pl.BlockSpec((n, cp), lambda i: (0, 0)),
        cost_estimate=cost,
    )(x, w1, b1, w2, b2, w3, b3)


# ------------------------- parameter / patch prep ---------------------------

def _pad_last(x, n):
    pad = n - x.shape[-1]
    if pad <= 0:
        return x
    cfg = [(0, 0)] * (x.ndim - 1) + [(0, pad)]
    return jnp.pad(x, cfg)


def _pad_axis(x, axis, n):
    pad = n - x.shape[axis]
    if pad <= 0:
        return x
    cfg = [(0, 0)] * x.ndim
    cfg[axis] = (0, pad)
    return jnp.pad(x, cfg)


def _pool_fused_conv_weight(w_oihw):
    """(Cout, Cin, k, k) conv weight -> ((k+1)^2*Cin, 4*128) bf16 matrix whose column
    group p = 2*hb + wb computes the conv output of pool phase (hb, wb) from the
    (k+1)x(k+1) input window that covers a full 2x2 pool block."""
    cout, cin, k, _ = w_oihw.shape
    w = jnp.transpose(w_oihw, (2, 3, 1, 0))                 # (k, k, cin, cout)
    blocks = []
    for hb in range(2):
        for wb in range(2):
            wp = jnp.zeros((k + 1, k + 1, cin, cout), w.dtype)
            blocks.append(wp.at[hb:hb + k, wb:wb + k].set(w))
    wt = jnp.stack(blocks, axis=3)                          # (k+1, k+1, cin, 4, cout)
    wt = _pad_axis(wt, 4, LANES)                            # lane-dense cout
    return wt.reshape((k + 1) * (k + 1) * cin, 4 * LANES).astype(jnp.bfloat16)


def _affine4(scale, bias):
    s = jnp.tile(_pad_last(scale, LANES), 4)[None, :].astype(jnp.float32)
    b = jnp.tile(_pad_last(bias, LANES), 4)[None, :].astype(jnp.float32)
    return s, b


def _pool_im2col(xpad, k, ho, wo):
    """Pool-fused patches: one row per 2x2 pool block holding its (k+1)x(k+1) window.
    xpad: (N, Hp, Wp[, C]) spatially padded input -> (N*ho*wo, (k+1)^2 * C)."""
    taps = []
    for u in range(k + 1):
        for v in range(k + 1):
            taps.append(xpad[:, u:u + 2 * ho:2, v:v + 2 * wo:2])
    t = jnp.stack(taps, axis=3)
    return t.reshape(t.shape[0] * ho * wo, -1)


def fold_params(p):
    """Fold eval-mode BatchNorm into per-channel affine and build the kernels'
    bf16 weight layouts.  Run once, outside the per-step forward."""
    def bn_fold(conv_b, bn):
        scale = bn["gamma"] / jnp.sqrt(bn["rvar"] + BN_EPS)
        bias = (conv_b - bn["rmean"]) * scale + bn["beta"]
        return scale, bias

    f = {}
    for idx, (wk, bk, bnk) in enumerate(
            [("conv1_w", "conv1_b", "bn1"), ("conv2_w", "conv2_b", "bn2"),
             ("conv3_w", "conv3_b", "bn3")], start=1):
        f[f"c{idx}_w"] = _pool_fused_conv_weight(p[wk])
        s, b = bn_fold(p[bk], p[bnk])
        f[f"c{idx}_s"], f[f"c{idx}_b"] = _affine4(s, b)

    # fc1: torch flattens NCHW (c*9 + h*3 + w); our features are (h*3 + w)*128 + c,
    # so permute the weight's input axis once here (activations never transpose).
    hid = p["fc1_w"].shape[0]
    w1 = p["fc1_w"].reshape(hid, 128, 3, 3)
    w1 = jnp.transpose(w1, (2, 3, 1, 0)).reshape(3 * 3 * 128, hid)
    f["f1_w"] = w1.astype(jnp.bfloat16)
    f["f1_b"] = p["fc1_b"][None, :].astype(jnp.float32)
    f["f2_w"] = p["fc2_w"].T.astype(jnp.bfloat16)
    f["f2_b"] = p["fc2_b"][None, :].astype(jnp.float32)
    f["f3_w"] = _pad_last(p["fc3_w"].T, LANES).astype(jnp.bfloat16)   # lane-dense fc3
    f["f3_b"] = _pad_last(p["fc3_b"], LANES)[None, :].astype(jnp.float32)
    return f


# ------------------------------- model glue --------------------------------

def init_params(key, embedding_dim=32):
    def conv_init(k, cout, cin, ks):
        kw, kb = jax.random.split(k)
        bound = 1.0 / math.sqrt(cin * ks * ks)
        return (jax.random.uniform(kw, (cout, cin, ks, ks), jnp.float32, -bound, bound),
                jax.random.uniform(kb, (cout,), jnp.float32, -bound, bound))

    def lin_init(k, nout, nin):
        kw, kb = jax.random.split(k)
        bound = 1.0 / math.sqrt(nin)
        return (jax.random.uniform(kw, (nout, nin), jnp.float32, -bound, bound),
                jax.random.uniform(kb, (nout,), jnp.float32, -bound, bound))

    def bn_init(c):
        return dict(gamma=jnp.ones((c,), jnp.float32), beta=jnp.zeros((c,), jnp.float32),
                    rmean=jnp.zeros((c,), jnp.float32), rvar=jnp.ones((c,), jnp.float32))

    ks = jax.random.split(key, 6)
    hid = 4 * embedding_dim
    p = {}
    p["conv1_w"], p["conv1_b"] = conv_init(ks[0], 32, 1, 5)
    p["bn1"] = bn_init(32)
    p["conv2_w"], p["conv2_b"] = conv_init(ks[1], 64, 32, 3)
    p["bn2"] = bn_init(64)
    p["conv3_w"], p["conv3_b"] = conv_init(ks[2], 128, 64, 3)
    p["bn3"] = bn_init(128)
    p["fc1_w"], p["fc1_b"] = lin_init(ks[3], hid, 128 * 3 * 3)
    p["fc2_w"], p["fc2_b"] = lin_init(ks[4], hid, hid)
    p["fc3_w"], p["fc3_b"] = lin_init(ks[5], embedding_dim, hid)
    return p


@functools.partial(jax.jit, static_argnames=("embedding_dim",))
def custom_cnn_forward(folded, inputs, *, embedding_dim=32):
    """inputs: (B, S, H, W, C) -> outputs: (B, S, embedding_dim)"""
    B, S, H, W, C = inputs.shape
    N = B * S

    # PyTorch `.view(B*S, C, H, W)` reinterprets the contiguous buffer (exact for C=1).
    x = inputs.astype(jnp.float32).reshape(N, C, H * W)
    x = minmax_map(x).reshape(N, H, W)                                   # Pallas

    # conv1: 1->32, k=5, pad=2, BN+ReLU+2x2 pool fused in one kernel
    xp = jnp.pad(x, ((0, 0), (2, 2), (2, 2)))
    p = _pool_im2col(xp, 5, H // 2, W // 2)                              # (N*14*14, 36)
    x = conv_bn_relu_pool(p, folded["c1_w"], folded["c1_s"], folded["c1_b"])
    H, W = H // 2, W // 2

    # conv2: 32->64 (real channels sliced back out of the lane-padded 128)
    x = x.reshape(N, H, W, LANES)[..., :32]
    xp = jnp.pad(x, ((0, 0), (1, 1), (1, 1), (0, 0)))
    p = _pool_im2col(xp, 3, H // 2, W // 2)                              # (N*7*7, 512)
    x = conv_bn_relu_pool(p, folded["c2_w"], folded["c2_s"], folded["c2_b"])
    H, W = H // 2, W // 2

    # conv3: 64->128 (odd 7x7 -> 3x3 floor pooling handled by the block layout)
    x = x.reshape(N, H, W, LANES)[..., :64]
    xp = jnp.pad(x, ((0, 0), (1, 1), (1, 1), (0, 0)))
    p = _pool_im2col(xp, 3, H // 2, W // 2)                              # (N*3*3, 1024)
    x = conv_bn_relu_pool(p, folded["c3_w"], folded["c3_s"], folded["c3_b"])
    H, W = H // 2, W // 2

    # fc1 -> ReLU -> fc2 -> ReLU -> fc3 fused in one kernel (NHWC flatten; fc1
    # weight was pre-permuted to match torch's NCHW flatten order).
    x = x.reshape(N, H * W * LANES)                                      # (N, 1152)
    y = fc_stack(x, folded["f1_w"], folded["f1_b"], folded["f2_w"], folded["f2_b"],
                 folded["f3_w"], folded["f3_b"])                         # (N, 128) f32
    return y[:, :embedding_dim].reshape(B, S, embedding_dim)


if __name__ == "__main__":
    key = jax.random.PRNGKey(0)
    pkey, xkey = jax.random.split(key)
    params = init_params(pkey, embedding_dim=32)
    folded = fold_params(params)   # one-time BN fold + kernel weight layouts

    # H = W = 28 is required by the fc input size 128*3*3 (28 -> 14 -> 7 -> 3)
    B, S, H, W, C = 2, 4, 28, 28, 1
    inputs = jax.random.uniform(xkey, (B, S, H, W, C), jnp.float32)

    out = custom_cnn_forward(folded, inputs, embedding_dim=32)
    out = jax.block_until_ready(out)
    assert out.shape == (B, S, 32), out.shape
    assert bool(jnp.all(jnp.isfinite(out)))
    print("KERNEL_OK")
</pallas_src>

<mosaic_0001>
module attributes {stable_mosaic.version = 11 : i64} {
  func.func @_minmax_kernel(%arg0: i32, %arg1: memref<8x1x784xf32, #tpu.memory_space<vmem>>, %arg2: memref<8x784xbf16, #tpu.memory_space<vmem>>) attributes {dimension_semantics = [#tpu.dimension_semantics<arbitrary>], iteration_bounds = array<i64: 1>, scalar_prefetch = 0 : i64, scratch_operands = 0 : i64, tpu.core_type = #tpu.core_type<tc>, window_params = [{pipeline_mode = #tpu.pipeline_mode<synchronous>, transform_indices = @transform_0, window_bounds = array<i64: 8, 1, 784>}, {pipeline_mode = #tpu.pipeline_mode<synchronous>, transform_indices = @transform_1, window_bounds = array<i64: 8, 784>}]} {
    %c0 = arith.constant 0 : index
    %c0_0 = arith.constant 0 : index
    %c0_1 = arith.constant 0 : index
    %0 = vector.load %arg1[%c0, %c0_0, %c0_1] : memref<8x1x784xf32, #tpu.memory_space<vmem>>, vector<8x1x784xf32>
    %cst = arith.constant dense<0.000000e+00> : vector<8x784xf32>
    %1 = vector.multi_reduction <add>, %0, %cst [1] : vector<8x1x784xf32> to vector<8x784xf32>
    %cst_2 = arith.constant dense<0xFF800000> : vector<8xf32>
    %2 = vector.multi_reduction <maximumf>, %1, %cst_2 [1] : vector<8x784xf32> to vector<8xf32>
    %3 = vector.shape_cast %2 : vector<8xf32> to vector<8x1xf32>
    %cst_3 = arith.constant dense<0x7F800000> : vector<8xf32>
    %4 = vector.multi_reduction <minimumf>, %1, %cst_3 [1] : vector<8x784xf32> to vector<8xf32>
    %5 = vector.shape_cast %4 : vector<8xf32> to vector<8x1xf32>
    %6 = vector.broadcast %5 : vector<8x1xf32> to vector<8x784xf32>
    %7 = arith.subf %1, %6 : vector<8x784xf32>
    %8 = arith.subf %3, %5 : vector<8x1xf32>
    %cst_4 = arith.constant 9.99999993E-9 : f32
    %9 = vector.broadcast %cst_4 : f32 to vector<8x1xf32>
    %10 = arith.addf %8, %9 : vector<8x1xf32>
    %11 = vector.broadcast %10 : vector<8x1xf32> to vector<8x784xf32>
    %12 = arith.divf %7, %11 : vector<8x784xf32>
    %13 = arith.truncf %12 : vector<8x784xf32> to vector<8x784xbf16>
    %c0_5 = arith.constant 0 : index
    %c0_6 = arith.constant 0 : index
    %14 = vector.load %arg2[%c0_5, %c0_6] : memref<8x784xbf16, #tpu.memory_space<vmem>>, vector<8x784xbf16>
    tpu.vector_store %arg2[%c0_5, %c0_6], %13 {strides = array<i32>} : memref<8x784xbf16, #tpu.memory_space<vmem>>, vector<8x784xbf16>,
    return
  }
  func.func @transform_0(%arg0: i32) -> (i32, i32, i32) {
    %c0_i32 = arith.constant 0 : i32
    %c0_i32_0 = arith.constant 0 : i32
    %c0_i32_1 = arith.constant 0 : i32
    %c0_i32_2 = arith.constant 0 : i32
    return %c0_i32, %c0_i32_0, %c0_i32_1 : i32, i32, i32
  }
  func.func @transform_1(%arg0: i32) -> (i32, i32) {
    %c0_i32 = arith.constant 0 : i32
    %c0_i32_0 = arith.constant 0 : i32
    %c0_i32_1 = arith.constant 0 : i32
    return %c0_i32, %c0_i32_0 : i32, i32
  }
}

module attributes {stable_mosaic.version = 11 : i64} {
  func.func @_conv_bn_relu_pool_kernel(%arg0: i32, %arg1: memref<784x36xbf16, #tpu.memory_space<vmem>>, %arg2: memref<36x512xbf16, #tpu.memory_space<vmem>>, %arg3: memref<1x512xf32, #tpu.memory_space<vmem>>, %arg4: memref<1x512xf32, #tpu.memory_space<vmem>>, %arg5: memref<784x128xbf16, #tpu.memory_space<vmem>>) attributes {dimension_semantics = [#tpu.dimension_semantics<parallel>], iteration_bounds = array<i64: 2>, scalar_prefetch = 0 : i64, scratch_operands = 0 : i64, tpu.core_type = #tpu.core_type<tc>, window_params = [{transform_indices = @transform_0, window_bounds = array<i64: 784, 36>}, {pipeline_mode = #tpu.pipeline_mode<synchronous>, transform_indices = @transform_1, window_bounds = array<i64: 36, 512>}, {pipeline_mode = #tpu.pipeline_mode<synchronous>, transform_indices = @transform_2, window_bounds = array<i64: 1, 512>}, {pipeline_mode = #tpu.pipeline_mode<synchronous>, transform_indices = @transform_3, window_bounds = array<i64: 1, 512>}, {transform_indices = @transform_4, window_bounds = array<i64: 784, 128>}]} {
    %c0 = arith.constant 0 : index
    %c0_0 = arith.constant 0 : index
    %0 = vector.load %arg1[%c0, %c0_0] : memref<784x36xbf16, #tpu.memory_space<vmem>>, vector<784x36xbf16>
    %c0_1 = arith.constant 0 : index
    %c0_2 = arith.constant 0 : index
    %1 = vector.load %arg2[%c0_1, %c0_2] : memref<36x512xbf16, #tpu.memory_space<vmem>>, vector<36x512xbf16>
    %cst = arith.constant dense<0.000000e+00> : vector<784x512xf32>
    %2 = tpu.matmul %0, %1, %cst {dimension_numbers = #tpu.dot_dimension_numbers<[1], [0], [0], [1], [0, 0, 1, 1], [], []>} : vector<784x36xbf16>, vector<36x512xbf16>, vector<784x512xf32> -> vector<784x512xf32>
    %c0_3 = arith.constant 0 : index
    %c0_4 = arith.constant 0 : index
    %3 = vector.load %arg3[%c0_3, %c0_4] : memref<1x512xf32, #tpu.memory_space<vmem>>, vector<1x512xf32>
    %4 = vector.broadcast %3 : vector<1x512xf32> to vector<784x512xf32>
    %5 = arith.mulf %2, %4 : vector<784x512xf32>
    %c0_5 = arith.constant 0 : index
    %c0_6 = arith.constant 0 : index
    %6 = vector.load %arg4[%c0_5, %c0_6] : memref<1x512xf32, #tpu.memory_space<vmem>>, vector<1x512xf32>
    %7 = vector.broadcast %6 : vector<1x512xf32> to vector<784x512xf32>
    %8 = arith.addf %5, %7 : vector<784x512xf32>
    %cst_7 = arith.constant 0.000000e+00 : f32
    %9 = vector.broadcast %cst_7 : f32 to vector<784x512xf32>
    %10 = arith.maximumf %8, %9 : vector<784x512xf32>
    %11 = vector.extract_strided_slice %10 {offsets = [0, 0], sizes = [784, 128], strides = [1, 1]} : vector<784x512xf32> to vector<784x128xf32>
    %12 = vector.extract_strided_slice %10 {offsets = [0, 128], sizes = [784, 128], strides = [1, 1]} : vector<784x512xf32> to vector<784x128xf32>
    %13 = arith.maximumf %11, %12 : vector<784x128xf32>
    %14 = vector.extract_strided_slice %10 {offsets = [0, 256], sizes = [784, 128], strides = [1, 1]} : vector<784x512xf32> to vector<784x128xf32>
    %15 = vector.extract_strided_slice %10 {offsets = [0, 384], sizes = [784, 128], strides = [1, 1]} : vector<784x512xf32> to vector<784x128xf32>
    %16 = arith.maximumf %14, %15 : vector<784x128xf32>
    %17 = arith.maximumf %13, %16 : vector<784x128xf32>
    %18 = arith.truncf %17 : vector<784x128xf32> to vector<784x128xbf16>
    %c0_8 = arith.constant 0 : index
    %c0_9 = arith.constant 0 : index
    %19 = vector.load %arg5[%c0_8, %c0_9] : memref<784x128xbf16, #tpu.memory_space<vmem>>, vector<784x128xbf16>
    tpu.vector_store %arg5[%c0_8, %c0_9], %18 {strides = array<i32>} : memref<784x128xbf16, #tpu.memory_space<vmem>>, vector<784x128xbf16>,
    return
  }
  func.func @transform_0(%arg0: i32) -> (i32, i32) {
    %c0_i32 = arith.constant 0 : i32
    %c0_i32_0 = arith.constant 0 : i32
    return %arg0, %c0_i32 : i32, i32
  }
  func.func @transform_1(%arg0: i32) -> (i32, i32) {
    %c0_i32 = arith.constant 0 : i32
    %c0_i32_0 = arith.constant 0 : i32
    %c0_i32_1 = arith.constant 0 : i32
    return %c0_i32, %c0_i32_0 : i32, i32
  }
  func.func @transform_2(%arg0: i32) -> (i32, i32) {
    %c0_i32 = arith.constant 0 : i32
    %c0_i32_0 = arith.constant 0 : i32
    %c0_i32_1 = arith.constant 0 : i32
    return %c0_i32, %c0_i32_0 : i32, i32
  }
  func.func @transform_3(%arg0: i32) -> (i32, i32) {
    %c0_i32 = arith.constant 0 : i32
    %c0_i32_0 = arith.constant 0 : i32
    %c0_i32_1 = arith.constant 0 : i32
    return %c0_i32, %c0_i32_0 : i32, i32
  }
  func.func @transform_4(%arg0: i32) -> (i32, i32) {
    %c0_i32 = arith.constant 0 : i32
    %c0_i32_0 = arith.constant 0 : i32
    return %arg0, %c0_i32 : i32, i32
  }
}

module attributes {stable_mosaic.version = 11 : i64} {
  func.func @_conv_bn_relu_pool_kernel(%arg0: i32, %arg1: memref<392x512xbf16, #tpu.memory_space<vmem>>, %arg2: memref<512x512xbf16, #tpu.memory_space<vmem>>, %arg3: memref<1x512xf32, #tpu.memory_space<vmem>>, %arg4: memref<1x512xf32, #tpu.memory_space<vmem>>, %arg5: memref<392x128xbf16, #tpu.memory_space<vmem>>) attributes {dimension_semantics = [#tpu.dimension_semantics<parallel>], iteration_bounds = array<i64: 1>, scalar_prefetch = 0 : i64, scratch_operands = 0 : i64, tpu.core_type = #tpu.core_type<tc>, window_params = [{transform_indices = @transform_0, window_bounds = array<i64: 392, 512>}, {pipeline_mode = #tpu.pipeline_mode<synchronous>, transform_indices = @transform_1, window_bounds = array<i64: 512, 512>}, {pipeline_mode = #tpu.pipeline_mode<synchronous>, transform_indices = @transform_2, window_bounds = array<i64: 1, 512>}, {pipeline_mode = #tpu.pipeline_mode<synchronous>, transform_indices = @transform_3, window_bounds = array<i64: 1, 512>}, {transform_indices = @transform_4, window_bounds = array<i64: 392, 128>}]} {
    %c0 = arith.constant 0 : index
    %c0_0 = arith.constant 0 : index
    %0 = vector.load %arg1[%c0, %c0_0] : memref<392x512xbf16, #tpu.memory_space<vmem>>, vector<392x512xbf16>
    %c0_1 = arith.constant 0 : index
    %c0_2 = arith.constant 0 : index
    %1 = vector.load %arg2[%c0_1, %c0_2] : memref<512x512xbf16, #tpu.memory_space<vmem>>, vector<512x512xbf16>
    %cst = arith.constant dense<0.000000e+00> : vector<392x512xf32>
    %2 = tpu.matmul %0, %1, %cst {dimension_numbers = #tpu.dot_dimension_numbers<[1], [0], [0], [1], [0, 0, 1, 1], [], []>} : vector<392x512xbf16>, vector<512x512xbf16>, vector<392x512xf32> -> vector<392x512xf32>
    %c0_3 = arith.constant 0 : index
    %c0_4 = arith.constant 0 : index
    %3 = vector.load %arg3[%c0_3, %c0_4] : memref<1x512xf32, #tpu.memory_space<vmem>>, vector<1x512xf32>
    %4 = vector.broadcast %3 : vector<1x512xf32> to vector<392x512xf32>
    %5 = arith.mulf %2, %4 : vector<392x512xf32>
    %c0_5 = arith.constant 0 : index
    %c0_6 = arith.constant 0 : index
    %6 = vector.load %arg4[%c0_5, %c0_6] : memref<1x512xf32, #tpu.memory_space<vmem>>, vector<1x512xf32>
    %7 = vector.broadcast %6 : vector<1x512xf32> to vector<392x512xf32>
    %8 = arith.addf %5, %7 : vector<392x512xf32>
    %cst_7 = arith.constant 0.000000e+00 : f32
    %9 = vector.broadcast %cst_7 : f32 to vector<392x512xf32>
    %10 = arith.maximumf %8, %9 : vector<392x512xf32>
    %11 = vector.extract_strided_slice %10 {offsets = [0, 0], sizes = [392, 128], strides = [1, 1]} : vector<392x512xf32> to vector<392x128xf32>
    %12 = vector.extract_strided_slice %10 {offsets = [0, 128], sizes = [392, 128], strides = [1, 1]} : vector<392x512xf32> to vector<392x128xf32>
    %13 = arith.maximumf %11, %12 : vector<392x128xf32>
    %14 = vector.extract_strided_slice %10 {offsets = [0, 256], sizes = [392, 128], strides = [1, 1]} : vector<392x512xf32> to vector<392x128xf32>
    %15 = vector.extract_strided_slice %10 {offsets = [0, 384], sizes = [392, 128], strides = [1, 1]} : vector<392x512xf32> to vector<392x128xf32>
    %16 = arith.maximumf %14, %15 : vector<392x128xf32>
    %17 = arith.maximumf %13, %16 : vector<392x128xf32>
    %18 = arith.truncf %17 : vector<392x128xf32> to vector<392x128xbf16>
    %c0_8 = arith.constant 0 : index
    %c0_9 = arith.constant 0 : index
    %19 = vector.load %arg5[%c0_8, %c0_9] : memref<392x128xbf16, #tpu.memory_space<vmem>>, vector<392x128xbf16>
    tpu.vector_store %arg5[%c0_8, %c0_9], %18 {strides = array<i32>} : memref<392x128xbf16, #tpu.memory_space<vmem>>, vector<392x128xbf16>,
    return
  }
  func.func @transform_0(%arg0: i32) -> (i32, i32) {
    %c0_i32 = arith.constant 0 : i32
    %c0_i32_0 = arith.constant 0 : i32
    return %arg0, %c0_i32 : i32, i32
  }
  func.func @transform_1(%arg0: i32) -> (i32, i32) {
    %c0_i32 = arith.constant 0 : i32
    %c0_i32_0 = arith.constant 0 : i32
    %c0_i32_1 = arith.constant 0 : i32
    return %c0_i32, %c0_i32_0 : i32, i32
  }
  func.func @transform_2(%arg0: i32) -> (i32, i32) {
    %c0_i32 = arith.constant 0 : i32
    %c0_i32_0 = arith.constant 0 : i32
    %c0_i32_1 = arith.constant 0 : i32
    return %c0_i32, %c0_i32_0 : i32, i32
  }
  func.func @transform_3(%arg0: i32) -> (i32, i32) {
    %c0_i32 = arith.constant 0 : i32
    %c0_i32_0 = arith.constant 0 : i32
    %c0_i32_1 = arith.constant 0 : i32
    return %c0_i32, %c0_i32_0 : i32, i32
  }
  func.func @transform_4(%arg0: i32) -> (i32, i32) {
    %c0_i32 = arith.constant 0 : i32
    %c0_i32_0 = arith.constant 0 : i32
    return %arg0, %c0_i32 : i32, i32
  }
}

module attributes {stable_mosaic.version = 11 : i64} {
  func.func @_conv_bn_relu_pool_kernel(%arg0: i32, %arg1: memref<72x1024xbf16, #tpu.memory_space<vmem>>, %arg2: memref<1024x512xbf16, #tpu.memory_space<vmem>>, %arg3: memref<1x512xf32, #tpu.memory_space<vmem>>, %arg4: memref<1x512xf32, #tpu.memory_space<vmem>>, %arg5: memref<72x128xbf16, #tpu.memory_space<vmem>>) attributes {dimension_semantics = [#tpu.dimension_semantics<parallel>], iteration_bounds = array<i64: 1>, scalar_prefetch = 0 : i64, scratch_operands = 0 : i64, tpu.core_type = #tpu.core_type<tc>, window_params = [{transform_indices = @transform_0, window_bounds = array<i64: 72, 1024>}, {pipeline_mode = #tpu.pipeline_mode<synchronous>, transform_indices = @transform_1, window_bounds = array<i64: 1024, 512>}, {pipeline_mode = #tpu.pipeline_mode<synchronous>, transform_indices = @transform_2, window_bounds = array<i64: 1, 512>}, {pipeline_mode = #tpu.pipeline_mode<synchronous>, transform_indices = @transform_3, window_bounds = array<i64: 1, 512>}, {transform_indices = @transform_4, window_bounds = array<i64: 72, 128>}]} {
    %c0 = arith.constant 0 : index
    %c0_0 = arith.constant 0 : index
    %0 = vector.load %arg1[%c0, %c0_0] : memref<72x1024xbf16, #tpu.memory_space<vmem>>, vector<72x1024xbf16>
    %c0_1 = arith.constant 0 : index
    %c0_2 = arith.constant 0 : index
    %1 = vector.load %arg2[%c0_1, %c0_2] : memref<1024x512xbf16, #tpu.memory_space<vmem>>, vector<1024x512xbf16>
    %cst = arith.constant dense<0.000000e+00> : vector<72x512xf32>
    %2 = tpu.matmul %0, %1, %cst {dimension_numbers = #tpu.dot_dimension_numbers<[1], [0], [0], [1], [0, 0, 1, 1], [], []>} : vector<72x1024xbf16>, vector<1024x512xbf16>, vector<72x512xf32> -> vector<72x512xf32>
    %c0_3 = arith.constant 0 : index
    %c0_4 = arith.constant 0 : index
    %3 = vector.load %arg3[%c0_3, %c0_4] : memref<1x512xf32, #tpu.memory_space<vmem>>, vector<1x512xf32>
    %4 = vector.broadcast %3 : vector<1x512xf32> to vector<72x512xf32>
    %5 = arith.mulf %2, %4 : vector<72x512xf32>
    %c0_5 = arith.constant 0 : index
    %c0_6 = arith.constant 0 : index
    %6 = vector.load %arg4[%c0_5, %c0_6] : memref<1x512xf32, #tpu.memory_space<vmem>>, vector<1x512xf32>
    %7 = vector.broadcast %6 : vector<1x512xf32> to vector<72x512xf32>
    %8 = arith.addf %5, %7 : vector<72x512xf32>
    %cst_7 = arith.constant 0.000000e+00 : f32
    %9 = vector.broadcast %cst_7 : f32 to vector<72x512xf32>
    %10 = arith.maximumf %8, %9 : vector<72x512xf32>
    %11 = vector.extract_strided_slice %10 {offsets = [0, 0], sizes = [72, 128], strides = [1, 1]} : vector<72x512xf32> to vector<72x128xf32>
    %12 = vector.extract_strided_slice %10 {offsets = [0, 128], sizes = [72, 128], strides = [1, 1]} : vector<72x512xf32> to vector<72x128xf32>
    %13 = arith.maximumf %11, %12 : vector<72x128xf32>
    %14 = vector.extract_strided_slice %10 {offsets = [0, 256], sizes = [72, 128], strides = [1, 1]} : vector<72x512xf32> to vector<72x128xf32>
    %15 = vector.extract_strided_slice %10 {offsets = [0, 384], sizes = [72, 128], strides = [1, 1]} : vector<72x512xf32> to vector<72x128xf32>
    %16 = arith.maximumf %14, %15 : vector<72x128xf32>
    %17 = arith.maximumf %13, %16 : vector<72x128xf32>
    %18 = arith.truncf %17 : vector<72x128xf32> to vector<72x128xbf16>
    %c0_8 = arith.constant 0 : index
    %c0_9 = arith.constant 0 : index
    %19 = vector.load %arg5[%c0_8, %c0_9] : memref<72x128xbf16, #tpu.memory_space<vmem>>, vector<72x128xbf16>
    tpu.vector_store %arg5[%c0_8, %c0_9], %18 {strides = array<i32>} : memref<72x128xbf16, #tpu.memory_space<vmem>>, vector<72x128xbf16>,
    return
  }
  func.func @transform_0(%arg0: i32) -> (i32, i32) {
    %c0_i32 = arith.constant 0 : i32
    %c0_i32_0 = arith.constant 0 : i32
    return %arg0, %c0_i32 : i32, i32
  }
  func.func @transform_1(%arg0: i32) -> (i32, i32) {
    %c0_i32 = arith.constant 0 : i32
    %c0_i32_0 = arith.constant 0 : i32
    %c0_i32_1 = arith.constant 0 : i32
    return %c0_i32, %c0_i32_0 : i32, i32
  }
  func.func @transform_2(%arg0: i32) -> (i32, i32) {
    %c0_i32 = arith.constant 0 : i32
    %c0_i32_0 = arith.constant 0 : i32
    %c0_i32_1 = arith.constant 0 : i32
    return %c0_i32, %c0_i32_0 : i32, i32
  }
  func.func @transform_3(%arg0: i32) -> (i32, i32) {
    %c0_i32 = arith.constant 0 : i32
    %c0_i32_0 = arith.constant 0 : i32
    %c0_i32_1 = arith.constant 0 : i32
    return %c0_i32, %c0_i32_0 : i32, i32
  }
  func.func @transform_4(%arg0: i32) -> (i32, i32) {
    %c0_i32 = arith.constant 0 : i32
    %c0_i32_0 = arith.constant 0 : i32
    return %arg0, %c0_i32 : i32, i32
  }
}

module attributes {stable_mosaic.version = 11 : i64} {
  func.func @_fc_stack_kernel(%arg0: i32, %arg1: memref<8x1152xbf16, #tpu.memory_space<vmem>>, %arg2: memref<1152x128xbf16, #tpu.memory_space<vmem>>, %arg3: memref<1x128xf32, #tpu.memory_space<vmem>>, %arg4: memref<128x128xbf16, #tpu.memory_space<vmem>>, %arg5: memref<1x128xf32, #tpu.memory_space<vmem>>, %arg6: memref<128x128xbf16, #tpu.memory_space<vmem>>, %arg7: memref<1x128xf32, #tpu.memory_space<vmem>>, %arg8: memref<8x128xf32, #tpu.memory_space<vmem>>) attributes {dimension_semantics = [#tpu.dimension_semantics<arbitrary>], iteration_bounds = array<i64: 1>, scalar_prefetch = 0 : i64, scratch_operands = 0 : i64, tpu.core_type = #tpu.core_type<tc>, window_params = [{pipeline_mode = #tpu.pipeline_mode<synchronous>, transform_indices = @transform_0, window_bounds = array<i64: 8, 1152>}, {pipeline_mode = #tpu.pipeline_mode<synchronous>, transform_indices = @transform_1, window_bounds = array<i64: 1152, 128>}, {pipeline_mode = #tpu.pipeline_mode<synchronous>, transform_indices = @transform_2, window_bounds = array<i64: 1, 128>}, {pipeline_mode = #tpu.pipeline_mode<synchronous>, transform_indices = @transform_3, window_bounds = array<i64: 128, 128>}, {pipeline_mode = #tpu.pipeline_mode<synchronous>, transform_indices = @transform_4, window_bounds = array<i64: 1, 128>}, {pipeline_mode = #tpu.pipeline_mode<synchronous>, transform_indices = @transform_5, window_bounds = array<i64: 128, 128>}, {pipeline_mode = #tpu.pipeline_mode<synchronous>, transform_indices = @transform_6, window_bounds = array<i64: 1, 128>}, {pipeline_mode = #tpu.pipeline_mode<synchronous>, transform_indices = @transform_7, window_bounds = array<i64: 8, 128>}]} {
    %c0 = arith.constant 0 : index
    %c0_0 = arith.constant 0 : index
    %0 = vector.load %arg1[%c0, %c0_0] : memref<8x1152xbf16, #tpu.memory_space<vmem>>, vector<8x1152xbf16>
    %c0_1 = arith.constant 0 : index
    %c0_2 = arith.constant 0 : index
    %1 = vector.load %arg2[%c0_1, %c0_2] : memref<1152x128xbf16, #tpu.memory_space<vmem>>, vector<1152x128xbf16>
    %cst = arith.constant dense<0.000000e+00> : vector<8x128xf32>
    %2 = tpu.matmul %0, %1, %cst {dimension_numbers = #tpu.dot_dimension_numbers<[1], [0], [0], [1], [0, 0, 1, 1], [], []>} : vector<8x1152xbf16>, vector<1152x128xbf16>, vector<8x128xf32> -> vector<8x128xf32>
    %c0_3 = arith.constant 0 : index
    %c0_4 = arith.constant 0 : index
    %3 = vector.load %arg3[%c0_3, %c0_4] : memref<1x128xf32, #tpu.memory_space<vmem>>, vector<1x128xf32>
    %4 = vector.broadcast %3 : vector<1x128xf32> to vector<8x128xf32>
    %5 = arith.addf %2, %4 : vector<8x128xf32>
    %cst_5 = arith.constant 0.000000e+00 : f32
    %6 = vector.broadcast %cst_5 : f32 to vector<8x128xf32>
    %7 = arith.maximumf %5, %6 : vector<8x128xf32>
    %8 = arith.truncf %7 : vector<8x128xf32> to vector<8x128xbf16>
    %c0_6 = arith.constant 0 : index
    %c0_7 = arith.constant 0 : index
    %9 = vector.load %arg4[%c0_6, %c0_7] : memref<128x128xbf16, #tpu.memory_space<vmem>>, vector<128x128xbf16>
    %cst_8 = arith.constant dense<0.000000e+00> : vector<8x128xf32>
    %10 = tpu.matmul %8, %9, %cst_8 {dimension_numbers = #tpu.dot_dimension_numbers<[1], [0], [0], [1], [0, 0, 1, 1], [], []>} : vector<8x128xbf16>, vector<128x128xbf16>, vector<8x128xf32> -> vector<8x128xf32>
    %c0_9 = arith.constant 0 : index
    %c0_10 = arith.constant 0 : index
    %11 = vector.load %arg5[%c0_9, %c0_10] : memref<1x128xf32, #tpu.memory_space<vmem>>, vector<1x128xf32>
    %12 = vector.broadcast %11 : vector<1x128xf32> to vector<8x128xf32>
    %13 = arith.addf %10, %12 : vector<8x128xf32>
    %cst_11 = arith.constant 0.000000e+00 : f32
    %14 = vector.broadcast %cst_11 : f32 to vector<8x128xf32>
    %15 = arith.maximumf %13, %14 : vector<8x128xf32>
    %16 = arith.truncf %15 : vector<8x128xf32> to vector<8x128xbf16>
    %c0_12 = arith.constant 0 : index
    %c0_13 = arith.constant 0 : index
    %17 = vector.load %arg6[%c0_12, %c0_13] : memref<128x128xbf16, #tpu.memory_space<vmem>>, vector<128x128xbf16>
    %cst_14 = arith.constant dense<0.000000e+00> : vector<8x128xf32>
    %18 = tpu.matmul %16, %17, %cst_14 {dimension_numbers = #tpu.dot_dimension_numbers<[1], [0], [0], [1], [0, 0, 1, 1], [], []>} : vector<8x128xbf16>, vector<128x128xbf16>, vector<8x128xf32> -> vector<8x128xf32>
    %c0_15 = arith.constant 0 : index
    %c0_16 = arith.constant 0 : index
    %19 = vector.load %arg7[%c0_15, %c0_16] : memref<1x128xf32, #tpu.memory_space<vmem>>, vector<1x128xf32>
    %20 = vector.broadcast %19 : vector<1x128xf32> to vector<8x128xf32>
    %21 = arith.addf %18, %20 : vector<8x128xf32>
    %c0_17 = arith.constant 0 : index
    %c0_18 = arith.constant 0 : index
    %22 = vector.load %arg8[%c0_17, %c0_18] : memref<8x128xf32, #tpu.memory_space<vmem>>, vector<8x128xf32>
    tpu.vector_store %arg8[%c0_17, %c0_18], %21 {strides = array<i32>} : memref<8x128xf32, #tpu.memory_space<vmem>>, vector<8x128xf32>,
    return
  }
  func.func @transform_0(%arg0: i32) -> (i32, i32) {
    %c0_i32 = arith.constant 0 : i32
    %c0_i32_0 = arith.constant 0 : i32
    %c0_i32_1 = arith.constant 0 : i32
    return %c0_i32, %c0_i32_0 : i32, i32
  }
  func.func @transform_1(%arg0: i32) -> (i32, i32) {
    %c0_i32 = arith.constant 0 : i32
    %c0_i32_0 = arith.constant 0 : i32
    %c0_i32_1 = arith.constant 0 : i32
    return %c0_i32, %c0_i32_0 : i32, i32
  }
  func.func @transform_2(%arg0: i32) -> (i32, i32) {
    %c0_i32 = arith.constant 0 : i32
    %c0_i32_0 = arith.constant 0 : i32
    %c0_i32_1 = arith.constant 0 : i32
    return %c0_i32, %c0_i32_0 : i32, i32
  }
  func.func @transform_3(%arg0: i32) -> (i32, i32) {
    %c0_i32 = arith.constant 0 : i32
    %c0_i32_0 = arith.constant 0 : i32
    %c0_i32_1 = arith.constant 0 : i32
    return %c0_i32, %c0_i32_0 : i32, i32
  }
  func.func @transform_4(%arg0: i32) -> (i32, i32) {
    %c0_i32 = arith.constant 0 : i32
    %c0_i32_0 = arith.constant 0 : i32
    %c0_i32_1 = arith.constant 0 : i32
    return %c0_i32, %c0_i32_0 : i32, i32
  }
  func.func @transform_5(%arg0: i32) -> (i32, i32) {
    %c0_i32 = arith.constant 0 : i32
    %c0_i32_0 = arith.constant 0 : i32
    %c0_i32_1 = arith.constant 0 : i32
    return %c0_i32, %c0_i32_0 : i32, i32
  }
  func.func @transform_6(%arg0: i32) -> (i32, i32) {
    %c0_i32 = arith.constant 0 : i32
    %c0_i32_0 = arith.constant 0 : i32
    %c0_i32_1 = arith.constant 0 : i32
    return %c0_i32, %c0_i32_0 : i32, i32
  }
  func.func @transform_7(%arg0: i32) -> (i32, i32) {
    %c0_i32 = arith.constant 0 : i32
    %c0_i32_0 = arith.constant 0 : i32
    %c0_i32_1 = arith.constant 0 : i32
    return %c0_i32, %c0_i32_0 : i32, i32
  }
}

</mosaic_0001>

<bundles_post_ra>
// kernel: custom_cnn_forward.5
= control target key start
LH: loop header
LB: loop body
LE: loop exit
PB: predicated region body
PF: predicated region fallthrough
CT: control target
= control target key end

     0   :  { %v43_v0 = vlaneseq  ;;  %v1056_v4 = vmov 1966171168   ;;  %vm176_vm0 = vcmask 130048   ;;  %vm846_vm1 = vcmask 1041409   ;;  %s1576_s0 = inlined_call_operand.vmem [shape: f32[8,1,784], index: 0, kind: input, shape index: {}]   ;;  %s1577_s1 = inlined_call_operand.vmem [shape: bf16[8,784], index: 1, kind: output, shape index: {}]  }
   0x1   :  { %v1070_v1 = vld [vmem:[%s1576_s0] sm:$0x7f]  ;;  %v1075_v2 = vld [vmem:[%s1576_s0 + $0x7] sm:$0x7f]  ;;  %v1080_v3 = vld [vmem:[%s1576_s0 + $0xe] sm:$0x7f]  ;;  %v41_v5 = vunpack.c.l.s4 %v1056_v4 }
   0x2   :  { %v1085_v6 = vld [vmem:[%s1576_s0 + $0x15] sm:$0x7f]  ;;  %v1090_v7 = vld [vmem:[%s1576_s0 + $0x1c] sm:$0x7f]  ;;  %v1095_v8 = vld [vmem:[%s1576_s0 + $0x23] sm:$0x7f]  ;;  %v32_v11 = vcombine.low %v1070_v1, %v1075_v2  ;;  %v33_v12 = vcombine.high %v1070_v1, %v1075_v2 }
   0x3   :  { %v1100_v9 = vld [vmem:[%s1576_s0 + $0x2a] sm:$0x7f]  ;;  %v1105_v10 = vld [vmem:[%s1576_s0 + $0x31] sm:$0x7f]  ;;  %v34_v13 = vcombine.low %v1080_v3, %v1085_v6  ;;  %v35_v14 = vcombine.high %v1080_v3, %v1085_v6  ;;  %v42_v15 = vunpack.c.0.s8 %v41_v5  ;;  %v1115_v16 = vshrl.u32 %v43_v0, 7 }
   0x4   :  { %v36_v17 = vcombine.low %v1090_v7, %v1095_v8  ;;  %v37_v18 = vcombine.high %v1090_v7, %v1095_v8  ;;  %v38_v19 = vcombine.low %v1100_v9, %v1105_v10  ;;  %v39_v20 = vcombine.high %v1100_v9, %v1105_v10 }
   0x5   :  { %v45_v21 = vsub.s32 %v42_v15, %v1115_v16  ;;  %v1130_v15 = vsub.s32 1, %v1115_v16  ;;  %vm849_vm2 = vcmask 1042434   ;;  %vm852_vm3 = vcmask 1043459  }
   0x6   :  { %vm855_vm4 = vcmask 1044484   ;;  %vm858_vm5 = vcmask 1045509   ;;  %vm861_vm6 = vcmask 1046534   ;;  %vm864_vm7 = vcmask 1047559  }
   0x7   :  { %v46_v22 = vrot.slane %v32_v11, %v45_v21  ;;  %v53_v23 = vrot.slane %v33_v12, %v45_v21  ;;  %v60_v24 = vrot.slane %v34_v13, %v45_v21  ;;  %v67_v25 = vrot.slane %v35_v14, %v45_v21 }
   0x8   :  { %v74_v26 = vrot.slane %v36_v17, %v45_v21  ;;  %v81_v27 = vrot.slane %v37_v18, %v45_v21  ;;  %v88_v28 = vrot.slane %v38_v19, %v45_v21  ;;  %v95_v29 = vrot.slane %v39_v20, %v45_v21 }
   0x9   :  { %v96_v30 = vcombine.low %v46_v22, %v60_v24  ;;  %v97_v31 = vcombine.high %v46_v22, %v60_v24  ;;  %v98_v32 = vcombine.low %v53_v23, %v67_v25  ;;  %v99_v33 = vcombine.high %v53_v23, %v67_v25 }
   0xa   :  { %v100_v34 = vcombine.low %v74_v26, %v88_v28  ;;  %v101_v35 = vcombine.high %v74_v26, %v88_v28  ;;  %v102_v36 = vcombine.low %v81_v27, %v95_v29  ;;  %v103_v37 = vcombine.high %v81_v27, %v95_v29 }
   0xb   :  { %v110_v38 = vrot.slane %v96_v30, %v45_v21  ;;  %v117_v39 = vrot.slane %v98_v32, %v45_v21  ;;  %v124_v40 = vrot.slane %v97_v31, %v45_v21  ;;  %v131_v41 = vrot.slane %v99_v33, %v45_v21 }
   0xc   :  { %v138_v42 = vrot.slane %v100_v34, %v45_v21  ;;  %v145_v43 = vrot.slane %v102_v36, %v45_v21  ;;  %v152_v44 = vrot.slane %v101_v35, %v45_v21  ;;  %v159_v45 = vrot.slane %v103_v37, %v45_v21 }
   0xd   :  { %v1127_v14 = vsub.s32 0, %v1115_v16  ;;  %v1133_v17 = vsub.s32 2, %v1115_v16  ;;  %v1136_v19 = vsub.s32 3, %v1115_v16  ;;  %v1139_v20 = vsub.s32 4, %v1115_v16 }
   0xe   :  { %v160_v46 = vcombine.low %v110_v38, %v138_v42  ;;  %v161_v47 = vcombine.high %v110_v38, %v138_v42  ;;  %v162_v48 = vcombine.low %v117_v39, %v145_v43  ;;  %v163_v49 = vcombine.high %v117_v39, %v145_v43 }
   0xf   :  { %v164_v50 = vcombine.low %v124_v40, %v152_v44  ;;  %v165_v51 = vcombine.high %v124_v40, %v152_v44  ;;  %v166_v52 = vcombine.low %v131_v41, %v159_v45  ;;  %v1145_v24 = vsub.s32 5, %v1115_v16 }
  0x10   :  { %v174_v53 = vmax.f32 %v160_v46, %v162_v48  ;;  %v177_v54 = vsel %vm176_vm0, %v163_v49, -inf  ;;  %v184_v55 = vmin.f32 %v160_v46, %v162_v48  ;;  %v186_v56 = vsel %vm176_vm0, %v163_v49, inf }
  0x11   :  { %v175_v57 = vmax.f32 %v164_v50, %v166_v52  ;;  %v178_v58 = vmax.f32 %v161_v47, %v177_v54  ;;  %v185_v59 = vmin.f32 %v164_v50, %v166_v52  ;;  %v187_v60 = vmin.f32 %v161_v47, %v186_v56 }
  0x12   :  { %v1149_v26 = vsub.s32 6, %v1115_v16  ;;  %v224_v28 = vsub.s32 7, %v1115_v16  ;;  %vm961_vm8 = vcmask 125952  }
  0x13   :  { %v179_v61 = vmax.f32 %v174_v53, %v175_v57  ;;  %v180_v62 = vmax.f32 %v178_v58, %v165_v51  ;;  %v188_v63 = vmin.f32 %v184_v55, %v185_v59  ;;  %v189_v0 = vmin.f32 %v187_v60, %v165_v51 }
  0x15   :  { %v181_v4 = vmax.f32 %v179_v61, %v180_v62  ;;  %v190_v5 = vmin.f32 %v188_v63, %v189_v0 }
  0x17   :  { %182 = vmax.xlane.f32.xlu0 %v181_v4 }
  0x1b   :  { %191 = vmin.xlane.f32.xlu0 %v190_v5 }
  0xa0   :  { %v183_v11 = vpop.xlane.xlu0 %182 }
  0xa4   :  { %v192_v12 = vpop.xlane.xlu0 %191 }
  0xa5   :  { %v242_v13 = vsub.f32 %v183_v11, %v192_v12  ;;  %v197_v32 = vrot.slane %v192_v12, %v1127_v14  ;;  %v201_v33 = vrot.slane %v192_v12, %v1130_v15  ;;  %v205_v34 = vrot.slane %v192_v12, %v1133_v17 }
  0xa6   :  { %v209_v16 = vrot.slane %v192_v12, %v1136_v19  ;;  %v213_v35 = vrot.slane %v192_v12, %v1139_v20  ;;  %v217_v36 = vrot.slane %v192_v12, %v1145_v24  ;;  %v221_v37 = vrot.slane %v192_v12, %v1149_v26 }
  0xa7   :  { %v243_v18 = vadd.f32 1e-08, %v242_v13  ;;  %v225_v38 = vrot.slane %v192_v12, %v224_v28  ;;  %v234_v39 = vsub.f32 %v1070_v1, %v197_v32  ;;  %v235_v41 = vsub.f32 %v1075_v2, %v201_v33 }
  0xa8   :  { %v236_v43 = vsub.f32 %v1080_v3, %v205_v34  ;;  %v237_v46 = vsub.f32 %v1085_v6, %v209_v16  ;;  %v238_v47 = vsub.f32 %v1090_v7, %v213_v35  ;;  %v239_v48 = vsub.f32 %v1095_v8, %v217_v36 }
  0xa9   :  { %v248_v21 = vrot.slane %v243_v18, %v1127_v14  ;;  %v252_v22 = vrot.slane %v243_v18, %v1130_v15  ;;  %v256_v23 = vrot.slane %v243_v18, %v1133_v17  ;;  %v260_v25 = vrot.slane %v243_v18, %v1136_v19 }
  0xaa   :  { %v264_v27 = vrot.slane %v243_v18, %v1139_v20  ;;  %v268_v29 = vrot.slane %v243_v18, %v1145_v24  ;;  %v272_v30 = vrot.slane %v243_v18, %v1149_v26  ;;  %v276_v31 = vrot.slane %v243_v18, %v224_v28 }
  0xab   :  { %1040 = vrcp.f32 %v248_v21  ;;  %v240_v1 = vsub.f32 %v1100_v9, %v221_v37  ;;  %v241_v51 = vsub.f32 %v1105_v10, %v225_v38 }
  0xac   :  { %1042 = vrcp.f32 %v252_v22 }
  0xad   :  { %1044 = vrcp.f32 %v256_v23 }
  0xae   :  { %1046 = vrcp.f32 %v260_v25 }
  0xaf   :  { %1048 = vrcp.f32 %v264_v27 }
  0xb0   :  { %1050 = vrcp.f32 %v268_v29 }
  0xb1   :  { %1052 = vrcp.f32 %v272_v30 }
  0xb2   :  { %1054 = vrcp.f32 %v276_v31 }
  0xb8   :  { %v1041_v40 = vpop.eup %1040 }
  0xb9   :  { %v1043_v42 = vpop.eup %1042  ;;  %v1165_v44 = vmul.f32 %v1041_v40, %v234_v39 }
  0xba   :  { %v1045_v45 = vpop.eup %1044  ;;  %v1170_v49 = vmul.f32 %v1043_v42, %v235_v41 }
  0xbb   :  { %v1047_v50 = vpop.eup %1046  ;;  %v1174_v2 = vmul.f32 %v1045_v45, %v236_v43  ;;  %v316_v6 = vrot.slane %v1165_v44, %v1130_v15  ;;  %v320_v7 = vrot.slane %v1165_v44, %v1133_v17  ;;  %v324_v8 = vrot.slane %v1165_v44, %v1136_v19 }
  0xbc   :  { %v1049_v52 = vpop.eup %1048  ;;  %v1178_v53 = vmul.f32 %v1047_v50, %v237_v46  ;;  %v328_v10 = vrot.slane %v1165_v44, %v1139_v20  ;;  %v332_v55 = vrot.slane %v1165_v44, %v1145_v24  ;;  %v1194_v56 = vrot.slane %v1165_v44, %v1149_v26 }
  0xbd   :  { %v1051_v9 = vpop.eup %1050  ;;  %v1186_v54 = vmul.f32 %v1049_v52, %v238_v47  ;;  %v340_v59 = vrot.slane %v1170_v49, %v1127_v14  ;;  %v344_v60 = vrot.slane %v1170_v49, %v1130_v15  ;;  %v348_v61 = vrot.slane %v1170_v49, %v1133_v17 }
  0xbe   :  { %v1053_v57 = vpop.eup %1052  ;;  %v1196_v58 = vmul.f32 %v1051_v9, %v239_v48  ;;  %v352_v0 = vrot.slane %v1170_v49, %v1136_v19  ;;  %v356_v4 = vrot.slane %v1170_v49, %v1139_v20  ;;  %v360_v5 = vrot.slane %v1170_v49, %v1145_v24 }
  0xbf   :  { %v1055_v62 = vpop.eup %1054  ;;  %v1204_v63 = vmul.f32 %v1053_v57, %v240_v1  ;;  %v1216_v12 = vrot.slane %v1170_v49, %v1149_v26  ;;  %v368_v13 = vrot.slane %v1174_v2, %v1127_v14  ;;  %v372_v18 = vrot.slane %v1174_v2, %v1130_v15 }
  0xc0   :  { %v1212_v11 = vmul.f32 %v1055_v62, %v241_v51  ;;  %v376_v21 = vrot.slane %v1174_v2, %v1133_v17  ;;  %v380_v22 = vrot.slane %v1174_v2, %v1136_v19  ;;  %v384_v23 = vrot.slane %v1174_v2, %v1139_v20 }
  0xc1   :  { %v388_v25 = vrot.slane %v1174_v2, %v1145_v24  ;;  %v1232_v27 = vrot.slane %v1174_v2, %v1149_v26  ;;  %v396_v28 = vrot.slane %v1178_v53, %v1127_v14  ;;  %v400_v29 = vrot.slane %v1178_v53, %v1130_v15 }
  0xc2   :  { %v404_v30 = vrot.slane %v1178_v53, %v1133_v17  ;;  %v408_v31 = vrot.slane %v1178_v53, %v1136_v19  ;;  %v412_v32 = vrot.slane %v1178_v53, %v1139_v20  ;;  %v416_v33 = vrot.slane %v1178_v53, %v1145_v24 }
  0xc3   :  { %v1248_v34 = vrot.slane %v1178_v53, %v1149_v26  ;;  %v424_v16 = vrot.slane %v1186_v54, %v1127_v14  ;;  %v428_v35 = vrot.slane %v1186_v54, %v1130_v15  ;;  %v432_v36 = vrot.slane %v1186_v54, %v1133_v17 }
  0xc4   :  { %v436_v37 = vrot.slane %v1186_v54, %v1136_v19  ;;  %v440_v38 = vrot.slane %v1186_v54, %v1139_v20  ;;  %v444_v39 = vrot.slane %v1186_v54, %v1145_v24  ;;  %v1264_v40 = vrot.slane %v1186_v54, %v1149_v26 }
  0xc5   :  { %v452_v41 = vrot.slane %v1196_v58, %v1127_v14  ;;  %v456_v42 = vrot.slane %v1196_v58, %v1130_v15  ;;  %v460_v43 = vrot.slane %v1196_v58, %v1133_v17  ;;  %v464_v45 = vrot.slane %v1196_v58, %v1136_v19 }
  0xc6   :  { %1578 = vst [vmem:[#allocation2_spill] sm:$0xff] %v1264_v40  ;;  %v468_v46 = vrot.slane %v1196_v58, %v1139_v20  ;;  %v472_v47 = vrot.slane %v1196_v58, %v1145_v24  ;;  %v1280_v48 = vrot.slane %v1196_v58, %v1149_v26  ;;  %v480_v49 = vrot.slane %v1204_v63, %v1127_v14 }
  0xc7   :  { %v484_v50 = vrot.slane %v1204_v63, %v1130_v15  ;;  %v488_v1 = vrot.slane %v1204_v63, %v1133_v17  ;;  %v492_v51 = vrot.slane %v1204_v63, %v1136_v19  ;;  %v496_v2 = vrot.slane %v1204_v63, %v1139_v20 }
  0xc8   :  { %1579 = vst [vmem:[#allocation3_spill] sm:$0xff] %v1280_v48  ;;  %v500_v52 = vrot.slane %v1204_v63, %v1145_v24  ;;  %v1296_v53 = vrot.slane %v1204_v63, %v1149_v26  ;;  %v508_v9 = vrot.slane %v1212_v11, %v1127_v14  ;;  %v512_v54 = vrot.slane %v1212_v11, %v1130_v15 }
  0xc9   :  { %v516_v57 = vrot.slane %v1212_v11, %v1133_v17  ;;  %v520_v58 = vrot.slane %v1212_v11, %v1136_v19  ;;  %v524_v62 = vrot.slane %v1212_v11, %v1139_v20  ;;  %v528_v3 = vrot.slane %v1212_v11, %v1145_v24 }
  0xca   :  { %1580 = vst [vmem:[#allocation4_spill] sm:$0xff] %v1296_v53  ;;  %v1312_v63 = vrot.slane %v1212_v11, %v1149_v26  ;;  %v1581_v53 = vrot.slane %v1165_v44, %v1127_v14  ;;  %v1319_v48 = vpack.c.bf16 %v324_v8, %v320_v7  ;;  %v1321_v17 = vpack.c.bf16 %v332_v55, %v328_v10 }
  0xcb   :  { %v1002_v19 = vpack.c.bf16 %v1194_v56, %v1194_v56  ;;  %v1325_v20 = vpack.c.bf16 %v344_v60, %v340_v59  ;;  %v1327_v40 = vpack.c.bf16 %v352_v0, %v348_v61  ;;  %v1329_v24 = vpack.c.bf16 %v360_v5, %v356_v4 }
  0xcc   :  { %v1317_v15 = vpack.c.bf16 %v316_v6, %v1581_v53  ;;  %v1006_v26 = vpack.c.bf16 %v1216_v12, %v1216_v12  ;;  %v1333_v11 = vpack.c.bf16 %v372_v18, %v368_v13  ;;  %v1335_v14 = vpack.c.bf16 %v380_v22, %v376_v21 }
  0xcd   :  { %v1337_v44 = vpack.c.bf16 %v388_v25, %v384_v23  ;;  %v1010_v6 = vpack.c.bf16 %v1232_v27, %v1232_v27  ;;  %v1341_v7 = vpack.c.bf16 %v400_v29, %v396_v28  ;;  %v1343_v8 = vpack.c.bf16 %v408_v31, %v404_v30  ;;  %v1582_v61 = vld [vmem:[#allocation2_spill] sm:$0xff] }
  0xce   :  { %v1345_v10 = vpack.c.bf16 %v416_v33, %v412_v32  ;;  %v1014_v55 = vpack.c.bf16 %v1248_v34, %v1248_v34  ;;  %v1349_v56 = vpack.c.bf16 %v428_v35, %v424_v16  ;;  %v1351_v59 = vpack.c.bf16 %v436_v37, %v432_v36 }
  0xcf   :  { %v1353_v60 = vpack.c.bf16 %v444_v39, %v440_v38  ;;  %v1018_v0 = vpack.c.bf16 %v1582_v61, %v1582_v61  ;;  %v1357_v4 = vpack.c.bf16 %v456_v42, %v452_v41  ;;  %v1359_v5 = vpack.c.bf16 %v464_v45, %v460_v43  ;;  %v1583_v13 = vld [vmem:[#allocation3_spill] sm:$0xff] }
  0xd0   :  { %v1361_v12 = vpack.c.bf16 %v472_v47, %v468_v46  ;;  %v1022_v18 = vpack.c.bf16 %v1583_v13, %v1583_v13  ;;  %v1365_v21 = vpack.c.bf16 %v484_v50, %v480_v49  ;;  %v1367_v22 = vpack.c.bf16 %v492_v51, %v488_v1 }
  0xd1   :  { %v1369_v23 = vpack.c.bf16 %v500_v52, %v496_v2  ;;  %v1584_v25 = vld [vmem:[#allocation4_spill] sm:$0xff]  ;;  %v1373_v28 = vpack.c.bf16 %v512_v54, %v508_v9  ;;  %v1375_v29 = vpack.c.bf16 %v520_v58, %v516_v57  ;;  %v1377_v30 = vpack.c.bf16 %v528_v3, %v524_v62 }
  0xd2   :  { %v1026_v27 = vpack.c.bf16 %v1584_v25, %v1584_v25  ;;  %v1030_v31 = vpack.c.bf16 %v1312_v63, %v1312_v63  ;;  %v789_v32 = vunpack.c.l.b16 %v1317_v15  ;;  %v790_v33 = vunpack.c.h.b16 %v1317_v15 }
  0xd3   :  { %v791_v34 = vunpack.c.l.b16 %v1319_v48  ;;  %v1387_v37 = vunpack.c.l.b16 %v1002_v19  ;;  %v796_v3 = vunpack.c.l.b16 %v1325_v20  ;;  %v797_v38 = vunpack.c.h.b16 %v1325_v20 }
  0xd4   :  { %v798_v39 = vunpack.c.l.b16 %v1327_v40  ;;  %v799_v41 = vunpack.c.h.b16 %v1327_v40  ;;  %v1395_v45 = vunpack.c.l.b16 %v1006_v26  ;;  %v803_v46 = vunpack.c.l.b16 %v1333_v11 }
  0xd5   :  { %v804_v47 = vunpack.c.h.b16 %v1333_v11  ;;  %v805_v49 = vunpack.c.l.b16 %v1335_v14  ;;  %v806_v50 = vunpack.c.h.b16 %v1335_v14  ;;  %v1403_v2 = vunpack.c.l.b16 %v1010_v6 }
  0xd6   :  { %v810_v52 = vunpack.c.l.b16 %v1341_v7  ;;  %v811_v53 = vunpack.c.h.b16 %v1341_v7  ;;  %v812_v9 = vunpack.c.l.b16 %v1343_v8  ;;  %v1411_v62 = vunpack.c.l.b16 %v1014_v55 }
  0xd7   :  { %v817_v19 = vunpack.c.l.b16 %v1349_v56  ;;  %v818_v20 = vunpack.c.h.b16 %v1349_v56  ;;  %v819_v26 = vunpack.c.l.b16 %v1351_v59  ;;  %v1419_v61 = vunpack.c.l.b16 %v1018_v0 }
  0xd8   :  { %v824_v13 = vunpack.c.l.b16 %v1357_v4  ;;  %v825_v55 = vunpack.c.h.b16 %v1357_v4  ;;  %v826_v25 = vunpack.c.l.b16 %v1359_v5  ;;  %v1427_v51 = vunpack.c.l.b16 %v1022_v18 }
  0xd9   :  { %v831_v7 = vunpack.c.l.b16 %v1365_v21  ;;  %v832_v0 = vunpack.c.h.b16 %v1365_v21  ;;  %v833_v43 = vunpack.c.l.b16 %v1367_v22  ;;  %v834_v6 = vunpack.c.h.b16 %v1367_v22 }
  0xda   :  { %v1435_v57 = vunpack.c.l.b16 %v1026_v27  ;;  %v838_v58 = vunpack.c.l.b16 %v1373_v28  ;;  %v839_v18 = vunpack.c.h.b16 %v1373_v28  ;;  %v840_v36 = vunpack.c.l.b16 %v1375_v29 }
  0xdb   :  { %v841_v1 = vunpack.c.h.b16 %v1375_v29  ;;  %v845_v42 = vrot.slane %v796_v3, 7  ;;  %v848_v56 = vrot.slane %v803_v46, 6  ;;  %v1446_v35 = vunpack.c.l.b16 %v1030_v31 }
  0xdc   :  { %v851_v27 = vrot.slane %v810_v52, 5  ;;  %v854_v4 = vrot.slane %v817_v19, 4  ;;  %v857_v11 = vrot.slane %v824_v13, 3  ;;  %v866_v54 = vrot.slane %v797_v38, 7 }
  0xdd   :  { %v847_v28 = vsel %vm846_vm1, %v845_v42, %v789_v32  ;;  %v868_v29 = vrot.slane %v804_v47, 6  ;;  %v860_v3 = vrot.slane %v831_v7, 2  ;;  %v863_v46 = vrot.slane %v838_v58, 1 }
  0xde   :  { %v850_v21 = vsel %vm849_vm2, %v848_v56, %v847_v28  ;;  %v870_v16 = vrot.slane %v811_v53, 5  ;;  %v867_v63 = vsel %vm846_vm1, %v866_v54, %v790_v33  ;;  %v872_v31 = vrot.slane %v818_v20, 4 }
  0xdf   :  { %v853_v22 = vsel %vm852_vm3, %v851_v27, %v850_v21  ;;  %v874_v52 = vrot.slane %v825_v55, 3  ;;  %v869_v32 = vsel %vm849_vm2, %v868_v29, %v867_v63  ;;  %v880_v38 = vrot.slane %v798_v39, 7 }
  0xe0   :  { %v856_v19 = vsel %vm855_vm4, %v854_v4, %v853_v22  ;;  %v882_v42 = vrot.slane %v805_v49, 6  ;;  %v871_v53 = vsel %vm852_vm3, %v870_v16, %v869_v32  ;;  %v876_v58 = vrot.slane %v832_v0, 2 }
  0xe1   :  { %v859_v47 = vsel %vm858_vm5, %v857_v11, %v856_v19  ;;  %v878_v15 = vrot.slane %v839_v18, 1  ;;  %v873_v54 = vsel %vm855_vm4, %v872_v31, %v871_v53  ;;  %v881_v20 = vsel %vm846_vm1, %v880_v38, %v791_v34 }
  0xe2   :  { %v862_v33 = vsel %vm861_vm6, %v860_v3, %v859_v47  ;;  %v884_v39 = vrot.slane %v812_v9, 5  ;;  %v875_v7 = vsel %vm858_vm5, %v874_v52, %v873_v54  ;;  %v883_v49 = vsel %vm849_vm2, %v882_v42, %v881_v20 }
  0xe3   :  { %v886_v11 = vrot.slane %v819_v26, 4  ;;  %v888_v13 = vrot.slane %v826_v25, 3  ;;  %v1474_v16 = vsel %vm864_vm7, %v863_v46, %v862_v33  ;;  %v877_v55 = vsel %vm861_vm6, %v876_v58, %v875_v7 }
  0xe4   :  { %v885_v56 = vsel %vm852_vm3, %v884_v39, %v883_v49  ;;  %v894_v0 = vrot.slane %v799_v41, 7  ;;  %v890_v4 = vrot.slane %v833_v43, 2  ;;  %v892_v9 = vrot.slane %v840_v36, 1 }
  0xe5   :  { %v887_v34 = vsel %vm855_vm4, %v886_v11, %v885_v56  ;;  %v896_v18 = vrot.slane %v806_v50, 6  ;;  %v879_v26 = vsel %vm864_vm7, %v878_v15, %v877_v55  ;;  %v1585_v21 = vunpack.c.h.b16 %v1319_v48 }
  0xe6   :  { %v889_v25 = vsel %vm858_vm5, %v888_v13, %v887_v34  ;;  %v1586_v27 = vunpack.c.h.b16 %v1343_v8  ;;  %v1587_v36 = vunpack.c.h.b16 %v1351_v59  ;;  %v1588_v14 = vunpack.c.h.b16 %v1359_v5 }
  0xe7   :  { %v895_v22 = vsel %vm846_vm1, %v894_v0, %v1585_v21  ;;  %v891_v40 = vsel %vm861_vm6, %v890_v4, %v889_v25  ;;  %v904_v3 = vrot.slane %v834_v6, 2  ;;  %v1589_v48 = vunpack.c.l.b16 %v1329_v24 }
  0xe8   :  { %v898_v28 = vrot.slane %v1586_v27, 5  ;;  %v897_v41 = vsel %vm849_vm2, %v896_v18, %v895_v22  ;;  %v900_v43 = vrot.slane %v1587_v36, 4  ;;  %v902_v50 = vrot.slane %v1588_v14, 3 }
  0xe9   :  { %v908_v46 = vrot.slane %v1589_v48, 7  ;;  %v1590_v63 = vunpack.c.l.b16 %v1337_v44  ;;  %v893_v31 = vsel %vm864_vm7, %v892_v9, %v891_v40  ;;  %v906_v19 = vrot.slane %v841_v1, 1 }
  0xea   :  { %v899_v29 = vsel %vm852_vm3, %v898_v28, %v897_v41  ;;  %v1591_v59 = vunpack.c.l.b16 %v1345_v10  ;;  %v1592_v38 = vunpack.c.l.b16 %v1321_v17  ;;  %v1593_v42 = vunpack.c.l.b16 %v1353_v60 }
  0xeb   :  { %v910_v8 = vrot.slane %v1590_v63, 6  ;;  %v901_v52 = vsel %vm855_vm4, %v900_v43, %v899_v29  ;;  %v1594_v53 = vunpack.c.l.b16 %v1361_v12  ;;  %v1595_v1 = vunpack.c.h.b16 %v1329_v24 }
  0xec   :  { %v912_v32 = vrot.slane %v1591_v59, 5  ;;  %v903_v5 = vsel %vm858_vm5, %v902_v50, %v901_v52  ;;  %v909_v6 = vsel %vm846_vm1, %v908_v46, %v1592_v38  ;;  %v914_v47 = vrot.slane %v1593_v42, 4 }
  0xed   :  { %v916_v58 = vrot.slane %v1594_v53, 3  ;;  %v905_v15 = vsel %vm861_vm6, %v904_v3, %v903_v5  ;;  %v911_v33 = vsel %vm849_vm2, %v910_v8, %v909_v6  ;;  %v922_v54 = vrot.slane %v1595_v1, 7 }
  0xee   :  { %v1596_v20 = vunpack.c.h.b16 %v1337_v44  ;;  %v907_v7 = vsel %vm864_vm7, %v906_v19, %v905_v15  ;;  %v913_v49 = vsel %vm852_vm3, %v912_v32, %v911_v33  ;;  %v1597_v11 = vunpack.c.l.b16 %v1369_v23 }
  0xef   :  { %v1598_v55 = vunpack.c.l.b16 %v1377_v30  ;;  %v915_v0 = vsel %vm855_vm4, %v914_v47, %v913_v49  ;;  %v1599_v34 = vunpack.c.h.b16 %v1321_v17  ;;  %v1600_v4 = vunpack.c.h.b16 %v1345_v10 }
  0xf0   :  { %v924_v39 = vrot.slane %v1596_v20, 6  ;;  %v918_v13 = vrot.slane %v1597_v11, 2  ;;  %v1601_v9 = vunpack.c.h.b16 %v1353_v60  ;;  %v917_v25 = vsel %vm858_vm5, %v916_v58, %v915_v0 }
  0xf1   :  { %v920_v56 = vrot.slane %v1598_v55, 1  ;;  %v923_v24 = vsel %vm846_vm1, %v922_v54, %v1599_v34  ;;  %v926_v44 = vrot.slane %v1600_v4, 5  ;;  %v1602_v22 = vunpack.c.h.b16 %v1361_v12 }
  0xf2   :  { %v928_v18 = vrot.slane %v1601_v9, 4  ;;  %v925_v21 = vsel %vm849_vm2, %v924_v39, %v923_v24  ;;  %v936_v28 = vrot.slane %v1395_v45, 7  ;;  %v919_v40 = vsel %vm861_vm6, %v918_v13, %v917_v25 }
  0xf3   :  { %v930_v27 = vrot.slane %v1602_v22, 3  ;;  %v927_v17 = vsel %vm852_vm3, %v926_v44, %v925_v21  ;;  %v1603_v41 = vunpack.c.h.b16 %v1369_v23  ;;  %v938_v36 = vrot.slane %v1403_v2, 6 }
  0xf4   :  { %v929_v60 = vsel %vm855_vm4, %v928_v18, %v927_v17  ;;  %v1604_v43 = vunpack.c.h.b16 %v1377_v30  ;;  %v937_v12 = vsel %vm846_vm1, %v936_v28, %v1387_v37  ;;  %v940_v50 = vrot.slane %v1411_v62, 5 }
  0xf5   :  { %v932_v10 = vrot.slane %v1603_v41, 2  ;;  %v921_v45 = vsel %vm864_vm7, %v920_v56, %v919_v40  ;;  %v931_v29 = vsel %vm858_vm5, %v930_v27, %v929_v60  ;;  %v939_v3 = vsel %vm849_vm2, %v938_v36, %v937_v12 }
  0xf6   :  { %v934_v14 = vrot.slane %v1604_v43, 1  ;;  %v942_v23 = vrot.slane %v1419_v61, 4  ;;  %v941_v48 = vsel %vm852_vm3, %v940_v50, %v939_v3  ;;  %v944_v30 = vrot.slane %v1427_v51, 3 }
  0xf7   :  { %v933_v2 = vsel %vm861_vm6, %v932_v10, %v931_v29  ;;  %v950_v46 = vpack.c.b16 %v879_v26, %v1474_v16  ;;  %v946_v63 = vrot.slane %v1435_v57, 2  ;;  %v951_v8 = vpack.c.b16 %v907_v7, %v893_v31 }
  0xf8   :  { %v935_v37 = vsel %vm864_vm7, %v934_v14, %v933_v2  ;;  %v943_v62 = vsel %vm855_vm4, %v942_v23, %v941_v48  ;;  %v948_v19 = vrot.slane %v1446_v35, 1 }
  0xf9   :  { %v945_v52 = vsel %vm858_vm5, %v944_v30, %v943_v62  ;;  %v952_v61 = vpack.c.b16 %v935_v37, %v921_v45  ;;  %958 = vst [vmem:[%s1577_s1] sm:$0xff] %v950_v46  ;;  %959 = vst [vmem:[%s1577_s1 + $0x8] sm:$0xff] %v951_v8 }
  0xfa   :  { %v947_v51 = vsel %vm861_vm6, %v946_v63, %v945_v52 }
  0xfb   :  { %v949_v16 = vsel %vm864_vm7, %v948_v19, %v947_v51  ;;  %960 = vst [vmem:[%s1577_s1 + $0x10] sm:$0xff] %v952_v61 }
  0xfc   :  { %v953_v57 = vpack.c.b16 %v949_v16, %v949_v16 }
  0xfe   :  { %962 = vst.msk [vmem:[%s1577_s1 + $0x18] sm:$0xf] %vm961_vm8, %v953_v57 }

// kernel: custom_cnn_forward.6
= control target key start
LH: loop header
LB: loop body
LE: loop exit
PB: predicated region body
PF: predicated region fallthrough
CT: control target
= control target key end

     0   :  { %s4639_s15 = smov 0   ;;  %s5797_s0 = inlined_call_operand.vmem [shape: bf16[1568,36], index: 0, kind: input, shape index: {}]   ;;  %s5798_s1 = inlined_call_operand.vmem [shape: bf16[36,512], index: 1, kind: input, shape index: {}]   ;;  %s5799_s2 = inlined_call_operand.vmem [shape: f32[1,512], index: 2, kind: input, shape index: {}]   ;;  %s5800_s3 = inlined_call_operand.vmem [shape: f32[1,512], index: 3, kind: input, shape index: {}]   ;;  %s5801_s4 = inlined_call_operand.vmem [shape: bf16[1568,128], index: 4, kind: output, shape index: {}]  }
   0x1 LB: > { %s3872_s16 = sadd.s32 4294967295, %s4611_s15   ;;  %p3876_p0 = scmp.ge.s32.totalorder %s4611_s15, 1  ;;  %s4611_s15 = sphi %s4639_s15, %s14_s15  }
   0x2   : > { %p163_p1 = scmp.lt.s32.totalorder %s4611_s15, 3 }
   0x4   : > { %p164_p2 = pnand %p3876_p0, %p163_p1 }
   0x5   : > { %s189_s23 = smul.u32 (!%p164_p2), 98, %s3872_s16 }
   0x6   : > { %167 = sbr.rel (%p164_p2) target bundleno = 623 (0x26f), region = 36 }
   0x7   : > { %p190_p3 = scmp.lt.s32.totalorder (!%p164_p2), %s189_s23, 195 }
   0xb   : > { %v308_v0 = vld [vmem:[%s5798_s1 + $0x40] sm:$0x33]  ;;  %vm753_vm0 = vcmask 1041408   ;;  %v309_v1 = vld [vmem:[%s5798_s1 + $0x48] sm:$0x33]  ;;  %v4613_v14 = vmov 0   ;;  %v1814_v40 = vlaneseq }
   0xc   : > { %v3937_v2 = vcombine.high %v308_v0, %v308_v0  ;;  %v3939_v3 = vcombine.high %v309_v1, %v309_v1  ;;  %v3936_v4 = vcombine.low %v308_v0, %v308_v0  ;;  %v3938_v5 = vcombine.low %v309_v1, %v309_v1  ;;  %v4544_v6 = vld [vmem:[%s5798_s1 + $0x24] ss:$16 sps:$4 sm:$0xff]   ;;  %v4546_v7 = vld [vmem:[%s5798_s1 + $0x2c] ss:$16 sps:$4 sm:$0xff]   ;;  %v4548_v8 = vld [vmem:[%s5798_s1 + $0x20] ss:$16 sps:$4 sm:$0xff]   ;;  %798 = vmatprep.mubr.bf16.mxu0 %v4613_v14 }
   0xd   : > { %v4549_v11 = vld [vmem:[%s5798_s1 + $0x28] ss:$16 sps:$4 sm:$0xff]   ;;  %v4550_v12 = vld [vmem:[%s5798_s1 + $0x4] ss:$16 sps:$4 sm:$0xff]   ;;  %v4552_v13 = vld [vmem:[%s5798_s1 + $0xc] ss:$16 sps:$4 sm:$0xff]   ;;  %1321 = vmatprep.mubr.bf16.mxu1 %v4613_v14 }
   0xe   : > { %3940 = vmatprep.subr.msk.bf16.mxu0 %vm753_vm0, %v3937_v2  ;;  %3990 = vmatprep.subr.msk.bf16.mxu1 %vm753_vm0, %v3939_v3  ;;  %v755_v9 = vsel %vm753_vm0, %v3936_v4, 0  ;;  %v761_v10 = vsel %vm753_vm0, %v3938_v5, 0  ;;  %s5803_s23 = smov (!%p190_p3, %s189_s23), 195  ;;  %v4554_v15 = vld [vmem:[%s5798_s1] ss:$16 sps:$4 sm:$0xff]   ;;  %vm605_vm1 = vcmask 293888  }
   0xf   : > { %777 = vmatpush1.bf16.msra.mxu0 %v755_v9  ;;  %1300 = vmatpush1.bf16.msra.mxu1 %v761_v10  ;;  %v4555_v16 = vld [vmem:[%s5798_s1 + $0x8] ss:$16 sps:$4 sm:$0xff]   ;;  %s3877_s12 = sshll.u32 %s5803_s23, 2  ;;  %v1815_v42 = vshrl.u32 %v1814_v40, 7  ;;  %v1812_v45 = vld [vmem:[%s5799_s2] sm:$0xf] }
  0x10   : > { %778 = vmatprep.subr.bf16.mxu0 %v4544_v6  ;;  %1301 = vmatprep.subr.bf16.mxu1 %v4546_v7  ;;  %s4687_s16 = scalar_lea.vmem %s5797_s0, %s3877_s12  ;;  %v2226_v48 = vld [vmem:[%s5800_s3] sm:$0xf]  ;;  %s4875_s24 = scalar_lea.vmem %s5801_s4, %s3877_s12 }
  0x11   : > { %v4556_v17 = vld [vmem:[%s4687_s16] sm:$0xff]   ;;  %v4557_v18 = vld [vmem:[%s4687_s16 + $0x8] sm:$0xff]   ;;  %v4558_v19 = vld [vmem:[%s4687_s16 + $0x10] sm:$0xff]   ;;  %v1816_v43 = vsub.s32 0, %v1815_v42  ;;  %v1824_v44 = vsub.s32 2, %v1815_v42  ;;  %v1820_v46 = vsub.s32 1, %v1815_v42 }
  0x12   : > { %v4559_v20 = vld [vmem:[%s4687_s16 + $0x18] sm:$0xff]   ;;  %v4560_v21 = vld [vmem:[%s4687_s16 + $0x20] sm:$0xff]   ;;  %v4561_v22 = vld [vmem:[%s4687_s16 + $0x28] sm:$0xff]   ;;  %v1828_v47 = vsub.s32 3, %v1815_v42 }
  0x13   : > { %779 = vmatpush1.bf16.msra.mxu0 %v4548_v8  ;;  %1302 = vmatpush1.bf16.msra.mxu1 %v4549_v11  ;;  %v4562_v23 = vld [vmem:[%s4687_s16 + $0x30] sm:$0xff]   ;;  %v4563_v24 = vld [vmem:[%s4687_s16 + $0x38] sm:$0xff]   ;;  %v4564_v25 = vld [vmem:[%s4687_s16 + $0x40] sm:$0xff]   ;;  %v4816_v50 = vrot.slane %v1812_v45, %v1816_v43  ;;  %v4818_v51 = vrot.slane %v1812_v45, %v1824_v44  ;;  %v4820_v52 = vrot.slane %v2226_v48, %v1816_v43 }
  0x14   : > { %780 = vmatprep.subr.bf16.mxu0 %v4550_v12  ;;  %1303 = vmatprep.subr.bf16.mxu1 %v4552_v13  ;;  %v4565_v26 = vld [vmem:[%s4687_s16 + $0x48] sm:$0xff]   ;;  %v4566_v27 = vld [vmem:[%s4687_s16 + $0x50] sm:$0xff]   ;;  %v4567_v28 = vld [vmem:[%s4687_s16 + $0x58] sm:$0xff]   ;;  %v4822_v53 = vrot.slane %v1812_v45, %v1820_v46  ;;  %v4824_v54 = vrot.slane %v1812_v45, %v1828_v47  ;;  %v4827_v57 = vrot.slane %v2226_v48, %v1824_v44 }
  0x15   : > { %v4568_v29 = vld [vmem:[%s4687_s16 + $0x60] sm:$0xff]   ;;  %v4569_v30 = vld [vmem:[%s4687_s16 + $0x68] sm:$0xff]   ;;  %v4570_v31 = vld [vmem:[%s4687_s16 + $0x70] sm:$0xff]   ;;  %v4830_v58 = vrot.slane %v2226_v48, %v1820_v46  ;;  %v4834_v61 = vrot.slane %v2226_v48, %v1828_v47 }
  0x16   : > { %v4571_v32 = vld [vmem:[%s4687_s16 + $0x78] sm:$0xff]   ;;  %v4572_v33 = vld [vmem:[%s4687_s16 + $0x80] sm:$0xff]   ;;  %v4573_v34 = vld [vmem:[%s4687_s16 + $0x88] sm:$0xff]  }
  0x17   : > { %781 = vmatpush1.bf16.msra.mxu0 %v4554_v15  ;;  %1304 = vmatpush1.bf16.msra.mxu1 %v4555_v16  ;;  %v4574_v35 = vld [vmem:[%s4687_s16 + $0x90] sm:$0xff]   ;;  %v4575_v36 = vld [vmem:[%s4687_s16 + $0x98] sm:$0xff]   ;;  %v4576_v37 = vld [vmem:[%s4687_s16 + $0xa0] sm:$0xff]  }
  0x18   : > { %v4577_v38 = vld [vmem:[%s4687_s16 + $0xa8] sm:$0xff]   ;;  %v4578_v39 = vld [vmem:[%s4687_s16 + $0xb0] sm:$0xff]   ;;  %v4579_v41 = vld [vmem:[%s4687_s16 + $0xb8] sm:$0xff]  }
  0x19   : > { %v4580_v49 = vld [vmem:[%s4687_s16 + $0xc0] sm:$0xff]   ;;  %v4581_v6 = vld [vmem:[%s4687_s16 + $0xc8] sm:$0xff]   ;;  %v4582_v42 = vld [vmem:[%s4687_s16 + $0xd0] sm:$0xff]  }
  0x1a   : > { %3941 = vmatmul.mubr.msk.bf16.vlgmr.msra.gmra.mxu0 %vm605_vm1, %v4556_v17  ;;  %3991 = vmatmul.mubr.msk.bf16.vlgmr.msra.gmra.mxu1 %vm605_vm1, %v4556_v17 }
  0x1b   : > { %808 = vmatprep.mubr.bf16.mxu0 %v4613_v14  ;;  %1331 = vmatprep.mubr.bf16.mxu1 %v4613_v14 }
  0x22   : > { %3942 = vmatmul.mubr.msk.bf16.gmra.mxu0 %vm605_vm1, %v4557_v18  ;;  %3992 = vmatmul.mubr.msk.bf16.gmra.mxu1 %vm605_vm1, %v4557_v18 }
  0x23   : > { %818 = vmatprep.mubr.bf16.mxu0 %v4613_v14  ;;  %1341 = vmatprep.mubr.bf16.mxu1 %v4613_v14 }
  0x2a   : > { %3943 = vmatmul.mubr.msk.bf16.gmra.mxu0 %vm605_vm1, %v4558_v19  ;;  %3993 = vmatmul.mubr.msk.bf16.gmra.mxu1 %vm605_vm1, %v4558_v19 }
  0x2b   : > { %828 = vmatprep.mubr.bf16.mxu0 %v4613_v14  ;;  %1351 = vmatprep.mubr.bf16.mxu1 %v4613_v14 }
  0x32   : > { %3944 = vmatmul.mubr.msk.bf16.gmra.mxu0 %vm605_vm1, %v4559_v20  ;;  %3994 = vmatmul.mubr.msk.bf16.gmra.mxu1 %vm605_vm1, %v4559_v20 }
  0x33   : > { %838 = vmatprep.mubr.bf16.mxu0 %v4613_v14  ;;  %1361 = vmatprep.mubr.bf16.mxu1 %v4613_v14 }
  0x3a   : > { %3945 = vmatmul.mubr.msk.bf16.gmra.mxu0 %vm605_vm1, %v4560_v21  ;;  %3995 = vmatmul.mubr.msk.bf16.gmra.mxu1 %vm605_vm1, %v4560_v21 }
  0x3b   : > { %848 = vmatprep.mubr.bf16.mxu0 %v4613_v14  ;;  %1371 = vmatprep.mubr.bf16.mxu1 %v4613_v14 }
  0x42   : > { %3946 = vmatmul.mubr.msk.bf16.gmra.mxu0 %vm605_vm1, %v4561_v22  ;;  %3996 = vmatmul.mubr.msk.bf16.gmra.mxu1 %vm605_vm1, %v4561_v22 }
  0x43   : > { %858 = vmatprep.mubr.bf16.mxu0 %v4613_v14  ;;  %1381 = vmatprep.mubr.bf16.mxu1 %v4613_v14 }
  0x4a   : > { %3947 = vmatmul.mubr.msk.bf16.gmra.mxu0 %vm605_vm1, %v4562_v23  ;;  %3997 = vmatmul.mubr.msk.bf16.gmra.mxu1 %vm605_vm1, %v4562_v23 }
  0x4b   : > { %868 = vmatprep.mubr.bf16.mxu0 %v4613_v14  ;;  %1391 = vmatprep.mubr.bf16.mxu1 %v4613_v14 }
  0x52   : > { %3948 = vmatmul.mubr.msk.bf16.gmra.mxu0 %vm605_vm1, %v4563_v24  ;;  %3998 = vmatmul.mubr.msk.bf16.gmra.mxu1 %vm605_vm1, %v4563_v24 }
  0x53   : > { %878 = vmatprep.mubr.bf16.mxu0 %v4613_v14  ;;  %1401 = vmatprep.mubr.bf16.mxu1 %v4613_v14 }
  0x5a   : > { %3949 = vmatmul.mubr.msk.bf16.gmra.mxu0 %vm605_vm1, %v4564_v25  ;;  %3999 = vmatmul.mubr.msk.bf16.gmra.mxu1 %vm605_vm1, %v4564_v25 }
  0x5b   : > { %888 = vmatprep.mubr.bf16.mxu0 %v4613_v14  ;;  %1411 = vmatprep.mubr.bf16.mxu1 %v4613_v14 }
  0x62   : > { %3950 = vmatmul.mubr.msk.bf16.gmra.mxu0 %vm605_vm1, %v4565_v26  ;;  %4000 = vmatmul.mubr.msk.bf16.gmra.mxu1 %vm605_vm1, %v4565_v26 }
  0x63   : > { %898 = vmatprep.mubr.bf16.mxu0 %v4613_v14  ;;  %1421 = vmatprep.mubr.bf16.mxu1 %v4613_v14 }
  0x6a   : > { %3951 = vmatmul.mubr.msk.bf16.gmra.mxu0 %vm605_vm1, %v4566_v27  ;;  %4001 = vmatmul.mubr.msk.bf16.gmra.mxu1 %vm605_vm1, %v4566_v27 }
  0x6b   : > { %908 = vmatprep.mubr.bf16.mxu0 %v4613_v14  ;;  %1431 = vmatprep.mubr.bf16.mxu1 %v4613_v14 }
  0x72   : > { %3952 = vmatmul.mubr.msk.bf16.gmra.mxu0 %vm605_vm1, %v4567_v28  ;;  %4002 = vmatmul.mubr.msk.bf16.gmra.mxu1 %vm605_vm1, %v4567_v28 }
  0x73   : > { %918 = vmatprep.mubr.bf16.mxu0 %v4613_v14  ;;  %1441 = vmatprep.mubr.bf16.mxu1 %v4613_v14 }
  0x7a   : > { %3953 = vmatmul.mubr.msk.bf16.gmra.mxu0 %vm605_vm1, %v4568_v29  ;;  %4003 = vmatmul.mubr.msk.bf16.gmra.mxu1 %vm605_vm1, %v4568_v29 }
  0x7b   : > { %928 = vmatprep.mubr.bf16.mxu0 %v4613_v14  ;;  %1451 = vmatprep.mubr.bf16.mxu1 %v4613_v14 }
  0x82   : > { %3954 = vmatmul.mubr.msk.bf16.gmra.mxu0 %vm605_vm1, %v4569_v30  ;;  %4004 = vmatmul.mubr.msk.bf16.gmra.mxu1 %vm605_vm1, %v4569_v30 }
  0x83   : > { %938 = vmatprep.mubr.bf16.mxu0 %v4613_v14  ;;  %1461 = vmatprep.mubr.bf16.mxu1 %v4613_v14 }
  0x8a   : > { %3955 = vmatmul.mubr.msk.bf16.gmra.mxu0 %vm605_vm1, %v4570_v31  ;;  %4005 = vmatmul.mubr.msk.bf16.gmra.mxu1 %vm605_vm1, %v4570_v31 }
  0x8b   : > { %948 = vmatprep.mubr.bf16.mxu0 %v4613_v14  ;;  %1471 = vmatprep.mubr.bf16.mxu1 %v4613_v14 }
  0x92   : > { %3956 = vmatmul.mubr.msk.bf16.gmra.mxu0 %vm605_vm1, %v4571_v32  ;;  %4006 = vmatmul.mubr.msk.bf16.gmra.mxu1 %vm605_vm1, %v4571_v32 }
  0x93   : > { %958 = vmatprep.mubr.bf16.mxu0 %v4613_v14  ;;  %1481 = vmatprep.mubr.bf16.mxu1 %v4613_v14 }
  0x9a   : > { %3957 = vmatmul.mubr.msk.bf16.gmra.mxu0 %vm605_vm1, %v4572_v33  ;;  %4007 = vmatmul.mubr.msk.bf16.gmra.mxu1 %vm605_vm1, %v4572_v33 }
  0x9b   : > { %968 = vmatprep.mubr.bf16.mxu0 %v4613_v14  ;;  %1491 = vmatprep.mubr.bf16.mxu1 %v4613_v14 }
  0xa2   : > { %3958 = vmatmul.mubr.msk.bf16.gmra.mxu0 %vm605_vm1, %v4573_v34  ;;  %4008 = vmatmul.mubr.msk.bf16.gmra.mxu1 %vm605_vm1, %v4573_v34 }
  0xa3   : > { %978 = vmatprep.mubr.bf16.mxu0 %v4613_v14  ;;  %1501 = vmatprep.mubr.bf16.mxu1 %v4613_v14 }
  0xaa   : > { %3959 = vmatmul.mubr.msk.bf16.gmra.mxu0 %vm605_vm1, %v4574_v35  ;;  %4009 = vmatmul.mubr.msk.bf16.gmra.mxu1 %vm605_vm1, %v4574_v35 }
  0xab   : > { %988 = vmatprep.mubr.bf16.mxu0 %v4613_v14  ;;  %1511 = vmatprep.mubr.bf16.mxu1 %v4613_v14 }
  0xb2   : > { %3960 = vmatmul.mubr.msk.bf16.gmra.mxu0 %vm605_vm1, %v4575_v36  ;;  %4010 = vmatmul.mubr.msk.bf16.gmra.mxu1 %vm605_vm1, %v4575_v36 }
  0xb3   : > { %998 = vmatprep.mubr.bf16.mxu0 %v4613_v14  ;;  %1521 = vmatprep.mubr.bf16.mxu1 %v4613_v14 }
  0xba   : > { %3961 = vmatmul.mubr.msk.bf16.gmra.mxu0 %vm605_vm1, %v4576_v37  ;;  %4011 = vmatmul.mubr.msk.bf16.gmra.mxu1 %vm605_vm1, %v4576_v37 }
  0xbb   : > { %1008 = vmatprep.mubr.bf16.mxu0 %v4613_v14  ;;  %1531 = vmatprep.mubr.bf16.mxu1 %v4613_v14 }
  0xc2   : > { %3962 = vmatmul.mubr.msk.bf16.gmra.mxu0 %vm605_vm1, %v4577_v38  ;;  %4012 = vmatmul.mubr.msk.bf16.gmra.mxu1 %vm605_vm1, %v4577_v38 }
  0xc3   : > { %1018 = vmatprep.mubr.bf16.mxu0 %v4613_v14  ;;  %1541 = vmatprep.mubr.bf16.mxu1 %v4613_v14 }
  0xca   : > { %3963 = vmatmul.mubr.msk.bf16.gmra.mxu0 %vm605_vm1, %v4578_v39  ;;  %4013 = vmatmul.mubr.msk.bf16.gmra.mxu1 %vm605_vm1, %v4578_v39 }
  0xcb   : > { %1028 = vmatprep.mubr.bf16.mxu0 %v4613_v14  ;;  %1551 = vmatprep.mubr.bf16.mxu1 %v4613_v14 }
  0xd2   : > { %3964 = vmatmul.mubr.msk.bf16.gmra.mxu0 %vm605_vm1, %v4579_v41  ;;  %4014 = vmatmul.mubr.msk.bf16.gmra.mxu1 %vm605_vm1, %v4579_v41 }
  0xd3   : > { %1038 = vmatprep.mubr.bf16.mxu0 %v4613_v14  ;;  %1561 = vmatprep.mubr.bf16.mxu1 %v4613_v14 }
  0xda   : > { %v800_v55 = vpop.f32.mrf.mxu0  ;;  %3965 = vmatmul.mubr.msk.bf16.gmra.mxu0 %vm605_vm1, %v4580_v49  ;;  %v1323_v56 = vpop.f32.mrf.mxu1  ;;  %4015 = vmatmul.mubr.msk.bf16.gmra.mxu1 %vm605_vm1, %v4580_v49 }
  0xdb   : > { %v1834_v59 = vmul.f32 %v4816_v50, %v800_v55  ;;  %v1836_v60 = vmul.f32 %v4818_v51, %v1323_v56  ;;  %1048 = vmatprep.mubr.bf16.mxu0 %v4613_v14  ;;  %1571 = vmatprep.mubr.bf16.mxu1 %v4613_v14 }
  0xdc   : > { %v802_v62 = vpop.f32.mrf.mxu0  ;;  %v1325_v63 = vpop.f32.mrf.mxu1 }
  0xdd   : > { %v2248_v0 = vadd.f32 %v4820_v52, %v1834_v59  ;;  %v1835_v1 = vmul.f32 %v4822_v53, %v802_v62  ;;  %v1837_v2 = vmul.f32 %v4824_v54, %v1325_v63  ;;  %v2250_v3 = vadd.f32 %v4827_v57, %v1836_v60 }
  0xde   : > { %v804_v4 = vpop.f32.mrf.mxu0  ;;  %v1327_v5 = vpop.f32.mrf.mxu1 }
  0xdf   : > { %v2249_v7 = vadd.f32 %v4830_v58, %v1835_v1  ;;  %v2251_v8 = vadd.f32 %v4834_v61, %v1837_v2  ;;  %v2640_v9 = vmax.f32 %v2248_v0, 0.0  ;;  %v1838_v10 = vmul.f32 %v4816_v50, %v804_v4 }
  0xe0   : > { %v1840_v11 = vmul.f32 %v4818_v51, %v1327_v5  ;;  %v806_v12 = vpop.f32.mrf.mxu0  ;;  %v1329_v13 = vpop.f32.mrf.mxu1  ;;  %v2642_v19 = vmax.f32 %v2250_v3, 0.0 }
  0xe1   : > { %v2641_v15 = vmax.f32 %v2249_v7, 0.0  ;;  %v2643_v16 = vmax.f32 %v2251_v8, 0.0  ;;  %v1839_v17 = vmul.f32 %v4822_v53, %v806_v12  ;;  %v1841_v18 = vmul.f32 %v4824_v54, %v1329_v13 }
  0xe2   : > { %v2252_v20 = vadd.f32 %v4820_v52, %v1838_v10  ;;  %v2254_v21 = vadd.f32 %v4827_v57, %v1840_v11  ;;  %v810_v22 = vpop.f32.mrf.mxu0  ;;  %3966 = vmatmul.mubr.msk.bf16.gmra.mxu0 %vm605_vm1, %v4581_v6  ;;  %v1333_v23 = vpop.f32.mrf.mxu1  ;;  %4016 = vmatmul.mubr.msk.bf16.gmra.mxu1 %vm605_vm1, %v4581_v6 }
  0xe3   : > { %v3032_v24 = vmax.f32 %v2640_v9, %v2641_v15  ;;  %v2253_v25 = vadd.f32 %v4830_v58, %v1839_v17  ;;  %v2255_v26 = vadd.f32 %v4834_v61, %v1841_v18  ;;  %1058 = vmatprep.mubr.bf16.mxu0 %v4613_v14  ;;  %v3130_v27 = vmax.f32 %v2642_v19, %v2643_v16 }
  0xe4   : > { %v2644_v28 = vmax.f32 %v2252_v20, 0.0  ;;  %v1842_v29 = vmul.f32 %v4816_v50, %v810_v22  ;;  %v1844_v30 = vmul.f32 %v4818_v51, %v1333_v23  ;;  %v812_v31 = vpop.f32.mrf.mxu0  ;;  %v1335_v32 = vpop.f32.mrf.mxu1  ;;  %1581 = vmatprep.mubr.bf16.mxu1 %v4613_v14  ;;  %v2646_v33 = vmax.f32 %v2254_v21, 0.0 }
  0xe5   : > { %v2645_v34 = vmax.f32 %v2253_v25, 0.0  ;;  %v2647_v35 = vmax.f32 %v2255_v26, 0.0  ;;  %v1843_v36 = vmul.f32 %v4822_v53, %v812_v31  ;;  %v1845_v39 = vmul.f32 %v4824_v54, %v1335_v32 }
  0xe6   : > { %v2256_v37 = vadd.f32 %v4820_v52, %v1842_v29  ;;  %v2258_v38 = vadd.f32 %v4827_v57, %v1844_v30  ;;  %v814_v40 = vpop.f32.mrf.mxu0  ;;  %v1337_v41 = vpop.f32.mrf.mxu1  ;;  %v3228_v47 = vmax.f32 %v3032_v24, %v3130_v27  ;;  %v4583_v27 = vld [vmem:[%s4687_s16 + $0xd8] sm:$0xff]  }
  0xe7   : > { %v3033_v43 = vmax.f32 %v2644_v28, %v2645_v34  ;;  %v3131_v44 = vmax.f32 %v2646_v33, %v2647_v35  ;;  %v2257_v45 = vadd.f32 %v4830_v58, %v1843_v36  ;;  %v1846_v46 = vmul.f32 %v4816_v50, %v814_v40 }
  0xe8   : > { %v2648_v48 = vmax.f32 %v2256_v37, 0.0  ;;  %v2259_v49 = vadd.f32 %v4834_v61, %v1845_v39  ;;  %v1848_v55 = vmul.f32 %v4818_v51, %v1337_v41  ;;  %v816_v56 = vpop.f32.mrf.mxu0  ;;  %v1339_v59 = vpop.f32.mrf.mxu1  ;;  %v2650_v1 = vmax.f32 %v2258_v38, 0.0 }
  0xe9   : > { %v3229_v60 = vmax.f32 %v3033_v43, %v3131_v44  ;;  %v2649_v62 = vmax.f32 %v2257_v45, 0.0  ;;  %v2260_v63 = vadd.f32 %v4820_v52, %v1846_v46  ;;  %v1847_v0 = vmul.f32 %v4822_v53, %v816_v56 }
  0xea   : > { %v2651_v2 = vmax.f32 %v2259_v49, 0.0  ;;  %v2262_v3 = vadd.f32 %v4827_v57, %v1848_v55  ;;  %v1849_v4 = vmul.f32 %v4824_v54, %v1339_v59  ;;  %v820_v5 = vpop.f32.mrf.mxu0  ;;  %3967 = vmatmul.mubr.msk.bf16.gmra.mxu0 %vm605_vm1, %v4582_v42  ;;  %v1343_v6 = vpop.f32.mrf.mxu1  ;;  %4017 = vmatmul.mubr.msk.bf16.gmra.mxu1 %vm605_vm1, %v4582_v42 }
  0xeb   : > { %v4241_v7 = vpack.c.bf16 %v3229_v60, %v3228_v47  ;;  %v3034_v8 = vmax.f32 %v2648_v48, %v2649_v62  ;;  %v2261_v9 = vadd.f32 %v4830_v58, %v1847_v0  ;;  %1068 = vmatprep.mubr.bf16.mxu0 %v4613_v14  ;;  %1591 = vmatprep.mubr.bf16.mxu1 %v4613_v14  ;;  %v2652_v11 = vmax.f32 %v2260_v63, 0.0 }
  0xec   : > { %v3132_v10 = vmax.f32 %v2650_v1, %v2651_v2  ;;  %v2263_v12 = vadd.f32 %v4834_v61, %v1849_v4  ;;  %v1850_v13 = vmul.f32 %v4816_v50, %v820_v5  ;;  %v822_v15 = vpop.f32.mrf.mxu0  ;;  %v1345_v16 = vpop.f32.mrf.mxu1  ;;  %v1852_v18 = vmul.f32 %v4818_v51, %v1343_v6 }
  0xed   : > { %4242 = vst [vmem:[%s4875_s24] sm:$0xff] %v4241_v7   ;;  %v2653_v17 = vmax.f32 %v2261_v9, 0.0  ;;  %v1851_v19 = vmul.f32 %v4822_v53, %v822_v15  ;;  %v1853_v20 = vmul.f32 %v4824_v54, %v1345_v16  ;;  %v2654_v22 = vmax.f32 %v2262_v3, 0.0 }
  0xee   : > { %v3230_v21 = vmax.f32 %v3034_v8, %v3132_v10  ;;  %v2655_v23 = vmax.f32 %v2263_v12, 0.0  ;;  %v2264_v24 = vadd.f32 %v4820_v52, %v1850_v13  ;;  %v824_v25 = vpop.f32.mrf.mxu0  ;;  %v1347_v26 = vpop.f32.mrf.mxu1  ;;  %v2266_v29 = vadd.f32 %v4827_v57, %v1852_v18 }
  0xef   : > { %v3035_v28 = vmax.f32 %v2652_v11, %v2653_v17  ;;  %v2265_v30 = vadd.f32 %v4830_v58, %v1851_v19  ;;  %v2267_v31 = vadd.f32 %v4834_v61, %v1853_v20  ;;  %v1854_v34 = vmul.f32 %v4816_v50, %v824_v25  ;;  %v4584_v11 = vld [vmem:[%s4687_s16 + $0xe0] sm:$0xff]  }
  0xf0   : > { %v3133_v32 = vmax.f32 %v2654_v22, %v2655_v23  ;;  %v2656_v33 = vmax.f32 %v2264_v24, 0.0  ;;  %v1856_v35 = vmul.f32 %v4818_v51, %v1347_v26  ;;  %v826_v36 = vpop.f32.mrf.mxu0  ;;  %v1349_v37 = vpop.f32.mrf.mxu1  ;;  %v2658_v38 = vmax.f32 %v2266_v29, 0.0 }
  0xf1   : > { %v2657_v39 = vmax.f32 %v2265_v30, 0.0  ;;  %v2659_v40 = vmax.f32 %v2267_v31, 0.0  ;;  %v1855_v41 = vmul.f32 %v4822_v53, %v826_v36  ;;  %v2268_v43 = vadd.f32 %v4820_v52, %v1854_v34 }
  0xf2   : > { %v3231_v42 = vmax.f32 %v3035_v28, %v3133_v32  ;;  %v2270_v44 = vadd.f32 %v4827_v57, %v1856_v35  ;;  %v1857_v45 = vmul.f32 %v4824_v54, %v1349_v37  ;;  %v830_v46 = vpop.f32.mrf.mxu0  ;;  %3968 = vmatmul.mubr.msk.bf16.gmra.mxu0 %vm605_vm1, %v4583_v27  ;;  %v1353_v47 = vpop.f32.mrf.mxu1  ;;  %4018 = vmatmul.mubr.msk.bf16.gmra.mxu1 %vm605_vm1, %v4583_v27 }
  0xf3   : > { %v3036_v48 = vmax.f32 %v2656_v33, %v2657_v39  ;;  %v3134_v49 = vmax.f32 %v2658_v38, %v2659_v40  ;;  %v2269_v55 = vadd.f32 %v4830_v58, %v1855_v41  ;;  %v1858_v56 = vmul.f32 %v4816_v50, %v830_v46  ;;  %1078 = vmatprep.mubr.bf16.mxu0 %v4613_v14 }
  0xf4   : > { %v4246_v59 = vpack.c.bf16 %v3231_v42, %v3230_v21  ;;  %v2660_v60 = vmax.f32 %v2268_v43, 0.0  ;;  %v2271_v62 = vadd.f32 %v4834_v61, %v1857_v45  ;;  %v832_v63 = vpop.f32.mrf.mxu0  ;;  %v1355_v0 = vpop.f32.mrf.mxu1  ;;  %1601 = vmatprep.mubr.bf16.mxu1 %v4613_v14  ;;  %v2662_v1 = vmax.f32 %v2270_v44, 0.0 }
  0xf5   : > { %v2661_v2 = vmax.f32 %v2269_v55, 0.0  ;;  %v2272_v3 = vadd.f32 %v4820_v52, %v1858_v56  ;;  %v1860_v4 = vmul.f32 %v4818_v51, %v1353_v47  ;;  %v3232_v5 = vmax.f32 %v3036_v48, %v3134_v49 }
  0xf6   : > { %4483 = vst [vmem:[%s4875_s24 + $0x8] sm:$0xff] %v4246_v59   ;;  %v2663_v6 = vmax.f32 %v2271_v62, 0.0  ;;  %v1859_v7 = vmul.f32 %v4822_v53, %v832_v63  ;;  %v1861_v8 = vmul.f32 %v4824_v54, %v1355_v0  ;;  %v834_v9 = vpop.f32.mrf.mxu0  ;;  %v1357_v10 = vpop.f32.mrf.mxu1  ;;  %v4585_v59 = vld [vmem:[%s4687_s16 + $0xe8] sm:$0xff]  }
  0xf7   : > { %v3037_v12 = vmax.f32 %v2660_v60, %v2661_v2  ;;  %v2664_v13 = vmax.f32 %v2272_v3, 0.0  ;;  %v2274_v15 = vadd.f32 %v4827_v57, %v1860_v4  ;;  %v1862_v16 = vmul.f32 %v4816_v50, %v834_v9 }
  0xf8   : > { %v3135_v17 = vmax.f32 %v2662_v1, %v2663_v6  ;;  %v2273_v18 = vadd.f32 %v4830_v58, %v1859_v7  ;;  %v2275_v19 = vadd.f32 %v4834_v61, %v1861_v8  ;;  %v1864_v20 = vmul.f32 %v4818_v51, %v1357_v10  ;;  %v836_v21 = vpop.f32.mrf.mxu0  ;;  %v1359_v22 = vpop.f32.mrf.mxu1 }
  0xf9   : > { %v2666_v23 = vmax.f32 %v2274_v15, 0.0  ;;  %v2276_v24 = vadd.f32 %v4820_v52, %v1862_v16  ;;  %v1863_v25 = vmul.f32 %v4822_v53, %v836_v21  ;;  %v1865_v26 = vmul.f32 %v4824_v54, %v1359_v22 }
  0xfa   : > { %v3233_v27 = vmax.f32 %v3037_v12, %v3135_v17  ;;  %v2665_v28 = vmax.f32 %v2273_v18, 0.0  ;;  %v2667_v29 = vmax.f32 %v2275_v19, 0.0  ;;  %v2278_v30 = vadd.f32 %v4827_v57, %v1864_v20  ;;  %v840_v31 = vpop.f32.mrf.mxu0  ;;  %3969 = vmatmul.mubr.msk.bf16.gmra.mxu0 %vm605_vm1, %v4584_v11  ;;  %v1363_v32 = vpop.f32.mrf.mxu1  ;;  %4019 = vmatmul.mubr.msk.bf16.gmra.mxu1 %vm605_vm1, %v4584_v11 }
  0xfb   : > { %v2668_v33 = vmax.f32 %v2276_v24, 0.0  ;;  %v2277_v34 = vadd.f32 %v4830_v58, %v1863_v25  ;;  %v2279_v35 = vadd.f32 %v4834_v61, %v1865_v26  ;;  %v1866_v36 = vmul.f32 %v4816_v50, %v840_v31  ;;  %1088 = vmatprep.mubr.bf16.mxu0 %v4613_v14  ;;  %1611 = vmatprep.mubr.bf16.mxu1 %v4613_v14 }
  0xfc   : > { %v4251_v37 = vpack.c.bf16 %v3233_v27, %v3232_v5  ;;  %v3038_v38 = vmax.f32 %v2664_v13, %v2665_v28  ;;  %v3136_v39 = vmax.f32 %v2666_v23, %v2667_v29  ;;  %v2670_v40 = vmax.f32 %v2278_v30, 0.0  ;;  %v842_v41 = vpop.f32.mrf.mxu0  ;;  %v1365_v42 = vpop.f32.mrf.mxu1 }
  0xfd   : > { %v2669_v43 = vmax.f32 %v2277_v34, 0.0  ;;  %v2671_v44 = vmax.f32 %v2279_v35, 0.0  ;;  %v2280_v45 = vadd.f32 %v4820_v52, %v1866_v36  ;;  %v1868_v46 = vmul.f32 %v4818_v51, %v1363_v32 }
  0xfe   : > { %4484 = vst [vmem:[%s4875_s24 + $0x10] sm:$0xff] %v4251_v37   ;;  %v3234_v47 = vmax.f32 %v3038_v38, %v3136_v39  ;;  %v1867_v48 = vmul.f32 %v4822_v53, %v842_v41  ;;  %v1869_v49 = vmul.f32 %v4824_v54, %v1365_v42  ;;  %v844_v55 = vpop.f32.mrf.mxu0  ;;  %v1367_v56 = vpop.f32.mrf.mxu1  ;;  %v4586_v37 = vld [vmem:[%s4687_s16 + $0xf0] sm:$0xff]  }
  0xff   : > { %v3039_v60 = vmax.f32 %v2668_v33, %v2669_v43  ;;  %v3137_v62 = vmax.f32 %v2670_v40, %v2671_v44  ;;  %v2672_v63 = vmax.f32 %v2280_v45, 0.0  ;;  %v2282_v0 = vadd.f32 %v4827_v57, %v1868_v46 }
 0x100   : > { %v2281_v1 = vadd.f32 %v4830_v58, %v1867_v48  ;;  %v2283_v2 = vadd.f32 %v4834_v61, %v1869_v49  ;;  %v1870_v3 = vmul.f32 %v4816_v50, %v844_v55  ;;  %v1872_v4 = vmul.f32 %v4818_v51, %v1367_v56  ;;  %v846_v5 = vpop.f32.mrf.mxu0  ;;  %v1369_v6 = vpop.f32.mrf.mxu1 }
 0x101   : > { %v3235_v7 = vmax.f32 %v3039_v60, %v3137_v62  ;;  %v2674_v8 = vmax.f32 %v2282_v0, 0.0  ;;  %v1871_v9 = vmul.f32 %v4822_v53, %v846_v5  ;;  %v1873_v10 = vmul.f32 %v4824_v54, %v1369_v6 }
 0x102   : > { %v2673_v11 = vmax.f32 %v2281_v1, 0.0  ;;  %v2675_v12 = vmax.f32 %v2283_v2, 0.0  ;;  %v2284_v13 = vadd.f32 %v4820_v52, %v1870_v3  ;;  %v2286_v15 = vadd.f32 %v4827_v57, %v1872_v4  ;;  %v850_v16 = vpop.f32.mrf.mxu0  ;;  %3970 = vmatmul.mubr.msk.bf16.gmra.mxu0 %vm605_vm1, %v4585_v59  ;;  %v1373_v17 = vpop.f32.mrf.mxu1  ;;  %4020 = vmatmul.mubr.msk.bf16.gmra.mxu1 %vm605_vm1, %v4585_v59 }
 0x103   : > { %v4256_v18 = vpack.c.bf16 %v3235_v7, %v3234_v47  ;;  %v2285_v19 = vadd.f32 %v4830_v58, %v1871_v9  ;;  %v2287_v20 = vadd.f32 %v4834_v61, %v1873_v10  ;;  %v1874_v21 = vmul.f32 %v4816_v50, %v850_v16  ;;  %1098 = vmatprep.mubr.bf16.mxu0 %v4613_v14 }
 0x104   : > { %v3040_v22 = vmax.f32 %v2672_v63, %v2673_v11  ;;  %v3138_v23 = vmax.f32 %v2674_v8, %v2675_v12  ;;  %v2676_v24 = vmax.f32 %v2284_v13, 0.0  ;;  %v2678_v25 = vmax.f32 %v2286_v15, 0.0  ;;  %v852_v26 = vpop.f32.mrf.mxu0  ;;  %v1375_v27 = vpop.f32.mrf.mxu1  ;;  %1621 = vmatprep.mubr.bf16.mxu1 %v4613_v14 }
 0x105   : > { %4485 = vst [vmem:[%s4875_s24 + $0x18] sm:$0xff] %v4256_v18   ;;  %v2677_v28 = vmax.f32 %v2285_v19, 0.0  ;;  %v2679_v29 = vmax.f32 %v2287_v20, 0.0  ;;  %v2288_v30 = vadd.f32 %v4820_v52, %v1874_v21  ;;  %v1876_v31 = vmul.f32 %v4818_v51, %v1373_v17 }
 0x106   : > { %v3236_v32 = vmax.f32 %v3040_v22, %v3138_v23  ;;  %v1875_v33 = vmul.f32 %v4822_v53, %v852_v26  ;;  %v1877_v34 = vmul.f32 %v4824_v54, %v1375_v27  ;;  %v854_v35 = vpop.f32.mrf.mxu0  ;;  %v1377_v36 = vpop.f32.mrf.mxu1  ;;  %v4587_v22 = vld [vmem:[%s4687_s16 + $0xf8] sm:$0xff]  }
 0x107   : > { %v3041_v38 = vmax.f32 %v2676_v24, %v2677_v28  ;;  %v3139_v39 = vmax.f32 %v2678_v25, %v2679_v29  ;;  %v2680_v40 = vmax.f32 %v2288_v30, 0.0  ;;  %v2290_v41 = vadd.f32 %v4827_v57, %v1876_v31 }
 0x108   : > { %v2289_v42 = vadd.f32 %v4830_v58, %v1875_v33  ;;  %v2291_v43 = vadd.f32 %v4834_v61, %v1877_v34  ;;  %v1878_v44 = vmul.f32 %v4816_v50, %v854_v35  ;;  %v1880_v45 = vmul.f32 %v4818_v51, %v1377_v36  ;;  %v856_v46 = vpop.f32.mrf.mxu0  ;;  %v1379_v47 = vpop.f32.mrf.mxu1 }
 0x109   : > { %v3237_v48 = vmax.f32 %v3041_v38, %v3139_v39  ;;  %v2682_v49 = vmax.f32 %v2290_v41, 0.0  ;;  %v1879_v55 = vmul.f32 %v4822_v53, %v856_v46  ;;  %v1881_v56 = vmul.f32 %v4824_v54, %v1379_v47 }
 0x10a   : > { %v2681_v59 = vmax.f32 %v2289_v42, 0.0  ;;  %v2683_v60 = vmax.f32 %v2291_v43, 0.0  ;;  %v2292_v62 = vadd.f32 %v4820_v52, %v1878_v44  ;;  %v2294_v63 = vadd.f32 %v4827_v57, %v1880_v45  ;;  %v860_v0 = vpop.f32.mrf.mxu0  ;;  %3971 = vmatmul.mubr.msk.bf16.gmra.mxu0 %vm605_vm1, %v4586_v37  ;;  %v1383_v1 = vpop.f32.mrf.mxu1  ;;  %4021 = vmatmul.mubr.msk.bf16.gmra.mxu1 %vm605_vm1, %v4586_v37 }
 0x10b   : > { %v4261_v2 = vpack.c.bf16 %v3237_v48, %v3236_v32  ;;  %v2293_v3 = vadd.f32 %v4830_v58, %v1879_v55  ;;  %v2295_v4 = vadd.f32 %v4834_v61, %v1881_v56  ;;  %v1882_v5 = vmul.f32 %v4816_v50, %v860_v0  ;;  %1108 = vmatprep.mubr.bf16.mxu0 %v4613_v14 }
 0x10c   : > { %v3042_v6 = vmax.f32 %v2680_v40, %v2681_v59  ;;  %v3140_v7 = vmax.f32 %v2682_v49, %v2683_v60  ;;  %v2684_v8 = vmax.f32 %v2292_v62, 0.0  ;;  %v2686_v9 = vmax.f32 %v2294_v63, 0.0  ;;  %v862_v10 = vpop.f32.mrf.mxu0  ;;  %v1385_v11 = vpop.f32.mrf.mxu1  ;;  %1631 = vmatprep.mubr.bf16.mxu1 %v4613_v14 }
 0x10d   : > { %4486 = vst [vmem:[%s4875_s24 + $0x20] sm:$0xff] %v4261_v2   ;;  %v2685_v12 = vmax.f32 %v2293_v3, 0.0  ;;  %v2687_v13 = vmax.f32 %v2295_v4, 0.0  ;;  %v2296_v15 = vadd.f32 %v4820_v52, %v1882_v5  ;;  %v1884_v16 = vmul.f32 %v4818_v51, %v1383_v1 }
 0x10e   : > { %v3238_v17 = vmax.f32 %v3042_v6, %v3140_v7  ;;  %v1883_v18 = vmul.f32 %v4822_v53, %v862_v10  ;;  %v1885_v19 = vmul.f32 %v4824_v54, %v1385_v11  ;;  %v864_v20 = vpop.f32.mrf.mxu0  ;;  %v1387_v21 = vpop.f32.mrf.mxu1  ;;  %v4588_v6 = vld [vmem:[%s4687_s16 + $0x100] sm:$0xff]  }
 0x10f   : > { %v3043_v23 = vmax.f32 %v2684_v8, %v2685_v12  ;;  %v3141_v24 = vmax.f32 %v2686_v9, %v2687_v13  ;;  %v2688_v25 = vmax.f32 %v2296_v15, 0.0  ;;  %v2298_v26 = vadd.f32 %v4827_v57, %v1884_v16 }
 0x110   : > { %v2297_v27 = vadd.f32 %v4830_v58, %v1883_v18  ;;  %v2299_v28 = vadd.f32 %v4834_v61, %v1885_v19  ;;  %v1886_v29 = vmul.f32 %v4816_v50, %v864_v20  ;;  %v1888_v30 = vmul.f32 %v4818_v51, %v1387_v21  ;;  %v866_v31 = vpop.f32.mrf.mxu0  ;;  %v1389_v32 = vpop.f32.mrf.mxu1 }
 0x111   : > { %v3239_v33 = vmax.f32 %v3043_v23, %v3141_v24  ;;  %v2690_v34 = vmax.f32 %v2298_v26, 0.0  ;;  %v1887_v35 = vmul.f32 %v4822_v53, %v866_v31  ;;  %v1889_v36 = vmul.f32 %v4824_v54, %v1389_v32 }
 0x112   : > { %v2689_v37 = vmax.f32 %v2297_v27, 0.0  ;;  %v2691_v38 = vmax.f32 %v2299_v28, 0.0  ;;  %v2300_v39 = vadd.f32 %v4820_v52, %v1886_v29  ;;  %v2302_v40 = vadd.f32 %v4827_v57, %v1888_v30  ;;  %v870_v41 = vpop.f32.mrf.mxu0  ;;  %3972 = vmatmul.mubr.msk.bf16.gmra.mxu0 %vm605_vm1, %v4587_v22  ;;  %v1393_v42 = vpop.f32.mrf.mxu1  ;;  %4022 = vmatmul.mubr.msk.bf16.gmra.mxu1 %vm605_vm1, %v4587_v22 }
 0x113   : > { %v4266_v43 = vpack.c.bf16 %v3239_v33, %v3238_v17  ;;  %v2301_v44 = vadd.f32 %v4830_v58, %v1887_v35  ;;  %v2303_v45 = vadd.f32 %v4834_v61, %v1889_v36  ;;  %v1890_v46 = vmul.f32 %v4816_v50, %v870_v41  ;;  %1118 = vmatprep.mubr.bf16.mxu0 %v4613_v14 }
 0x114   : > { %v3044_v47 = vmax.f32 %v2688_v25, %v2689_v37  ;;  %v3142_v48 = vmax.f32 %v2690_v34, %v2691_v38  ;;  %v2692_v49 = vmax.f32 %v2300_v39, 0.0  ;;  %v2694_v55 = vmax.f32 %v2302_v40, 0.0  ;;  %v872_v56 = vpop.f32.mrf.mxu0  ;;  %v1395_v59 = vpop.f32.mrf.mxu1  ;;  %1641 = vmatprep.mubr.bf16.mxu1 %v4613_v14 }
 0x115   : > { %4487 = vst [vmem:[%s4875_s24 + $0x28] sm:$0xff] %v4266_v43   ;;  %v2693_v60 = vmax.f32 %v2301_v44, 0.0  ;;  %v2695_v62 = vmax.f32 %v2303_v45, 0.0  ;;  %v2304_v63 = vadd.f32 %v4820_v52, %v1890_v46  ;;  %v1892_v0 = vmul.f32 %v4818_v51, %v1393_v42 }
 0x116   : > { %v3240_v1 = vmax.f32 %v3044_v47, %v3142_v48  ;;  %v1891_v2 = vmul.f32 %v4822_v53, %v872_v56  ;;  %v1893_v3 = vmul.f32 %v4824_v54, %v1395_v59  ;;  %v874_v4 = vpop.f32.mrf.mxu0  ;;  %v1397_v5 = vpop.f32.mrf.mxu1  ;;  %v4589_v47 = vld [vmem:[%s4687_s16 + $0x108] sm:$0xff]  }
 0x117   : > { %v3045_v7 = vmax.f32 %v2692_v49, %v2693_v60  ;;  %v3143_v8 = vmax.f32 %v2694_v55, %v2695_v62  ;;  %v2696_v9 = vmax.f32 %v2304_v63, 0.0  ;;  %v2306_v10 = vadd.f32 %v4827_v57, %v1892_v0 }
 0x118   : > { %v2305_v11 = vadd.f32 %v4830_v58, %v1891_v2  ;;  %v2307_v12 = vadd.f32 %v4834_v61, %v1893_v3  ;;  %v1894_v13 = vmul.f32 %v4816_v50, %v874_v4  ;;  %v1896_v15 = vmul.f32 %v4818_v51, %v1397_v5  ;;  %v876_v16 = vpop.f32.mrf.mxu0  ;;  %v1399_v17 = vpop.f32.mrf.mxu1 }
 0x119   : > { %v3241_v18 = vmax.f32 %v3045_v7, %v3143_v8  ;;  %v2698_v19 = vmax.f32 %v2306_v10, 0.0  ;;  %v1895_v20 = vmul.f32 %v4822_v53, %v876_v16  ;;  %v1897_v21 = vmul.f32 %v4824_v54, %v1399_v17 }
 0x11a   : > { %v2697_v22 = vmax.f32 %v2305_v11, 0.0  ;;  %v2699_v23 = vmax.f32 %v2307_v12, 0.0  ;;  %v2308_v24 = vadd.f32 %v4820_v52, %v1894_v13  ;;  %v2310_v25 = vadd.f32 %v4827_v57, %v1896_v15  ;;  %v880_v26 = vpop.f32.mrf.mxu0  ;;  %3973 = vmatmul.mubr.msk.bf16.gmra.mxu0 %vm605_vm1, %v4588_v6  ;;  %v1403_v27 = vpop.f32.mrf.mxu1  ;;  %4023 = vmatmul.mubr.msk.bf16.gmra.mxu1 %vm605_vm1, %v4588_v6 }
 0x11b   : > { %v4271_v28 = vpack.c.bf16 %v3241_v18, %v3240_v1  ;;  %v2309_v29 = vadd.f32 %v4830_v58, %v1895_v20  ;;  %v2311_v30 = vadd.f32 %v4834_v61, %v1897_v21  ;;  %v1898_v31 = vmul.f32 %v4816_v50, %v880_v26  ;;  %1128 = vmatprep.mubr.bf16.mxu0 %v4613_v14 }
 0x11c   : > { %v3046_v32 = vmax.f32 %v2696_v9, %v2697_v22  ;;  %v3144_v33 = vmax.f32 %v2698_v19, %v2699_v23  ;;  %v2700_v34 = vmax.f32 %v2308_v24, 0.0  ;;  %v2702_v35 = vmax.f32 %v2310_v25, 0.0  ;;  %v882_v36 = vpop.f32.mrf.mxu0  ;;  %v1405_v37 = vpop.f32.mrf.mxu1  ;;  %1651 = vmatprep.mubr.bf16.mxu1 %v4613_v14 }
 0x11d   : > { %4488 = vst [vmem:[%s4875_s24 + $0x30] sm:$0xff] %v4271_v28   ;;  %v2701_v38 = vmax.f32 %v2309_v29, 0.0  ;;  %v2703_v39 = vmax.f32 %v2311_v30, 0.0  ;;  %v2312_v40 = vadd.f32 %v4820_v52, %v1898_v31  ;;  %v1900_v41 = vmul.f32 %v4818_v51, %v1403_v27 }
 0x11e   : > { %v3242_v42 = vmax.f32 %v3046_v32, %v3144_v33  ;;  %v1899_v43 = vmul.f32 %v4822_v53, %v882_v36  ;;  %v1901_v44 = vmul.f32 %v4824_v54, %v1405_v37  ;;  %v884_v45 = vpop.f32.mrf.mxu0  ;;  %v1407_v46 = vpop.f32.mrf.mxu1  ;;  %v4590_v32 = vld [vmem:[%s4687_s16 + $0x110] sm:$0xff]  }
 0x11f   : > { %v3047_v48 = vmax.f32 %v2700_v34, %v2701_v38  ;;  %v3145_v49 = vmax.f32 %v2702_v35, %v2703_v39  ;;  %v2704_v55 = vmax.f32 %v2312_v40, 0.0  ;;  %v2314_v56 = vadd.f32 %v4827_v57, %v1900_v41 }
 0x120   : > { %v2313_v59 = vadd.f32 %v4830_v58, %v1899_v43  ;;  %v2315_v60 = vadd.f32 %v4834_v61, %v1901_v44  ;;  %v1902_v62 = vmul.f32 %v4816_v50, %v884_v45  ;;  %v1904_v63 = vmul.f32 %v4818_v51, %v1407_v46  ;;  %v886_v0 = vpop.f32.mrf.mxu0  ;;  %v1409_v1 = vpop.f32.mrf.mxu1 }
 0x121   : > { %v3243_v2 = vmax.f32 %v3047_v48, %v3145_v49  ;;  %v2706_v3 = vmax.f32 %v2314_v56, 0.0  ;;  %v1903_v4 = vmul.f32 %v4822_v53, %v886_v0  ;;  %v1905_v5 = vmul.f32 %v4824_v54, %v1409_v1 }
 0x122   : > { %v2705_v6 = vmax.f32 %v2313_v59, 0.0  ;;  %v2707_v7 = vmax.f32 %v2315_v60, 0.0  ;;  %v2316_v8 = vadd.f32 %v4820_v52, %v1902_v62  ;;  %v2318_v9 = vadd.f32 %v4827_v57, %v1904_v63  ;;  %v890_v10 = vpop.f32.mrf.mxu0  ;;  %3974 = vmatmul.mubr.msk.bf16.gmra.mxu0 %vm605_vm1, %v4589_v47  ;;  %v1413_v11 = vpop.f32.mrf.mxu1  ;;  %4024 = vmatmul.mubr.msk.bf16.gmra.mxu1 %vm605_vm1, %v4589_v47 }
 0x123   : > { %v4276_v12 = vpack.c.bf16 %v3243_v2, %v3242_v42  ;;  %v2317_v13 = vadd.f32 %v4830_v58, %v1903_v4  ;;  %v2319_v15 = vadd.f32 %v4834_v61, %v1905_v5  ;;  %v1906_v16 = vmul.f32 %v4816_v50, %v890_v10  ;;  %1138 = vmatprep.mubr.bf16.mxu0 %v4613_v14 }
 0x124   : > { %v3048_v17 = vmax.f32 %v2704_v55, %v2705_v6  ;;  %v3146_v18 = vmax.f32 %v2706_v3, %v2707_v7  ;;  %v2708_v19 = vmax.f32 %v2316_v8, 0.0  ;;  %v2710_v20 = vmax.f32 %v2318_v9, 0.0  ;;  %v892_v21 = vpop.f32.mrf.mxu0  ;;  %v1415_v22 = vpop.f32.mrf.mxu1  ;;  %1661 = vmatprep.mubr.bf16.mxu1 %v4613_v14 }
 0x125   : > { %4489 = vst [vmem:[%s4875_s24 + $0x38] sm:$0xff] %v4276_v12   ;;  %v2709_v23 = vmax.f32 %v2317_v13, 0.0  ;;  %v2711_v24 = vmax.f32 %v2319_v15, 0.0  ;;  %v2320_v25 = vadd.f32 %v4820_v52, %v1906_v16  ;;  %v1908_v26 = vmul.f32 %v4818_v51, %v1413_v11 }
 0x126   : > { %v3244_v27 = vmax.f32 %v3048_v17, %v3146_v18  ;;  %v1907_v28 = vmul.f32 %v4822_v53, %v892_v21  ;;  %v1909_v29 = vmul.f32 %v4824_v54, %v1415_v22  ;;  %v894_v30 = vpop.f32.mrf.mxu0  ;;  %v1417_v31 = vpop.f32.mrf.mxu1  ;;  %v4591_v17 = vld [vmem:[%s4687_s16 + $0x118] sm:$0xff]  }
 0x127   : > { %v3049_v33 = vmax.f32 %v2708_v19, %v2709_v23  ;;  %v3147_v34 = vmax.f32 %v2710_v20, %v2711_v24  ;;  %v2712_v35 = vmax.f32 %v2320_v25, 0.0  ;;  %v2322_v36 = vadd.f32 %v4827_v57, %v1908_v26 }
 0x128   : > { %v2321_v37 = vadd.f32 %v4830_v58, %v1907_v28  ;;  %v2323_v38 = vadd.f32 %v4834_v61, %v1909_v29  ;;  %v1910_v39 = vmul.f32 %v4816_v50, %v894_v30  ;;  %v1912_v40 = vmul.f32 %v4818_v51, %v1417_v31  ;;  %v896_v41 = vpop.f32.mrf.mxu0  ;;  %v1419_v42 = vpop.f32.mrf.mxu1 }
 0x129   : > { %v3245_v43 = vmax.f32 %v3049_v33, %v3147_v34  ;;  %v2714_v44 = vmax.f32 %v2322_v36, 0.0  ;;  %v1911_v45 = vmul.f32 %v4822_v53, %v896_v41  ;;  %v1913_v46 = vmul.f32 %v4824_v54, %v1419_v42 }
 0x12a   : > { %v2713_v47 = vmax.f32 %v2321_v37, 0.0  ;;  %v2715_v48 = vmax.f32 %v2323_v38, 0.0  ;;  %v2324_v49 = vadd.f32 %v4820_v52, %v1910_v39  ;;  %v2326_v55 = vadd.f32 %v4827_v57, %v1912_v40  ;;  %v900_v56 = vpop.f32.mrf.mxu0  ;;  %3975 = vmatmul.mubr.msk.bf16.gmra.mxu0 %vm605_vm1, %v4590_v32  ;;  %v1423_v59 = vpop.f32.mrf.mxu1  ;;  %4025 = vmatmul.mubr.msk.bf16.gmra.mxu1 %vm605_vm1, %v4590_v32 }
 0x12b   : > { %v4281_v60 = vpack.c.bf16 %v3245_v43, %v3244_v27  ;;  %v2325_v62 = vadd.f32 %v4830_v58, %v1911_v45  ;;  %v2327_v63 = vadd.f32 %v4834_v61, %v1913_v46  ;;  %v1914_v0 = vmul.f32 %v4816_v50, %v900_v56  ;;  %1148 = vmatprep.mubr.bf16.mxu0 %v4613_v14 }
 0x12c   : > { %v3050_v1 = vmax.f32 %v2712_v35, %v2713_v47  ;;  %v3148_v2 = vmax.f32 %v2714_v44, %v2715_v48  ;;  %v2716_v3 = vmax.f32 %v2324_v49, 0.0  ;;  %v2718_v4 = vmax.f32 %v2326_v55, 0.0  ;;  %v902_v5 = vpop.f32.mrf.mxu0  ;;  %v1425_v6 = vpop.f32.mrf.mxu1  ;;  %1671 = vmatprep.mubr.bf16.mxu1 %v4613_v14 }
 0x12d   : > { %4490 = vst [vmem:[%s4875_s24 + $0x40] sm:$0xff] %v4281_v60   ;;  %v2717_v7 = vmax.f32 %v2325_v62, 0.0  ;;  %v2719_v8 = vmax.f32 %v2327_v63, 0.0  ;;  %v2328_v9 = vadd.f32 %v4820_v52, %v1914_v0  ;;  %v1916_v10 = vmul.f32 %v4818_v51, %v1423_v59 }
 0x12e   : > { %v3246_v11 = vmax.f32 %v3050_v1, %v3148_v2  ;;  %v1915_v12 = vmul.f32 %v4822_v53, %v902_v5  ;;  %v1917_v13 = vmul.f32 %v4824_v54, %v1425_v6  ;;  %v904_v15 = vpop.f32.mrf.mxu0  ;;  %v1427_v16 = vpop.f32.mrf.mxu1  ;;  %v4592_v1 = vld [vmem:[%s4687_s16 + $0x120] sm:$0xff]  }
 0x12f   : > { %v3051_v18 = vmax.f32 %v2716_v3, %v2717_v7  ;;  %v3149_v19 = vmax.f32 %v2718_v4, %v2719_v8  ;;  %v2720_v20 = vmax.f32 %v2328_v9, 0.0  ;;  %v2330_v21 = vadd.f32 %v4827_v57, %v1916_v10 }
 0x130   : > { %v2329_v22 = vadd.f32 %v4830_v58, %v1915_v12  ;;  %v2331_v23 = vadd.f32 %v4834_v61, %v1917_v13  ;;  %v1918_v24 = vmul.f32 %v4816_v50, %v904_v15  ;;  %v1920_v25 = vmul.f32 %v4818_v51, %v1427_v16  ;;  %v906_v26 = vpop.f32.mrf.mxu0  ;;  %v1429_v27 = vpop.f32.mrf.mxu1 }
 0x131   : > { %v3247_v28 = vmax.f32 %v3051_v18, %v3149_v19  ;;  %v2722_v29 = vmax.f32 %v2330_v21, 0.0  ;;  %v1919_v30 = vmul.f32 %v4822_v53, %v906_v26  ;;  %v1921_v31 = vmul.f32 %v4824_v54, %v1429_v27 }
 0x132   : > { %v2721_v32 = vmax.f32 %v2329_v22, 0.0  ;;  %v2723_v33 = vmax.f32 %v2331_v23, 0.0  ;;  %v2332_v34 = vadd.f32 %v4820_v52, %v1918_v24  ;;  %v2334_v35 = vadd.f32 %v4827_v57, %v1920_v25  ;;  %v910_v36 = vpop.f32.mrf.mxu0  ;;  %3976 = vmatmul.mubr.msk.bf16.gmra.mxu0 %vm605_vm1, %v4591_v17  ;;  %v1433_v37 = vpop.f32.mrf.mxu1  ;;  %4026 = vmatmul.mubr.msk.bf16.gmra.mxu1 %vm605_vm1, %v4591_v17 }
 0x133   : > { %v4286_v38 = vpack.c.bf16 %v3247_v28, %v3246_v11  ;;  %v2333_v39 = vadd.f32 %v4830_v58, %v1919_v30  ;;  %v2335_v40 = vadd.f32 %v4834_v61, %v1921_v31  ;;  %v1922_v41 = vmul.f32 %v4816_v50, %v910_v36  ;;  %1158 = vmatprep.mubr.bf16.mxu0 %v4613_v14 }
 0x134   : > { %v3052_v42 = vmax.f32 %v2720_v20, %v2721_v32  ;;  %v3150_v43 = vmax.f32 %v2722_v29, %v2723_v33  ;;  %v2724_v44 = vmax.f32 %v2332_v34, 0.0  ;;  %v2726_v45 = vmax.f32 %v2334_v35, 0.0  ;;  %v912_v46 = vpop.f32.mrf.mxu0  ;;  %v1435_v47 = vpop.f32.mrf.mxu1  ;;  %1681 = vmatprep.mubr.bf16.mxu1 %v4613_v14 }
 0x135   : > { %4491 = vst [vmem:[%s4875_s24 + $0x48] sm:$0xff] %v4286_v38   ;;  %v2725_v48 = vmax.f32 %v2333_v39, 0.0  ;;  %v2727_v49 = vmax.f32 %v2335_v40, 0.0  ;;  %v2336_v55 = vadd.f32 %v4820_v52, %v1922_v41  ;;  %v1924_v56 = vmul.f32 %v4818_v51, %v1433_v37 }
 0x136   : > { %v3248_v59 = vmax.f32 %v3052_v42, %v3150_v43  ;;  %v1923_v60 = vmul.f32 %v4822_v53, %v912_v46  ;;  %v1925_v62 = vmul.f32 %v4824_v54, %v1435_v47  ;;  %v914_v63 = vpop.f32.mrf.mxu0  ;;  %v1437_v0 = vpop.f32.mrf.mxu1  ;;  %v4593_v42 = vld [vmem:[%s4687_s16 + $0x128] sm:$0xff]  }
 0x137   : > { %v3053_v2 = vmax.f32 %v2724_v44, %v2725_v48  ;;  %v3151_v3 = vmax.f32 %v2726_v45, %v2727_v49  ;;  %v2728_v4 = vmax.f32 %v2336_v55, 0.0  ;;  %v2338_v5 = vadd.f32 %v4827_v57, %v1924_v56 }
 0x138   : > { %v2337_v6 = vadd.f32 %v4830_v58, %v1923_v60  ;;  %v2339_v7 = vadd.f32 %v4834_v61, %v1925_v62  ;;  %v1926_v8 = vmul.f32 %v4816_v50, %v914_v63  ;;  %v1928_v9 = vmul.f32 %v4818_v51, %v1437_v0  ;;  %v916_v10 = vpop.f32.mrf.mxu0  ;;  %v1439_v11 = vpop.f32.mrf.mxu1 }
 0x139   : > { %v3249_v12 = vmax.f32 %v3053_v2, %v3151_v3  ;;  %v2730_v13 = vmax.f32 %v2338_v5, 0.0  ;;  %v1927_v15 = vmul.f32 %v4822_v53, %v916_v10  ;;  %v1929_v16 = vmul.f32 %v4824_v54, %v1439_v11 }
 0x13a   : > { %v2729_v17 = vmax.f32 %v2337_v6, 0.0  ;;  %v2731_v18 = vmax.f32 %v2339_v7, 0.0  ;;  %v2340_v19 = vadd.f32 %v4820_v52, %v1926_v8  ;;  %v2342_v20 = vadd.f32 %v4827_v57, %v1928_v9  ;;  %v920_v21 = vpop.f32.mrf.mxu0  ;;  %3977 = vmatmul.mubr.msk.bf16.gmra.mxu0 %vm605_vm1, %v4592_v1  ;;  %v1443_v22 = vpop.f32.mrf.mxu1  ;;  %4027 = vmatmul.mubr.msk.bf16.gmra.mxu1 %vm605_vm1, %v4592_v1 }
 0x13b   : > { %v4291_v23 = vpack.c.bf16 %v3249_v12, %v3248_v59  ;;  %v2341_v24 = vadd.f32 %v4830_v58, %v1927_v15  ;;  %v2343_v25 = vadd.f32 %v4834_v61, %v1929_v16  ;;  %v1930_v26 = vmul.f32 %v4816_v50, %v920_v21  ;;  %1168 = vmatprep.mubr.bf16.mxu0 %v4613_v14 }
 0x13c   : > { %v3054_v27 = vmax.f32 %v2728_v4, %v2729_v17  ;;  %v3152_v28 = vmax.f32 %v2730_v13, %v2731_v18  ;;  %v2732_v29 = vmax.f32 %v2340_v19, 0.0  ;;  %v2734_v30 = vmax.f32 %v2342_v20, 0.0  ;;  %v922_v31 = vpop.f32.mrf.mxu0  ;;  %v1445_v32 = vpop.f32.mrf.mxu1  ;;  %1691 = vmatprep.mubr.bf16.mxu1 %v4613_v14 }
 0x13d   : > { %4492 = vst [vmem:[%s4875_s24 + $0x50] sm:$0xff] %v4291_v23   ;;  %v2733_v33 = vmax.f32 %v2341_v24, 0.0  ;;  %v2735_v34 = vmax.f32 %v2343_v25, 0.0  ;;  %v2344_v35 = vadd.f32 %v4820_v52, %v1930_v26  ;;  %v1932_v36 = vmul.f32 %v4818_v51, %v1443_v22 }
 0x13e   : > { %v3250_v37 = vmax.f32 %v3054_v27, %v3152_v28  ;;  %v1931_v38 = vmul.f32 %v4822_v53, %v922_v31  ;;  %v1933_v39 = vmul.f32 %v4824_v54, %v1445_v32  ;;  %v924_v40 = vpop.f32.mrf.mxu0  ;;  %v1447_v41 = vpop.f32.mrf.mxu1  ;;  %v4594_v27 = vld [vmem:[%s4687_s16 + $0x130] sm:$0xff]  }
 0x13f   : > { %v3055_v43 = vmax.f32 %v2732_v29, %v2733_v33  ;;  %v3153_v44 = vmax.f32 %v2734_v30, %v2735_v34  ;;  %v2736_v45 = vmax.f32 %v2344_v35, 0.0  ;;  %v2346_v46 = vadd.f32 %v4827_v57, %v1932_v36 }
 0x140   : > { %v2345_v47 = vadd.f32 %v4830_v58, %v1931_v38  ;;  %v2347_v48 = vadd.f32 %v4834_v61, %v1933_v39  ;;  %v1934_v49 = vmul.f32 %v4816_v50, %v924_v40  ;;  %v1936_v55 = vmul.f32 %v4818_v51, %v1447_v41  ;;  %v926_v56 = vpop.f32.mrf.mxu0  ;;  %v1449_v59 = vpop.f32.mrf.mxu1 }
 0x141   : > { %v3251_v60 = vmax.f32 %v3055_v43, %v3153_v44  ;;  %v2738_v62 = vmax.f32 %v2346_v46, 0.0  ;;  %v1935_v63 = vmul.f32 %v4822_v53, %v926_v56  ;;  %v1937_v0 = vmul.f32 %v4824_v54, %v1449_v59 }
 0x142   : > { %v2737_v1 = vmax.f32 %v2345_v47, 0.0  ;;  %v2739_v2 = vmax.f32 %v2347_v48, 0.0  ;;  %v2348_v3 = vadd.f32 %v4820_v52, %v1934_v49  ;;  %v2350_v4 = vadd.f32 %v4827_v57, %v1936_v55  ;;  %v930_v5 = vpop.f32.mrf.mxu0  ;;  %3978 = vmatmul.mubr.msk.bf16.gmra.mxu0 %vm605_vm1, %v4593_v42  ;;  %v1453_v6 = vpop.f32.mrf.mxu1  ;;  %4028 = vmatmul.mubr.msk.bf16.gmra.mxu1 %vm605_vm1, %v4593_v42 }
 0x143   : > { %v4296_v7 = vpack.c.bf16 %v3251_v60, %v3250_v37  ;;  %v2349_v8 = vadd.f32 %v4830_v58, %v1935_v63  ;;  %v2351_v9 = vadd.f32 %v4834_v61, %v1937_v0  ;;  %v1938_v10 = vmul.f32 %v4816_v50, %v930_v5  ;;  %1178 = vmatprep.mubr.bf16.mxu0 %v4613_v14 }
 0x144   : > { %v3056_v11 = vmax.f32 %v2736_v45, %v2737_v1  ;;  %v3154_v12 = vmax.f32 %v2738_v62, %v2739_v2  ;;  %v2740_v13 = vmax.f32 %v2348_v3, 0.0  ;;  %v2742_v15 = vmax.f32 %v2350_v4, 0.0  ;;  %v932_v16 = vpop.f32.mrf.mxu0  ;;  %v1455_v17 = vpop.f32.mrf.mxu1  ;;  %1701 = vmatprep.mubr.bf16.mxu1 %v4613_v14 }
 0x145   : > { %4493 = vst [vmem:[%s4875_s24 + $0x58] sm:$0xff] %v4296_v7   ;;  %v2741_v18 = vmax.f32 %v2349_v8, 0.0  ;;  %v2743_v19 = vmax.f32 %v2351_v9, 0.0  ;;  %v2352_v20 = vadd.f32 %v4820_v52, %v1938_v10  ;;  %v1940_v21 = vmul.f32 %v4818_v51, %v1453_v6 }
 0x146   : > { %v3252_v22 = vmax.f32 %v3056_v11, %v3154_v12  ;;  %v1939_v23 = vmul.f32 %v4822_v53, %v932_v16  ;;  %v1941_v24 = vmul.f32 %v4824_v54, %v1455_v17  ;;  %v934_v25 = vpop.f32.mrf.mxu0  ;;  %v1457_v26 = vpop.f32.mrf.mxu1  ;;  %v4595_v11 = vld [vmem:[%s4687_s16 + $0x138] sm:$0xff]  }
 0x147   : > { %v3057_v28 = vmax.f32 %v2740_v13, %v2741_v18  ;;  %v3155_v29 = vmax.f32 %v2742_v15, %v2743_v19  ;;  %v2744_v30 = vmax.f32 %v2352_v20, 0.0  ;;  %v2354_v31 = vadd.f32 %v4827_v57, %v1940_v21 }
 0x148   : > { %v2353_v32 = vadd.f32 %v4830_v58, %v1939_v23  ;;  %v2355_v33 = vadd.f32 %v4834_v61, %v1941_v24  ;;  %v1942_v34 = vmul.f32 %v4816_v50, %v934_v25  ;;  %v1944_v35 = vmul.f32 %v4818_v51, %v1457_v26  ;;  %v936_v36 = vpop.f32.mrf.mxu0  ;;  %v1459_v37 = vpop.f32.mrf.mxu1 }
 0x149   : > { %v3253_v38 = vmax.f32 %v3057_v28, %v3155_v29  ;;  %v2746_v39 = vmax.f32 %v2354_v31, 0.0  ;;  %v1943_v40 = vmul.f32 %v4822_v53, %v936_v36  ;;  %v1945_v41 = vmul.f32 %v4824_v54, %v1459_v37 }
 0x14a   : > { %v2745_v42 = vmax.f32 %v2353_v32, 0.0  ;;  %v2747_v43 = vmax.f32 %v2355_v33, 0.0  ;;  %v2356_v44 = vadd.f32 %v4820_v52, %v1942_v34  ;;  %v2358_v45 = vadd.f32 %v4827_v57, %v1944_v35  ;;  %v940_v46 = vpop.f32.mrf.mxu0  ;;  %3979 = vmatmul.mubr.msk.bf16.gmra.mxu0 %vm605_vm1, %v4594_v27  ;;  %v1463_v47 = vpop.f32.mrf.mxu1  ;;  %4029 = vmatmul.mubr.msk.bf16.gmra.mxu1 %vm605_vm1, %v4594_v27 }
 0x14b   : > { %v4301_v48 = vpack.c.bf16 %v3253_v38, %v3252_v22  ;;  %v2357_v49 = vadd.f32 %v4830_v58, %v1943_v40  ;;  %v2359_v55 = vadd.f32 %v4834_v61, %v1945_v41  ;;  %v1946_v56 = vmul.f32 %v4816_v50, %v940_v46  ;;  %1188 = vmatprep.mubr.bf16.mxu0 %v4613_v14 }
 0x14c   : > { %v3058_v59 = vmax.f32 %v2744_v30, %v2745_v42  ;;  %v3156_v60 = vmax.f32 %v2746_v39, %v2747_v43  ;;  %v2748_v62 = vmax.f32 %v2356_v44, 0.0  ;;  %v2750_v63 = vmax.f32 %v2358_v45, 0.0  ;;  %v942_v0 = vpop.f32.mrf.mxu0  ;;  %v1465_v1 = vpop.f32.mrf.mxu1  ;;  %1711 = vmatprep.mubr.bf16.mxu1 %v4613_v14 }
 0x14d   : > { %4494 = vst [vmem:[%s4875_s24 + $0x60] sm:$0xff] %v4301_v48   ;;  %v2749_v2 = vmax.f32 %v2357_v49, 0.0  ;;  %v2751_v3 = vmax.f32 %v2359_v55, 0.0  ;;  %v2360_v4 = vadd.f32 %v4820_v52, %v1946_v56  ;;  %v1948_v5 = vmul.f32 %v4818_v51, %v1463_v47 }
 0x14e   : > { %v3254_v6 = vmax.f32 %v3058_v59, %v3156_v60  ;;  %v1947_v7 = vmul.f32 %v4822_v53, %v942_v0  ;;  %v1949_v8 = vmul.f32 %v4824_v54, %v1465_v1  ;;  %v944_v9 = vpop.f32.mrf.mxu0  ;;  %v1467_v10 = vpop.f32.mrf.mxu1  ;;  %v4596_v59 = vld [vmem:[%s4687_s16 + $0x140] sm:$0xff]  }
 0x14f   : > { %v3059_v12 = vmax.f32 %v2748_v62, %v2749_v2  ;;  %v3157_v13 = vmax.f32 %v2750_v63, %v2751_v3  ;;  %v2752_v15 = vmax.f32 %v2360_v4, 0.0  ;;  %v2362_v16 = vadd.f32 %v4827_v57, %v1948_v5 }
 0x150   : > { %v2361_v17 = vadd.f32 %v4830_v58, %v1947_v7  ;;  %v2363_v18 = vadd.f32 %v4834_v61, %v1949_v8  ;;  %v1950_v19 = vmul.f32 %v4816_v50, %v944_v9  ;;  %v1952_v20 = vmul.f32 %v4818_v51, %v1467_v10  ;;  %v946_v21 = vpop.f32.mrf.mxu0  ;;  %v1469_v22 = vpop.f32.mrf.mxu1 }
 0x151   : > { %v3255_v23 = vmax.f32 %v3059_v12, %v3157_v13  ;;  %v2754_v24 = vmax.f32 %v2362_v16, 0.0  ;;  %v1951_v25 = vmul.f32 %v4822_v53, %v946_v21  ;;  %v1953_v26 = vmul.f32 %v4824_v54, %v1469_v22 }
 0x152   : > { %v2753_v27 = vmax.f32 %v2361_v17, 0.0  ;;  %v2755_v28 = vmax.f32 %v2363_v18, 0.0  ;;  %v2364_v29 = vadd.f32 %v4820_v52, %v1950_v19  ;;  %v2366_v30 = vadd.f32 %v4827_v57, %v1952_v20  ;;  %v950_v31 = vpop.f32.mrf.mxu0  ;;  %3980 = vmatmul.mubr.msk.bf16.gmra.mxu0 %vm605_vm1, %v4595_v11  ;;  %v1473_v32 = vpop.f32.mrf.mxu1  ;;  %4030 = vmatmul.mubr.msk.bf16.gmra.mxu1 %vm605_vm1, %v4595_v11 }
 0x153   : > { %v4306_v33 = vpack.c.bf16 %v3255_v23, %v3254_v6  ;;  %v2365_v34 = vadd.f32 %v4830_v58, %v1951_v25  ;;  %v2367_v35 = vadd.f32 %v4834_v61, %v1953_v26  ;;  %v1954_v36 = vmul.f32 %v4816_v50, %v950_v31  ;;  %1198 = vmatprep.mubr.bf16.mxu0 %v4613_v14 }
 0x154   : > { %v3060_v37 = vmax.f32 %v2752_v15, %v2753_v27  ;;  %v3158_v38 = vmax.f32 %v2754_v24, %v2755_v28  ;;  %v2756_v39 = vmax.f32 %v2364_v29, 0.0  ;;  %v2758_v40 = vmax.f32 %v2366_v30, 0.0  ;;  %v952_v41 = vpop.f32.mrf.mxu0  ;;  %v1475_v42 = vpop.f32.mrf.mxu1  ;;  %1721 = vmatprep.mubr.bf16.mxu1 %v4613_v14 }
 0x155   : > { %4495 = vst [vmem:[%s4875_s24 + $0x68] sm:$0xff] %v4306_v33   ;;  %v2757_v43 = vmax.f32 %v2365_v34, 0.0  ;;  %v2759_v44 = vmax.f32 %v2367_v35, 0.0  ;;  %v2368_v45 = vadd.f32 %v4820_v52, %v1954_v36  ;;  %v1956_v46 = vmul.f32 %v4818_v51, %v1473_v32 }
 0x156   : > { %v3256_v47 = vmax.f32 %v3060_v37, %v3158_v38  ;;  %v1955_v48 = vmul.f32 %v4822_v53, %v952_v41  ;;  %v1957_v49 = vmul.f32 %v4824_v54, %v1475_v42  ;;  %v954_v55 = vpop.f32.mrf.mxu0  ;;  %v1477_v56 = vpop.f32.mrf.mxu1  ;;  %v4597_v37 = vld [vmem:[%s4687_s16 + $0x148] sm:$0xff]  }
 0x157   : > { %v3061_v60 = vmax.f32 %v2756_v39, %v2757_v43  ;;  %v3159_v62 = vmax.f32 %v2758_v40, %v2759_v44  ;;  %v2760_v63 = vmax.f32 %v2368_v45, 0.0  ;;  %v2370_v0 = vadd.f32 %v4827_v57, %v1956_v46 }
 0x158   : > { %v2369_v1 = vadd.f32 %v4830_v58, %v1955_v48  ;;  %v2371_v2 = vadd.f32 %v4834_v61, %v1957_v49  ;;  %v1958_v3 = vmul.f32 %v4816_v50, %v954_v55  ;;  %v1960_v4 = vmul.f32 %v4818_v51, %v1477_v56  ;;  %v956_v5 = vpop.f32.mrf.mxu0  ;;  %v1479_v6 = vpop.f32.mrf.mxu1 }
 0x159   : > { %v3257_v7 = vmax.f32 %v3061_v60, %v3159_v62  ;;  %v2762_v8 = vmax.f32 %v2370_v0, 0.0  ;;  %v1959_v9 = vmul.f32 %v4822_v53, %v956_v5  ;;  %v1961_v10 = vmul.f32 %v4824_v54, %v1479_v6 }
 0x15a   : > { %v2761_v11 = vmax.f32 %v2369_v1, 0.0  ;;  %v2763_v12 = vmax.f32 %v2371_v2, 0.0  ;;  %v2372_v13 = vadd.f32 %v4820_v52, %v1958_v3  ;;  %v2374_v15 = vadd.f32 %v4827_v57, %v1960_v4  ;;  %v960_v16 = vpop.f32.mrf.mxu0  ;;  %3981 = vmatmul.mubr.msk.bf16.gmra.mxu0 %vm605_vm1, %v4596_v59  ;;  %v1483_v17 = vpop.f32.mrf.mxu1  ;;  %4031 = vmatmul.mubr.msk.bf16.gmra.mxu1 %vm605_vm1, %v4596_v59 }
 0x15b   : > { %v4311_v18 = vpack.c.bf16 %v3257_v7, %v3256_v47  ;;  %v2373_v19 = vadd.f32 %v4830_v58, %v1959_v9  ;;  %v2375_v20 = vadd.f32 %v4834_v61, %v1961_v10  ;;  %v1962_v21 = vmul.f32 %v4816_v50, %v960_v16  ;;  %1208 = vmatprep.mubr.bf16.mxu0 %v4613_v14 }
 0x15c   : > { %v3062_v22 = vmax.f32 %v2760_v63, %v2761_v11  ;;  %v3160_v23 = vmax.f32 %v2762_v8, %v2763_v12  ;;  %v2764_v24 = vmax.f32 %v2372_v13, 0.0  ;;  %v2766_v25 = vmax.f32 %v2374_v15, 0.0  ;;  %v962_v26 = vpop.f32.mrf.mxu0  ;;  %v1485_v27 = vpop.f32.mrf.mxu1  ;;  %1731 = vmatprep.mubr.bf16.mxu1 %v4613_v14 }
 0x15d   : > { %4496 = vst [vmem:[%s4875_s24 + $0x70] sm:$0xff] %v4311_v18   ;;  %v2765_v28 = vmax.f32 %v2373_v19, 0.0  ;;  %v2767_v29 = vmax.f32 %v2375_v20, 0.0  ;;  %v2376_v30 = vadd.f32 %v4820_v52, %v1962_v21  ;;  %v1964_v31 = vmul.f32 %v4818_v51, %v1483_v17 }
 0x15e   : > { %v3258_v32 = vmax.f32 %v3062_v22, %v3160_v23  ;;  %v1963_v33 = vmul.f32 %v4822_v53, %v962_v26  ;;  %v1965_v34 = vmul.f32 %v4824_v54, %v1485_v27  ;;  %v964_v35 = vpop.f32.mrf.mxu0  ;;  %v1487_v36 = vpop.f32.mrf.mxu1  ;;  %v4598_v22 = vld [vmem:[%s4687_s16 + $0x150] sm:$0xff]  }
 0x15f   : > { %v3063_v38 = vmax.f32 %v2764_v24, %v2765_v28  ;;  %v3161_v39 = vmax.f32 %v2766_v25, %v2767_v29  ;;  %v2768_v40 = vmax.f32 %v2376_v30, 0.0  ;;  %v2378_v41 = vadd.f32 %v4827_v57, %v1964_v31 }
 0x160   : > { %v2377_v42 = vadd.f32 %v4830_v58, %v1963_v33  ;;  %v2379_v43 = vadd.f32 %v4834_v61, %v1965_v34  ;;  %v1966_v44 = vmul.f32 %v4816_v50, %v964_v35  ;;  %v1968_v45 = vmul.f32 %v4818_v51, %v1487_v36  ;;  %v966_v46 = vpop.f32.mrf.mxu0  ;;  %v1489_v47 = vpop.f32.mrf.mxu1 }
 0x161   : > { %v3259_v48 = vmax.f32 %v3063_v38, %v3161_v39  ;;  %v2770_v49 = vmax.f32 %v2378_v41, 0.0  ;;  %v1967_v55 = vmul.f32 %v4822_v53, %v966_v46  ;;  %v1969_v56 = vmul.f32 %v4824_v54, %v1489_v47 }
 0x162   : > { %v2769_v59 = vmax.f32 %v2377_v42, 0.0  ;;  %v2771_v60 = vmax.f32 %v2379_v43, 0.0  ;;  %v2380_v62 = vadd.f32 %v4820_v52, %v1966_v44  ;;  %v2382_v63 = vadd.f32 %v4827_v57, %v1968_v45  ;;  %v970_v0 = vpop.f32.mrf.mxu0  ;;  %3982 = vmatmul.mubr.msk.bf16.gmra.mxu0 %vm605_vm1, %v4597_v37  ;;  %v1493_v1 = vpop.f32.mrf.mxu1  ;;  %4032 = vmatmul.mubr.msk.bf16.gmra.mxu1 %vm605_vm1, %v4597_v37 }
 0x163   : > { %v4316_v2 = vpack.c.bf16 %v3259_v48, %v3258_v32  ;;  %v2381_v3 = vadd.f32 %v4830_v58, %v1967_v55  ;;  %v2383_v4 = vadd.f32 %v4834_v61, %v1969_v56  ;;  %v1970_v5 = vmul.f32 %v4816_v50, %v970_v0  ;;  %1218 = vmatprep.mubr.bf16.mxu0 %v4613_v14 }
 0x164   : > { %v3064_v6 = vmax.f32 %v2768_v40, %v2769_v59  ;;  %v3162_v7 = vmax.f32 %v2770_v49, %v2771_v60  ;;  %v2772_v8 = vmax.f32 %v2380_v62, 0.0  ;;  %v2774_v9 = vmax.f32 %v2382_v63, 0.0  ;;  %v972_v10 = vpop.f32.mrf.mxu0  ;;  %v1495_v11 = vpop.f32.mrf.mxu1  ;;  %1741 = vmatprep.mubr.bf16.mxu1 %v4613_v14 }
 0x165   : > { %4497 = vst [vmem:[%s4875_s24 + $0x78] sm:$0xff] %v4316_v2   ;;  %v2773_v12 = vmax.f32 %v2381_v3, 0.0  ;;  %v2775_v13 = vmax.f32 %v2383_v4, 0.0  ;;  %v2384_v15 = vadd.f32 %v4820_v52, %v1970_v5  ;;  %v1972_v16 = vmul.f32 %v4818_v51, %v1493_v1 }
 0x166   : > { %v3260_v17 = vmax.f32 %v3064_v6, %v3162_v7  ;;  %v1971_v18 = vmul.f32 %v4822_v53, %v972_v10  ;;  %v1973_v19 = vmul.f32 %v4824_v54, %v1495_v11  ;;  %v974_v20 = vpop.f32.mrf.mxu0  ;;  %v1497_v21 = vpop.f32.mrf.mxu1  ;;  %v4599_v6 = vld [vmem:[%s4687_s16 + $0x158] sm:$0xff]  }
 0x167   : > { %v3065_v23 = vmax.f32 %v2772_v8, %v2773_v12  ;;  %v3163_v24 = vmax.f32 %v2774_v9, %v2775_v13  ;;  %v2776_v25 = vmax.f32 %v2384_v15, 0.0  ;;  %v2386_v26 = vadd.f32 %v4827_v57, %v1972_v16 }
 0x168   : > { %v2385_v27 = vadd.f32 %v4830_v58, %v1971_v18  ;;  %v2387_v28 = vadd.f32 %v4834_v61, %v1973_v19  ;;  %v1974_v29 = vmul.f32 %v4816_v50, %v974_v20  ;;  %v1976_v30 = vmul.f32 %v4818_v51, %v1497_v21  ;;  %v976_v31 = vpop.f32.mrf.mxu0  ;;  %v1499_v32 = vpop.f32.mrf.mxu1 }
 0x169   : > { %v3261_v33 = vmax.f32 %v3065_v23, %v3163_v24  ;;  %v2778_v34 = vmax.f32 %v2386_v26, 0.0  ;;  %v1975_v35 = vmul.f32 %v4822_v53, %v976_v31  ;;  %v1977_v36 = vmul.f32 %v4824_v54, %v1499_v32 }
 0x16a   : > { %v2777_v37 = vmax.f32 %v2385_v27, 0.0  ;;  %v2779_v38 = vmax.f32 %v2387_v28, 0.0  ;;  %v2388_v39 = vadd.f32 %v4820_v52, %v1974_v29  ;;  %v2390_v40 = vadd.f32 %v4827_v57, %v1976_v30  ;;  %v980_v41 = vpop.f32.mrf.mxu0  ;;  %3983 = vmatmul.mubr.msk.bf16.gmra.mxu0 %vm605_vm1, %v4598_v22  ;;  %v1503_v42 = vpop.f32.mrf.mxu1  ;;  %4033 = vmatmul.mubr.msk.bf16.gmra.mxu1 %vm605_vm1, %v4598_v22 }
 0x16b   : > { %v4321_v43 = vpack.c.bf16 %v3261_v33, %v3260_v17  ;;  %v2389_v44 = vadd.f32 %v4830_v58, %v1975_v35  ;;  %v2391_v45 = vadd.f32 %v4834_v61, %v1977_v36  ;;  %v1978_v46 = vmul.f32 %v4816_v50, %v980_v41  ;;  %1228 = vmatprep.mubr.bf16.mxu0 %v4613_v14 }
 0x16c   : > { %v3066_v47 = vmax.f32 %v2776_v25, %v2777_v37  ;;  %v3164_v48 = vmax.f32 %v2778_v34, %v2779_v38  ;;  %v2780_v49 = vmax.f32 %v2388_v39, 0.0  ;;  %v2782_v55 = vmax.f32 %v2390_v40, 0.0  ;;  %v982_v56 = vpop.f32.mrf.mxu0  ;;  %v1505_v59 = vpop.f32.mrf.mxu1  ;;  %1751 = vmatprep.mubr.bf16.mxu1 %v4613_v14 }
 0x16d   : > { %4498 = vst [vmem:[%s4875_s24 + $0x80] sm:$0xff] %v4321_v43   ;;  %v2781_v60 = vmax.f32 %v2389_v44, 0.0  ;;  %v2783_v62 = vmax.f32 %v2391_v45, 0.0  ;;  %v2392_v63 = vadd.f32 %v4820_v52, %v1978_v46  ;;  %v1980_v0 = vmul.f32 %v4818_v51, %v1503_v42 }
 0x16e   : > { %v3262_v1 = vmax.f32 %v3066_v47, %v3164_v48  ;;  %v1979_v2 = vmul.f32 %v4822_v53, %v982_v56  ;;  %v1981_v3 = vmul.f32 %v4824_v54, %v1505_v59  ;;  %v984_v4 = vpop.f32.mrf.mxu0  ;;  %v1507_v5 = vpop.f32.mrf.mxu1  ;;  %v4600_v47 = vld [vmem:[%s4687_s16 + $0x160] sm:$0xff]  }
 0x16f   : > { %v3067_v7 = vmax.f32 %v2780_v49, %v2781_v60  ;;  %v3165_v8 = vmax.f32 %v2782_v55, %v2783_v62  ;;  %v2784_v9 = vmax.f32 %v2392_v63, 0.0  ;;  %v2394_v10 = vadd.f32 %v4827_v57, %v1980_v0 }
 0x170   : > { %v2393_v11 = vadd.f32 %v4830_v58, %v1979_v2  ;;  %v2395_v12 = vadd.f32 %v4834_v61, %v1981_v3  ;;  %v1982_v13 = vmul.f32 %v4816_v50, %v984_v4  ;;  %v1984_v15 = vmul.f32 %v4818_v51, %v1507_v5  ;;  %v986_v16 = vpop.f32.mrf.mxu0  ;;  %v1509_v17 = vpop.f32.mrf.mxu1 }
 0x171   : > { %v3263_v18 = vmax.f32 %v3067_v7, %v3165_v8  ;;  %v2786_v19 = vmax.f32 %v2394_v10, 0.0  ;;  %v1983_v20 = vmul.f32 %v4822_v53, %v986_v16  ;;  %v1985_v21 = vmul.f32 %v4824_v54, %v1509_v17 }
 0x172   : > { %v2785_v22 = vmax.f32 %v2393_v11, 0.0  ;;  %v2787_v23 = vmax.f32 %v2395_v12, 0.0  ;;  %v2396_v24 = vadd.f32 %v4820_v52, %v1982_v13  ;;  %v2398_v25 = vadd.f32 %v4827_v57, %v1984_v15  ;;  %v990_v26 = vpop.f32.mrf.mxu0  ;;  %3984 = vmatmul.mubr.msk.bf16.gmra.mxu0 %vm605_vm1, %v4599_v6  ;;  %v1513_v27 = vpop.f32.mrf.mxu1  ;;  %4034 = vmatmul.mubr.msk.bf16.gmra.mxu1 %vm605_vm1, %v4599_v6 }
 0x173   : > { %v4326_v28 = vpack.c.bf16 %v3263_v18, %v3262_v1  ;;  %v2397_v29 = vadd.f32 %v4830_v58, %v1983_v20  ;;  %v2399_v30 = vadd.f32 %v4834_v61, %v1985_v21  ;;  %v1986_v31 = vmul.f32 %v4816_v50, %v990_v26  ;;  %1238 = vmatprep.mubr.bf16.mxu0 %v4613_v14 }
 0x174   : > { %v3068_v32 = vmax.f32 %v2784_v9, %v2785_v22  ;;  %v3166_v33 = vmax.f32 %v2786_v19, %v2787_v23  ;;  %v2788_v34 = vmax.f32 %v2396_v24, 0.0  ;;  %v2790_v35 = vmax.f32 %v2398_v25, 0.0  ;;  %v992_v36 = vpop.f32.mrf.mxu0  ;;  %v1515_v37 = vpop.f32.mrf.mxu1  ;;  %1761 = vmatprep.mubr.bf16.mxu1 %v4613_v14 }
 0x175   : > { %4499 = vst [vmem:[%s4875_s24 + $0x88] sm:$0xff] %v4326_v28   ;;  %v2789_v38 = vmax.f32 %v2397_v29, 0.0  ;;  %v2791_v39 = vmax.f32 %v2399_v30, 0.0  ;;  %v2400_v40 = vadd.f32 %v4820_v52, %v1986_v31  ;;  %v1988_v41 = vmul.f32 %v4818_v51, %v1513_v27 }
 0x176   : > { %v3264_v42 = vmax.f32 %v3068_v32, %v3166_v33  ;;  %v1987_v43 = vmul.f32 %v4822_v53, %v992_v36  ;;  %v1989_v44 = vmul.f32 %v4824_v54, %v1515_v37  ;;  %v994_v45 = vpop.f32.mrf.mxu0  ;;  %v1517_v46 = vpop.f32.mrf.mxu1  ;;  %v4601_v32 = vld [vmem:[%s4687_s16 + $0x168] sm:$0xff]  }
 0x177   : > { %v3069_v48 = vmax.f32 %v2788_v34, %v2789_v38  ;;  %v3167_v49 = vmax.f32 %v2790_v35, %v2791_v39  ;;  %v2792_v55 = vmax.f32 %v2400_v40, 0.0  ;;  %v2402_v56 = vadd.f32 %v4827_v57, %v1988_v41 }
 0x178   : > { %v2401_v59 = vadd.f32 %v4830_v58, %v1987_v43  ;;  %v2403_v60 = vadd.f32 %v4834_v61, %v1989_v44  ;;  %v1990_v62 = vmul.f32 %v4816_v50, %v994_v45  ;;  %v1992_v63 = vmul.f32 %v4818_v51, %v1517_v46  ;;  %v996_v0 = vpop.f32.mrf.mxu0  ;;  %v1519_v1 = vpop.f32.mrf.mxu1 }
 0x179   : > { %v3265_v2 = vmax.f32 %v3069_v48, %v3167_v49  ;;  %v2794_v3 = vmax.f32 %v2402_v56, 0.0  ;;  %v1991_v4 = vmul.f32 %v4822_v53, %v996_v0  ;;  %v1993_v5 = vmul.f32 %v4824_v54, %v1519_v1 }
 0x17a   : > { %v2793_v6 = vmax.f32 %v2401_v59, 0.0  ;;  %v2795_v7 = vmax.f32 %v2403_v60, 0.0  ;;  %v2404_v8 = vadd.f32 %v4820_v52, %v1990_v62  ;;  %v2406_v9 = vadd.f32 %v4827_v57, %v1992_v63  ;;  %v1000_v10 = vpop.f32.mrf.mxu0  ;;  %3985 = vmatmul.mubr.msk.bf16.gmra.mxu0 %vm605_vm1, %v4600_v47  ;;  %v1523_v11 = vpop.f32.mrf.mxu1  ;;  %4035 = vmatmul.mubr.msk.bf16.gmra.mxu1 %vm605_vm1, %v4600_v47 }
 0x17b   : > { %v4331_v12 = vpack.c.bf16 %v3265_v2, %v3264_v42  ;;  %v2405_v13 = vadd.f32 %v4830_v58, %v1991_v4  ;;  %v2407_v15 = vadd.f32 %v4834_v61, %v1993_v5  ;;  %v1994_v16 = vmul.f32 %v4816_v50, %v1000_v10  ;;  %1248 = vmatprep.mubr.bf16.mxu0 %v4613_v14 }
 0x17c   : > { %v3070_v17 = vmax.f32 %v2792_v55, %v2793_v6  ;;  %v3168_v18 = vmax.f32 %v2794_v3, %v2795_v7  ;;  %v2796_v19 = vmax.f32 %v2404_v8, 0.0  ;;  %v2798_v20 = vmax.f32 %v2406_v9, 0.0  ;;  %v1002_v21 = vpop.f32.mrf.mxu0  ;;  %v1525_v22 = vpop.f32.mrf.mxu1  ;;  %1771 = vmatprep.mubr.bf16.mxu1 %v4613_v14 }
 0x17d   : > { %4500 = vst [vmem:[%s4875_s24 + $0x90] sm:$0xff] %v4331_v12   ;;  %v2797_v23 = vmax.f32 %v2405_v13, 0.0  ;;  %v2799_v24 = vmax.f32 %v2407_v15, 0.0  ;;  %v2408_v25 = vadd.f32 %v4820_v52, %v1994_v16  ;;  %v1996_v26 = vmul.f32 %v4818_v51, %v1523_v11 }
 0x17e   : > { %v3266_v27 = vmax.f32 %v3070_v17, %v3168_v18  ;;  %v1995_v28 = vmul.f32 %v4822_v53, %v1002_v21  ;;  %v1997_v29 = vmul.f32 %v4824_v54, %v1525_v22  ;;  %v1004_v30 = vpop.f32.mrf.mxu0  ;;  %v1527_v31 = vpop.f32.mrf.mxu1  ;;  %v4602_v17 = vld [vmem:[%s4687_s16 + $0x170] sm:$0xff]  }
 0x17f   : > { %v3071_v33 = vmax.f32 %v2796_v19, %v2797_v23  ;;  %v3169_v34 = vmax.f32 %v2798_v20, %v2799_v24  ;;  %v2800_v35 = vmax.f32 %v2408_v25, 0.0  ;;  %v2410_v36 = vadd.f32 %v4827_v57, %v1996_v26 }
 0x180   : > { %v2409_v37 = vadd.f32 %v4830_v58, %v1995_v28  ;;  %v2411_v38 = vadd.f32 %v4834_v61, %v1997_v29  ;;  %v1998_v39 = vmul.f32 %v4816_v50, %v1004_v30  ;;  %v2000_v40 = vmul.f32 %v4818_v51, %v1527_v31  ;;  %v1006_v41 = vpop.f32.mrf.mxu0  ;;  %v1529_v42 = vpop.f32.mrf.mxu1 }
 0x181   : > { %v3267_v43 = vmax.f32 %v3071_v33, %v3169_v34  ;;  %v2802_v44 = vmax.f32 %v2410_v36, 0.0  ;;  %v1999_v45 = vmul.f32 %v4822_v53, %v1006_v41  ;;  %v2001_v46 = vmul.f32 %v4824_v54, %v1529_v42 }
 0x182   : > { %v2801_v47 = vmax.f32 %v2409_v37, 0.0  ;;  %v2803_v48 = vmax.f32 %v2411_v38, 0.0  ;;  %v2412_v49 = vadd.f32 %v4820_v52, %v1998_v39  ;;  %v2414_v55 = vadd.f32 %v4827_v57, %v2000_v40  ;;  %v1010_v56 = vpop.f32.mrf.mxu0  ;;  %3986 = vmatmul.mubr.msk.bf16.gmra.mxu0 %vm605_vm1, %v4601_v32  ;;  %v1533_v59 = vpop.f32.mrf.mxu1  ;;  %4036 = vmatmul.mubr.msk.bf16.gmra.mxu1 %vm605_vm1, %v4601_v32 }
 0x183   : > { %v4336_v60 = vpack.c.bf16 %v3267_v43, %v3266_v27  ;;  %v2413_v62 = vadd.f32 %v4830_v58, %v1999_v45  ;;  %v2415_v63 = vadd.f32 %v4834_v61, %v2001_v46  ;;  %v2002_v0 = vmul.f32 %v4816_v50, %v1010_v56  ;;  %1258 = vmatprep.mubr.bf16.mxu0 %v4613_v14 }
 0x184   : > { %v3072_v1 = vmax.f32 %v2800_v35, %v2801_v47  ;;  %v3170_v2 = vmax.f32 %v2802_v44, %v2803_v48  ;;  %v2804_v3 = vmax.f32 %v2412_v49, 0.0  ;;  %v2806_v4 = vmax.f32 %v2414_v55, 0.0  ;;  %v1012_v5 = vpop.f32.mrf.mxu0  ;;  %v1535_v6 = vpop.f32.mrf.mxu1  ;;  %1781 = vmatprep.mubr.bf16.mxu1 %v4613_v14 }
 0x185   : > { %4501 = vst [vmem:[%s4875_s24 + $0x98] sm:$0xff] %v4336_v60   ;;  %v2805_v7 = vmax.f32 %v2413_v62, 0.0  ;;  %v2807_v8 = vmax.f32 %v2415_v63, 0.0  ;;  %v2416_v9 = vadd.f32 %v4820_v52, %v2002_v0  ;;  %v2004_v10 = vmul.f32 %v4818_v51, %v1533_v59 }
 0x186   : > { %v3268_v11 = vmax.f32 %v3072_v1, %v3170_v2  ;;  %v2003_v12 = vmul.f32 %v4822_v53, %v1012_v5  ;;  %v2005_v13 = vmul.f32 %v4824_v54, %v1535_v6  ;;  %v1014_v15 = vpop.f32.mrf.mxu0  ;;  %v1537_v16 = vpop.f32.mrf.mxu1  ;;  %v4603_v1 = vld [vmem:[%s4687_s16 + $0x178] sm:$0xff]  }
 0x187   : > { %v3073_v18 = vmax.f32 %v2804_v3, %v2805_v7  ;;  %v3171_v19 = vmax.f32 %v2806_v4, %v2807_v8  ;;  %v2808_v20 = vmax.f32 %v2416_v9, 0.0  ;;  %v2418_v21 = vadd.f32 %v4827_v57, %v2004_v10 }
 0x188   : > { %v2417_v22 = vadd.f32 %v4830_v58, %v2003_v12  ;;  %v2419_v23 = vadd.f32 %v4834_v61, %v2005_v13  ;;  %v2006_v24 = vmul.f32 %v4816_v50, %v1014_v15  ;;  %v2008_v25 = vmul.f32 %v4818_v51, %v1537_v16  ;;  %v1016_v26 = vpop.f32.mrf.mxu0  ;;  %v1539_v27 = vpop.f32.mrf.mxu1 }
 0x189   : > { %v3269_v28 = vmax.f32 %v3073_v18, %v3171_v19  ;;  %v2810_v29 = vmax.f32 %v2418_v21, 0.0  ;;  %v2007_v30 = vmul.f32 %v4822_v53, %v1016_v26  ;;  %v2009_v31 = vmul.f32 %v4824_v54, %v1539_v27 }
 0x18a   : > { %v2809_v32 = vmax.f32 %v2417_v22, 0.0  ;;  %v2811_v33 = vmax.f32 %v2419_v23, 0.0  ;;  %v2420_v34 = vadd.f32 %v4820_v52, %v2006_v24  ;;  %v2422_v35 = vadd.f32 %v4827_v57, %v2008_v25  ;;  %v1020_v36 = vpop.f32.mrf.mxu0  ;;  %3987 = vmatmul.mubr.msk.bf16.gmra.mxu0 %vm605_vm1, %v4602_v17  ;;  %v1543_v37 = vpop.f32.mrf.mxu1  ;;  %4037 = vmatmul.mubr.msk.bf16.gmra.mxu1 %vm605_vm1, %v4602_v17 }
 0x18b   : > { %v4341_v38 = vpack.c.bf16 %v3269_v28, %v3268_v11  ;;  %v2421_v39 = vadd.f32 %v4830_v58, %v2007_v30  ;;  %v2423_v40 = vadd.f32 %v4834_v61, %v2009_v31  ;;  %v2010_v41 = vmul.f32 %v4816_v50, %v1020_v36  ;;  %1268 = vmatprep.mubr.bf16.mxu0 %v4613_v14 }
 0x18c   : > { %v3074_v42 = vmax.f32 %v2808_v20, %v2809_v32  ;;  %v3172_v43 = vmax.f32 %v2810_v29, %v2811_v33  ;;  %v2812_v44 = vmax.f32 %v2420_v34, 0.0  ;;  %v2814_v45 = vmax.f32 %v2422_v35, 0.0  ;;  %v1022_v46 = vpop.f32.mrf.mxu0  ;;  %v1545_v47 = vpop.f32.mrf.mxu1  ;;  %1791 = vmatprep.mubr.bf16.mxu1 %v4613_v14 }
 0x18d   : > { %4502 = vst [vmem:[%s4875_s24 + $0xa0] sm:$0xff] %v4341_v38   ;;  %v2813_v48 = vmax.f32 %v2421_v39, 0.0  ;;  %v2815_v49 = vmax.f32 %v2423_v40, 0.0  ;;  %v2424_v55 = vadd.f32 %v4820_v52, %v2010_v41  ;;  %v2012_v56 = vmul.f32 %v4818_v51, %v1543_v37 }
 0x18e   : > { %v3270_v59 = vmax.f32 %v3074_v42, %v3172_v43  ;;  %v2011_v60 = vmul.f32 %v4822_v53, %v1022_v46  ;;  %v2013_v62 = vmul.f32 %v4824_v54, %v1545_v47  ;;  %v1024_v63 = vpop.f32.mrf.mxu0  ;;  %v1547_v0 = vpop.f32.mrf.mxu1  ;;  %v4604_v42 = vld [vmem:[%s4687_s16 + $0x180] sm:$0xff]  }
 0x18f   : > { %v3075_v2 = vmax.f32 %v2812_v44, %v2813_v48  ;;  %v3173_v3 = vmax.f32 %v2814_v45, %v2815_v49  ;;  %v2816_v4 = vmax.f32 %v2424_v55, 0.0  ;;  %v2426_v5 = vadd.f32 %v4827_v57, %v2012_v56 }
 0x190   : > { %v2425_v6 = vadd.f32 %v4830_v58, %v2011_v60  ;;  %v2427_v7 = vadd.f32 %v4834_v61, %v2013_v62  ;;  %v2014_v8 = vmul.f32 %v4816_v50, %v1024_v63  ;;  %v2016_v9 = vmul.f32 %v4818_v51, %v1547_v0  ;;  %v1026_v10 = vpop.f32.mrf.mxu0  ;;  %v1549_v11 = vpop.f32.mrf.mxu1 }
 0x191   : > { %v3271_v12 = vmax.f32 %v3075_v2, %v3173_v3  ;;  %v2818_v13 = vmax.f32 %v2426_v5, 0.0  ;;  %v2015_v15 = vmul.f32 %v4822_v53, %v1026_v10  ;;  %v2017_v16 = vmul.f32 %v4824_v54, %v1549_v11 }
 0x192   : > { %v2817_v17 = vmax.f32 %v2425_v6, 0.0  ;;  %v2819_v18 = vmax.f32 %v2427_v7, 0.0  ;;  %v2428_v19 = vadd.f32 %v4820_v52, %v2014_v8  ;;  %v2430_v20 = vadd.f32 %v4827_v57, %v2016_v9  ;;  %v1030_v21 = vpop.f32.mrf.mxu0  ;;  %3988 = vmatmul.mubr.msk.bf16.gmra.mxu0 %vm605_vm1, %v4603_v1  ;;  %v1553_v22 = vpop.f32.mrf.mxu1  ;;  %4038 = vmatmul.mubr.msk.bf16.gmra.mxu1 %vm605_vm1, %v4603_v1 }
 0x193   : > { %v4346_v23 = vpack.c.bf16 %v3271_v12, %v3270_v59  ;;  %v2429_v24 = vadd.f32 %v4830_v58, %v2015_v15  ;;  %v2431_v25 = vadd.f32 %v4834_v61, %v2017_v16  ;;  %v2018_v26 = vmul.f32 %v4816_v50, %v1030_v21  ;;  %1278 = vmatprep.mubr.bf16.mxu0 %v4613_v14 }
 0x194   : > { %v3076_v27 = vmax.f32 %v2816_v4, %v2817_v17  ;;  %v3174_v28 = vmax.f32 %v2818_v13, %v2819_v18  ;;  %v2820_v29 = vmax.f32 %v2428_v19, 0.0  ;;  %v2822_v30 = vmax.f32 %v2430_v20, 0.0  ;;  %v1032_v31 = vpop.f32.mrf.mxu0  ;;  %v1555_v32 = vpop.f32.mrf.mxu1  ;;  %1801 = vmatprep.mubr.bf16.mxu1 %v4613_v14 }
 0x195   : > { %4503 = vst [vmem:[%s4875_s24 + $0xa8] sm:$0xff] %v4346_v23   ;;  %v2821_v33 = vmax.f32 %v2429_v24, 0.0  ;;  %v2823_v34 = vmax.f32 %v2431_v25, 0.0  ;;  %v2432_v35 = vadd.f32 %v4820_v52, %v2018_v26  ;;  %v2020_v36 = vmul.f32 %v4818_v51, %v1553_v22 }
 0x196   : > { %v3272_v37 = vmax.f32 %v3076_v27, %v3174_v28  ;;  %v2019_v38 = vmul.f32 %v4822_v53, %v1032_v31  ;;  %v2021_v39 = vmul.f32 %v4824_v54, %v1555_v32  ;;  %v1034_v40 = vpop.f32.mrf.mxu0  ;;  %v1557_v41 = vpop.f32.mrf.mxu1 }
 0x197   : > { %v3077_v43 = vmax.f32 %v2820_v29, %v2821_v33  ;;  %v3175_v44 = vmax.f32 %v2822_v30, %v2823_v34  ;;  %v2824_v45 = vmax.f32 %v2432_v35, 0.0  ;;  %v2434_v14 = vadd.f32 %v4827_v57, %v2020_v36 }
 0x198   : > { %v2433_v46 = vadd.f32 %v4830_v58, %v2019_v38  ;;  %v2435_v47 = vadd.f32 %v4834_v61, %v2021_v39  ;;  %v2022_v48 = vmul.f32 %v4816_v50, %v1034_v40  ;;  %v2024_v49 = vmul.f32 %v4818_v51, %v1557_v41  ;;  %v1036_v55 = vpop.f32.mrf.mxu0  ;;  %v1559_v56 = vpop.f32.mrf.mxu1 }
 0x199   : > { %v3273_v59 = vmax.f32 %v3077_v43, %v3175_v44  ;;  %v2826_v60 = vmax.f32 %v2434_v14, 0.0  ;;  %v2023_v62 = vmul.f32 %v4822_v53, %v1036_v55  ;;  %v2025_v63 = vmul.f32 %v4824_v54, %v1559_v56 }
 0x19a   : > { %v2825_v0 = vmax.f32 %v2433_v46, 0.0  ;;  %v2827_v1 = vmax.f32 %v2435_v47, 0.0  ;;  %v2436_v2 = vadd.f32 %v4820_v52, %v2022_v48  ;;  %v2438_v3 = vadd.f32 %v4827_v57, %v2024_v49  ;;  %v1040_v4 = vpop.f32.mrf.mxu0  ;;  %3989 = vmatmul.mubr.msk.bf16.gmra.mxu0 %vm605_vm1, %v4604_v42  ;;  %v1563_v5 = vpop.f32.mrf.mxu1  ;;  %4039 = vmatmul.mubr.msk.bf16.gmra.mxu1 %vm605_vm1, %v4604_v42 }
 0x19b   : > { %v4351_v6 = vpack.c.bf16 %v3273_v59, %v3272_v37  ;;  %v2437_v7 = vadd.f32 %v4830_v58, %v2023_v62  ;;  %v2439_v8 = vadd.f32 %v4834_v61, %v2025_v63  ;;  %v2026_v9 = vmul.f32 %v4816_v50, %v1040_v4 }
 0x19c   : > { %v3078_v10 = vmax.f32 %v2824_v45, %v2825_v0  ;;  %v3176_v11 = vmax.f32 %v2826_v60, %v2827_v1  ;;  %v2828_v12 = vmax.f32 %v2436_v2, 0.0  ;;  %v2830_v13 = vmax.f32 %v2438_v3, 0.0  ;;  %v1042_v15 = vpop.f32.mrf.mxu0  ;;  %v1565_v16 = vpop.f32.mrf.mxu1 }
 0x19d   : > { %4504 = vst [vmem:[%s4875_s24 + $0xb0] sm:$0xff] %v4351_v6   ;;  %v2829_v17 = vmax.f32 %v2437_v7, 0.0  ;;  %v2831_v18 = vmax.f32 %v2439_v8, 0.0  ;;  %v2440_v19 = vadd.f32 %v4820_v52, %v2026_v9  ;;  %v2028_v20 = vmul.f32 %v4818_v51, %v1563_v5 }
 0x19e   : > { %v3274_v21 = vmax.f32 %v3078_v10, %v3176_v11  ;;  %v2027_v22 = vmul.f32 %v4822_v53, %v1042_v15  ;;  %v2029_v23 = vmul.f32 %v4824_v54, %v1565_v16  ;;  %v1044_v24 = vpop.f32.mrf.mxu0  ;;  %v1567_v25 = vpop.f32.mrf.mxu1 }
 0x19f   : > { %v3079_v26 = vmax.f32 %v2828_v12, %v2829_v17  ;;  %v3177_v27 = vmax.f32 %v2830_v13, %v2831_v18  ;;  %v2832_v28 = vmax.f32 %v2440_v19, 0.0  ;;  %v2442_v29 = vadd.f32 %v4827_v57, %v2028_v20 }
 0x1a0   : > { %v2441_v30 = vadd.f32 %v4830_v58, %v2027_v22  ;;  %v2443_v31 = vadd.f32 %v4834_v61, %v2029_v23  ;;  %v2030_v32 = vmul.f32 %v4816_v50, %v1044_v24  ;;  %v2032_v33 = vmul.f32 %v4818_v51, %v1567_v25  ;;  %v1046_v34 = vpop.f32.mrf.mxu0  ;;  %v1569_v35 = vpop.f32.mrf.mxu1 }
 0x1a1   : > { %v3275_v36 = vmax.f32 %v3079_v26, %v3177_v27  ;;  %v2834_v37 = vmax.f32 %v2442_v29, 0.0  ;;  %v2031_v38 = vmul.f32 %v4822_v53, %v1046_v34  ;;  %v2033_v39 = vmul.f32 %v4824_v54, %v1569_v35 }
 0x1a2   : > { %v2833_v40 = vmax.f32 %v2441_v30, 0.0  ;;  %v2835_v41 = vmax.f32 %v2443_v31, 0.0  ;;  %v2444_v42 = vadd.f32 %v4820_v52, %v2030_v32  ;;  %v2446_v43 = vadd.f32 %v4827_v57, %v2032_v33  ;;  %v1050_v44 = vpop.f32.mrf.mxu0  ;;  %v1573_v45 = vpop.f32.mrf.mxu1 }
 0x1a3   : > { %v4356_v14 = vpack.c.bf16 %v3275_v36, %v3274_v21  ;;  %v2445_v46 = vadd.f32 %v4830_v58, %v2031_v38  ;;  %v2447_v47 = vadd.f32 %v4834_v61, %v2033_v39  ;;  %v2034_v48 = vmul.f32 %v4816_v50, %v1050_v44 }
 0x1a4   : > { %v3080_v49 = vmax.f32 %v2832_v28, %v2833_v40  ;;  %v3178_v55 = vmax.f32 %v2834_v37, %v2835_v41  ;;  %v2836_v56 = vmax.f32 %v2444_v42, 0.0  ;;  %v2838_v59 = vmax.f32 %v2446_v43, 0.0  ;;  %v1052_v60 = vpop.f32.mrf.mxu0  ;;  %v1575_v62 = vpop.f32.mrf.mxu1 }
 0x1a5   : > { %4505 = vst [vmem:[%s4875_s24 + $0xb8] sm:$0xff] %v4356_v14   ;;  %v2837_v63 = vmax.f32 %v2445_v46, 0.0  ;;  %v2839_v0 = vmax.f32 %v2447_v47, 0.0  ;;  %v2448_v1 = vadd.f32 %v4820_v52, %v2034_v48  ;;  %v2036_v2 = vmul.f32 %v4818_v51, %v1573_v45 }
 0x1a6   : > { %v3276_v3 = vmax.f32 %v3080_v49, %v3178_v55  ;;  %v2035_v4 = vmul.f32 %v4822_v53, %v1052_v60  ;;  %v2037_v5 = vmul.f32 %v4824_v54, %v1575_v62  ;;  %v1054_v6 = vpop.f32.mrf.mxu0  ;;  %v1577_v7 = vpop.f32.mrf.mxu1 }
 0x1a7   : > { %v3081_v8 = vmax.f32 %v2836_v56, %v2837_v63  ;;  %v3179_v9 = vmax.f32 %v2838_v59, %v2839_v0  ;;  %v2840_v10 = vmax.f32 %v2448_v1, 0.0  ;;  %v2450_v11 = vadd.f32 %v4827_v57, %v2036_v2 }
 0x1a8   : > { %v2449_v12 = vadd.f32 %v4830_v58, %v2035_v4  ;;  %v2451_v13 = vadd.f32 %v4834_v61, %v2037_v5  ;;  %v2038_v15 = vmul.f32 %v4816_v50, %v1054_v6  ;;  %v2040_v16 = vmul.f32 %v4818_v51, %v1577_v7  ;;  %v1056_v17 = vpop.f32.mrf.mxu0  ;;  %v1579_v18 = vpop.f32.mrf.mxu1 }
 0x1a9   : > { %v3277_v19 = vmax.f32 %v3081_v8, %v3179_v9  ;;  %v2842_v20 = vmax.f32 %v2450_v11, 0.0  ;;  %v2039_v21 = vmul.f32 %v4822_v53, %v1056_v17  ;;  %v2041_v22 = vmul.f32 %v4824_v54, %v1579_v18 }
 0x1aa   : > { %v2841_v23 = vmax.f32 %v2449_v12, 0.0  ;;  %v2843_v24 = vmax.f32 %v2451_v13, 0.0  ;;  %v2452_v25 = vadd.f32 %v4820_v52, %v2038_v15  ;;  %v2454_v26 = vadd.f32 %v4827_v57, %v2040_v16  ;;  %v1060_v27 = vpop.f32.mrf.mxu0  ;;  %v1583_v28 = vpop.f32.mrf.mxu1 }
 0x1ab   : > { %v4361_v29 = vpack.c.bf16 %v3277_v19, %v3276_v3  ;;  %v2453_v30 = vadd.f32 %v4830_v58, %v2039_v21  ;;  %v2455_v31 = vadd.f32 %v4834_v61, %v2041_v22  ;;  %v2042_v32 = vmul.f32 %v4816_v50, %v1060_v27 }
 0x1ac   : > { %v3082_v33 = vmax.f32 %v2840_v10, %v2841_v23  ;;  %v3180_v34 = vmax.f32 %v2842_v20, %v2843_v24  ;;  %v2844_v35 = vmax.f32 %v2452_v25, 0.0  ;;  %v2846_v36 = vmax.f32 %v2454_v26, 0.0  ;;  %v1062_v37 = vpop.f32.mrf.mxu0  ;;  %v1585_v38 = vpop.f32.mrf.mxu1 }
 0x1ad   : > { %4506 = vst [vmem:[%s4875_s24 + $0xc0] sm:$0xff] %v4361_v29   ;;  %v2845_v39 = vmax.f32 %v2453_v30, 0.0  ;;  %v2847_v40 = vmax.f32 %v2455_v31, 0.0  ;;  %v2456_v41 = vadd.f32 %v4820_v52, %v2042_v32  ;;  %v2044_v42 = vmul.f32 %v4818_v51, %v1583_v28 }
 0x1ae   : > { %v3278_v43 = vmax.f32 %v3082_v33, %v3180_v34  ;;  %v2043_v44 = vmul.f32 %v4822_v53, %v1062_v37  ;;  %v2045_v45 = vmul.f32 %v4824_v54, %v1585_v38  ;;  %v1064_v14 = vpop.f32.mrf.mxu0  ;;  %v1587_v46 = vpop.f32.mrf.mxu1 }
 0x1af   : > { %v3083_v47 = vmax.f32 %v2844_v35, %v2845_v39  ;;  %v3181_v48 = vmax.f32 %v2846_v36, %v2847_v40  ;;  %v2848_v49 = vmax.f32 %v2456_v41, 0.0  ;;  %v2458_v55 = vadd.f32 %v4827_v57, %v2044_v42 }
 0x1b0   : > { %v2457_v56 = vadd.f32 %v4830_v58, %v2043_v44  ;;  %v2459_v59 = vadd.f32 %v4834_v61, %v2045_v45  ;;  %v2046_v60 = vmul.f32 %v4816_v50, %v1064_v14  ;;  %v2048_v62 = vmul.f32 %v4818_v51, %v1587_v46  ;;  %v1066_v63 = vpop.f32.mrf.mxu0  ;;  %v1589_v0 = vpop.f32.mrf.mxu1 }
 0x1b1   : > { %v3279_v1 = vmax.f32 %v3083_v47, %v3181_v48  ;;  %v2850_v2 = vmax.f32 %v2458_v55, 0.0  ;;  %v2047_v3 = vmul.f32 %v4822_v53, %v1066_v63  ;;  %v2049_v4 = vmul.f32 %v4824_v54, %v1589_v0 }
 0x1b2   : > { %v2849_v5 = vmax.f32 %v2457_v56, 0.0  ;;  %v2851_v6 = vmax.f32 %v2459_v59, 0.0  ;;  %v2460_v7 = vadd.f32 %v4820_v52, %v2046_v60  ;;  %v2462_v8 = vadd.f32 %v4827_v57, %v2048_v62  ;;  %v1070_v9 = vpop.f32.mrf.mxu0  ;;  %v1593_v15 = vpop.f32.mrf.mxu1 }
 0x1b3   : > { %v4366_v10 = vpack.c.bf16 %v3279_v1, %v3278_v43  ;;  %v2461_v11 = vadd.f32 %v4830_v58, %v2047_v3  ;;  %v2463_v12 = vadd.f32 %v4834_v61, %v2049_v4  ;;  %v2050_v13 = vmul.f32 %v4816_v50, %v1070_v9 }
 0x1b4   : > { %v3084_v16 = vmax.f32 %v2848_v49, %v2849_v5  ;;  %v3182_v17 = vmax.f32 %v2850_v2, %v2851_v6  ;;  %v2852_v18 = vmax.f32 %v2460_v7, 0.0  ;;  %v2854_v19 = vmax.f32 %v2462_v8, 0.0  ;;  %v1072_v20 = vpop.f32.mrf.mxu0  ;;  %v1595_v25 = vpop.f32.mrf.mxu1 }
 0x1b5   : > { %4507 = vst [vmem:[%s4875_s24 + $0xc8] sm:$0xff] %v4366_v10   ;;  %v2853_v21 = vmax.f32 %v2461_v11, 0.0  ;;  %v2855_v22 = vmax.f32 %v2463_v12, 0.0  ;;  %v2464_v23 = vadd.f32 %v4820_v52, %v2050_v13  ;;  %v2052_v24 = vmul.f32 %v4818_v51, %v1593_v15 }
 0x1b6   : > { %v2051_v26 = vmul.f32 %v4822_v53, %v1072_v20  ;;  %v2053_v27 = vmul.f32 %v4824_v54, %v1595_v25  ;;  %v1074_v28 = vpop.f32.mrf.mxu0  ;;  %v3280_v29 = vmax.f32 %v3084_v16, %v3182_v17  ;;  %v1597_v33 = vpop.f32.mrf.mxu1 }
 0x1b7   : > { %v3085_v30 = vmax.f32 %v2852_v18, %v2853_v21  ;;  %v3183_v31 = vmax.f32 %v2854_v19, %v2855_v22  ;;  %v2466_v32 = vadd.f32 %v4827_v57, %v2052_v24  ;;  %v2054_v36 = vmul.f32 %v4816_v50, %v1074_v28 }
 0x1b8   : > { %v2465_v34 = vadd.f32 %v4830_v58, %v2051_v26  ;;  %v2467_v35 = vadd.f32 %v4834_v61, %v2053_v27  ;;  %v2056_v37 = vmul.f32 %v4818_v51, %v1597_v33  ;;  %v1076_v38 = vpop.f32.mrf.mxu0  ;;  %v2856_v40 = vmax.f32 %v2464_v23, 0.0  ;;  %v1599_v43 = vpop.f32.mrf.mxu1 }
 0x1b9   : > { %v3281_v39 = vmax.f32 %v3085_v30, %v3183_v31  ;;  %v2858_v41 = vmax.f32 %v2466_v32, 0.0  ;;  %v2055_v42 = vmul.f32 %v4822_v53, %v1076_v38  ;;  %v2468_v14 = vadd.f32 %v4820_v52, %v2054_v36 }
 0x1ba   : > { %v2857_v44 = vmax.f32 %v2465_v34, 0.0  ;;  %v2859_v45 = vmax.f32 %v2467_v35, 0.0  ;;  %v2470_v46 = vadd.f32 %v4827_v57, %v2056_v37  ;;  %v1080_v47 = vpop.f32.mrf.mxu0  ;;  %v2057_v55 = vmul.f32 %v4824_v54, %v1599_v43  ;;  %v1603_v59 = vpop.f32.mrf.mxu1 }
 0x1bb   : > { %v4371_v48 = vpack.c.bf16 %v3281_v39, %v3280_v29  ;;  %v2469_v49 = vadd.f32 %v4830_v58, %v2055_v42  ;;  %v2058_v56 = vmul.f32 %v4816_v50, %v1080_v47  ;;  %v2860_v63 = vmax.f32 %v2468_v14, 0.0 }
 0x1bc   : > { %v3086_v60 = vmax.f32 %v2856_v40, %v2857_v44  ;;  %v3184_v62 = vmax.f32 %v2858_v41, %v2859_v45  ;;  %v1082_v0 = vpop.f32.mrf.mxu0  ;;  %v2471_v2 = vadd.f32 %v4834_v61, %v2057_v55  ;;  %v2060_v4 = vmul.f32 %v4818_v51, %v1603_v59  ;;  %v1605_v5 = vpop.f32.mrf.mxu1 }
 0x1bd   : > { %4508 = vst [vmem:[%s4875_s24 + $0xd0] sm:$0xff] %v4371_v48   ;;  %v2861_v1 = vmax.f32 %v2469_v49, 0.0  ;;  %v2472_v3 = vadd.f32 %v4820_v52, %v2058_v56  ;;  %v2059_v6 = vmul.f32 %v4822_v53, %v1082_v0  ;;  %v2061_v7 = vmul.f32 %v4824_v54, %v1605_v5 }
 0x1be   : > { %v1084_v8 = vpop.f32.mrf.mxu0  ;;  %v2862_v9 = vmax.f32 %v2470_v46, 0.0  ;;  %v2863_v11 = vmax.f32 %v2471_v2, 0.0  ;;  %v2474_v12 = vadd.f32 %v4827_v57, %v2060_v4  ;;  %v1607_v13 = vpop.f32.mrf.mxu1  ;;  %v3282_v20 = vmax.f32 %v3086_v60, %v3184_v62 }
 0x1bf   : > { %v3087_v10 = vmax.f32 %v2860_v63, %v2861_v1  ;;  %v2473_v15 = vadd.f32 %v4830_v58, %v2059_v6  ;;  %v2475_v16 = vadd.f32 %v4834_v61, %v2061_v7  ;;  %v2062_v17 = vmul.f32 %v4816_v50, %v1084_v8 }
 0x1c0   : > { %v2064_v18 = vmul.f32 %v4818_v51, %v1607_v13  ;;  %v1086_v19 = vpop.f32.mrf.mxu0  ;;  %v3185_v21 = vmax.f32 %v2862_v9, %v2863_v11  ;;  %v2864_v22 = vmax.f32 %v2472_v3, 0.0  ;;  %v1609_v24 = vpop.f32.mrf.mxu1  ;;  %v2866_v35 = vmax.f32 %v2474_v12, 0.0 }
 0x1c1   : > { %v2063_v23 = vmul.f32 %v4822_v53, %v1086_v19  ;;  %v2865_v25 = vmax.f32 %v2473_v15, 0.0  ;;  %v2867_v26 = vmax.f32 %v2475_v16, 0.0  ;;  %v2476_v27 = vadd.f32 %v4820_v52, %v2062_v17 }
 0x1c2   : > { %v2478_v28 = vadd.f32 %v4827_v57, %v2064_v18  ;;  %v1090_v29 = vpop.f32.mrf.mxu0  ;;  %v3283_v30 = vmax.f32 %v3087_v10, %v3185_v21  ;;  %v2065_v32 = vmul.f32 %v4824_v54, %v1609_v24  ;;  %v1613_v34 = vpop.f32.mrf.mxu1 }
 0x1c3   : > { %v2477_v31 = vadd.f32 %v4830_v58, %v2063_v23  ;;  %v2066_v33 = vmul.f32 %v4816_v50, %v1090_v29  ;;  %v3088_v36 = vmax.f32 %v2864_v22, %v2865_v25  ;;  %v2868_v37 = vmax.f32 %v2476_v27, 0.0 }
 0x1c4   : > { %v1092_v38 = vpop.f32.mrf.mxu0  ;;  %v4376_v39 = vpack.c.bf16 %v3283_v30, %v3282_v20  ;;  %v2479_v41 = vadd.f32 %v4834_v61, %v2065_v32  ;;  %v1615_v43 = vpop.f32.mrf.mxu1  ;;  %v3186_v44 = vmax.f32 %v2866_v35, %v2867_v26  ;;  %v2068_v45 = vmul.f32 %v4818_v51, %v1613_v34 }
 0x1c5   : > { %v2869_v40 = vmax.f32 %v2477_v31, 0.0  ;;  %v2480_v42 = vadd.f32 %v4820_v52, %v2066_v33  ;;  %v2067_v14 = vmul.f32 %v4822_v53, %v1092_v38  ;;  %v2069_v46 = vmul.f32 %v4824_v54, %v1615_v43 }
 0x1c6   : > { %v1094_v47 = vpop.f32.mrf.mxu0  ;;  %4509 = vst [vmem:[%s4875_s24 + $0xd8] sm:$0xff] %v4376_v39   ;;  %v2870_v48 = vmax.f32 %v2478_v28, 0.0  ;;  %v2871_v55 = vmax.f32 %v2479_v41, 0.0  ;;  %v1617_v59 = vpop.f32.mrf.mxu1  ;;  %v2482_v60 = vadd.f32 %v4827_v57, %v2068_v45  ;;  %v3284_v12 = vmax.f32 %v3088_v36, %v3186_v44 }
 0x1c7   : > { %v3089_v49 = vmax.f32 %v2868_v37, %v2869_v40  ;;  %v2070_v56 = vmul.f32 %v4816_v50, %v1094_v47  ;;  %v2481_v62 = vadd.f32 %v4830_v58, %v2067_v14  ;;  %v2483_v63 = vadd.f32 %v4834_v61, %v2069_v46 }
 0x1c8   : > { %v2072_v0 = vmul.f32 %v4818_v51, %v1617_v59  ;;  %v1096_v1 = vpop.f32.mrf.mxu0  ;;  %v3187_v2 = vmax.f32 %v2870_v48, %v2871_v55  ;;  %v2872_v3 = vmax.f32 %v2480_v42, 0.0  ;;  %v1619_v6 = vpop.f32.mrf.mxu1  ;;  %v2874_v7 = vmax.f32 %v2482_v60, 0.0 }
 0x1c9   : > { %v2484_v4 = vadd.f32 %v4820_v52, %v2070_v56  ;;  %v2071_v5 = vmul.f32 %v4822_v53, %v1096_v1  ;;  %v2873_v8 = vmax.f32 %v2481_v62, 0.0  ;;  %v2875_v9 = vmax.f32 %v2483_v63, 0.0 }
 0x1ca   : > { %v2486_v10 = vadd.f32 %v4827_v57, %v2072_v0  ;;  %v1100_v11 = vpop.f32.mrf.mxu0  ;;  %v3285_v13 = vmax.f32 %v3089_v49, %v3187_v2  ;;  %v2073_v16 = vmul.f32 %v4824_v54, %v1619_v6  ;;  %v1623_v17 = vpop.f32.mrf.mxu1 }
 0x1cb   : > { %v2485_v15 = vadd.f32 %v4830_v58, %v2071_v5  ;;  %v3090_v18 = vmax.f32 %v2872_v3, %v2873_v8  ;;  %v3188_v19 = vmax.f32 %v2874_v7, %v2875_v9  ;;  %v2876_v20 = vmax.f32 %v2484_v4, 0.0 }
 0x1cc   : > { %v2074_v21 = vmul.f32 %v4816_v50, %v1100_v11  ;;  %v1102_v22 = vpop.f32.mrf.mxu0  ;;  %v4381_v23 = vpack.c.bf16 %v3285_v13, %v3284_v12  ;;  %v2487_v25 = vadd.f32 %v4834_v61, %v2073_v16  ;;  %v2076_v26 = vmul.f32 %v4818_v51, %v1623_v17  ;;  %v1625_v27 = vpop.f32.mrf.mxu1 }
 0x1cd   : > { %v2877_v24 = vmax.f32 %v2485_v15, 0.0  ;;  %v2878_v28 = vmax.f32 %v2486_v10, 0.0  ;;  %v2075_v30 = vmul.f32 %v4822_v53, %v1102_v22  ;;  %v2077_v31 = vmul.f32 %v4824_v54, %v1625_v27 }
 0x1ce   : > { %v2488_v29 = vadd.f32 %v4820_v52, %v2074_v21  ;;  %v1104_v32 = vpop.f32.mrf.mxu0  ;;  %4510 = vst [vmem:[%s4875_s24 + $0xe0] sm:$0xff] %v4381_v23   ;;  %v2879_v34 = vmax.f32 %v2487_v25, 0.0  ;;  %v2490_v35 = vadd.f32 %v4827_v57, %v2076_v26  ;;  %v1627_v37 = vpop.f32.mrf.mxu1  ;;  %v3286_v59 = vmax.f32 %v3090_v18, %v3188_v19 }
 0x1cf   : > { %v3091_v33 = vmax.f32 %v2876_v20, %v2877_v24  ;;  %v2078_v36 = vmul.f32 %v4816_v50, %v1104_v32  ;;  %v2489_v39 = vadd.f32 %v4830_v58, %v2075_v30  ;;  %v2491_v40 = vadd.f32 %v4834_v61, %v2077_v31 }
 0x1d0   : > { %v2880_v38 = vmax.f32 %v2488_v29, 0.0  ;;  %v2080_v41 = vmul.f32 %v4818_v51, %v1627_v37  ;;  %v1106_v42 = vpop.f32.mrf.mxu0  ;;  %v3189_v43 = vmax.f32 %v2878_v28, %v2879_v34  ;;  %v2882_v44 = vmax.f32 %v2490_v35, 0.0  ;;  %v1629_v46 = vpop.f32.mrf.mxu1 }
 0x1d1   : > { %v2492_v45 = vadd.f32 %v4820_v52, %v2078_v36  ;;  %v2079_v14 = vmul.f32 %v4822_v53, %v1106_v42  ;;  %v2881_v47 = vmax.f32 %v2489_v39, 0.0  ;;  %v2883_v48 = vmax.f32 %v2491_v40, 0.0 }
 0x1d2   : > { %v2494_v49 = vadd.f32 %v4827_v57, %v2080_v41  ;;  %v2081_v55 = vmul.f32 %v4824_v54, %v1629_v46  ;;  %v1110_v56 = vpop.f32.mrf.mxu0  ;;  %v3287_v60 = vmax.f32 %v3091_v33, %v3189_v43  ;;  %v1633_v0 = vpop.f32.mrf.mxu1 }
 0x1d3   : > { %v2493_v62 = vadd.f32 %v4830_v58, %v2079_v14  ;;  %v2082_v63 = vmul.f32 %v4816_v50, %v1110_v56  ;;  %v3092_v1 = vmax.f32 %v2880_v38, %v2881_v47  ;;  %v3190_v2 = vmax.f32 %v2882_v44, %v2883_v48 }
 0x1d4   : > { %v2884_v3 = vmax.f32 %v2492_v45, 0.0  ;;  %v2495_v4 = vadd.f32 %v4834_v61, %v2081_v55  ;;  %v1112_v5 = vpop.f32.mrf.mxu0  ;;  %v4386_v6 = vpack.c.bf16 %v3287_v60, %v3286_v59  ;;  %v2084_v9 = vmul.f32 %v4818_v51, %v1633_v0  ;;  %v1635_v10 = vpop.f32.mrf.mxu1 }
 0x1d5   : > { %v2885_v7 = vmax.f32 %v2493_v62, 0.0  ;;  %v2496_v8 = vadd.f32 %v4820_v52, %v2082_v63  ;;  %v2886_v11 = vmax.f32 %v2494_v49, 0.0  ;;  %v2083_v13 = vmul.f32 %v4822_v53, %v1112_v5 }
 0x1d6   : > { %v2887_v12 = vmax.f32 %v2495_v4, 0.0  ;;  %v2085_v15 = vmul.f32 %v4824_v54, %v1635_v10  ;;  %v1114_v16 = vpop.f32.mrf.mxu0  ;;  %4511 = vst [vmem:[%s4875_s24 + $0xe8] sm:$0xff] %v4386_v6   ;;  %v2498_v18 = vadd.f32 %v4827_v57, %v2084_v9  ;;  %v1637_v20 = vpop.f32.mrf.mxu1  ;;  %v3288_v26 = vmax.f32 %v3092_v1, %v3190_v2 }
 0x1d7   : > { %v3093_v17 = vmax.f32 %v2884_v3, %v2885_v7  ;;  %v2086_v19 = vmul.f32 %v4816_v50, %v1114_v16  ;;  %v2497_v22 = vadd.f32 %v4830_v58, %v2083_v13  ;;  %v2088_v24 = vmul.f32 %v4818_v51, %v1637_v20 }
 0x1d8   : > { %v3191_v21 = vmax.f32 %v2886_v11, %v2887_v12  ;;  %v2499_v23 = vadd.f32 %v4834_v61, %v2085_v15  ;;  %v1116_v25 = vpop.f32.mrf.mxu0  ;;  %v2888_v27 = vmax.f32 %v2496_v8, 0.0  ;;  %v1639_v30 = vpop.f32.mrf.mxu1  ;;  %v2890_v32 = vmax.f32 %v2498_v18, 0.0 }
 0x1d9   : > { %v2500_v28 = vadd.f32 %v4820_v52, %v2086_v19  ;;  %v2087_v29 = vmul.f32 %v4822_v53, %v1116_v25  ;;  %v2889_v33 = vmax.f32 %v2497_v22, 0.0  ;;  %v2502_v36 = vadd.f32 %v4827_v57, %v2088_v24 }
 0x1da   : > { %v3289_v31 = vmax.f32 %v3093_v17, %v3191_v21  ;;  %v2891_v34 = vmax.f32 %v2499_v23, 0.0  ;;  %v1120_v35 = vpop.f32.mrf.mxu0  ;;  %v2089_v38 = vmul.f32 %v4824_v54, %v1639_v30  ;;  %v1643_v40 = vpop.f32.mrf.mxu1 }
 0x1db   : > { %v2501_v37 = vadd.f32 %v4830_v58, %v2087_v29  ;;  %v2090_v39 = vmul.f32 %v4816_v50, %v1120_v35  ;;  %v3094_v42 = vmax.f32 %v2888_v27, %v2889_v33  ;;  %v2892_v44 = vmax.f32 %v2500_v28, 0.0 }
 0x1dc   : > { %v4391_v41 = vpack.c.bf16 %v3289_v31, %v3288_v26  ;;  %v3192_v43 = vmax.f32 %v2890_v32, %v2891_v34  ;;  %v1122_v45 = vpop.f32.mrf.mxu0  ;;  %v2503_v46 = vadd.f32 %v4834_v61, %v2089_v38  ;;  %v2092_v48 = vmul.f32 %v4818_v51, %v1643_v40  ;;  %v1645_v49 = vpop.f32.mrf.mxu1 }
 0x1dd   : > { %v2893_v14 = vmax.f32 %v2501_v37, 0.0  ;;  %v2504_v47 = vadd.f32 %v4820_v52, %v2090_v39  ;;  %v2091_v55 = vmul.f32 %v4822_v53, %v1122_v45  ;;  %v2093_v56 = vmul.f32 %v4824_v54, %v1645_v49 }
 0x1de   : > { %4512 = vst [vmem:[%s4875_s24 + $0xf0] sm:$0xff] %v4391_v41   ;;  %v1124_v59 = vpop.f32.mrf.mxu0  ;;  %v2894_v60 = vmax.f32 %v2502_v36, 0.0  ;;  %v2895_v63 = vmax.f32 %v2503_v46, 0.0  ;;  %v2506_v0 = vadd.f32 %v4827_v57, %v2092_v48  ;;  %v1647_v1 = vpop.f32.mrf.mxu1  ;;  %v3290_v7 = vmax.f32 %v3094_v42, %v3192_v43 }
 0x1df   : > { %v3095_v62 = vmax.f32 %v2892_v44, %v2893_v14  ;;  %v2505_v2 = vadd.f32 %v4830_v58, %v2091_v55  ;;  %v2507_v3 = vadd.f32 %v4834_v61, %v2093_v56  ;;  %v2094_v4 = vmul.f32 %v4816_v50, %v1124_v59 }
 0x1e0   : > { %v2096_v5 = vmul.f32 %v4818_v51, %v1647_v1  ;;  %v1126_v6 = vpop.f32.mrf.mxu0  ;;  %v3193_v8 = vmax.f32 %v2894_v60, %v2895_v63  ;;  %v2896_v9 = vmax.f32 %v2504_v47, 0.0  ;;  %v1649_v11 = vpop.f32.mrf.mxu1  ;;  %v2898_v23 = vmax.f32 %v2506_v0, 0.0 }
 0x1e1   : > { %v2095_v10 = vmul.f32 %v4822_v53, %v1126_v6  ;;  %v2897_v12 = vmax.f32 %v2505_v2, 0.0  ;;  %v2899_v13 = vmax.f32 %v2507_v3, 0.0  ;;  %v2508_v15 = vadd.f32 %v4820_v52, %v2094_v4 }
 0x1e2   : > { %v2510_v16 = vadd.f32 %v4827_v57, %v2096_v5  ;;  %v1130_v17 = vpop.f32.mrf.mxu0  ;;  %v3291_v18 = vmax.f32 %v3095_v62, %v3193_v8  ;;  %v2097_v20 = vmul.f32 %v4824_v54, %v1649_v11  ;;  %v1653_v22 = vpop.f32.mrf.mxu1 }
 0x1e3   : > { %v2509_v19 = vadd.f32 %v4830_v58, %v2095_v10  ;;  %v2098_v21 = vmul.f32 %v4816_v50, %v1130_v17  ;;  %v3096_v24 = vmax.f32 %v2896_v9, %v2897_v12  ;;  %v2900_v25 = vmax.f32 %v2508_v15, 0.0 }
 0x1e4   : > { %v1132_v26 = vpop.f32.mrf.mxu0  ;;  %v4396_v27 = vpack.c.bf16 %v3291_v18, %v3290_v7  ;;  %v2511_v29 = vadd.f32 %v4834_v61, %v2097_v20  ;;  %v1655_v31 = vpop.f32.mrf.mxu1  ;;  %v3194_v32 = vmax.f32 %v2898_v23, %v2899_v13  ;;  %v2100_v33 = vmul.f32 %v4818_v51, %v1653_v22 }
 0x1e5   : > { %v2901_v28 = vmax.f32 %v2509_v19, 0.0  ;;  %v2512_v30 = vadd.f32 %v4820_v52, %v2098_v21  ;;  %v2099_v34 = vmul.f32 %v4822_v53, %v1132_v26  ;;  %v2101_v35 = vmul.f32 %v4824_v54, %v1655_v31 }
 0x1e6   : > { %v1134_v36 = vpop.f32.mrf.mxu0  ;;  %4513 = vst [vmem:[%s4875_s24 + $0xf8] sm:$0xff] %v4396_v27   ;;  %v2902_v37 = vmax.f32 %v2510_v16, 0.0  ;;  %v2903_v39 = vmax.f32 %v2511_v29, 0.0  ;;  %v1657_v41 = vpop.f32.mrf.mxu1  ;;  %v2514_v42 = vadd.f32 %v4827_v57, %v2100_v33  ;;  %v3292_v0 = vmax.f32 %v3096_v24, %v3194_v32 }
 0x1e7   : > { %v3097_v38 = vmax.f32 %v2900_v25, %v2901_v28  ;;  %v2102_v40 = vmul.f32 %v4816_v50, %v1134_v36  ;;  %v2513_v43 = vadd.f32 %v4830_v58, %v2099_v34  ;;  %v2515_v44 = vadd.f32 %v4834_v61, %v2101_v35 }
 0x1e8   : > { %v2104_v45 = vmul.f32 %v4818_v51, %v1657_v41  ;;  %v1136_v14 = vpop.f32.mrf.mxu0  ;;  %v3195_v46 = vmax.f32 %v2902_v37, %v2903_v39  ;;  %v2904_v47 = vmax.f32 %v2512_v30, 0.0  ;;  %v1659_v55 = vpop.f32.mrf.mxu1  ;;  %v2906_v56 = vmax.f32 %v2514_v42, 0.0 }
 0x1e9   : > { %v2516_v48 = vadd.f32 %v4820_v52, %v2102_v40  ;;  %v2103_v49 = vmul.f32 %v4822_v53, %v1136_v14  ;;  %v2905_v59 = vmax.f32 %v2513_v43, 0.0  ;;  %v2907_v60 = vmax.f32 %v2515_v44, 0.0 }
 0x1ea   : > { %v2518_v62 = vadd.f32 %v4827_v57, %v2104_v45  ;;  %v1140_v63 = vpop.f32.mrf.mxu0  ;;  %v3293_v1 = vmax.f32 %v3097_v38, %v3195_v46  ;;  %v2105_v3 = vmul.f32 %v4824_v54, %v1659_v55  ;;  %v1663_v4 = vpop.f32.mrf.mxu1 }
 0x1eb   : > { %v2517_v2 = vadd.f32 %v4830_v58, %v2103_v49  ;;  %v3098_v5 = vmax.f32 %v2904_v47, %v2905_v59  ;;  %v3196_v6 = vmax.f32 %v2906_v56, %v2907_v60  ;;  %v2908_v7 = vmax.f32 %v2516_v48, 0.0 }
 0x1ec   : > { %v2106_v8 = vmul.f32 %v4816_v50, %v1140_v63  ;;  %v1142_v9 = vpop.f32.mrf.mxu0  ;;  %v4401_v10 = vpack.c.bf16 %v3293_v1, %v3292_v0  ;;  %v2519_v12 = vadd.f32 %v4834_v61, %v2105_v3  ;;  %v2108_v13 = vmul.f32 %v4818_v51, %v1663_v4  ;;  %v1665_v15 = vpop.f32.mrf.mxu1 }
 0x1ed   : > { %v2909_v11 = vmax.f32 %v2517_v2, 0.0  ;;  %v2910_v16 = vmax.f32 %v2518_v62, 0.0  ;;  %v2107_v18 = vmul.f32 %v4822_v53, %v1142_v9  ;;  %v2109_v19 = vmul.f32 %v4824_v54, %v1665_v15 }
 0x1ee   : > { %v2520_v17 = vadd.f32 %v4820_v52, %v2106_v8  ;;  %v1144_v20 = vpop.f32.mrf.mxu0  ;;  %4514 = vst [vmem:[%s4875_s24 + $0x100] sm:$0xff] %v4401_v10   ;;  %v2911_v22 = vmax.f32 %v2519_v12, 0.0  ;;  %v2522_v23 = vadd.f32 %v4827_v57, %v2108_v13  ;;  %v1667_v25 = vpop.f32.mrf.mxu1  ;;  %v3294_v41 = vmax.f32 %v3098_v5, %v3196_v6 }
 0x1ef   : > { %v3099_v21 = vmax.f32 %v2908_v7, %v2909_v11  ;;  %v2110_v24 = vmul.f32 %v4816_v50, %v1144_v20  ;;  %v2521_v27 = vadd.f32 %v4830_v58, %v2107_v18  ;;  %v2523_v28 = vadd.f32 %v4834_v61, %v2109_v19 }
 0x1f0   : > { %v2912_v26 = vmax.f32 %v2520_v17, 0.0  ;;  %v2112_v29 = vmul.f32 %v4818_v51, %v1667_v25  ;;  %v1146_v30 = vpop.f32.mrf.mxu0  ;;  %v3197_v31 = vmax.f32 %v2910_v16, %v2911_v22  ;;  %v2914_v32 = vmax.f32 %v2522_v23, 0.0  ;;  %v1669_v35 = vpop.f32.mrf.mxu1 }
 0x1f1   : > { %v2524_v33 = vadd.f32 %v4820_v52, %v2110_v24  ;;  %v2111_v34 = vmul.f32 %v4822_v53, %v1146_v30  ;;  %v2913_v36 = vmax.f32 %v2521_v27, 0.0  ;;  %v2915_v37 = vmax.f32 %v2523_v28, 0.0 }
 0x1f2   : > { %v2526_v38 = vadd.f32 %v4827_v57, %v2112_v29  ;;  %v2113_v39 = vmul.f32 %v4824_v54, %v1669_v35  ;;  %v1150_v40 = vpop.f32.mrf.mxu0  ;;  %v3295_v42 = vmax.f32 %v3099_v21, %v3197_v31  ;;  %v1673_v45 = vpop.f32.mrf.mxu1 }
 0x1f3   : > { %v2525_v43 = vadd.f32 %v4830_v58, %v2111_v34  ;;  %v2114_v44 = vmul.f32 %v4816_v50, %v1150_v40  ;;  %v3100_v14 = vmax.f32 %v2912_v26, %v2913_v36  ;;  %v3198_v46 = vmax.f32 %v2914_v32, %v2915_v37 }
 0x1f4   : > { %v2916_v47 = vmax.f32 %v2524_v33, 0.0  ;;  %v2527_v48 = vadd.f32 %v4834_v61, %v2113_v39  ;;  %v1152_v49 = vpop.f32.mrf.mxu0  ;;  %v4406_v55 = vpack.c.bf16 %v3295_v42, %v3294_v41  ;;  %v2116_v60 = vmul.f32 %v4818_v51, %v1673_v45  ;;  %v1675_v62 = vpop.f32.mrf.mxu1 }
 0x1f5   : > { %v2917_v56 = vmax.f32 %v2525_v43, 0.0  ;;  %v2528_v59 = vadd.f32 %v4820_v52, %v2114_v44  ;;  %v2918_v63 = vmax.f32 %v2526_v38, 0.0  ;;  %v2115_v1 = vmul.f32 %v4822_v53, %v1152_v49 }
 0x1f6   : > { %v2919_v0 = vmax.f32 %v2527_v48, 0.0  ;;  %v2117_v2 = vmul.f32 %v4824_v54, %v1675_v62  ;;  %v1154_v3 = vpop.f32.mrf.mxu0  ;;  %4515 = vst [vmem:[%s4875_s24 + $0x108] sm:$0xff] %v4406_v55   ;;  %v2530_v5 = vadd.f32 %v4827_v57, %v2116_v60  ;;  %v1677_v7 = vpop.f32.mrf.mxu1  ;;  %v3296_v13 = vmax.f32 %v3100_v14, %v3198_v46 }
 0x1f7   : > { %v3101_v4 = vmax.f32 %v2916_v47, %v2917_v56  ;;  %v2118_v6 = vmul.f32 %v4816_v50, %v1154_v3  ;;  %v2529_v9 = vadd.f32 %v4830_v58, %v2115_v1  ;;  %v2120_v11 = vmul.f32 %v4818_v51, %v1677_v7 }
 0x1f8   : > { %v3199_v8 = vmax.f32 %v2918_v63, %v2919_v0  ;;  %v2531_v10 = vadd.f32 %v4834_v61, %v2117_v2  ;;  %v1156_v12 = vpop.f32.mrf.mxu0  ;;  %v2920_v15 = vmax.f32 %v2528_v59, 0.0  ;;  %v1679_v18 = vpop.f32.mrf.mxu1  ;;  %v2922_v20 = vmax.f32 %v2530_v5, 0.0 }
 0x1f9   : > { %v2532_v16 = vadd.f32 %v4820_v52, %v2118_v6  ;;  %v2119_v17 = vmul.f32 %v4822_v53, %v1156_v12  ;;  %v2921_v21 = vmax.f32 %v2529_v9, 0.0  ;;  %v2534_v24 = vadd.f32 %v4827_v57, %v2120_v11 }
 0x1fa   : > { %v3297_v19 = vmax.f32 %v3101_v4, %v3199_v8  ;;  %v2923_v22 = vmax.f32 %v2531_v10, 0.0  ;;  %v1160_v23 = vpop.f32.mrf.mxu0  ;;  %v2121_v26 = vmul.f32 %v4824_v54, %v1679_v18  ;;  %v1683_v28 = vpop.f32.mrf.mxu1 }
 0x1fb   : > { %v2533_v25 = vadd.f32 %v4830_v58, %v2119_v17  ;;  %v2122_v27 = vmul.f32 %v4816_v50, %v1160_v23  ;;  %v3102_v30 = vmax.f32 %v2920_v15, %v2921_v21  ;;  %v2924_v32 = vmax.f32 %v2532_v16, 0.0 }
 0x1fc   : > { %v4411_v29 = vpack.c.bf16 %v3297_v19, %v3296_v13  ;;  %v3200_v31 = vmax.f32 %v2922_v20, %v2923_v22  ;;  %v1162_v33 = vpop.f32.mrf.mxu0  ;;  %v2535_v35 = vadd.f32 %v4834_v61, %v2121_v26  ;;  %v2124_v37 = vmul.f32 %v4818_v51, %v1683_v28  ;;  %v1685_v38 = vpop.f32.mrf.mxu1 }
 0x1fd   : > { %v2925_v34 = vmax.f32 %v2533_v25, 0.0  ;;  %v2536_v36 = vadd.f32 %v4820_v52, %v2122_v27  ;;  %v2123_v39 = vmul.f32 %v4822_v53, %v1162_v33  ;;  %v2125_v40 = vmul.f32 %v4824_v54, %v1685_v38 }
 0x1fe   : > { %4516 = vst [vmem:[%s4875_s24 + $0x110] sm:$0xff] %v4411_v29   ;;  %v1164_v41 = vpop.f32.mrf.mxu0  ;;  %v2926_v42 = vmax.f32 %v2534_v24, 0.0  ;;  %v2927_v44 = vmax.f32 %v2535_v35, 0.0  ;;  %v2538_v45 = vadd.f32 %v4827_v57, %v2124_v37  ;;  %v1687_v14 = vpop.f32.mrf.mxu1  ;;  %v3298_v56 = vmax.f32 %v3102_v30, %v3200_v31 }
 0x1ff   : > { %v3103_v43 = vmax.f32 %v2924_v32, %v2925_v34  ;;  %v2537_v46 = vadd.f32 %v4830_v58, %v2123_v39  ;;  %v2539_v47 = vadd.f32 %v4834_v61, %v2125_v40  ;;  %v2126_v48 = vmul.f32 %v4816_v50, %v1164_v41 }
 0x200   : > { %v2128_v49 = vmul.f32 %v4818_v51, %v1687_v14  ;;  %v1166_v55 = vpop.f32.mrf.mxu0  ;;  %v3201_v59 = vmax.f32 %v2926_v42, %v2927_v44  ;;  %v2928_v60 = vmax.f32 %v2536_v36, 0.0  ;;  %v1689_v63 = vpop.f32.mrf.mxu1  ;;  %v2930_v10 = vmax.f32 %v2538_v45, 0.0 }
 0x201   : > { %v2127_v62 = vmul.f32 %v4822_v53, %v1166_v55  ;;  %v2929_v0 = vmax.f32 %v2537_v46, 0.0  ;;  %v2931_v1 = vmax.f32 %v2539_v47, 0.0  ;;  %v2540_v2 = vadd.f32 %v4820_v52, %v2126_v48 }
 0x202   : > { %v2542_v3 = vadd.f32 %v4827_v57, %v2128_v49  ;;  %v1170_v4 = vpop.f32.mrf.mxu0  ;;  %v3299_v5 = vmax.f32 %v3103_v43, %v3201_v59  ;;  %v2129_v7 = vmul.f32 %v4824_v54, %v1689_v63  ;;  %v1693_v9 = vpop.f32.mrf.mxu1 }
 0x203   : > { %v2541_v6 = vadd.f32 %v4830_v58, %v2127_v62  ;;  %v2130_v8 = vmul.f32 %v4816_v50, %v1170_v4  ;;  %v3104_v11 = vmax.f32 %v2928_v60, %v2929_v0  ;;  %v2932_v12 = vmax.f32 %v2540_v2, 0.0 }
 0x204   : > { %v1172_v13 = vpop.f32.mrf.mxu0  ;;  %v4416_v15 = vpack.c.bf16 %v3299_v5, %v3298_v56  ;;  %v2543_v17 = vadd.f32 %v4834_v61, %v2129_v7  ;;  %v1695_v19 = vpop.f32.mrf.mxu1  ;;  %v3202_v20 = vmax.f32 %v2930_v10, %v2931_v1  ;;  %v2132_v21 = vmul.f32 %v4818_v51, %v1693_v9 }
 0x205   : > { %v2933_v16 = vmax.f32 %v2541_v6, 0.0  ;;  %v2544_v18 = vadd.f32 %v4820_v52, %v2130_v8  ;;  %v2131_v22 = vmul.f32 %v4822_v53, %v1172_v13  ;;  %v2133_v23 = vmul.f32 %v4824_v54, %v1695_v19 }
 0x206   : > { %v1174_v24 = vpop.f32.mrf.mxu0  ;;  %4517 = vst [vmem:[%s4875_s24 + $0x118] sm:$0xff] %v4416_v15   ;;  %v2934_v25 = vmax.f32 %v2542_v3, 0.0  ;;  %v2935_v27 = vmax.f32 %v2543_v17, 0.0  ;;  %v1697_v29 = vpop.f32.mrf.mxu1  ;;  %v2546_v30 = vadd.f32 %v4827_v57, %v2132_v21  ;;  %v3300_v45 = vmax.f32 %v3104_v11, %v3202_v20 }
 0x207   : > { %v3105_v26 = vmax.f32 %v2932_v12, %v2933_v16  ;;  %v2134_v28 = vmul.f32 %v4816_v50, %v1174_v24  ;;  %v2545_v31 = vadd.f32 %v4830_v58, %v2131_v22  ;;  %v2547_v32 = vadd.f32 %v4834_v61, %v2133_v23 }
 0x208   : > { %v2136_v33 = vmul.f32 %v4818_v51, %v1697_v29  ;;  %v1176_v34 = vpop.f32.mrf.mxu0  ;;  %v3203_v35 = vmax.f32 %v2934_v25, %v2935_v27  ;;  %v2936_v36 = vmax.f32 %v2544_v18, 0.0  ;;  %v1699_v39 = vpop.f32.mrf.mxu1  ;;  %v2938_v40 = vmax.f32 %v2546_v30, 0.0 }
 0x209   : > { %v2548_v37 = vadd.f32 %v4820_v52, %v2134_v28  ;;  %v2135_v38 = vmul.f32 %v4822_v53, %v1176_v34  ;;  %v2937_v41 = vmax.f32 %v2545_v31, 0.0  ;;  %v2939_v42 = vmax.f32 %v2547_v32, 0.0 }
 0x20a   : > { %v2550_v43 = vadd.f32 %v4827_v57, %v2136_v33  ;;  %v1180_v44 = vpop.f32.mrf.mxu0  ;;  %v3301_v14 = vmax.f32 %v3105_v26, %v3203_v35  ;;  %v2137_v47 = vmul.f32 %v4824_v54, %v1699_v39  ;;  %v1703_v48 = vpop.f32.mrf.mxu1 }
 0x20b   : > { %v2549_v46 = vadd.f32 %v4830_v58, %v2135_v38  ;;  %v3106_v49 = vmax.f32 %v2936_v36, %v2937_v41  ;;  %v3204_v55 = vmax.f32 %v2938_v40, %v2939_v42  ;;  %v2940_v56 = vmax.f32 %v2548_v37, 0.0 }
 0x20c   : > { %v2138_v59 = vmul.f32 %v4816_v50, %v1180_v44  ;;  %v1182_v60 = vpop.f32.mrf.mxu0  ;;  %v4421_v62 = vpack.c.bf16 %v3301_v14, %v3300_v45  ;;  %v2551_v0 = vadd.f32 %v4834_v61, %v2137_v47  ;;  %v2140_v1 = vmul.f32 %v4818_v51, %v1703_v48  ;;  %v1705_v2 = vpop.f32.mrf.mxu1 }
 0x20d   : > { %v2941_v63 = vmax.f32 %v2549_v46, 0.0  ;;  %v2942_v3 = vmax.f32 %v2550_v43, 0.0  ;;  %v2139_v5 = vmul.f32 %v4822_v53, %v1182_v60  ;;  %v2141_v6 = vmul.f32 %v4824_v54, %v1705_v2 }
 0x20e   : > { %v2552_v4 = vadd.f32 %v4820_v52, %v2138_v59  ;;  %v1184_v7 = vpop.f32.mrf.mxu0  ;;  %4518 = vst [vmem:[%s4875_s24 + $0x120] sm:$0xff] %v4421_v62   ;;  %v2943_v9 = vmax.f32 %v2551_v0, 0.0  ;;  %v2554_v10 = vadd.f32 %v4827_v57, %v2140_v1  ;;  %v1707_v12 = vpop.f32.mrf.mxu1  ;;  %v3302_v29 = vmax.f32 %v3106_v49, %v3204_v55 }
 0x20f   : > { %v3107_v8 = vmax.f32 %v2940_v56, %v2941_v63  ;;  %v2142_v11 = vmul.f32 %v4816_v50, %v1184_v7  ;;  %v2553_v15 = vadd.f32 %v4830_v58, %v2139_v5  ;;  %v2555_v16 = vadd.f32 %v4834_v61, %v2141_v6 }
 0x210   : > { %v2944_v13 = vmax.f32 %v2552_v4, 0.0  ;;  %v2144_v17 = vmul.f32 %v4818_v51, %v1707_v12  ;;  %v1186_v18 = vpop.f32.mrf.mxu0  ;;  %v3205_v19 = vmax.f32 %v2942_v3, %v2943_v9  ;;  %v2946_v20 = vmax.f32 %v2554_v10, 0.0  ;;  %v1709_v23 = vpop.f32.mrf.mxu1 }
 0x211   : > { %v2556_v21 = vadd.f32 %v4820_v52, %v2142_v11  ;;  %v2143_v22 = vmul.f32 %v4822_v53, %v1186_v18  ;;  %v2945_v24 = vmax.f32 %v2553_v15, 0.0  ;;  %v2947_v25 = vmax.f32 %v2555_v16, 0.0 }
 0x212   : > { %v2558_v26 = vadd.f32 %v4827_v57, %v2144_v17  ;;  %v2145_v27 = vmul.f32 %v4824_v54, %v1709_v23  ;;  %v1190_v28 = vpop.f32.mrf.mxu0  ;;  %v3303_v30 = vmax.f32 %v3107_v8, %v3205_v19  ;;  %v1713_v33 = vpop.f32.mrf.mxu1 }
 0x213   : > { %v2557_v31 = vadd.f32 %v4830_v58, %v2143_v22  ;;  %v2146_v32 = vmul.f32 %v4816_v50, %v1190_v28  ;;  %v3108_v34 = vmax.f32 %v2944_v13, %v2945_v24  ;;  %v3206_v35 = vmax.f32 %v2946_v20, %v2947_v25 }
 0x214   : > { %v2948_v36 = vmax.f32 %v2556_v21, 0.0  ;;  %v2559_v37 = vadd.f32 %v4834_v61, %v2145_v27  ;;  %v1192_v38 = vpop.f32.mrf.mxu0  ;;  %v4426_v39 = vpack.c.bf16 %v3303_v30, %v3302_v29  ;;  %v2148_v42 = vmul.f32 %v4818_v51, %v1713_v33  ;;  %v1715_v43 = vpop.f32.mrf.mxu1 }
 0x215   : > { %v2949_v40 = vmax.f32 %v2557_v31, 0.0  ;;  %v2560_v41 = vadd.f32 %v4820_v52, %v2146_v32  ;;  %v2950_v44 = vmax.f32 %v2558_v26, 0.0  ;;  %v2147_v14 = vmul.f32 %v4822_v53, %v1192_v38 }
 0x216   : > { %v2951_v45 = vmax.f32 %v2559_v37, 0.0  ;;  %v2149_v46 = vmul.f32 %v4824_v54, %v1715_v43  ;;  %v1194_v47 = vpop.f32.mrf.mxu0  ;;  %4519 = vst [vmem:[%s4875_s24 + $0x128] sm:$0xff] %v4426_v39   ;;  %v2562_v49 = vadd.f32 %v4827_v57, %v2148_v42  ;;  %v1717_v56 = vpop.f32.mrf.mxu1  ;;  %v3304_v1 = vmax.f32 %v3108_v34, %v3206_v35 }
 0x217   : > { %v3109_v48 = vmax.f32 %v2948_v36, %v2949_v40  ;;  %v2150_v55 = vmul.f32 %v4816_v50, %v1194_v47  ;;  %v2561_v60 = vadd.f32 %v4830_v58, %v2147_v14  ;;  %v2152_v63 = vmul.f32 %v4818_v51, %v1717_v56 }
 0x218   : > { %v3207_v59 = vmax.f32 %v2950_v44, %v2951_v45  ;;  %v2563_v62 = vadd.f32 %v4834_v61, %v2149_v46  ;;  %v1196_v0 = vpop.f32.mrf.mxu0  ;;  %v2952_v2 = vmax.f32 %v2560_v41, 0.0  ;;  %v1719_v5 = vpop.f32.mrf.mxu1  ;;  %v2954_v7 = vmax.f32 %v2562_v49, 0.0 }
 0x219   : > { %v2564_v3 = vadd.f32 %v4820_v52, %v2150_v55  ;;  %v2151_v4 = vmul.f32 %v4822_v53, %v1196_v0  ;;  %v2953_v8 = vmax.f32 %v2561_v60, 0.0  ;;  %v2566_v11 = vadd.f32 %v4827_v57, %v2152_v63 }
 0x21a   : > { %v3305_v6 = vmax.f32 %v3109_v48, %v3207_v59  ;;  %v2955_v9 = vmax.f32 %v2563_v62, 0.0  ;;  %v1200_v10 = vpop.f32.mrf.mxu0  ;;  %v2153_v13 = vmul.f32 %v4824_v54, %v1719_v5  ;;  %v1723_v16 = vpop.f32.mrf.mxu1 }
 0x21b   : > { %v2565_v12 = vadd.f32 %v4830_v58, %v2151_v4  ;;  %v2154_v15 = vmul.f32 %v4816_v50, %v1200_v10  ;;  %v3110_v18 = vmax.f32 %v2952_v2, %v2953_v8  ;;  %v2956_v20 = vmax.f32 %v2564_v3, 0.0 }
 0x21c   : > { %v4431_v17 = vpack.c.bf16 %v3305_v6, %v3304_v1  ;;  %v3208_v19 = vmax.f32 %v2954_v7, %v2955_v9  ;;  %v1202_v21 = vpop.f32.mrf.mxu0  ;;  %v2567_v23 = vadd.f32 %v4834_v61, %v2153_v13  ;;  %v2156_v25 = vmul.f32 %v4818_v51, %v1723_v16  ;;  %v1725_v26 = vpop.f32.mrf.mxu1 }
 0x21d   : > { %v2957_v22 = vmax.f32 %v2565_v12, 0.0  ;;  %v2568_v24 = vadd.f32 %v4820_v52, %v2154_v15  ;;  %v2155_v27 = vmul.f32 %v4822_v53, %v1202_v21  ;;  %v2157_v28 = vmul.f32 %v4824_v54, %v1725_v26 }
 0x21e   : > { %4520 = vst [vmem:[%s4875_s24 + $0x130] sm:$0xff] %v4431_v17   ;;  %v1204_v29 = vpop.f32.mrf.mxu0  ;;  %v2958_v30 = vmax.f32 %v2566_v11, 0.0  ;;  %v2959_v32 = vmax.f32 %v2567_v23, 0.0  ;;  %v2570_v33 = vadd.f32 %v4827_v57, %v2156_v25  ;;  %v1727_v34 = vpop.f32.mrf.mxu1  ;;  %v3306_v40 = vmax.f32 %v3110_v18, %v3208_v19 }
 0x21f   : > { %v3111_v31 = vmax.f32 %v2956_v20, %v2957_v22  ;;  %v2569_v35 = vadd.f32 %v4830_v58, %v2155_v27  ;;  %v2571_v36 = vadd.f32 %v4834_v61, %v2157_v28  ;;  %v2158_v37 = vmul.f32 %v4816_v50, %v1204_v29 }
 0x220   : > { %v2160_v38 = vmul.f32 %v4818_v51, %v1727_v34  ;;  %v1206_v39 = vpop.f32.mrf.mxu0  ;;  %v3209_v41 = vmax.f32 %v2958_v30, %v2959_v32  ;;  %v2960_v42 = vmax.f32 %v2568_v24, 0.0  ;;  %v1729_v44 = vpop.f32.mrf.mxu1  ;;  %v2962_v62 = vmax.f32 %v2570_v33, 0.0 }
 0x221   : > { %v2159_v43 = vmul.f32 %v4822_v53, %v1206_v39  ;;  %v2961_v45 = vmax.f32 %v2569_v35, 0.0  ;;  %v2963_v14 = vmax.f32 %v2571_v36, 0.0  ;;  %v2572_v46 = vadd.f32 %v4820_v52, %v2158_v37 }
 0x222   : > { %v2574_v47 = vadd.f32 %v4827_v57, %v2160_v38  ;;  %v1210_v48 = vpop.f32.mrf.mxu0  ;;  %v3307_v49 = vmax.f32 %v3111_v31, %v3209_v41  ;;  %v2161_v56 = vmul.f32 %v4824_v54, %v1729_v44  ;;  %v1733_v60 = vpop.f32.mrf.mxu1 }
 0x223   : > { %v2573_v55 = vadd.f32 %v4830_v58, %v2159_v43  ;;  %v2162_v59 = vmul.f32 %v4816_v50, %v1210_v48  ;;  %v3112_v63 = vmax.f32 %v2960_v42, %v2961_v45  ;;  %v2964_v0 = vmax.f32 %v2572_v46, 0.0 }
 0x224   : > { %v1212_v1 = vpop.f32.mrf.mxu0  ;;  %v4436_v2 = vpack.c.bf16 %v3307_v49, %v3306_v40  ;;  %v2575_v4 = vadd.f32 %v4834_v61, %v2161_v56  ;;  %v1735_v6 = vpop.f32.mrf.mxu1  ;;  %v3210_v7 = vmax.f32 %v2962_v62, %v2963_v14  ;;  %v2164_v8 = vmul.f32 %v4818_v51, %v1733_v60 }
 0x225   : > { %v2965_v3 = vmax.f32 %v2573_v55, 0.0  ;;  %v2576_v5 = vadd.f32 %v4820_v52, %v2162_v59  ;;  %v2163_v9 = vmul.f32 %v4822_v53, %v1212_v1  ;;  %v2165_v10 = vmul.f32 %v4824_v54, %v1735_v6 }
 0x226   : > { %v1214_v11 = vpop.f32.mrf.mxu0  ;;  %4521 = vst [vmem:[%s4875_s24 + $0x138] sm:$0xff] %v4436_v2   ;;  %v2966_v12 = vmax.f32 %v2574_v47, 0.0  ;;  %v2967_v15 = vmax.f32 %v2575_v4, 0.0  ;;  %v1737_v17 = vpop.f32.mrf.mxu1  ;;  %v2578_v18 = vadd.f32 %v4827_v57, %v2164_v8  ;;  %v3308_v33 = vmax.f32 %v3112_v63, %v3210_v7 }
 0x227   : > { %v3113_v13 = vmax.f32 %v2964_v0, %v2965_v3  ;;  %v2166_v16 = vmul.f32 %v4816_v50, %v1214_v11  ;;  %v2577_v19 = vadd.f32 %v4830_v58, %v2163_v9  ;;  %v2579_v20 = vadd.f32 %v4834_v61, %v2165_v10 }
 0x228   : > { %v2168_v21 = vmul.f32 %v4818_v51, %v1737_v17  ;;  %v1216_v22 = vpop.f32.mrf.mxu0  ;;  %v3211_v23 = vmax.f32 %v2966_v12, %v2967_v15  ;;  %v2968_v24 = vmax.f32 %v2576_v5, 0.0  ;;  %v1739_v27 = vpop.f32.mrf.mxu1  ;;  %v2970_v28 = vmax.f32 %v2578_v18, 0.0 }
 0x229   : > { %v2580_v25 = vadd.f32 %v4820_v52, %v2166_v16  ;;  %v2167_v26 = vmul.f32 %v4822_v53, %v1216_v22  ;;  %v2969_v29 = vmax.f32 %v2577_v19, 0.0  ;;  %v2971_v30 = vmax.f32 %v2579_v20, 0.0 }
 0x22a   : > { %v2582_v31 = vadd.f32 %v4827_v57, %v2168_v21  ;;  %v1220_v32 = vpop.f32.mrf.mxu0  ;;  %v3309_v34 = vmax.f32 %v3113_v13, %v3211_v23  ;;  %v2169_v36 = vmul.f32 %v4824_v54, %v1739_v27  ;;  %v1743_v37 = vpop.f32.mrf.mxu1 }
 0x22b   : > { %v2581_v35 = vadd.f32 %v4830_v58, %v2167_v26  ;;  %v3114_v38 = vmax.f32 %v2968_v24, %v2969_v29  ;;  %v3212_v39 = vmax.f32 %v2970_v28, %v2971_v30  ;;  %v2972_v40 = vmax.f32 %v2580_v25, 0.0 }
 0x22c   : > { %v2170_v41 = vmul.f32 %v4816_v50, %v1220_v32  ;;  %v1222_v42 = vpop.f32.mrf.mxu0  ;;  %v4441_v43 = vpack.c.bf16 %v3309_v34, %v3308_v33  ;;  %v2583_v45 = vadd.f32 %v4834_v61, %v2169_v36  ;;  %v2172_v14 = vmul.f32 %v4818_v51, %v1743_v37  ;;  %v1745_v46 = vpop.f32.mrf.mxu1 }
 0x22d   : > { %v2973_v44 = vmax.f32 %v2581_v35, 0.0  ;;  %v2974_v47 = vmax.f32 %v2582_v31, 0.0  ;;  %v2171_v49 = vmul.f32 %v4822_v53, %v1222_v42  ;;  %v2173_v55 = vmul.f32 %v4824_v54, %v1745_v46 }
 0x22e   : > { %v2584_v48 = vadd.f32 %v4820_v52, %v2170_v41  ;;  %v1224_v56 = vpop.f32.mrf.mxu0  ;;  %4522 = vst [vmem:[%s4875_s24 + $0x140] sm:$0xff] %v4441_v43   ;;  %v2975_v60 = vmax.f32 %v2583_v45, 0.0  ;;  %v2586_v62 = vadd.f32 %v4827_v57, %v2172_v14  ;;  %v1747_v0 = vpop.f32.mrf.mxu1  ;;  %v3310_v17 = vmax.f32 %v3114_v38, %v3212_v39 }
 0x22f   : > { %v3115_v59 = vmax.f32 %v2972_v40, %v2973_v44  ;;  %v2174_v63 = vmul.f32 %v4816_v50, %v1224_v56  ;;  %v2585_v2 = vadd.f32 %v4830_v58, %v2171_v49  ;;  %v2587_v3 = vadd.f32 %v4834_v61, %v2173_v55 }
 0x230   : > { %v2976_v1 = vmax.f32 %v2584_v48, 0.0  ;;  %v2176_v4 = vmul.f32 %v4818_v51, %v1747_v0  ;;  %v1226_v5 = vpop.f32.mrf.mxu0  ;;  %v3213_v6 = vmax.f32 %v2974_v47, %v2975_v60  ;;  %v2978_v7 = vmax.f32 %v2586_v62, 0.0  ;;  %v1749_v10 = vpop.f32.mrf.mxu1 }
 0x231   : > { %v2588_v8 = vadd.f32 %v4820_v52, %v2174_v63  ;;  %v2175_v9 = vmul.f32 %v4822_v53, %v1226_v5  ;;  %v2977_v11 = vmax.f32 %v2585_v2, 0.0  ;;  %v2979_v12 = vmax.f32 %v2587_v3, 0.0 }
 0x232   : > { %v2590_v13 = vadd.f32 %v4827_v57, %v2176_v4  ;;  %v2177_v15 = vmul.f32 %v4824_v54, %v1749_v10  ;;  %v1230_v16 = vpop.f32.mrf.mxu0  ;;  %v3311_v18 = vmax.f32 %v3115_v59, %v3213_v6  ;;  %v1753_v21 = vpop.f32.mrf.mxu1 }
 0x233   : > { %v2589_v19 = vadd.f32 %v4830_v58, %v2175_v9  ;;  %v2178_v20 = vmul.f32 %v4816_v50, %v1230_v16  ;;  %v3116_v22 = vmax.f32 %v2976_v1, %v2977_v11  ;;  %v3214_v23 = vmax.f32 %v2978_v7, %v2979_v12 }
 0x234   : > { %v2980_v24 = vmax.f32 %v2588_v8, 0.0  ;;  %v2591_v25 = vadd.f32 %v4834_v61, %v2177_v15  ;;  %v1232_v26 = vpop.f32.mrf.mxu0  ;;  %v4446_v27 = vpack.c.bf16 %v3311_v18, %v3310_v17  ;;  %v2180_v30 = vmul.f32 %v4818_v51, %v1753_v21  ;;  %v1755_v31 = vpop.f32.mrf.mxu1 }
 0x235   : > { %v2981_v28 = vmax.f32 %v2589_v19, 0.0  ;;  %v2592_v29 = vadd.f32 %v4820_v52, %v2178_v20  ;;  %v2982_v32 = vmax.f32 %v2590_v13, 0.0  ;;  %v2179_v34 = vmul.f32 %v4822_v53, %v1232_v26 }
 0x236   : > { %v2983_v33 = vmax.f32 %v2591_v25, 0.0  ;;  %v2181_v35 = vmul.f32 %v4824_v54, %v1755_v31  ;;  %v1234_v36 = vpop.f32.mrf.mxu0  ;;  %4523 = vst [vmem:[%s4875_s24 + $0x148] sm:$0xff] %v4446_v27   ;;  %v2594_v38 = vadd.f32 %v4827_v57, %v2180_v30  ;;  %v1757_v40 = vpop.f32.mrf.mxu1  ;;  %v3312_v14 = vmax.f32 %v3116_v22, %v3214_v23 }
 0x237   : > { %v3117_v37 = vmax.f32 %v2980_v24, %v2981_v28  ;;  %v2182_v39 = vmul.f32 %v4816_v50, %v1234_v36  ;;  %v2593_v42 = vadd.f32 %v4830_v58, %v2179_v34  ;;  %v2184_v44 = vmul.f32 %v4818_v51, %v1757_v40 }
 0x238   : > { %v3215_v41 = vmax.f32 %v2982_v32, %v2983_v33  ;;  %v2595_v43 = vadd.f32 %v4834_v61, %v2181_v35  ;;  %v1236_v45 = vpop.f32.mrf.mxu0  ;;  %v2984_v46 = vmax.f32 %v2592_v29, 0.0  ;;  %v1759_v49 = vpop.f32.mrf.mxu1  ;;  %v2986_v56 = vmax.f32 %v2594_v38, 0.0 }
 0x239   : > { %v2596_v47 = vadd.f32 %v4820_v52, %v2182_v39  ;;  %v2183_v48 = vmul.f32 %v4822_v53, %v1236_v45  ;;  %v2985_v59 = vmax.f32 %v2593_v42, 0.0  ;;  %v2598_v63 = vadd.f32 %v4827_v57, %v2184_v44 }
 0x23a   : > { %v3313_v55 = vmax.f32 %v3117_v37, %v3215_v41  ;;  %v2987_v60 = vmax.f32 %v2595_v43, 0.0  ;;  %v1240_v62 = vpop.f32.mrf.mxu0  ;;  %v2185_v1 = vmul.f32 %v4824_v54, %v1759_v49  ;;  %v1763_v3 = vpop.f32.mrf.mxu1 }
 0x23b   : > { %v2597_v0 = vadd.f32 %v4830_v58, %v2183_v48  ;;  %v2186_v2 = vmul.f32 %v4816_v50, %v1240_v62  ;;  %v3118_v5 = vmax.f32 %v2984_v46, %v2985_v59  ;;  %v2988_v7 = vmax.f32 %v2596_v47, 0.0 }
 0x23c   : > { %v4451_v4 = vpack.c.bf16 %v3313_v55, %v3312_v14  ;;  %v3216_v6 = vmax.f32 %v2986_v56, %v2987_v60  ;;  %v1242_v8 = vpop.f32.mrf.mxu0  ;;  %v2599_v10 = vadd.f32 %v4834_v61, %v2185_v1  ;;  %v2188_v12 = vmul.f32 %v4818_v51, %v1763_v3  ;;  %v1765_v13 = vpop.f32.mrf.mxu1 }
 0x23d   : > { %v2989_v9 = vmax.f32 %v2597_v0, 0.0  ;;  %v2600_v11 = vadd.f32 %v4820_v52, %v2186_v2  ;;  %v2187_v15 = vmul.f32 %v4822_v53, %v1242_v8  ;;  %v2189_v16 = vmul.f32 %v4824_v54, %v1765_v13 }
 0x23e   : > { %4524 = vst [vmem:[%s4875_s24 + $0x150] sm:$0xff] %v4451_v4   ;;  %v1244_v17 = vpop.f32.mrf.mxu0  ;;  %v2990_v18 = vmax.f32 %v2598_v63, 0.0  ;;  %v2991_v20 = vmax.f32 %v2599_v10, 0.0  ;;  %v2602_v21 = vadd.f32 %v4827_v57, %v2188_v12  ;;  %v1767_v22 = vpop.f32.mrf.mxu1  ;;  %v3314_v28 = vmax.f32 %v3118_v5, %v3216_v6 }
 0x23f   : > { %v3119_v19 = vmax.f32 %v2988_v7, %v2989_v9  ;;  %v2601_v23 = vadd.f32 %v4830_v58, %v2187_v15  ;;  %v2603_v24 = vadd.f32 %v4834_v61, %v2189_v16  ;;  %v2190_v25 = vmul.f32 %v4816_v50, %v1244_v17 }
 0x240   : > { %v2192_v26 = vmul.f32 %v4818_v51, %v1767_v22  ;;  %v1246_v27 = vpop.f32.mrf.mxu0  ;;  %v3217_v29 = vmax.f32 %v2990_v18, %v2991_v20  ;;  %v2992_v30 = vmax.f32 %v2600_v11, 0.0  ;;  %v1769_v32 = vpop.f32.mrf.mxu1  ;;  %v2994_v43 = vmax.f32 %v2602_v21, 0.0 }
 0x241   : > { %v2191_v31 = vmul.f32 %v4822_v53, %v1246_v27  ;;  %v2993_v33 = vmax.f32 %v2601_v23, 0.0  ;;  %v2995_v34 = vmax.f32 %v2603_v24, 0.0  ;;  %v2604_v35 = vadd.f32 %v4820_v52, %v2190_v25 }
 0x242   : > { %v2606_v36 = vadd.f32 %v4827_v57, %v2192_v26  ;;  %v1250_v37 = vpop.f32.mrf.mxu0  ;;  %v3315_v38 = vmax.f32 %v3119_v19, %v3217_v29  ;;  %v2193_v40 = vmul.f32 %v4824_v54, %v1769_v32  ;;  %v1773_v42 = vpop.f32.mrf.mxu1 }
 0x243   : > { %v2605_v39 = vadd.f32 %v4830_v58, %v2191_v31  ;;  %v2194_v41 = vmul.f32 %v4816_v50, %v1250_v37  ;;  %v3120_v44 = vmax.f32 %v2992_v30, %v2993_v33  ;;  %v2996_v45 = vmax.f32 %v2604_v35, 0.0 }
 0x244   : > { %v1252_v14 = vpop.f32.mrf.mxu0  ;;  %v4456_v46 = vpack.c.bf16 %v3315_v38, %v3314_v28  ;;  %v2607_v48 = vadd.f32 %v4834_v61, %v2193_v40  ;;  %v1775_v55 = vpop.f32.mrf.mxu1  ;;  %v3218_v56 = vmax.f32 %v2994_v43, %v2995_v34  ;;  %v2196_v59 = vmul.f32 %v4818_v51, %v1773_v42 }
 0x245   : > { %v2997_v47 = vmax.f32 %v2605_v39, 0.0  ;;  %v2608_v49 = vadd.f32 %v4820_v52, %v2194_v41  ;;  %v2195_v60 = vmul.f32 %v4822_v53, %v1252_v14  ;;  %v2197_v62 = vmul.f32 %v4824_v54, %v1775_v55 }
 0x246   : > { %v1254_v63 = vpop.f32.mrf.mxu0  ;;  %4525 = vst [vmem:[%s4875_s24 + $0x158] sm:$0xff] %v4456_v46   ;;  %v2998_v0 = vmax.f32 %v2606_v36, 0.0  ;;  %v2999_v2 = vmax.f32 %v2607_v48, 0.0  ;;  %v1777_v4 = vpop.f32.mrf.mxu1  ;;  %v2610_v5 = vadd.f32 %v4827_v57, %v2196_v59  ;;  %v3316_v21 = vmax.f32 %v3120_v44, %v3218_v56 }
 0x247   : > { %v3121_v1 = vmax.f32 %v2996_v45, %v2997_v47  ;;  %v2198_v3 = vmul.f32 %v4816_v50, %v1254_v63  ;;  %v2609_v6 = vadd.f32 %v4830_v58, %v2195_v60  ;;  %v2611_v7 = vadd.f32 %v4834_v61, %v2197_v62 }
 0x248   : > { %v2200_v8 = vmul.f32 %v4818_v51, %v1777_v4  ;;  %v1256_v9 = vpop.f32.mrf.mxu0  ;;  %v3219_v10 = vmax.f32 %v2998_v0, %v2999_v2  ;;  %v3000_v11 = vmax.f32 %v2608_v49, 0.0  ;;  %v1779_v15 = vpop.f32.mrf.mxu1  ;;  %v3002_v16 = vmax.f32 %v2610_v5, 0.0 }
 0x249   : > { %v2612_v12 = vadd.f32 %v4820_v52, %v2198_v3  ;;  %v2199_v13 = vmul.f32 %v4822_v53, %v1256_v9  ;;  %v3001_v17 = vmax.f32 %v2609_v6, 0.0  ;;  %v3003_v18 = vmax.f32 %v2611_v7, 0.0 }
 0x24a   : > { %v2614_v19 = vadd.f32 %v4827_v57, %v2200_v8  ;;  %v1260_v20 = vpop.f32.mrf.mxu0  ;;  %v3317_v22 = vmax.f32 %v3121_v1, %v3219_v10  ;;  %v2201_v24 = vmul.f32 %v4824_v54, %v1779_v15  ;;  %v1783_v25 = vpop.f32.mrf.mxu1 }
 0x24b   : > { %v2613_v23 = vadd.f32 %v4830_v58, %v2199_v13  ;;  %v3122_v26 = vmax.f32 %v3000_v11, %v3001_v17  ;;  %v3220_v27 = vmax.f32 %v3002_v16, %v3003_v18  ;;  %v3004_v28 = vmax.f32 %v2612_v12, 0.0 }
 0x24c   : > { %v2202_v29 = vmul.f32 %v4816_v50, %v1260_v20  ;;  %v1262_v30 = vpop.f32.mrf.mxu0  ;;  %v4461_v31 = vpack.c.bf16 %v3317_v22, %v3316_v21  ;;  %v2615_v33 = vadd.f32 %v4834_v61, %v2201_v24  ;;  %v2204_v34 = vmul.f32 %v4818_v51, %v1783_v25  ;;  %v1785_v35 = vpop.f32.mrf.mxu1 }
 0x24d   : > { %v3005_v32 = vmax.f32 %v2613_v23, 0.0  ;;  %v3006_v36 = vmax.f32 %v2614_v19, 0.0  ;;  %v2203_v38 = vmul.f32 %v4822_v53, %v1262_v30  ;;  %v2205_v39 = vmul.f32 %v4824_v54, %v1785_v35 }
 0x24e   : > { %v2616_v37 = vadd.f32 %v4820_v52, %v2202_v29  ;;  %v1264_v40 = vpop.f32.mrf.mxu0  ;;  %4526 = vst [vmem:[%s4875_s24 + $0x160] sm:$0xff] %v4461_v31   ;;  %v3007_v42 = vmax.f32 %v2615_v33, 0.0  ;;  %v2618_v43 = vadd.f32 %v4827_v57, %v2204_v34  ;;  %v1787_v45 = vpop.f32.mrf.mxu1  ;;  %v3318_v14 = vmax.f32 %v3122_v26, %v3220_v27 }
 0x24f   : > { %v3123_v41 = vmax.f32 %v3004_v28, %v3005_v32  ;;  %v2206_v44 = vmul.f32 %v4816_v50, %v1264_v40  ;;  %v2617_v46 = vadd.f32 %v4830_v58, %v2203_v38  ;;  %v2619_v47 = vadd.f32 %v4834_v61, %v2205_v39 }
 0x250   : > { %v2208_v48 = vmul.f32 %v4818_v51, %v1787_v45  ;;  %v1266_v49 = vpop.f32.mrf.mxu0  ;;  %v3221_v55 = vmax.f32 %v3006_v36, %v3007_v42  ;;  %v3008_v56 = vmax.f32 %v2616_v37, 0.0  ;;  %v1789_v62 = vpop.f32.mrf.mxu1  ;;  %v3010_v5 = vmax.f32 %v2618_v43, 0.0 }
 0x251   : > { %v2620_v59 = vadd.f32 %v4820_v52, %v2206_v44  ;;  %v2207_v60 = vmul.f32 %v4822_v53, %v1266_v49  ;;  %v3009_v63 = vmax.f32 %v2617_v46, 0.0  ;;  %v3011_v0 = vmax.f32 %v2619_v47, 0.0 }
 0x252   : > { %v2622_v1 = vadd.f32 %v4827_v57, %v2208_v48  ;;  %v2209_v2 = vmul.f32 %v4824_v54, %v1789_v62  ;;  %v1270_v3 = vpop.f32.mrf.mxu0  ;;  %v3319_v4 = vmax.f32 %v3123_v41, %v3221_v55  ;;  %v1793_v8 = vpop.f32.mrf.mxu1 }
 0x253   : > { %v2621_v6 = vadd.f32 %v4830_v58, %v2207_v60  ;;  %v2210_v7 = vmul.f32 %v4816_v50, %v1270_v3  ;;  %v3124_v9 = vmax.f32 %v3008_v56, %v3009_v63  ;;  %v3012_v10 = vmax.f32 %v2620_v59, 0.0 }
 0x254   : > { %v2623_v11 = vadd.f32 %v4834_v61, %v2209_v2  ;;  %v1272_v12 = vpop.f32.mrf.mxu0  ;;  %v4466_v13 = vpack.c.bf16 %v3319_v4, %v3318_v14  ;;  %v3222_v15 = vmax.f32 %v3010_v5, %v3011_v0  ;;  %v2212_v17 = vmul.f32 %v4818_v51, %v1793_v8  ;;  %v1795_v18 = vpop.f32.mrf.mxu1 }
 0x255   : > { %v3013_v16 = vmax.f32 %v2621_v6, 0.0  ;;  %v3014_v19 = vmax.f32 %v2622_v1, 0.0  ;;  %v2211_v21 = vmul.f32 %v4822_v53, %v1272_v12  ;;  %v2213_v22 = vmul.f32 %v4824_v54, %v1795_v18 }
 0x256   : > { %v3015_v20 = vmax.f32 %v2623_v11, 0.0  ;;  %v1274_v23 = vpop.f32.mrf.mxu0  ;;  %4527 = vst [vmem:[%s4875_s24 + $0x168] sm:$0xff] %v4466_v13   ;;  %v2624_v25 = vadd.f32 %v4820_v52, %v2210_v7  ;;  %v2626_v26 = vadd.f32 %v4827_v57, %v2212_v17  ;;  %v1797_v28 = vpop.f32.mrf.mxu1  ;;  %v3320_v34 = vmax.f32 %v3124_v9, %v3222_v15 }
 0x257   : > { %v3125_v24 = vmax.f32 %v3012_v10, %v3013_v16  ;;  %v2214_v27 = vmul.f32 %v4816_v50, %v1274_v23  ;;  %v2625_v30 = vadd.f32 %v4830_v58, %v2211_v21  ;;  %v2627_v31 = vadd.f32 %v4834_v61, %v2213_v22 }
 0x258   : > { %v3223_v29 = vmax.f32 %v3014_v19, %v3015_v20  ;;  %v2216_v32 = vmul.f32 %v4818_v51, %v1797_v28  ;;  %v1276_v33 = vpop.f32.mrf.mxu0  ;;  %v1799_v37 = vpop.f32.mrf.mxu1  ;;  %v3016_v43 = vmax.f32 %v2624_v25, 0.0  ;;  %v3018_v48 = vmax.f32 %v2626_v26, 0.0 }
 0x259   : > { %v2628_v35 = vadd.f32 %v4820_v52, %v2214_v27  ;;  %v2215_v36 = vmul.f32 %v4822_v53, %v1276_v33  ;;  %v3017_v39 = vmax.f32 %v2625_v30, 0.0  ;;  %v3019_v40 = vmax.f32 %v2627_v31, 0.0 }
 0x25a   : > { %v3321_v38 = vmax.f32 %v3125_v24, %v3223_v29  ;;  %v2630_v41 = vadd.f32 %v4827_v57, %v2216_v32  ;;  %v1280_v42 = vpop.f32.mrf.mxu0  ;;  %v2217_v45 = vmul.f32 %v4824_v54, %v1799_v37  ;;  %v1803_v46 = vpop.f32.mrf.mxu1 }
 0x25b   : > { %v2629_v44 = vadd.f32 %v4830_v58, %v2215_v36  ;;  %v2218_v14 = vmul.f32 %v4816_v50, %v1280_v42  ;;  %v3020_v49 = vmax.f32 %v2628_v35, 0.0  ;;  %v3126_v56 = vmax.f32 %v3016_v43, %v3017_v39 }
 0x25c   : > { %v4471_v47 = vpack.c.bf16 %v3321_v38, %v3320_v34  ;;  %v1282_v55 = vpop.f32.mrf.mxu0  ;;  %v2631_v60 = vadd.f32 %v4834_v61, %v2217_v45  ;;  %v2220_v62 = vmul.f32 %v4818_v51, %v1803_v46  ;;  %v1805_v63 = vpop.f32.mrf.mxu1  ;;  %v3224_v0 = vmax.f32 %v3018_v48, %v3019_v40 }
 0x25d   : > { %v3021_v59 = vmax.f32 %v2629_v44, 0.0  ;;  %v3022_v1 = vmax.f32 %v2630_v41, 0.0  ;;  %v2219_v2 = vmul.f32 %v4822_v53, %v1282_v55  ;;  %v2221_v3 = vmul.f32 %v4824_v54, %v1805_v63 }
 0x25e   : > { %4528 = vst [vmem:[%s4875_s24 + $0x170] sm:$0xff] %v4471_v47   ;;  %v1284_v4 = vpop.f32.mrf.mxu0  ;;  %v3023_v6 = vmax.f32 %v2631_v60, 0.0  ;;  %v2632_v7 = vadd.f32 %v4820_v52, %v2218_v14  ;;  %v2634_v8 = vadd.f32 %v4827_v57, %v2220_v62  ;;  %v1807_v9 = vpop.f32.mrf.mxu1  ;;  %v3322_v19 = vmax.f32 %v3126_v56, %v3224_v0 }
 0x25f   : > { %v3127_v5 = vmax.f32 %v3020_v49, %v3021_v59  ;;  %v2633_v10 = vadd.f32 %v4830_v58, %v2219_v2  ;;  %v2635_v11 = vadd.f32 %v4834_v61, %v2221_v3  ;;  %v2222_v12 = vmul.f32 %v4816_v50, %v1284_v4 }
 0x260   : > { %v2224_v13 = vmul.f32 %v4818_v51, %v1807_v9  ;;  %v1286_v15 = vpop.f32.mrf.mxu0  ;;  %v3225_v16 = vmax.f32 %v3022_v1, %v3023_v6  ;;  %v1809_v18 = vpop.f32.mrf.mxu1  ;;  %v3024_v26 = vmax.f32 %v2632_v7, 0.0  ;;  %v3026_v51 = vmax.f32 %v2634_v8, 0.0 }
 0x261   : > { %v2223_v17 = vmul.f32 %v4822_v53, %v1286_v15  ;;  %v3025_v20 = vmax.f32 %v2633_v10, 0.0  ;;  %v3027_v21 = vmax.f32 %v2635_v11, 0.0  ;;  %v2636_v22 = vadd.f32 %v4820_v52, %v2222_v12 }
 0x262   : > { %v3323_v23 = vmax.f32 %v3127_v5, %v3225_v16  ;;  %v2638_v24 = vadd.f32 %v4827_v57, %v2224_v13  ;;  %v2225_v50 = vmul.f32 %v4824_v54, %v1809_v18 }
 0x263   : > { %v2637_v25 = vadd.f32 %v4830_v58, %v2223_v17  ;;  %v3028_v28 = vmax.f32 %v2636_v22, 0.0  ;;  %v3128_v30 = vmax.f32 %v3024_v26, %v3025_v20  ;;  %v3226_v31 = vmax.f32 %v3026_v51, %v3027_v21 }
 0x264   : > { %v4476_v27 = vpack.c.bf16 %v3323_v23, %v3322_v19  ;;  %v2639_v29 = vadd.f32 %v4834_v61, %v2225_v50  ;;  %v3030_v32 = vmax.f32 %v2638_v24, 0.0 }
 0x265   : > { %v3029_v53 = vmax.f32 %v2637_v25, 0.0  ;;  %v3324_v57 = vmax.f32 %v3128_v30, %v3226_v31 }
 0x266   : > { %4529 = vst [vmem:[%s4875_s24 + $0x178] sm:$0xff] %v4476_v27   ;;  %v3031_v33 = vmax.f32 %v2639_v29, 0.0 }
 0x267   : > { %v3129_v52 = vmax.f32 %v3028_v28, %v3029_v53 }
 0x268   : > { %v3227_v34 = vmax.f32 %v3030_v32, %v3031_v33 }
 0x26a   : > { %v3325_v35 = vmax.f32 %v3129_v52, %v3227_v34 }
 0x26c   : > { %v4481_v58 = vpack.c.bf16 %v3325_v35, %v3324_v57 }
 0x26e   : > { %4530 = vst [vmem:[%s4875_s24 + $0x180] sm:$0xff] %v4481_v58  }
 0x26f PF: > { %s14_s15 = sadd.s32 1, %s4611_s15  }
 0x270   : > { %p11_p4 = scmp.ge.s32.totalorder %s14_s15, 4  }
 0x272   :  { %13 = sbr.rel (!%p11_p4) target bundleno = 1 (0x1), region = 66 }

// kernel: custom_cnn_forward.7
= control target key start
LH: loop header
LB: loop body
LE: loop exit
PB: predicated region body
PF: predicated region fallthrough
CT: control target
= control target key end

     0   :  { %s6092_s1 = inlined_call_operand.vmem [shape: bf16[512,512], index: 1, kind: input, shape index: {}]   ;;  %s6093_s0 = inlined_call_operand.vmem [shape: bf16[392,512], index: 0, kind: input, shape index: {}]   ;;  %s6094_s2 = inlined_call_operand.vmem [shape: f32[1,512], index: 2, kind: input, shape index: {}]   ;;  %s6095_s3 = inlined_call_operand.vmem [shape: f32[1,512], index: 3, kind: input, shape index: {}]   ;;  %s6096_s4 = inlined_call_operand.vmem [shape: bf16[392,128], index: 4, kind: output, shape index: {}]  }
   0x1   :  { %v3999_v0 = vld [vmem:[%s6092_s1 + $0xe4] ss:$16 sps:$4 sm:$0xff]   ;;  %v4003_v2 = vld [vmem:[%s6092_s1 + $0xe0] ss:$16 sps:$4 sm:$0xff]   ;;  %v4100_v51 = vld [vmem:[%s6093_s0 + $0xc] ss:$16 sps:$4 sm:$0xff]  }
   0x2   :  { %v4001_v1 = vld [vmem:[%s6092_s1 + $0x2e4] ss:$16 sps:$4 sm:$0xff]   ;;  %1377 = vmatprep.subr.bf16.mxu0 %v3999_v0  ;;  %v4004_v3 = vld [vmem:[%s6092_s1 + $0x2e0] ss:$16 sps:$4 sm:$0xff]   ;;  %1690 = vmatprep.mubr.bf16.mxu1 %v4100_v51  ;;  %v4212_v51 = vld [vmem:[%s6092_s1 + $0x208] ss:$16 sps:$4 sm:$0xff]  }
   0x3   :  { %1658 = vmatprep.subr.bf16.mxu1 %v4001_v1  ;;  %v4005_v4 = vld [vmem:[%s6092_s1 + $0xc4] ss:$16 sps:$4 sm:$0xff]   ;;  %1378 = vmatpush1.bf16.msra.mxu0 %v4003_v2  ;;  %v4009_v6 = vld [vmem:[%s6092_s1 + $0xc0] ss:$16 sps:$4 sm:$0xff]   ;;  %v4103_v2 = vld [vmem:[%s6092_s1 + $0xec] ss:$16 sps:$4 sm:$0xff]  }
   0x4   :  { %1659 = vmatpush1.bf16.msra.mxu1 %v4004_v3  ;;  %v4007_v5 = vld [vmem:[%s6092_s1 + $0x2c4] ss:$16 sps:$4 sm:$0xff]   ;;  %1379 = vmatprep.subr.bf16.mxu0 %v4005_v4  ;;  %v4010_v7 = vld [vmem:[%s6092_s1 + $0x2c0] ss:$16 sps:$4 sm:$0xff]   ;;  %v4106_v3 = vld [vmem:[%s6092_s1 + $0x2ec] ss:$16 sps:$4 sm:$0xff]  }
   0x5   :  { %1660 = vmatprep.subr.bf16.mxu1 %v4007_v5  ;;  %v4011_v8 = vld [vmem:[%s6092_s1 + $0xa4] ss:$16 sps:$4 sm:$0xff]   ;;  %v4015_v10 = vld [vmem:[%s6092_s1 + $0xa0] ss:$16 sps:$4 sm:$0xff]   ;;  %v4622_v5 = vld [vmem:[%s6093_s0 + $0x8] ss:$16 sps:$4 sm:$0xff]  }
   0x6   :  { %v4013_v9 = vld [vmem:[%s6092_s1 + $0x2a4] ss:$16 sps:$4 sm:$0xff]   ;;  %v4016_v11 = vld [vmem:[%s6092_s1 + $0x2a0] ss:$16 sps:$4 sm:$0xff]  }
   0x7   :  { %1380 = vmatpush1.bf16.msra.mxu0 %v4009_v6  ;;  %v4017_v12 = vld [vmem:[%s6092_s1 + $0x84] ss:$16 sps:$4 sm:$0xff]   ;;  %v4021_v14 = vld [vmem:[%s6092_s1 + $0x80] ss:$16 sps:$4 sm:$0xff]   ;;  %v4101_v6 = vld [vmem:[%s6092_s1 + $0xe8] ss:$16 sps:$4 sm:$0xff]  }
   0x8   :  { %1661 = vmatpush1.bf16.msra.mxu1 %v4010_v7  ;;  %1381 = vmatprep.subr.bf16.mxu0 %v4011_v8  ;;  %v4019_v13 = vld [vmem:[%s6092_s1 + $0x284] ss:$16 sps:$4 sm:$0xff]   ;;  %v4022_v15 = vld [vmem:[%s6092_s1 + $0x280] ss:$16 sps:$4 sm:$0xff]   ;;  %v4104_v7 = vld [vmem:[%s6092_s1 + $0x2e8] ss:$16 sps:$4 sm:$0xff]  }
   0x9   :  { %1662 = vmatprep.subr.bf16.mxu1 %v4013_v9  ;;  %v4023_v16 = vld [vmem:[%s6092_s1 + $0x64] ss:$16 sps:$4 sm:$0xff]   ;;  %v4027_v18 = vld [vmem:[%s6092_s1 + $0x60] ss:$16 sps:$4 sm:$0xff]   ;;  %v4638_v9 = vld [vmem:[%s6093_s0 + $0x2c] ss:$16 sps:$4 sm:$0xff]  }
   0xa   :  { %v4025_v17 = vld [vmem:[%s6092_s1 + $0x264] ss:$16 sps:$4 sm:$0xff]   ;;  %v4028_v19 = vld [vmem:[%s6092_s1 + $0x260] ss:$16 sps:$4 sm:$0xff]  }
   0xb   :  { %1382 = vmatpush1.bf16.msra.mxu0 %v4015_v10  ;;  %v4029_v20 = vld [vmem:[%s6092_s1 + $0x44] ss:$16 sps:$4 sm:$0xff]   ;;  %v4033_v22 = vld [vmem:[%s6092_s1 + $0x40] ss:$16 sps:$4 sm:$0xff]   ;;  %v4115_v10 = vld [vmem:[%s6092_s1 + $0xcc] ss:$16 sps:$4 sm:$0xff]  }
   0xc   :  { %1663 = vmatpush1.bf16.msra.mxu1 %v4016_v11  ;;  %1383 = vmatprep.subr.bf16.mxu0 %v4017_v12  ;;  %v4031_v21 = vld [vmem:[%s6092_s1 + $0x244] ss:$16 sps:$4 sm:$0xff]   ;;  %v4034_v23 = vld [vmem:[%s6092_s1 + $0x240] ss:$16 sps:$4 sm:$0xff]   ;;  %v4118_v11 = vld [vmem:[%s6092_s1 + $0x2cc] ss:$16 sps:$4 sm:$0xff]  }
   0xd   :  { %1664 = vmatprep.subr.bf16.mxu1 %v4019_v13  ;;  %v4035_v24 = vld [vmem:[%s6092_s1 + $0x24] ss:$16 sps:$4 sm:$0xff]   ;;  %v4039_v26 = vld [vmem:[%s6092_s1 + $0x20] ss:$16 sps:$4 sm:$0xff]   ;;  %v4113_v12 = vld [vmem:[%s6092_s1 + $0xc8] ss:$16 sps:$4 sm:$0xff]  }
   0xe   :  { %v4037_v25 = vld [vmem:[%s6092_s1 + $0x224] ss:$16 sps:$4 sm:$0xff]   ;;  %v4040_v27 = vld [vmem:[%s6092_s1 + $0x220] ss:$16 sps:$4 sm:$0xff]   ;;  %v4116_v13 = vld [vmem:[%s6092_s1 + $0x2c8] ss:$16 sps:$4 sm:$0xff]  }
   0xf   :  { %1384 = vmatpush1.bf16.msra.mxu0 %v4021_v14  ;;  %v4041_v28 = vld [vmem:[%s6092_s1 + $0x4] ss:$16 sps:$4 sm:$0xff]   ;;  %v4045_v30 = vld [vmem:[%s6092_s1] ss:$16 sps:$4 sm:$0xff]   ;;  %v4133_v14 = vld [vmem:[%s6092_s1 + $0xac] ss:$16 sps:$4 sm:$0xff]  }
  0x10   :  { %1665 = vmatpush1.bf16.msra.mxu1 %v4022_v15  ;;  %1385 = vmatprep.subr.bf16.mxu0 %v4023_v16  ;;  %v4043_v29 = vld [vmem:[%s6092_s1 + $0x204] ss:$16 sps:$4 sm:$0xff]   ;;  %v4046_v31 = vld [vmem:[%s6092_s1 + $0x200] ss:$16 sps:$4 sm:$0xff]   ;;  %v4136_v15 = vld [vmem:[%s6092_s1 + $0x2ac] ss:$16 sps:$4 sm:$0xff]  }
  0x11   :  { %1666 = vmatprep.subr.bf16.mxu1 %v4025_v17  ;;  %v4047_v32 = vld [vmem:[%s6092_s1 + $0x1e4] ss:$16 sps:$4 sm:$0xff]   ;;  %v4051_v34 = vld [vmem:[%s6092_s1 + $0x1e0] ss:$16 sps:$4 sm:$0xff]   ;;  %v4670_v17 = vld [vmem:[%s6093_s0 + $0x28] ss:$16 sps:$4 sm:$0xff]  }
  0x12   :  { %v4049_v33 = vld [vmem:[%s6092_s1 + $0x3e4] ss:$16 sps:$4 sm:$0xff]   ;;  %v4052_v35 = vld [vmem:[%s6092_s1 + $0x3e0] ss:$16 sps:$4 sm:$0xff]  }
  0x13   :  { %1386 = vmatpush1.bf16.msra.mxu0 %v4027_v18  ;;  %v4053_v36 = vld [vmem:[%s6092_s1 + $0x1c4] ss:$16 sps:$4 sm:$0xff]   ;;  %v4057_v38 = vld [vmem:[%s6092_s1 + $0x1c0] ss:$16 sps:$4 sm:$0xff]  }
  0x14   :  { %1667 = vmatpush1.bf16.msra.mxu1 %v4028_v19  ;;  %1387 = vmatprep.subr.bf16.mxu0 %v4029_v20  ;;  %v4055_v37 = vld [vmem:[%s6092_s1 + $0x3c4] ss:$16 sps:$4 sm:$0xff]   ;;  %v4058_v39 = vld [vmem:[%s6092_s1 + $0x3c0] ss:$16 sps:$4 sm:$0xff]   ;;  %v4680_v19 = vld [vmem:[%s6093_s0 + $0x4c] ss:$16 sps:$4 sm:$0xff]  }
  0x15   :  { %1668 = vmatprep.subr.bf16.mxu1 %v4031_v21  ;;  %v4059_v40 = vld [vmem:[%s6092_s1 + $0x1a4] ss:$16 sps:$4 sm:$0xff]   ;;  %v4063_v42 = vld [vmem:[%s6092_s1 + $0x1a0] ss:$16 sps:$4 sm:$0xff]   ;;  %v4131_v20 = vld [vmem:[%s6092_s1 + $0xa8] ss:$16 sps:$4 sm:$0xff]  }
  0x16   :  { %v4061_v41 = vld [vmem:[%s6092_s1 + $0x3a4] ss:$16 sps:$4 sm:$0xff]   ;;  %v4064_v43 = vld [vmem:[%s6092_s1 + $0x3a0] ss:$16 sps:$4 sm:$0xff]   ;;  %v4134_v21 = vld [vmem:[%s6092_s1 + $0x2a8] ss:$16 sps:$4 sm:$0xff]  }
  0x17   :  { %1388 = vmatpush1.bf16.msra.mxu0 %v4033_v22  ;;  %v4065_v44 = vld [vmem:[%s6092_s1 + $0x184] ss:$16 sps:$4 sm:$0xff]   ;;  %v4069_v46 = vld [vmem:[%s6092_s1 + $0x180] ss:$16 sps:$4 sm:$0xff]   ;;  %v4145_v22 = vld [vmem:[%s6092_s1 + $0x8c] ss:$16 sps:$4 sm:$0xff]  }
  0x18   :  { %1669 = vmatpush1.bf16.msra.mxu1 %v4034_v23  ;;  %1389 = vmatprep.subr.bf16.mxu0 %v4035_v24  ;;  %v4067_v45 = vld [vmem:[%s6092_s1 + $0x384] ss:$16 sps:$4 sm:$0xff]   ;;  %v4070_v47 = vld [vmem:[%s6092_s1 + $0x380] ss:$16 sps:$4 sm:$0xff]   ;;  %v4148_v23 = vld [vmem:[%s6092_s1 + $0x28c] ss:$16 sps:$4 sm:$0xff]  }
  0x19   :  { %1670 = vmatprep.subr.bf16.mxu1 %v4037_v25  ;;  %v4071_v48 = vld [vmem:[%s6092_s1 + $0x164] ss:$16 sps:$4 sm:$0xff]   ;;  %v4075_v52 = vld [vmem:[%s6092_s1 + $0x160] ss:$16 sps:$4 sm:$0xff]   ;;  %v4143_v24 = vld [vmem:[%s6092_s1 + $0x88] ss:$16 sps:$4 sm:$0xff]  }
  0x1a   :  { %v4097_v49 = vld [vmem:[%s6093_s0 + $0x4] ss:$16 sps:$4 sm:$0xff]   ;;  %v4076_v53 = vld [vmem:[%s6092_s1 + $0x360] ss:$16 sps:$4 sm:$0xff]   ;;  %v4146_v25 = vld [vmem:[%s6092_s1 + $0x288] ss:$16 sps:$4 sm:$0xff]  }
  0x1b   :  { %1390 = vmatpush1.bf16.msra.mxu0 %v4039_v26  ;;  %v4073_v50 = vld [vmem:[%s6092_s1 + $0x364] ss:$16 sps:$4 sm:$0xff]   ;;  %1409 = vmatprep.mubr.bf16.mxu0 %v4097_v49  ;;  %v4081_v56 = vld [vmem:[%s6092_s1 + $0x140] ss:$16 sps:$4 sm:$0xff]   ;;  %v4209_v49 = vld [vmem:[%s6092_s1 + $0x8] ss:$16 sps:$4 sm:$0xff]  }
  0x1c   :  { %1671 = vmatpush1.bf16.msra.mxu1 %v4040_v27  ;;  %1391 = vmatprep.subr.bf16.mxu0 %v4041_v28  ;;  %v4077_v54 = vld [vmem:[%s6092_s1 + $0x144] ss:$16 sps:$4 sm:$0xff]   ;;  %v4082_v57 = vld [vmem:[%s6092_s1 + $0x340] ss:$16 sps:$4 sm:$0xff]   ;;  %v4163_v27 = vld [vmem:[%s6092_s1 + $0x6c] ss:$16 sps:$4 sm:$0xff]  }
  0x1d   :  { %1672 = vmatprep.subr.bf16.mxu1 %v4043_v29  ;;  %v4079_v55 = vld [vmem:[%s6092_s1 + $0x344] ss:$16 sps:$4 sm:$0xff]   ;;  %v4087_v60 = vld [vmem:[%s6092_s1 + $0x120] ss:$16 sps:$4 sm:$0xff]   ;;  %v4166_v28 = vld [vmem:[%s6092_s1 + $0x26c] ss:$16 sps:$4 sm:$0xff]  }
  0x1e   :  { %v4083_v58 = vld [vmem:[%s6092_s1 + $0x124] ss:$16 sps:$4 sm:$0xff]   ;;  %v4088_v61 = vld [vmem:[%s6092_s1 + $0x320] ss:$16 sps:$4 sm:$0xff]   ;;  %v4718_v29 = vld [vmem:[%s6093_s0 + $0x48] ss:$16 sps:$4 sm:$0xff]  }
  0x1f   :  { %1392 = vmatpush1.bf16.msra.mxu0 %v4045_v30  ;;  %v4085_v59 = vld [vmem:[%s6092_s1 + $0x324] ss:$16 sps:$4 sm:$0xff]   ;;  %v4093_v0 = vld [vmem:[%s6092_s1 + $0x100] ss:$16 sps:$4 sm:$0xff]  }
  0x20   :  { %1673 = vmatpush1.bf16.msra.mxu1 %v4046_v31  ;;  %1393 = vmatprep.subr.bf16.mxu0 %v4047_v32  ;;  %v4089_v62 = vld [vmem:[%s6092_s1 + $0x104] ss:$16 sps:$4 sm:$0xff]   ;;  %v4094_v1 = vld [vmem:[%s6092_s1 + $0x300] ss:$16 sps:$4 sm:$0xff]   ;;  %v4728_v31 = vld [vmem:[%s6093_s0 + $0x6c] ss:$16 sps:$4 sm:$0xff]  }
  0x21   :  { %1674 = vmatprep.subr.bf16.mxu1 %v4049_v33  ;;  %v4091_v63 = vld [vmem:[%s6092_s1 + $0x304] ss:$16 sps:$4 sm:$0xff]   ;;  %v4617_v4 = vld [vmem:[%s6093_s0] ss:$16 sps:$4 sm:$0xff]   ;;  %v4161_v32 = vld [vmem:[%s6092_s1 + $0x68] ss:$16 sps:$4 sm:$0xff]  }
  0x22   :  { %v4633_v8 = vld [vmem:[%s6093_s0 + $0x24] ss:$16 sps:$4 sm:$0xff]   ;;  %v4665_v16 = vld [vmem:[%s6093_s0 + $0x20] ss:$16 sps:$4 sm:$0xff]   ;;  %v4164_v33 = vld [vmem:[%s6092_s1 + $0x268] ss:$16 sps:$4 sm:$0xff]  }
  0x23   :  { %1394 = vmatpush2.bf16.msra.mxu0 %v4051_v34  ;;  %v4675_v18 = vld [vmem:[%s6093_s0 + $0x44] ss:$16 sps:$4 sm:$0xff]   ;;  %v4707_v26 = vld [vmem:[%s6093_s0 + $0x40] ss:$16 sps:$4 sm:$0xff]   ;;  %v4179_v34 = vld [vmem:[%s6092_s1 + $0x4c] ss:$16 sps:$4 sm:$0xff]  }
  0x24   :  { %1675 = vmatpush2.bf16.msra.mxu1 %v4052_v35  ;;  %1395 = vmatprep.subr.bf16.mxu0 %v4053_v36  ;;  %v4723_v30 = vld [vmem:[%s6093_s0 + $0x64] ss:$16 sps:$4 sm:$0xff]   ;;  %v4182_v35 = vld [vmem:[%s6092_s1 + $0x24c] ss:$16 sps:$4 sm:$0xff]   ;;  %v4177_v36 = vld [vmem:[%s6092_s1 + $0x48] ss:$16 sps:$4 sm:$0xff]  }
  0x25   :  { %1676 = vmatprep.subr.bf16.mxu1 %v4055_v37  ;;  %v4752_v37 = vld [vmem:[%s6093_s0 + $0x60] ss:$16 sps:$4 sm:$0xff]  }
  0x27   :  { %1396 = vmatpush2.bf16.msra.mxu0 %v4057_v38  ;;  %v4757_v38 = vld [vmem:[%s6093_s0 + $0x68] ss:$16 sps:$4 sm:$0xff]  }
  0x28   :  { %1677 = vmatpush2.bf16.msra.mxu1 %v4058_v39  ;;  %1397 = vmatprep.subr.bf16.mxu0 %v4059_v40  ;;  %v4180_v39 = vld [vmem:[%s6092_s1 + $0x248] ss:$16 sps:$4 sm:$0xff]   ;;  %v4765_v40 = vld [vmem:[%s6093_s0 + $0x84] ss:$16 sps:$4 sm:$0xff]  }
  0x29   :  { %1678 = vmatprep.subr.bf16.mxu1 %v4061_v41  ;;  %v4193_v41 = vld [vmem:[%s6092_s1 + $0x2c] ss:$16 sps:$4 sm:$0xff]  }
  0x2b   :  { %1398 = vmatpush2.bf16.msra.mxu0 %v4063_v42  ;;  %v4773_v42 = vld [vmem:[%s6093_s0 + $0x8c] ss:$16 sps:$4 sm:$0xff]  }
  0x2c   :  { %1679 = vmatpush2.bf16.msra.mxu1 %v4064_v43  ;;  %1399 = vmatprep.subr.bf16.mxu0 %v4065_v44  ;;  %v4196_v43 = vld [vmem:[%s6092_s1 + $0x22c] ss:$16 sps:$4 sm:$0xff]   ;;  %v4191_v44 = vld [vmem:[%s6092_s1 + $0x28] ss:$16 sps:$4 sm:$0xff]  }
  0x2d   :  { %1680 = vmatprep.subr.bf16.mxu1 %v4067_v45  ;;  %v4194_v45 = vld [vmem:[%s6092_s1 + $0x228] ss:$16 sps:$4 sm:$0xff]  }
  0x2f   :  { %1400 = vmatpush2.bf16.msra.mxu0 %v4069_v46  ;;  %v4791_v46 = vld [vmem:[%s6093_s0 + $0x80] ss:$16 sps:$4 sm:$0xff]  }
  0x30   :  { %1681 = vmatpush2.bf16.msra.mxu1 %v4070_v47  ;;  %1401 = vmatprep.subr.bf16.mxu0 %v4071_v48  ;;  %v4796_v47 = vld [vmem:[%s6093_s0 + $0x88] ss:$16 sps:$4 sm:$0xff]   ;;  %v4801_v48 = vld [vmem:[%s6093_s0 + $0xa4] ss:$16 sps:$4 sm:$0xff]  }
  0x31   :  { %1682 = vmatprep.subr.bf16.mxu1 %v4073_v50  ;;  %v4211_v50 = vld [vmem:[%s6092_s1 + $0xc] ss:$16 sps:$4 sm:$0xff]  }
  0x33   :  { %1402 = vmatpush2.bf16.msra.mxu0 %v4075_v52  ;;  %v4214_v52 = vld [vmem:[%s6092_s1 + $0x20c] ss:$16 sps:$4 sm:$0xff]  }
  0x34   :  { %1683 = vmatpush2.bf16.msra.mxu1 %v4076_v53  ;;  %1403 = vmatprep.subr.bf16.mxu0 %v4077_v54  ;;  %v4818_v53 = vld [vmem:[%s6093_s0 + $0xac] ss:$16 sps:$4 sm:$0xff]   ;;  %v4221_v54 = vld [vmem:[%s6092_s1 + $0x1e8] ss:$16 sps:$4 sm:$0xff]  }
  0x35   :  { %1684 = vmatprep.subr.bf16.mxu1 %v4079_v55  ;;  %v4223_v55 = vld [vmem:[%s6092_s1 + $0x1ec] ss:$16 sps:$4 sm:$0xff]  }
  0x37   :  { %1404 = vmatpush2.bf16.msra.mxu0 %v4081_v56  ;;  %v4224_v56 = vld [vmem:[%s6092_s1 + $0x3e8] ss:$16 sps:$4 sm:$0xff]  }
  0x38   :  { %1685 = vmatpush2.bf16.msra.mxu1 %v4082_v57  ;;  %1405 = vmatprep.subr.bf16.mxu0 %v4083_v58  ;;  %v4226_v57 = vld [vmem:[%s6092_s1 + $0x3ec] ss:$16 sps:$4 sm:$0xff]   ;;  %v4839_v58 = vld [vmem:[%s6093_s0 + $0xa0] ss:$16 sps:$4 sm:$0xff]  }
  0x39   :  { %1686 = vmatprep.subr.bf16.mxu1 %v4085_v59  ;;  %v4844_v59 = vld [vmem:[%s6093_s0 + $0xa8] ss:$16 sps:$4 sm:$0xff]  }
  0x3b   :  { %1406 = vmatpush2.bf16.msra.mxu0 %v4087_v60  ;;  %v4849_v60 = vld [vmem:[%s6093_s0 + $0xc4] ss:$16 sps:$4 sm:$0xff]  }
  0x3c   :  { %1687 = vmatpush2.bf16.msra.mxu1 %v4088_v61  ;;  %1407 = vmatprep.subr.bf16.mxu0 %v4089_v62  ;;  %v4854_v61 = vld [vmem:[%s6093_s0 + $0xcc] ss:$16 sps:$4 sm:$0xff]   ;;  %v4239_v62 = vld [vmem:[%s6092_s1 + $0x1c8] ss:$16 sps:$4 sm:$0xff]  }
  0x3d   :  { %1688 = vmatprep.subr.bf16.mxu1 %v4091_v63  ;;  %v4241_v63 = vld [vmem:[%s6092_s1 + $0x1cc] ss:$16 sps:$4 sm:$0xff]  }
  0x3f   :  { %1408 = vmatpush2.bf16.msra.mxu0 %v4093_v0  ;;  %v4242_v0 = vld [vmem:[%s6092_s1 + $0x3c8] ss:$16 sps:$4 sm:$0xff]  }
  0x40   :  { %1689 = vmatpush2.bf16.msra.mxu1 %v4094_v1  ;;  %1939 = vmatprep.subr.bf16.mxu0 %v4103_v2  ;;  %v4244_v1 = vld [vmem:[%s6092_s1 + $0x3cc] ss:$16 sps:$4 sm:$0xff]   ;;  %v4875_v2 = vld [vmem:[%s6093_s0 + $0xc0] ss:$16 sps:$4 sm:$0xff]  }
  0x41   :  { %2220 = vmatprep.subr.bf16.mxu1 %v4106_v3  ;;  %v4880_v3 = vld [vmem:[%s6093_s0 + $0xc8] ss:$16 sps:$4 sm:$0xff]  }
  0x42   :  { %1410 = vmatmul.mubr.bf16.vlgmr.msra.gmra.mxu0 %v4617_v4 }
  0x43   :  { %1691 = vmatmul.mubr.bf16.vlgmr.msra.gmra.mxu1 %v4622_v5  ;;  %1940 = vmatpush1.bf16.msra.mxu0 %v4101_v6  ;;  %v4885_v6 = vld [vmem:[%s6093_s0 + $0xe4] ss:$16 sps:$4 sm:$0xff]  }
  0x44   :  { %2221 = vmatpush1.bf16.msra.mxu1 %v4104_v7  ;;  %1419 = vmatprep.mubr.bf16.mxu0 %v4633_v8  ;;  %v4890_v7 = vld [vmem:[%s6093_s0 + $0xec] ss:$16 sps:$4 sm:$0xff]  }
  0x45   :  { %1700 = vmatprep.mubr.bf16.mxu1 %v4638_v9  ;;  %1941 = vmatprep.subr.bf16.mxu0 %v4115_v10  ;;  %v4251_v10 = vld [vmem:[%s6092_s1 + $0x1a8] ss:$16 sps:$4 sm:$0xff]  }
  0x46   :  { %2222 = vmatprep.subr.bf16.mxu1 %v4118_v11  ;;  %v4253_v11 = vld [vmem:[%s6092_s1 + $0x1ac] ss:$16 sps:$4 sm:$0xff]  }
  0x47   :  { %1942 = vmatpush1.bf16.msra.mxu0 %v4113_v12  ;;  %v4254_v12 = vld [vmem:[%s6092_s1 + $0x3a8] ss:$16 sps:$4 sm:$0xff]  }
  0x48   :  { %2223 = vmatpush1.bf16.msra.mxu1 %v4116_v13  ;;  %1943 = vmatprep.subr.bf16.mxu0 %v4133_v14  ;;  %v4256_v13 = vld [vmem:[%s6092_s1 + $0x3ac] ss:$16 sps:$4 sm:$0xff]   ;;  %v4911_v14 = vld [vmem:[%s6093_s0 + $0xe0] ss:$16 sps:$4 sm:$0xff]  }
  0x49   :  { %2224 = vmatprep.subr.bf16.mxu1 %v4136_v15  ;;  %v4916_v15 = vld [vmem:[%s6093_s0 + $0xe8] ss:$16 sps:$4 sm:$0xff]  }
  0x4a   :  { %1420 = vmatmul.mubr.bf16.gmra.mxu0 %v4665_v16 }
  0x4b   :  { %1701 = vmatmul.mubr.bf16.gmra.mxu1 %v4670_v17  ;;  %1429 = vmatprep.mubr.bf16.mxu0 %v4675_v18 }
  0x4c   :  { %1710 = vmatprep.mubr.bf16.mxu1 %v4680_v19  ;;  %1944 = vmatpush1.bf16.msra.mxu0 %v4131_v20  ;;  %v4921_v20 = vld [vmem:[%s6093_s0 + $0x104] ss:$16 sps:$4 sm:$0xff]  }
  0x4d   :  { %2225 = vmatpush1.bf16.msra.mxu1 %v4134_v21  ;;  %1945 = vmatprep.subr.bf16.mxu0 %v4145_v22  ;;  %v4926_v21 = vld [vmem:[%s6093_s0 + $0x10c] ss:$16 sps:$4 sm:$0xff]   ;;  %v4269_v22 = vld [vmem:[%s6092_s1 + $0x188] ss:$16 sps:$4 sm:$0xff]  }
  0x4e   :  { %2226 = vmatprep.subr.bf16.mxu1 %v4148_v23  ;;  %v4271_v23 = vld [vmem:[%s6092_s1 + $0x18c] ss:$16 sps:$4 sm:$0xff]  }
  0x50   :  { %1946 = vmatpush1.bf16.msra.mxu0 %v4143_v24  ;;  %v4272_v24 = vld [vmem:[%s6092_s1 + $0x388] ss:$16 sps:$4 sm:$0xff]  }
  0x51   :  { %2227 = vmatpush1.bf16.msra.mxu1 %v4146_v25  ;;  %1947 = vmatprep.subr.bf16.mxu0 %v4163_v27  ;;  %v4274_v25 = vld [vmem:[%s6092_s1 + $0x38c] ss:$16 sps:$4 sm:$0xff]   ;;  %v4947_v27 = vld [vmem:[%s6093_s0 + $0x100] ss:$16 sps:$4 sm:$0xff]  }
  0x52   :  { %2228 = vmatprep.subr.bf16.mxu1 %v4166_v28  ;;  %1430 = vmatmul.mubr.bf16.gmra.mxu0 %v4707_v26  ;;  %v4952_v28 = vld [vmem:[%s6093_s0 + $0x108] ss:$16 sps:$4 sm:$0xff]  }
  0x53   :  { %1711 = vmatmul.mubr.bf16.gmra.mxu1 %v4718_v29  ;;  %1439 = vmatprep.mubr.bf16.mxu0 %v4723_v30 }
  0x54   :  { %1720 = vmatprep.mubr.bf16.mxu1 %v4728_v31  ;;  %1948 = vmatpush1.bf16.msra.mxu0 %v4161_v32  ;;  %v4957_v32 = vld [vmem:[%s6093_s0 + $0x124] ss:$16 sps:$4 sm:$0xff]  }
  0x55   :  { %2229 = vmatpush1.bf16.msra.mxu1 %v4164_v33  ;;  %1949 = vmatprep.subr.bf16.mxu0 %v4179_v34  ;;  %v4281_v33 = vld [vmem:[%s6092_s1 + $0x168] ss:$16 sps:$4 sm:$0xff]   ;;  %v4283_v34 = vld [vmem:[%s6092_s1 + $0x16c] ss:$16 sps:$4 sm:$0xff]  }
  0x56   :  { %2230 = vmatprep.subr.bf16.mxu1 %v4182_v35  ;;  %v4284_v35 = vld [vmem:[%s6092_s1 + $0x368] ss:$16 sps:$4 sm:$0xff]  }
  0x58   :  { %1950 = vmatpush1.bf16.msra.mxu0 %v4177_v36  ;;  %v4286_v36 = vld [vmem:[%s6092_s1 + $0x36c] ss:$16 sps:$4 sm:$0xff]  }
  0x59   :  { %2231 = vmatpush1.bf16.msra.mxu1 %v4180_v39  ;;  %1951 = vmatprep.subr.bf16.mxu0 %v4193_v41  ;;  %v4974_v39 = vld [vmem:[%s6093_s0 + $0x12c] ss:$16 sps:$4 sm:$0xff]   ;;  %v4983_v41 = vld [vmem:[%s6093_s0 + $0x120] ss:$16 sps:$4 sm:$0xff]  }
  0x5a   :  { %2232 = vmatprep.subr.bf16.mxu1 %v4196_v43  ;;  %1440 = vmatmul.mubr.bf16.gmra.mxu0 %v4752_v37  ;;  %v4988_v43 = vld [vmem:[%s6093_s0 + $0x128] ss:$16 sps:$4 sm:$0xff]  }
  0x5b   :  { %1721 = vmatmul.mubr.bf16.gmra.mxu1 %v4757_v38  ;;  %1449 = vmatprep.mubr.bf16.mxu0 %v4765_v40 }
  0x5c   :  { %1730 = vmatprep.mubr.bf16.mxu1 %v4773_v42  ;;  %1952 = vmatpush1.bf16.msra.mxu0 %v4191_v44  ;;  %v4993_v44 = vld [vmem:[%s6093_s0 + $0x144] ss:$16 sps:$4 sm:$0xff]  }
  0x5d   :  { %2233 = vmatpush1.bf16.msra.mxu1 %v4194_v45  ;;  %1953 = vmatprep.subr.bf16.mxu0 %v4211_v50  ;;  %v4299_v45 = vld [vmem:[%s6092_s1 + $0x148] ss:$16 sps:$4 sm:$0xff]  }
  0x5e   :  { %2234 = vmatprep.subr.bf16.mxu1 %v4214_v52  ;;  %v4302_v50 = vld [vmem:[%s6092_s1 + $0x348] ss:$16 sps:$4 sm:$0xff]   ;;  %v5010_v52 = vld [vmem:[%s6093_s0 + $0x14c] ss:$16 sps:$4 sm:$0xff]  }
  0x60   :  { %1954 = vmatpush1.bf16.msra.mxu0 %v4209_v49  ;;  %v4301_v49 = vld [vmem:[%s6092_s1 + $0x14c] ss:$16 sps:$4 sm:$0xff]  }
  0x61   :  { %2235 = vmatpush1.bf16.msra.mxu1 %v4212_v51  ;;  %1955 = vmatprep.subr.bf16.mxu0 %v4223_v55  ;;  %v4304_v51 = vld [vmem:[%s6092_s1 + $0x34c] ss:$16 sps:$4 sm:$0xff]   ;;  %v4315_v55 = vld [vmem:[%s6092_s1 + $0x128] ss:$16 sps:$4 sm:$0xff]  }
  0x62   :  { %1450 = vmatmul.mubr.bf16.gmra.mxu0 %v4791_v46  ;;  %2236 = vmatprep.subr.bf16.mxu1 %v4226_v57  ;;  %v4318_v57 = vld [vmem:[%s6092_s1 + $0x328] ss:$16 sps:$4 sm:$0xff]  }
  0x63   :  { %1731 = vmatmul.mubr.bf16.gmra.mxu1 %v4796_v47  ;;  %1459 = vmatprep.mubr.bf16.mxu0 %v4801_v48 }
  0x64   :  { %1740 = vmatprep.mubr.bf16.mxu1 %v4818_v53  ;;  %1956 = vmatpush2.bf16.msra.mxu0 %v4221_v54  ;;  %v5019_v54 = vld [vmem:[%s6093_s0 + $0x140] ss:$16 sps:$4 sm:$0xff]  }
  0x65   :  { %2237 = vmatpush2.bf16.msra.mxu1 %v4224_v56  ;;  %1957 = vmatprep.subr.bf16.mxu0 %v4241_v63  ;;  %v4317_v56 = vld [vmem:[%s6092_s1 + $0x12c] ss:$16 sps:$4 sm:$0xff]   ;;  %v5038_v63 = vld [vmem:[%s6093_s0 + $0x164] ss:$16 sps:$4 sm:$0xff]  }
  0x66   :  { %2238 = vmatprep.subr.bf16.mxu1 %v4244_v1  ;;  %6115 = vst [vmem:[#allocation3_spill] sm:$0xff] %v5038_v63  ;;  %v5046_v1 = vld [vmem:[%s6093_s0 + $0x16c] ss:$16 sps:$4 sm:$0xff]  }
  0x67   :  { %6116 = vst [vmem:[#allocation4_spill] sm:$0xff] %v5046_v1 }
  0x68   :  { %1958 = vmatpush2.bf16.msra.mxu0 %v4239_v62  ;;  %v5033_v62 = vld [vmem:[%s6093_s0 + $0x148] ss:$16 sps:$4 sm:$0xff]  }
  0x69   :  { %2239 = vmatpush2.bf16.msra.mxu1 %v4242_v0  ;;  %1959 = vmatprep.subr.bf16.mxu0 %v4253_v11  ;;  %6114 = vst [vmem:[#allocation2_spill] sm:$0xff] %v5033_v62  ;;  %v4320_v0 = vld [vmem:[%s6092_s1 + $0x32c] ss:$16 sps:$4 sm:$0xff]  }
  0x6a   :  { %1460 = vmatmul.mubr.bf16.gmra.mxu0 %v4839_v58  ;;  %2240 = vmatprep.subr.bf16.mxu1 %v4256_v13  ;;  %v4331_v11 = vld [vmem:[%s6092_s1 + $0x10c] ss:$16 sps:$4 sm:$0xff]  }
  0x6b   :  { %1741 = vmatmul.mubr.bf16.gmra.mxu1 %v4844_v59  ;;  %1469 = vmatprep.mubr.bf16.mxu0 %v4849_v60  ;;  %v4334_v13 = vld [vmem:[%s6092_s1 + $0x30c] ss:$16 sps:$4 sm:$0xff]  }
  0x6c   :  { %1750 = vmatprep.mubr.bf16.mxu1 %v4854_v61  ;;  %1960 = vmatpush2.bf16.msra.mxu0 %v4251_v10  ;;  %v4329_v10 = vld [vmem:[%s6092_s1 + $0x108] ss:$16 sps:$4 sm:$0xff]  }
  0x6d   :  { %2241 = vmatpush2.bf16.msra.mxu1 %v4254_v12  ;;  %1961 = vmatprep.subr.bf16.mxu0 %v4271_v23  ;;  %v4332_v12 = vld [vmem:[%s6092_s1 + $0x308] ss:$16 sps:$4 sm:$0xff]  }
  0x6e   :  { %2242 = vmatprep.subr.bf16.mxu1 %v4274_v25  ;;  %v5072_v23 = vld [vmem:[%s6093_s0 + $0x168] ss:$16 sps:$4 sm:$0xff]   ;;  %v5082_v25 = vld [vmem:[%s6093_s0 + $0x18c] ss:$16 sps:$4 sm:$0xff]  }
  0x6f   :  { %6118 = vst [vmem:[#allocation6_spill] sm:$0xff] %v5072_v23  ;;  %6120 = vst [vmem:[#allocation8_spill] sm:$0xff] %v5082_v25 }
  0x70   :  { %1962 = vmatpush2.bf16.msra.mxu0 %v4269_v22  ;;  %v5067_v22 = vld [vmem:[%s6093_s0 + $0x160] ss:$16 sps:$4 sm:$0xff]  }
  0x71   :  { %2243 = vmatpush2.bf16.msra.mxu1 %v4272_v24  ;;  %1963 = vmatprep.subr.bf16.mxu0 %v4283_v34  ;;  %6117 = vst [vmem:[#allocation5_spill] sm:$0xff] %v5067_v22  ;;  %v5077_v24 = vld [vmem:[%s6093_s0 + $0x184] ss:$16 sps:$4 sm:$0xff]   ;;  %v5096_v34 = vld [vmem:[%s6093_s0 + $0x188] ss:$16 sps:$4 sm:$0xff]  }
  0x72   :  { %1470 = vmatmul.mubr.bf16.gmra.mxu0 %v4875_v2  ;;  %2244 = vmatprep.subr.bf16.mxu1 %v4286_v36  ;;  %6119 = vst [vmem:[#allocation7_spill] sm:$0xff] %v5077_v24  ;;  %6122 = vst [vmem:[#allocation10_spill] sm:$0xff] %v5096_v34  ;;  %v5106_v36 = vld [vmem:[%s6093_s0 + $0x1ac] ss:$16 sps:$4 sm:$0xff]  }
  0x73   :  { %1751 = vmatmul.mubr.bf16.gmra.mxu1 %v4880_v3  ;;  %1479 = vmatprep.mubr.bf16.mxu0 %v4885_v6  ;;  %6124 = vst [vmem:[#allocation12_spill] sm:$0xff] %v5106_v36 }
  0x74   :  { %1760 = vmatprep.mubr.bf16.mxu1 %v4890_v7  ;;  %1964 = vmatpush2.bf16.msra.mxu0 %v4281_v33  ;;  %v5091_v33 = vld [vmem:[%s6093_s0 + $0x180] ss:$16 sps:$4 sm:$0xff]  }
  0x75   :  { %2245 = vmatpush2.bf16.msra.mxu1 %v4284_v35  ;;  %1965 = vmatprep.subr.bf16.mxu0 %v4301_v49  ;;  %6121 = vst [vmem:[#allocation9_spill] sm:$0xff] %v5091_v33  ;;  %v5101_v35 = vld [vmem:[%s6093_s0 + $0x1a4] ss:$16 sps:$4 sm:$0xff]   ;;  %v4232_v49 = vld [vmem:[%s6093_s0 + $0x1a8] ss:$16 sps:$4 sm:$0xff]  }
  0x76   :  { %2246 = vmatprep.subr.bf16.mxu1 %v4304_v51  ;;  %6123 = vst [vmem:[#allocation11_spill] sm:$0xff] %v5101_v35  ;;  %v4235_v51 = vld [vmem:[%s6093_s0 + $0x1cc] ss:$16 sps:$4 sm:$0xff]  }
  0x78   :  { %1966 = vmatpush2.bf16.msra.mxu0 %v4299_v45  ;;  %v4231_v45 = vld [vmem:[%s6093_s0 + $0x1a0] ss:$16 sps:$4 sm:$0xff]  }
  0x79   :  { %2247 = vmatpush2.bf16.msra.mxu1 %v4302_v50  ;;  %1967 = vmatprep.subr.bf16.mxu0 %v4317_v56  ;;  %v4233_v50 = vld [vmem:[%s6093_s0 + $0x1c4] ss:$16 sps:$4 sm:$0xff]   ;;  %v4238_v56 = vld [vmem:[%s6093_s0 + $0x1c8] ss:$16 sps:$4 sm:$0xff]  }
  0x7a   :  { %1480 = vmatmul.mubr.bf16.gmra.mxu0 %v4911_v14  ;;  %2248 = vmatprep.subr.bf16.mxu1 %v4320_v0  ;;  %v4247_v0 = vld [vmem:[%s6093_s0 + $0x1ec] ss:$16 sps:$4 sm:$0xff]  }
  0x7b   :  { %1761 = vmatmul.mubr.bf16.gmra.mxu1 %v4916_v15  ;;  %1489 = vmatprep.mubr.bf16.mxu0 %v4921_v20 }
  0x7c   :  { %1770 = vmatprep.mubr.bf16.mxu1 %v4926_v21  ;;  %1968 = vmatpush2.bf16.msra.mxu0 %v4315_v55  ;;  %v4237_v55 = vld [vmem:[%s6093_s0 + $0x1c0] ss:$16 sps:$4 sm:$0xff]  }
  0x7d   :  { %2249 = vmatpush2.bf16.msra.mxu1 %v4318_v57  ;;  %1969 = vmatprep.subr.bf16.mxu0 %v4331_v11  ;;  %v4245_v57 = vld [vmem:[%s6093_s0 + $0x1e4] ss:$16 sps:$4 sm:$0xff]   ;;  %v4250_v11 = vld [vmem:[%s6093_s0 + $0x1e8] ss:$16 sps:$4 sm:$0xff]  }
  0x7e   :  { %2250 = vmatprep.subr.bf16.mxu1 %v4334_v13  ;;  %v4259_v13 = vld [vmem:[%s6093_s0 + $0x20c] ss:$16 sps:$4 sm:$0xff]  }
  0x80   :  { %1970 = vmatpush2.bf16.msra.mxu0 %v4329_v10  ;;  %v4249_v10 = vld [vmem:[%s6093_s0 + $0x1e0] ss:$16 sps:$4 sm:$0xff]  }
  0x81   :  { %2251 = vmatpush2.bf16.msra.mxu1 %v4332_v12  ;;  %v4257_v12 = vld [vmem:[%s6093_s0 + $0x204] ss:$16 sps:$4 sm:$0xff]  }
  0x82   :  { %1490 = vmatmul.mubr.bf16.gmra.mxu0 %v4947_v27 }
  0x83   :  { %1771 = vmatmul.mubr.bf16.gmra.mxu1 %v4952_v28  ;;  %1499 = vmatprep.mubr.bf16.mxu0 %v4957_v32 }
  0x84   :  { %1780 = vmatprep.mubr.bf16.mxu1 %v4974_v39 }
  0x8a   :  { %1500 = vmatmul.mubr.bf16.gmra.mxu0 %v4983_v41 }
  0x8b   :  { %1781 = vmatmul.mubr.bf16.gmra.mxu1 %v4988_v43  ;;  %1509 = vmatprep.mubr.bf16.mxu0 %v4993_v44 }
  0x8c   :  { %1790 = vmatprep.mubr.bf16.mxu1 %v5010_v52 }
  0x92   :  { %1510 = vmatmul.mubr.bf16.gmra.mxu0 %v5019_v54 }
  0x93   :  { %1791 = vmatmul.mubr.bf16.gmra.mxu1 %v5033_v62  ;;  %1519 = vmatprep.mubr.bf16.mxu0 %v5038_v63 }
  0x94   :  { %1800 = vmatprep.mubr.bf16.mxu1 %v5046_v1 }
  0x9a   :  { %1520 = vmatmul.mubr.bf16.gmra.mxu0 %v5067_v22 }
  0x9b   :  { %1801 = vmatmul.mubr.bf16.gmra.mxu1 %v5072_v23  ;;  %1529 = vmatprep.mubr.bf16.mxu0 %v5077_v24 }
  0x9c   :  { %1810 = vmatprep.mubr.bf16.mxu1 %v5082_v25 }
  0xa2   :  { %1530 = vmatmul.mubr.bf16.gmra.mxu0 %v5091_v33 }
  0xa3   :  { %1811 = vmatmul.mubr.bf16.gmra.mxu1 %v5096_v34  ;;  %1539 = vmatprep.mubr.bf16.mxu0 %v5101_v35 }
  0xa4   :  { %1820 = vmatprep.mubr.bf16.mxu1 %v5106_v36 }
  0xaa   :  { %1540 = vmatmul.mubr.bf16.gmra.mxu0 %v4231_v45  ;;  %v4261_v45 = vld [vmem:[%s6093_s0 + $0x200] ss:$16 sps:$4 sm:$0xff]  }
  0xab   :  { %1821 = vmatmul.mubr.bf16.gmra.mxu1 %v4232_v49  ;;  %1549 = vmatprep.mubr.bf16.mxu0 %v4233_v50  ;;  %v4262_v49 = vld [vmem:[%s6093_s0 + $0x208] ss:$16 sps:$4 sm:$0xff]   ;;  %v4263_v50 = vld [vmem:[%s6093_s0 + $0x224] ss:$16 sps:$4 sm:$0xff]  }
  0xac   :  { %1830 = vmatprep.mubr.bf16.mxu1 %v4235_v51  ;;  %v4265_v51 = vld [vmem:[%s6093_s0 + $0x22c] ss:$16 sps:$4 sm:$0xff]  }
  0xb2   :  { %1550 = vmatmul.mubr.bf16.gmra.mxu0 %v4237_v55  ;;  %v4267_v55 = vld [vmem:[%s6093_s0 + $0x220] ss:$16 sps:$4 sm:$0xff]  }
  0xb3   :  { %1831 = vmatmul.mubr.bf16.gmra.mxu1 %v4238_v56  ;;  %1559 = vmatprep.mubr.bf16.mxu0 %v4245_v57  ;;  %v4268_v56 = vld [vmem:[%s6093_s0 + $0x228] ss:$16 sps:$4 sm:$0xff]   ;;  %v4275_v57 = vld [vmem:[%s6093_s0 + $0x244] ss:$16 sps:$4 sm:$0xff]  }
  0xb4   :  { %1840 = vmatprep.mubr.bf16.mxu1 %v4247_v0  ;;  %v4277_v0 = vld [vmem:[%s6093_s0 + $0x24c] ss:$16 sps:$4 sm:$0xff]  }
  0xba   :  { %1560 = vmatmul.mubr.bf16.gmra.mxu0 %v4249_v10  ;;  %v4279_v10 = vld [vmem:[%s6093_s0 + $0x240] ss:$16 sps:$4 sm:$0xff]  }
  0xbb   :  { %1841 = vmatmul.mubr.bf16.gmra.mxu1 %v4250_v11  ;;  %1569 = vmatprep.mubr.bf16.mxu0 %v4257_v12  ;;  %v4280_v11 = vld [vmem:[%s6093_s0 + $0x248] ss:$16 sps:$4 sm:$0xff]   ;;  %v4287_v12 = vld [vmem:[%s6093_s0 + $0x264] ss:$16 sps:$4 sm:$0xff]  }
  0xbc   :  { %1850 = vmatprep.mubr.bf16.mxu1 %v4259_v13  ;;  %v4289_v13 = vld [vmem:[%s6093_s0 + $0x26c] ss:$16 sps:$4 sm:$0xff]  }
  0xc2   :  { %1570 = vmatmul.mubr.bf16.gmra.mxu0 %v4261_v45  ;;  %v4291_v45 = vld [vmem:[%s6093_s0 + $0x260] ss:$16 sps:$4 sm:$0xff]  }
  0xc3   :  { %1851 = vmatmul.mubr.bf16.gmra.mxu1 %v4262_v49  ;;  %1579 = vmatprep.mubr.bf16.mxu0 %v4263_v50  ;;  %v4292_v49 = vld [vmem:[%s6093_s0 + $0x268] ss:$16 sps:$4 sm:$0xff]   ;;  %v4293_v50 = vld [vmem:[%s6093_s0 + $0x284] ss:$16 sps:$4 sm:$0xff]  }
  0xc4   :  { %1860 = vmatprep.mubr.bf16.mxu1 %v4265_v51  ;;  %v4295_v51 = vld [vmem:[%s6093_s0 + $0x28c] ss:$16 sps:$4 sm:$0xff]  }
  0xca   :  { %1580 = vmatmul.mubr.bf16.gmra.mxu0 %v4267_v55  ;;  %v4297_v55 = vld [vmem:[%s6093_s0 + $0x280] ss:$16 sps:$4 sm:$0xff]  }
  0xcb   :  { %1861 = vmatmul.mubr.bf16.gmra.mxu1 %v4268_v56  ;;  %1589 = vmatprep.mubr.bf16.mxu0 %v4275_v57  ;;  %v4298_v56 = vld [vmem:[%s6093_s0 + $0x288] ss:$16 sps:$4 sm:$0xff]   ;;  %v4305_v57 = vld [vmem:[%s6093_s0 + $0x2a4] ss:$16 sps:$4 sm:$0xff]  }
  0xcc   :  { %1870 = vmatprep.mubr.bf16.mxu1 %v4277_v0  ;;  %v4307_v0 = vld [vmem:[%s6093_s0 + $0x2ac] ss:$16 sps:$4 sm:$0xff]  }
  0xd2   :  { %1590 = vmatmul.mubr.bf16.gmra.mxu0 %v4279_v10  ;;  %v4309_v10 = vld [vmem:[%s6093_s0 + $0x2a0] ss:$16 sps:$4 sm:$0xff]  }
  0xd3   :  { %1871 = vmatmul.mubr.bf16.gmra.mxu1 %v4280_v11  ;;  %1599 = vmatprep.mubr.bf16.mxu0 %v4287_v12  ;;  %v4310_v11 = vld [vmem:[%s6093_s0 + $0x2a8] ss:$16 sps:$4 sm:$0xff]   ;;  %v4311_v12 = vld [vmem:[%s6093_s0 + $0x2c4] ss:$16 sps:$4 sm:$0xff]  }
  0xd4   :  { %1880 = vmatprep.mubr.bf16.mxu1 %v4289_v13  ;;  %v4313_v13 = vld [vmem:[%s6093_s0 + $0x2cc] ss:$16 sps:$4 sm:$0xff]  }
  0xda   :  { %1600 = vmatmul.mubr.bf16.gmra.mxu0 %v4291_v45  ;;  %v4321_v45 = vld [vmem:[%s6093_s0 + $0x2c0] ss:$16 sps:$4 sm:$0xff]  }
  0xdb   :  { %1881 = vmatmul.mubr.bf16.gmra.mxu1 %v4292_v49  ;;  %1609 = vmatprep.mubr.bf16.mxu0 %v4293_v50  ;;  %v4322_v49 = vld [vmem:[%s6093_s0 + $0x2c8] ss:$16 sps:$4 sm:$0xff]   ;;  %v4323_v50 = vld [vmem:[%s6093_s0 + $0x2e4] ss:$16 sps:$4 sm:$0xff]  }
  0xdc   :  { %1890 = vmatprep.mubr.bf16.mxu1 %v4295_v51  ;;  %v4325_v51 = vld [vmem:[%s6093_s0 + $0x2ec] ss:$16 sps:$4 sm:$0xff]  }
  0xe2   :  { %1610 = vmatmul.mubr.bf16.gmra.mxu0 %v4297_v55  ;;  %v113_v55 = vld [vmem:[%s6093_s0 + $0x300] sm:$0xff] }
  0xe3   :  { %1891 = vmatmul.mubr.bf16.gmra.mxu1 %v4298_v56  ;;  %1619 = vmatprep.mubr.bf16.mxu0 %v4305_v57  ;;  %v114_v56 = vld [vmem:[%s6093_s0 + $0x308] sm:$0xff]  ;;  %v2503_v57 = vlaneseq }
  0xe4   :  { %1900 = vmatprep.mubr.bf16.mxu1 %v4307_v0  ;;  %v4327_v0 = vld [vmem:[%s6093_s0 + $0x2e0] ss:$16 sps:$4 sm:$0xff]  }
  0xea   :  { %1620 = vmatmul.mubr.bf16.gmra.mxu0 %v4309_v10  ;;  %v4328_v10 = vld [vmem:[%s6093_s0 + $0x2e8] ss:$16 sps:$4 sm:$0xff]  }
  0xeb   :  { %1901 = vmatmul.mubr.bf16.gmra.mxu1 %v4310_v11  ;;  %1629 = vmatprep.mubr.bf16.mxu0 %v4311_v12  ;;  %v5244_v11 = vcombine.high %v113_v55, %v113_v55  ;;  %v5246_v12 = vcombine.high %v114_v56, %v114_v56 }
  0xec   :  { %1910 = vmatprep.mubr.bf16.mxu1 %v4313_v13  ;;  %v5248_v13 = vshrl.u32 %v2503_v57, 7  ;;  %v2719_v57 = vld [vmem:[%s6095_s3] sm:$0xf] }
  0xed   :  { %6125 = vst [vmem:[#allocation13_spill] sm:$0xff] %v5244_v11  ;;  %6126 = vst [vmem:[#allocation14_spill] sm:$0xff] %v5246_v12 }
  0xee   :  { %6127 = vst [vmem:[#allocation15_spill] sm:$0xff] %v5248_v13  ;;  %v2509_v36 = vsub.s32 1, %v5248_v13 }
  0xf2   :  { %1630 = vmatmul.mubr.bf16.gmra.mxu0 %v4321_v45  ;;  %v2505_v45 = vsub.s32 0, %v5248_v13  ;;  %v4340_v13 = vld [vmem:[%s6093_s0 + $0xc] ss:$16 sps:$4 sm:$0xff]  }
  0xf3   :  { %1911 = vmatmul.mubr.bf16.gmra.mxu1 %v4322_v49  ;;  %1639 = vmatprep.mubr.bf16.mxu0 %v4323_v50  ;;  %v5253_v49 = vcombine.low %v113_v55, %v113_v55  ;;  %v2501_v50 = vld [vmem:[%s6094_s2] sm:$0xf] }
  0xf4   :  { %1920 = vmatprep.mubr.bf16.mxu1 %v4325_v51  ;;  %v5258_v51 = vcombine.low %v114_v56, %v114_v56  ;;  %v5270_v35 = vrot.slane %v2501_v50, %v2509_v36  ;;  %v4339_v56 = vld [vmem:[%s6093_s0 + $0x4] ss:$16 sps:$4 sm:$0xff]  }
  0xf5   :  { %6128 = vst [vmem:[#allocation16_spill] sm:$0xff] %v5253_v49 }
  0xf6   :  { %6129 = vst [vmem:[#allocation17_spill] sm:$0xff] %v5258_v51 }
  0xfa   :  { %1640 = vmatmul.mubr.bf16.gmra.mxu0 %v4327_v0  ;;  %v5264_v0 = vrot.slane %v2501_v50, %v2505_v45 }
  0xfb   :  { %1921 = vmatmul.mubr.bf16.gmra.mxu1 %v4328_v10  ;;  %1649 = vmatprep.mubr.bf16.mxu0 %v5244_v11  ;;  %v5268_v11 = vrot.slane %v2719_v57, %v2505_v45 }
  0xfc   :  { %1930 = vmatprep.mubr.bf16.mxu1 %v5246_v12 }
 0x102   :  { %v1411_v10 = vpop.f32.mrf.mxu0  ;;  %1650 = vmatmul.mubr.bf16.gmra.mxu0 %v5253_v49 }
 0x103   :  { %v1692_v12 = vpop.f32.mrf.mxu1  ;;  %1931 = vmatmul.mubr.bf16.gmra.mxu1 %v5258_v51  ;;  %1971 = vmatprep.mubr.bf16.mxu0 %v4339_v56 }
 0x104   :  { %v1693_v55 = vadd.f32 %v1692_v12, %v1411_v10  ;;  %2252 = vmatprep.mubr.bf16.mxu1 %v4340_v13  ;;  %v1413_v34 = vpop.f32.mrf.mxu0  ;;  %v5279_v12 = vrot.slane %v2719_v57, %v2509_v36 }
 0x105   :  { %v1694_v49 = vpop.f32.mrf.mxu1 }
 0x106   :  { %v2523_v33 = vmul.f32 %v5264_v0, %v1693_v55  ;;  %v1695_v51 = vadd.f32 %v1694_v49, %v1413_v34  ;;  %v1415_v45 = vpop.f32.mrf.mxu0 }
 0x107   :  { %v1696_v50 = vpop.f32.mrf.mxu1 }
 0x108   :  { %v2741_v10 = vadd.f32 %v5268_v11, %v2523_v33  ;;  %v2524_v25 = vmul.f32 %v5270_v35, %v1695_v51  ;;  %v1697_v24 = vadd.f32 %v1696_v50, %v1415_v45  ;;  %v1417_v56 = vpop.f32.mrf.mxu0 }
 0x109   :  { %v1698_v23 = vpop.f32.mrf.mxu1 }
 0x10a   :  { %v2742_v22 = vadd.f32 %v5279_v12, %v2524_v25  ;;  %v2527_v13 = vmul.f32 %v5264_v0, %v1697_v24  ;;  %v1699_v1 = vadd.f32 %v1698_v23, %v1417_v56  ;;  %v2937_v63 = vmax.f32 %v2741_v10, 0.0  ;;  %v1421_v62 = vpop.f32.mrf.mxu0  ;;  %1972 = vmatmul.mubr.bf16.vlgmr.msra.gmra.mxu0 %v4617_v4 }
 0x10b   :  { %v1702_v55 = vpop.f32.mrf.mxu1  ;;  %2253 = vmatmul.mubr.bf16.vlgmr.msra.gmra.mxu1 %v4622_v5  ;;  %1981 = vmatprep.mubr.bf16.mxu0 %v4633_v8 }
 0x10c   :  { %v2938_v34 = vmax.f32 %v2742_v22, 0.0  ;;  %v2745_v33 = vadd.f32 %v5268_v11, %v2527_v13  ;;  %v2528_v36 = vmul.f32 %v5270_v35, %v1699_v1  ;;  %v1703_v49 = vadd.f32 %v1702_v55, %v1421_v62  ;;  %2262 = vmatprep.mubr.bf16.mxu1 %v4638_v9  ;;  %v1423_v25 = vpop.f32.mrf.mxu0 }
 0x10d   :  { %v1704_v24 = vpop.f32.mrf.mxu1 }
 0x10e   :  { %v5291_v23 = vmax.f32 %v2937_v63, %v2938_v34  ;;  %v2746_v51 = vadd.f32 %v5279_v12, %v2528_v36  ;;  %v2531_v4 = vmul.f32 %v5264_v0, %v1703_v49  ;;  %v1705_v57 = vadd.f32 %v1704_v24, %v1423_v25  ;;  %v1425_v5 = vpop.f32.mrf.mxu0 }
 0x10f   :  { %v1706_v22 = vpop.f32.mrf.mxu1  ;;  %v2941_v45 = vmax.f32 %v2745_v33, 0.0 }
 0x110   :  { %v2942_v50 = vmax.f32 %v2746_v51, 0.0  ;;  %v1707_v10 = vadd.f32 %v1706_v22, %v1425_v5  ;;  %v2749_v62 = vadd.f32 %v5268_v11, %v2531_v4  ;;  %v2532_v8 = vmul.f32 %v5270_v35, %v1705_v57  ;;  %v1427_v1 = vpop.f32.mrf.mxu0 }
 0x111   :  { %v1708_v9 = vpop.f32.mrf.mxu1 }
 0x112   :  { %v5297_v56 = vmax.f32 %v2941_v45, %v2942_v50  ;;  %v2535_v63 = vmul.f32 %v5264_v0, %v1707_v10  ;;  %v1709_v13 = vadd.f32 %v1708_v9, %v1427_v1  ;;  %v2750_v55 = vadd.f32 %v5279_v12, %v2532_v8  ;;  %v1431_v34 = vpop.f32.mrf.mxu0  ;;  %1982 = vmatmul.mubr.bf16.gmra.mxu0 %v4665_v16 }
 0x113   :  { %v1712_v36 = vpop.f32.mrf.mxu1  ;;  %2263 = vmatmul.mubr.bf16.gmra.mxu1 %v4670_v17  ;;  %1991 = vmatprep.mubr.bf16.mxu0 %v4675_v18  ;;  %v2945_v24 = vmax.f32 %v2749_v62, 0.0 }
 0x114   :  { %v2753_v33 = vadd.f32 %v5268_v11, %v2535_v63  ;;  %v2536_v49 = vmul.f32 %v5270_v35, %v1709_v13  ;;  %v1713_v25 = vadd.f32 %v1712_v36, %v1431_v34  ;;  %2272 = vmatprep.mubr.bf16.mxu1 %v4680_v19  ;;  %v2946_v51 = vmax.f32 %v2750_v55, 0.0  ;;  %v1433_v4 = vpop.f32.mrf.mxu0 }
 0x115   :  { %v1714_v57 = vpop.f32.mrf.mxu1 }
 0x116   :  { %v2754_v5 = vadd.f32 %v5279_v12, %v2536_v49  ;;  %v2539_v22 = vmul.f32 %v5264_v0, %v1713_v25  ;;  %v1715_v16 = vadd.f32 %v1714_v57, %v1433_v4  ;;  %v5309_v45 = vmax.f32 %v2945_v24, %v2946_v51  ;;  %v1435_v50 = vpop.f32.mrf.mxu0 }
 0x117   :  { %v2949_v17 = vmax.f32 %v2753_v33, 0.0  ;;  %v1716_v10 = vpop.f32.mrf.mxu1 }
 0x118   :  { %v2950_v8 = vmax.f32 %v2754_v5, 0.0  ;;  %v2757_v1 = vadd.f32 %v5268_v11, %v2539_v22  ;;  %v2540_v18 = vmul.f32 %v5270_v35, %v1715_v16  ;;  %v1717_v19 = vadd.f32 %v1716_v10, %v1435_v50  ;;  %v1437_v62 = vpop.f32.mrf.mxu0 }
 0x119   :  { %v1718_v9 = vpop.f32.mrf.mxu1 }
 0x11a   :  { %v5313_v63 = vmax.f32 %v2949_v17, %v2950_v8  ;;  %v2758_v13 = vadd.f32 %v5279_v12, %v2540_v18  ;;  %v2543_v55 = vmul.f32 %v5264_v0, %v1717_v19  ;;  %v1719_v34 = vadd.f32 %v1718_v9, %v1437_v62  ;;  %v1441_v36 = vpop.f32.mrf.mxu0  ;;  %1992 = vmatmul.mubr.bf16.gmra.mxu0 %v4707_v26 }
 0x11b   :  { %v1722_v49 = vpop.f32.mrf.mxu1  ;;  %2273 = vmatmul.mubr.bf16.gmra.mxu1 %v4718_v29  ;;  %v2953_v33 = vmax.f32 %v2757_v1, 0.0  ;;  %2001 = vmatprep.mubr.bf16.mxu0 %v4723_v30 }
 0x11c   :  { %v2954_v25 = vmax.f32 %v2758_v13, 0.0  ;;  %v1723_v24 = vadd.f32 %v1722_v49, %v1441_v36  ;;  %2282 = vmatprep.mubr.bf16.mxu1 %v4728_v31  ;;  %v2761_v51 = vadd.f32 %v5268_v11, %v2543_v55  ;;  %v2544_v4 = vmul.f32 %v5270_v35, %v1719_v34  ;;  %v1443_v57 = vpop.f32.mrf.mxu0 }
 0x11d   :  { %v1724_v5 = vpop.f32.mrf.mxu1 }
 0x11e   :  { %v5323_v22 = vmax.f32 %v2953_v33, %v2954_v25  ;;  %v2547_v16 = vmul.f32 %v5264_v0, %v1723_v24  ;;  %v1725_v26 = vadd.f32 %v1724_v5, %v1443_v57  ;;  %v2762_v29 = vadd.f32 %v5279_v12, %v2544_v4  ;;  %v1445_v17 = vpop.f32.mrf.mxu0 }
 0x11f   :  { %v1726_v50 = vpop.f32.mrf.mxu1  ;;  %v2957_v8 = vmax.f32 %v2761_v51, 0.0 }
 0x120   :  { %v2765_v10 = vadd.f32 %v5268_v11, %v2547_v16  ;;  %v2548_v30 = vmul.f32 %v5270_v35, %v1725_v26  ;;  %v1727_v31 = vadd.f32 %v1726_v50, %v1445_v17  ;;  %v2958_v1 = vmax.f32 %v2762_v29, 0.0  ;;  %v1447_v18 = vpop.f32.mrf.mxu0 }
 0x121   :  { %v1728_v19 = vpop.f32.mrf.mxu1 }
 0x122   :  { %v2766_v62 = vadd.f32 %v5279_v12, %v2548_v30  ;;  %v2551_v9 = vmul.f32 %v5264_v0, %v1727_v31  ;;  %v1729_v13 = vadd.f32 %v1728_v19, %v1447_v18  ;;  %v5331_v55 = vmax.f32 %v2957_v8, %v2958_v1  ;;  %v1451_v36 = vpop.f32.mrf.mxu0  ;;  %2002 = vmatmul.mubr.bf16.gmra.mxu0 %v4752_v37 }
 0x123   :  { %v2961_v34 = vmax.f32 %v2765_v10, 0.0  ;;  %v1732_v49 = vpop.f32.mrf.mxu1  ;;  %2283 = vmatmul.mubr.bf16.gmra.mxu1 %v4757_v38  ;;  %2011 = vmatprep.mubr.bf16.mxu0 %v4765_v40 }
 0x124   :  { %v2962_v33 = vmax.f32 %v2766_v62, 0.0  ;;  %v2769_v25 = vadd.f32 %v5268_v11, %v2551_v9  ;;  %v2552_v24 = vmul.f32 %v5270_v35, %v1729_v13  ;;  %v1733_v51 = vadd.f32 %v1732_v49, %v1451_v36  ;;  %2292 = vmatprep.mubr.bf16.mxu1 %v4773_v42  ;;  %v1453_v4 = vpop.f32.mrf.mxu0 }
 0x125   :  { %v1734_v57 = vpop.f32.mrf.mxu1 }
 0x126   :  { %v5339_v5 = vmax.f32 %v2961_v34, %v2962_v33  ;;  %v2770_v16 = vadd.f32 %v5279_v12, %v2552_v24  ;;  %v2555_v37 = vmul.f32 %v5264_v0, %v1733_v51  ;;  %v1735_v26 = vadd.f32 %v1734_v57, %v1453_v4  ;;  %v1455_v38 = vpop.f32.mrf.mxu0 }
 0x127   :  { %v1736_v29 = vpop.f32.mrf.mxu1  ;;  %v2965_v17 = vmax.f32 %v2769_v25, 0.0 }
 0x128   :  { %v2966_v50 = vmax.f32 %v2770_v16, 0.0  ;;  %v1737_v10 = vadd.f32 %v1736_v29, %v1455_v38  ;;  %v2773_v30 = vadd.f32 %v5268_v11, %v2555_v37  ;;  %v2556_v40 = vmul.f32 %v5270_v35, %v1735_v26  ;;  %v1457_v31 = vpop.f32.mrf.mxu0 }
 0x129   :  { %v1738_v42 = vpop.f32.mrf.mxu1 }
 0x12a   :  { %v5345_v8 = vmax.f32 %v2965_v17, %v2966_v50  ;;  %v2559_v1 = vmul.f32 %v5264_v0, %v1737_v10  ;;  %v1739_v18 = vadd.f32 %v1738_v42, %v1457_v31  ;;  %v2774_v19 = vadd.f32 %v5279_v12, %v2556_v40  ;;  %v1461_v62 = vpop.f32.mrf.mxu0  ;;  %2012 = vmatmul.mubr.bf16.gmra.mxu0 %v4791_v46 }
 0x12b   :  { %v1742_v9 = vpop.f32.mrf.mxu1  ;;  %2293 = vmatmul.mubr.bf16.gmra.mxu1 %v4796_v47  ;;  %2021 = vmatprep.mubr.bf16.mxu0 %v4801_v48  ;;  %v2969_v49 = vmax.f32 %v2773_v30, 0.0 }
 0x12c   :  { %v2777_v13 = vadd.f32 %v5268_v11, %v2559_v1  ;;  %v2560_v34 = vmul.f32 %v5270_v35, %v1739_v18  ;;  %v1743_v36 = vadd.f32 %v1742_v9, %v1461_v62  ;;  %2302 = vmatprep.mubr.bf16.mxu1 %v4818_v53  ;;  %v2970_v33 = vmax.f32 %v2774_v19, 0.0  ;;  %v1463_v25 = vpop.f32.mrf.mxu0 }
 0x12d   :  { %v1744_v24 = vpop.f32.mrf.mxu1 }
 0x12e   :  { %v2778_v51 = vadd.f32 %v5279_v12, %v2560_v34  ;;  %v2563_v4 = vmul.f32 %v5264_v0, %v1743_v36  ;;  %v1745_v46 = vadd.f32 %v1744_v24, %v1463_v25  ;;  %v5357_v57 = vmax.f32 %v2969_v49, %v2970_v33  ;;  %v1465_v16 = vpop.f32.mrf.mxu0 }
 0x12f   :  { %v2973_v47 = vmax.f32 %v2777_v13, 0.0  ;;  %v1746_v37 = vpop.f32.mrf.mxu1 }
 0x130   :  { %v2974_v26 = vmax.f32 %v2778_v51, 0.0  ;;  %v2781_v38 = vadd.f32 %v5268_v11, %v2563_v4  ;;  %v2564_v48 = vmul.f32 %v5270_v35, %v1745_v46  ;;  %v1747_v53 = vadd.f32 %v1746_v37, %v1465_v16  ;;  %v1467_v29 = vpop.f32.mrf.mxu0 }
 0x131   :  { %v1748_v17 = vpop.f32.mrf.mxu1 }
 0x132   :  { %v5361_v50 = vmax.f32 %v2973_v47, %v2974_v26  ;;  %v2782_v10 = vadd.f32 %v5279_v12, %v2564_v48  ;;  %v2567_v30 = vmul.f32 %v5264_v0, %v1747_v53  ;;  %v1749_v40 = vadd.f32 %v1748_v17, %v1467_v29  ;;  %v1471_v31 = vpop.f32.mrf.mxu0  ;;  %2022 = vmatmul.mubr.bf16.gmra.mxu0 %v4839_v58 }
 0x133   :  { %v1752_v42 = vpop.f32.mrf.mxu1  ;;  %2303 = vmatmul.mubr.bf16.gmra.mxu1 %v4844_v59  ;;  %v2977_v1 = vmax.f32 %v2781_v38, 0.0  ;;  %2031 = vmatprep.mubr.bf16.mxu0 %v4849_v60 }
 0x134   :  { %v2978_v18 = vmax.f32 %v2782_v10, 0.0  ;;  %v1753_v19 = vadd.f32 %v1752_v42, %v1471_v31  ;;  %2312 = vmatprep.mubr.bf16.mxu1 %v4854_v61  ;;  %v2785_v62 = vadd.f32 %v5268_v11, %v2567_v30  ;;  %v2568_v9 = vmul.f32 %v5270_v35, %v1749_v40  ;;  %v1473_v13 = vpop.f32.mrf.mxu0 }
 0x135   :  { %v1754_v34 = vpop.f32.mrf.mxu1 }
 0x136   :  { %v5371_v36 = vmax.f32 %v2977_v1, %v2978_v18  ;;  %v2571_v49 = vmul.f32 %v5264_v0, %v1753_v19  ;;  %v1755_v58 = vadd.f32 %v1754_v34, %v1473_v13  ;;  %v2786_v59 = vadd.f32 %v5279_v12, %v2568_v9  ;;  %v1475_v33 = vpop.f32.mrf.mxu0 }
 0x137   :  { %v1756_v25 = vpop.f32.mrf.mxu1  ;;  %v2981_v51 = vmax.f32 %v2785_v62, 0.0 }
 0x138   :  { %v2789_v24 = vadd.f32 %v5268_v11, %v2571_v49  ;;  %v2572_v60 = vmul.f32 %v5270_v35, %v1755_v58  ;;  %v1757_v61 = vadd.f32 %v1756_v25, %v1475_v33  ;;  %v2982_v4 = vmax.f32 %v2786_v59, 0.0  ;;  %v1477_v46 = vpop.f32.mrf.mxu0 }
 0x139   :  { %v1758_v47 = vpop.f32.mrf.mxu1 }
 0x13a   :  { %v2790_v16 = vadd.f32 %v5279_v12, %v2572_v60  ;;  %v2575_v37 = vmul.f32 %v5264_v0, %v1757_v61  ;;  %v1759_v26 = vadd.f32 %v1758_v47, %v1477_v46  ;;  %v5379_v38 = vmax.f32 %v2981_v51, %v2982_v4  ;;  %v1481_v53 = vpop.f32.mrf.mxu0  ;;  %2032 = vmatmul.mubr.bf16.gmra.mxu0 %v4875_v2 }
 0x13b   :  { %v2985_v48 = vmax.f32 %v2789_v24, 0.0  ;;  %v1762_v29 = vpop.f32.mrf.mxu1  ;;  %2313 = vmatmul.mubr.bf16.gmra.mxu1 %v4880_v3  ;;  %2041 = vmatprep.mubr.bf16.mxu0 %v4885_v6 }
 0x13c   :  { %v2986_v17 = vmax.f32 %v2790_v16, 0.0  ;;  %v2793_v10 = vadd.f32 %v5268_v11, %v2575_v37  ;;  %v2576_v30 = vmul.f32 %v5270_v35, %v1759_v26  ;;  %v1763_v40 = vadd.f32 %v1762_v29, %v1481_v53  ;;  %2322 = vmatprep.mubr.bf16.mxu1 %v4890_v7  ;;  %v1483_v31 = vpop.f32.mrf.mxu0 }
 0x13d   :  { %v1764_v42 = vpop.f32.mrf.mxu1 }
 0x13e   :  { %v5387_v1 = vmax.f32 %v2985_v48, %v2986_v17  ;;  %v2794_v18 = vadd.f32 %v5279_v12, %v2576_v30  ;;  %v2579_v2 = vmul.f32 %v5264_v0, %v1763_v40  ;;  %v1765_v19 = vadd.f32 %v1764_v42, %v1483_v31  ;;  %v1485_v3 = vpop.f32.mrf.mxu0 }
 0x13f   :  { %v1766_v62 = vpop.f32.mrf.mxu1  ;;  %v2989_v9 = vmax.f32 %v2793_v10, 0.0 }
 0x140   :  { %v2990_v13 = vmax.f32 %v2794_v18, 0.0  ;;  %v1767_v34 = vadd.f32 %v1766_v62, %v1485_v3  ;;  %v2797_v49 = vadd.f32 %v5268_v11, %v2579_v2  ;;  %v2580_v6 = vmul.f32 %v5270_v35, %v1765_v19  ;;  %v1487_v58 = vpop.f32.mrf.mxu0 }
 0x141   :  { %v1768_v7 = vpop.f32.mrf.mxu1 }
 0x142   :  { %v5393_v59 = vmax.f32 %v2989_v9, %v2990_v13  ;;  %v2583_v33 = vmul.f32 %v5264_v0, %v1767_v34  ;;  %v1769_v25 = vadd.f32 %v1768_v7, %v1487_v58  ;;  %v2798_v24 = vadd.f32 %v5279_v12, %v2580_v6  ;;  %v1491_v60 = vpop.f32.mrf.mxu0  ;;  %2042 = vmatmul.mubr.bf16.gmra.mxu0 %v4911_v14 }
 0x143   :  { %v1772_v61 = vpop.f32.mrf.mxu1  ;;  %2323 = vmatmul.mubr.bf16.gmra.mxu1 %v4916_v15  ;;  %2051 = vmatprep.mubr.bf16.mxu0 %v4921_v20  ;;  %v2993_v47 = vmax.f32 %v2797_v49, 0.0 }
 0x144   :  { %v2801_v51 = vadd.f32 %v5268_v11, %v2583_v33  ;;  %v2584_v4 = vmul.f32 %v5270_v35, %v1769_v25  ;;  %v1773_v46 = vadd.f32 %v1772_v61, %v1491_v60  ;;  %2332 = vmatprep.mubr.bf16.mxu1 %v4926_v21  ;;  %v2994_v16 = vmax.f32 %v2798_v24, 0.0  ;;  %v1493_v37 = vpop.f32.mrf.mxu0 }
 0x145   :  { %v1774_v26 = vpop.f32.mrf.mxu1 }
 0x146   :  { %v2802_v48 = vadd.f32 %v5279_v12, %v2584_v4  ;;  %v2587_v53 = vmul.f32 %v5264_v0, %v1773_v46  ;;  %v1775_v14 = vadd.f32 %v1774_v26, %v1493_v37  ;;  %v5405_v29 = vmax.f32 %v2993_v47, %v2994_v16  ;;  %v1495_v17 = vpop.f32.mrf.mxu0 }
 0x147   :  { %v2997_v15 = vmax.f32 %v2801_v51, 0.0  ;;  %v1776_v10 = vpop.f32.mrf.mxu1 }
 0x148   :  { %v2998_v30 = vmax.f32 %v2802_v48, 0.0  ;;  %v2805_v40 = vadd.f32 %v5268_v11, %v2587_v53  ;;  %v2588_v20 = vmul.f32 %v5270_v35, %v1775_v14  ;;  %v1777_v21 = vadd.f32 %v1776_v10, %v1495_v17  ;;  %v1497_v31 = vpop.f32.mrf.mxu0 }
 0x149   :  { %v1778_v42 = vpop.f32.mrf.mxu1 }
 0x14a   :  { %v5409_v18 = vmax.f32 %v2997_v15, %v2998_v30  ;;  %v2806_v2 = vadd.f32 %v5279_v12, %v2588_v20  ;;  %v2591_v19 = vmul.f32 %v5264_v0, %v1777_v21  ;;  %v1779_v3 = vadd.f32 %v1778_v42, %v1497_v31  ;;  %v1501_v62 = vpop.f32.mrf.mxu0  ;;  %2052 = vmatmul.mubr.bf16.gmra.mxu0 %v4947_v27 }
 0x14b   :  { %v1782_v9 = vpop.f32.mrf.mxu1  ;;  %2333 = vmatmul.mubr.bf16.gmra.mxu1 %v4952_v28  ;;  %v3001_v13 = vmax.f32 %v2805_v40, 0.0  ;;  %2061 = vmatprep.mubr.bf16.mxu0 %v4957_v32 }
 0x14c   :  { %v3002_v34 = vmax.f32 %v2806_v2, 0.0  ;;  %v1783_v49 = vadd.f32 %v1782_v9, %v1501_v62  ;;  %2342 = vmatprep.mubr.bf16.mxu1 %v4974_v39  ;;  %v2809_v6 = vadd.f32 %v5268_v11, %v2591_v19  ;;  %v2592_v58 = vmul.f32 %v5270_v35, %v1779_v3  ;;  %v1503_v7 = vpop.f32.mrf.mxu0 }
 0x14d   :  { %v1784_v33 = vpop.f32.mrf.mxu1 }
 0x14e   :  { %v5419_v25 = vmax.f32 %v3001_v13, %v3002_v34  ;;  %v2595_v24 = vmul.f32 %v5264_v0, %v1783_v49  ;;  %v1785_v27 = vadd.f32 %v1784_v33, %v1503_v7  ;;  %v2810_v28 = vadd.f32 %v5279_v12, %v2592_v58  ;;  %v1505_v60 = vpop.f32.mrf.mxu0 }
 0x14f   :  { %v1786_v61 = vpop.f32.mrf.mxu1  ;;  %v3005_v4 = vmax.f32 %v2809_v6, 0.0 }
 0x150   :  { %v2813_v51 = vadd.f32 %v5268_v11, %v2595_v24  ;;  %v2596_v32 = vmul.f32 %v5270_v35, %v1785_v27  ;;  %v1787_v39 = vadd.f32 %v1786_v61, %v1505_v60  ;;  %v3006_v46 = vmax.f32 %v2810_v28, 0.0  ;;  %v1507_v47 = vpop.f32.mrf.mxu0  ;;  %v6130_v28 = vld [vmem:[#allocation2_spill] sm:$0xff] }
 0x151   :  { %v1788_v16 = vpop.f32.mrf.mxu1 }
 0x152   :  { %v2814_v37 = vadd.f32 %v5279_v12, %v2596_v32  ;;  %v2599_v26 = vmul.f32 %v5264_v0, %v1787_v39  ;;  %v1789_v48 = vadd.f32 %v1788_v16, %v1507_v47  ;;  %v5427_v53 = vmax.f32 %v3005_v4, %v3006_v46  ;;  %v1511_v15 = vpop.f32.mrf.mxu0  ;;  %2062 = vmatmul.mubr.bf16.gmra.mxu0 %v4983_v41  ;;  %v6131_v32 = vld [vmem:[#allocation3_spill] sm:$0xff]  ;;  %v6132_v39 = vld [vmem:[#allocation4_spill] sm:$0xff] }
 0x153   :  { %v3009_v14 = vmax.f32 %v2813_v51, 0.0  ;;  %v1792_v17 = vpop.f32.mrf.mxu1  ;;  %2343 = vmatmul.mubr.bf16.gmra.mxu1 %v4988_v43  ;;  %2071 = vmatprep.mubr.bf16.mxu0 %v4993_v44 }
 0x154   :  { %v3010_v10 = vmax.f32 %v2814_v37, 0.0  ;;  %v2817_v30 = vadd.f32 %v5268_v11, %v2599_v26  ;;  %v2600_v40 = vmul.f32 %v5270_v35, %v1789_v48  ;;  %v1793_v20 = vadd.f32 %v1792_v17, %v1511_v15  ;;  %2352 = vmatprep.mubr.bf16.mxu1 %v5010_v52  ;;  %v1513_v21 = vpop.f32.mrf.mxu0 }
 0x155   :  { %v1794_v31 = vpop.f32.mrf.mxu1 }
 0x156   :  { %v5435_v42 = vmax.f32 %v3009_v14, %v3010_v10  ;;  %v2818_v2 = vadd.f32 %v5279_v12, %v2600_v40  ;;  %v2603_v41 = vmul.f32 %v5264_v0, %v1793_v20  ;;  %v1795_v19 = vadd.f32 %v1794_v31, %v1513_v21  ;;  %v1515_v43 = vpop.f32.mrf.mxu0 }
 0x157   :  { %v1796_v3 = vpop.f32.mrf.mxu1  ;;  %v3013_v62 = vmax.f32 %v2817_v30, 0.0 }
 0x158   :  { %v3014_v9 = vmax.f32 %v2818_v2, 0.0  ;;  %v1797_v13 = vadd.f32 %v1796_v3, %v1515_v43  ;;  %v2821_v34 = vadd.f32 %v5268_v11, %v2603_v41  ;;  %v2604_v44 = vmul.f32 %v5270_v35, %v1795_v19  ;;  %v1517_v49 = vpop.f32.mrf.mxu0 }
 0x159   :  { %v1798_v52 = vpop.f32.mrf.mxu1 }
 0x15a   :  { %v5441_v6 = vmax.f32 %v3013_v62, %v3014_v9  ;;  %v2607_v58 = vmul.f32 %v5264_v0, %v1797_v13  ;;  %v1799_v7 = vadd.f32 %v1798_v52, %v1517_v49  ;;  %v2822_v33 = vadd.f32 %v5279_v12, %v2604_v44  ;;  %v1521_v24 = vpop.f32.mrf.mxu0  ;;  %2072 = vmatmul.mubr.bf16.gmra.mxu0 %v5019_v54  ;;  %v6133_v9 = vld [vmem:[#allocation5_spill] sm:$0xff]  ;;  %v6134_v13 = vld [vmem:[#allocation6_spill] sm:$0xff]  ;;  %v6135_v52 = vld [vmem:[#allocation7_spill] sm:$0xff] }
 0x15b   :  { %v1802_v27 = vpop.f32.mrf.mxu1  ;;  %2353 = vmatmul.mubr.bf16.gmra.mxu1 %v6130_v28  ;;  %2081 = vmatprep.mubr.bf16.mxu0 %v6131_v32  ;;  %v3017_v4 = vmax.f32 %v2821_v34, 0.0 }
 0x15c   :  { %v2825_v60 = vadd.f32 %v5268_v11, %v2607_v58  ;;  %v2608_v61 = vmul.f32 %v5270_v35, %v1799_v7  ;;  %v1803_v51 = vadd.f32 %v1802_v27, %v1521_v24  ;;  %2362 = vmatprep.mubr.bf16.mxu1 %v6132_v39  ;;  %v3018_v46 = vmax.f32 %v2822_v33, 0.0  ;;  %v1523_v47 = vpop.f32.mrf.mxu0  ;;  %v6136_v58 = vld [vmem:[#allocation8_spill] sm:$0xff] }
 0x15d   :  { %v1804_v16 = vpop.f32.mrf.mxu1 }
 0x15e   :  { %v2826_v37 = vadd.f32 %v5279_v12, %v2608_v61  ;;  %v2611_v26 = vmul.f32 %v5264_v0, %v1803_v51  ;;  %v1805_v54 = vadd.f32 %v1804_v16, %v1523_v47  ;;  %v5453_v48 = vmax.f32 %v3017_v4, %v3018_v46  ;;  %v1525_v15 = vpop.f32.mrf.mxu0 }
 0x15f   :  { %v3021_v14 = vmax.f32 %v2825_v60, 0.0  ;;  %v1806_v17 = vpop.f32.mrf.mxu1 }
 0x160   :  { %v3022_v10 = vmax.f32 %v2826_v37, 0.0  ;;  %v2829_v30 = vadd.f32 %v5268_v11, %v2611_v26  ;;  %v2612_v40 = vmul.f32 %v5270_v35, %v1805_v54  ;;  %v1807_v20 = vadd.f32 %v1806_v17, %v1525_v15  ;;  %v1527_v21 = vpop.f32.mrf.mxu0 }
 0x161   :  { %v1808_v31 = vpop.f32.mrf.mxu1 }
 0x162   :  { %v5457_v2 = vmax.f32 %v3021_v14, %v3022_v10  ;;  %v2830_v41 = vadd.f32 %v5279_v12, %v2612_v40  ;;  %v2615_v19 = vmul.f32 %v5264_v0, %v1807_v20  ;;  %v1809_v43 = vadd.f32 %v1808_v31, %v1527_v21  ;;  %v1531_v3 = vpop.f32.mrf.mxu0  ;;  %2082 = vmatmul.mubr.bf16.gmra.mxu0 %v6133_v9  ;;  %v6137_v21 = vld [vmem:[#allocation9_spill] sm:$0xff]  ;;  %v6138_v31 = vld [vmem:[#allocation10_spill] sm:$0xff]  ;;  %v6140_v9 = vld [vmem:[#allocation12_spill] sm:$0xff] }
 0x163   :  { %v1812_v62 = vpop.f32.mrf.mxu1  ;;  %2363 = vmatmul.mubr.bf16.gmra.mxu1 %v6134_v13  ;;  %v3025_v34 = vmax.f32 %v2829_v30, 0.0  ;;  %2091 = vmatprep.mubr.bf16.mxu0 %v6135_v52 }
 0x164   :  { %v3026_v44 = vmax.f32 %v2830_v41, 0.0  ;;  %v1813_v49 = vadd.f32 %v1812_v62, %v1531_v3  ;;  %2372 = vmatprep.mubr.bf16.mxu1 %v6136_v58  ;;  %v2833_v7 = vadd.f32 %v5268_v11, %v2615_v19  ;;  %v2616_v33 = vmul.f32 %v5270_v35, %v1809_v43  ;;  %v1533_v24 = vpop.f32.mrf.mxu0  ;;  %v6139_v62 = vld [vmem:[#allocation11_spill] sm:$0xff] }
 0x165   :  { %v1814_v27 = vpop.f32.mrf.mxu1 }
 0x166   :  { %v5467_v28 = vmax.f32 %v3025_v34, %v3026_v44  ;;  %v2619_v60 = vmul.f32 %v5264_v0, %v1813_v49  ;;  %v1815_v61 = vadd.f32 %v1814_v27, %v1533_v24  ;;  %v2834_v51 = vadd.f32 %v5279_v12, %v2616_v33  ;;  %v1535_v32 = vpop.f32.mrf.mxu0 }
 0x167   :  { %v1816_v39 = vpop.f32.mrf.mxu1  ;;  %v3029_v16 = vmax.f32 %v2833_v7, 0.0 }
 0x168   :  { %v2837_v4 = vadd.f32 %v5268_v11, %v2619_v60  ;;  %v2620_v46 = vmul.f32 %v5270_v35, %v1815_v61  ;;  %v1817_v47 = vadd.f32 %v1816_v39, %v1535_v32  ;;  %v3030_v37 = vmax.f32 %v2834_v51, 0.0  ;;  %v1537_v26 = vpop.f32.mrf.mxu0 }
 0x169   :  { %v1818_v54 = vpop.f32.mrf.mxu1 }
 0x16a   :  { %v2838_v14 = vadd.f32 %v5279_v12, %v2620_v46  ;;  %v2623_v15 = vmul.f32 %v5264_v0, %v1817_v47  ;;  %v1819_v17 = vadd.f32 %v1818_v54, %v1537_v26  ;;  %v5475_v10 = vmax.f32 %v3029_v16, %v3030_v37  ;;  %v1541_v40 = vpop.f32.mrf.mxu0  ;;  %2092 = vmatmul.mubr.bf16.gmra.mxu0 %v6137_v21  ;;  %v4341_v54 = vld [vmem:[%s6093_s0 + $0x1a0] ss:$16 sps:$4 sm:$0xff]  }
 0x16b   :  { %v3033_v30 = vmax.f32 %v2837_v4, 0.0  ;;  %v1822_v20 = vpop.f32.mrf.mxu1  ;;  %2373 = vmatmul.mubr.bf16.gmra.mxu1 %v6138_v31  ;;  %2101 = vmatprep.mubr.bf16.mxu0 %v6139_v62 }
 0x16c   :  { %v3034_v41 = vmax.f32 %v2838_v14, 0.0  ;;  %v2841_v19 = vadd.f32 %v5268_v11, %v2623_v15  ;;  %v2624_v43 = vmul.f32 %v5270_v35, %v1819_v17  ;;  %v1823_v3 = vadd.f32 %v1822_v20, %v1541_v40  ;;  %2382 = vmatprep.mubr.bf16.mxu1 %v6140_v9  ;;  %v1543_v13 = vpop.f32.mrf.mxu0  ;;  %v4342_v14 = vld [vmem:[%s6093_s0 + $0x1a8] ss:$16 sps:$4 sm:$0xff]   ;;  %v4343_v40 = vld [vmem:[%s6093_s0 + $0x1c4] ss:$16 sps:$4 sm:$0xff]  }
 0x16d   :  { %v1824_v34 = vpop.f32.mrf.mxu1  ;;  %v4344_v20 = vld [vmem:[%s6093_s0 + $0x1cc] ss:$16 sps:$4 sm:$0xff]  }
 0x16e   :  { %v5483_v44 = vmax.f32 %v3033_v30, %v3034_v41  ;;  %v2842_v49 = vadd.f32 %v5279_v12, %v2624_v43  ;;  %v2627_v52 = vmul.f32 %v5264_v0, %v1823_v3  ;;  %v1825_v58 = vadd.f32 %v1824_v34, %v1543_v13  ;;  %v1545_v7 = vpop.f32.mrf.mxu0 }
 0x16f   :  { %v1826_v33 = vpop.f32.mrf.mxu1  ;;  %v3037_v24 = vmax.f32 %v2841_v19, 0.0 }
 0x170   :  { %v3038_v27 = vmax.f32 %v2842_v49, 0.0  ;;  %v1827_v60 = vadd.f32 %v1826_v33, %v1545_v7  ;;  %v2845_v61 = vadd.f32 %v5268_v11, %v2627_v52  ;;  %v2628_v51 = vmul.f32 %v5270_v35, %v1825_v58  ;;  %v1547_v32 = vpop.f32.mrf.mxu0 }
 0x171   :  { %v1828_v39 = vpop.f32.mrf.mxu1 }
 0x172   :  { %v5489_v4 = vmax.f32 %v3037_v24, %v3038_v27  ;;  %v2631_v46 = vmul.f32 %v5264_v0, %v1827_v60  ;;  %v1829_v47 = vadd.f32 %v1828_v39, %v1547_v32  ;;  %v2846_v16 = vadd.f32 %v5279_v12, %v2628_v51  ;;  %v1551_v37 = vpop.f32.mrf.mxu0  ;;  %2102 = vmatmul.mubr.bf16.gmra.mxu0 %v4341_v54 }
 0x173   :  { %v1832_v26 = vpop.f32.mrf.mxu1  ;;  %2383 = vmatmul.mubr.bf16.gmra.mxu1 %v4342_v14  ;;  %2111 = vmatprep.mubr.bf16.mxu0 %v4343_v40  ;;  %v3041_v21 = vmax.f32 %v2845_v61, 0.0  ;;  %v4347_v14 = vld [vmem:[%s6093_s0 + $0x1e4] ss:$16 sps:$4 sm:$0xff]  }
 0x174   :  { %v2849_v15 = vadd.f32 %v5268_v11, %v2631_v46  ;;  %v2632_v17 = vmul.f32 %v5270_v35, %v1829_v47  ;;  %v1833_v30 = vadd.f32 %v1832_v26, %v1551_v37  ;;  %2392 = vmatprep.mubr.bf16.mxu1 %v4344_v20  ;;  %v3042_v31 = vmax.f32 %v2846_v16, 0.0  ;;  %v1553_v41 = vpop.f32.mrf.mxu0  ;;  %v4345_v47 = vld [vmem:[%s6093_s0 + $0x1c0] ss:$16 sps:$4 sm:$0xff]   ;;  %v4346_v16 = vld [vmem:[%s6093_s0 + $0x1c8] ss:$16 sps:$4 sm:$0xff]  }
 0x175   :  { %v1834_v19 = vpop.f32.mrf.mxu1 }
 0x176   :  { %v2850_v43 = vadd.f32 %v5279_v12, %v2632_v17  ;;  %v2635_v3 = vmul.f32 %v5264_v0, %v1833_v30  ;;  %v1835_v62 = vadd.f32 %v1834_v19, %v1553_v41  ;;  %v5509_v9 = vmax.f32 %v3041_v21, %v3042_v31  ;;  %v1555_v34 = vpop.f32.mrf.mxu0 }
 0x177   :  { %v3045_v13 = vmax.f32 %v2849_v15, 0.0  ;;  %v1836_v49 = vpop.f32.mrf.mxu1  ;;  %v4348_v15 = vld [vmem:[%s6093_s0 + $0x1ec] ss:$16 sps:$4 sm:$0xff]  }
 0x178   :  { %v3046_v52 = vmax.f32 %v2850_v43, 0.0  ;;  %v2853_v58 = vadd.f32 %v5268_v11, %v2635_v3  ;;  %v2636_v7 = vmul.f32 %v5270_v35, %v1835_v62  ;;  %v1837_v33 = vadd.f32 %v1836_v49, %v1555_v34  ;;  %v1557_v24 = vpop.f32.mrf.mxu0 }
 0x179   :  { %v1838_v27 = vpop.f32.mrf.mxu1 }
 0x17a   :  { %v5513_v60 = vmax.f32 %v3045_v13, %v3046_v52  ;;  %v2854_v61 = vadd.f32 %v5279_v12, %v2636_v7  ;;  %v2639_v51 = vmul.f32 %v5264_v0, %v1837_v33  ;;  %v1839_v32 = vadd.f32 %v1838_v27, %v1557_v24  ;;  %v1561_v39 = vpop.f32.mrf.mxu0  ;;  %2112 = vmatmul.mubr.bf16.gmra.mxu0 %v4345_v47  ;;  %v4350_v47 = vld [vmem:[%s6093_s0 + $0x1e8] ss:$16 sps:$4 sm:$0xff]  }
 0x17b   :  { %v1842_v46 = vpop.f32.mrf.mxu1  ;;  %2393 = vmatmul.mubr.bf16.gmra.mxu1 %v4346_v16  ;;  %v3049_v37 = vmax.f32 %v2853_v58, 0.0  ;;  %2121 = vmatprep.mubr.bf16.mxu0 %v4347_v14  ;;  %v4351_v14 = vld [vmem:[%s6093_s0 + $0x204] ss:$16 sps:$4 sm:$0xff]  }
 0x17c   :  { %v3050_v26 = vmax.f32 %v2854_v61, 0.0  ;;  %v1843_v54 = vadd.f32 %v1842_v46, %v1561_v39  ;;  %2402 = vmatprep.mubr.bf16.mxu1 %v4348_v15  ;;  %v2857_v17 = vadd.f32 %v5268_v11, %v2639_v51  ;;  %v2640_v30 = vmul.f32 %v5270_v35, %v1839_v32  ;;  %v1563_v40 = vpop.f32.mrf.mxu0  ;;  %v4349_v46 = vld [vmem:[%s6093_s0 + $0x1e0] ss:$16 sps:$4 sm:$0xff]   ;;  %v4352_v15 = vld [vmem:[%s6093_s0 + $0x20c] ss:$16 sps:$4 sm:$0xff]  }
 0x17d   :  { %v1844_v20 = vpop.f32.mrf.mxu1 }
 0x17e   :  { %v5531_v21 = vmax.f32 %v3049_v37, %v3050_v26  ;;  %v2643_v31 = vmul.f32 %v5264_v0, %v1843_v54  ;;  %v1845_v41 = vadd.f32 %v1844_v20, %v1563_v40  ;;  %v2858_v19 = vadd.f32 %v5279_v12, %v2640_v30  ;;  %v1565_v43 = vpop.f32.mrf.mxu0 }
 0x17f   :  { %v1846_v3 = vpop.f32.mrf.mxu1  ;;  %v3053_v49 = vmax.f32 %v2857_v17, 0.0 }
 0x180   :  { %v2861_v62 = vadd.f32 %v5268_v11, %v2643_v31  ;;  %v2644_v13 = vmul.f32 %v5270_v35, %v1845_v41  ;;  %v1847_v34 = vadd.f32 %v1846_v3, %v1565_v43  ;;  %v3054_v52 = vmax.f32 %v2858_v19, 0.0  ;;  %v1567_v58 = vpop.f32.mrf.mxu0 }
 0x181   :  { %v1848_v7 = vpop.f32.mrf.mxu1 }
 0x182   :  { %v2862_v33 = vadd.f32 %v5279_v12, %v2644_v13  ;;  %v2647_v24 = vmul.f32 %v5264_v0, %v1847_v34  ;;  %v1849_v27 = vadd.f32 %v1848_v7, %v1567_v58  ;;  %v5539_v61 = vmax.f32 %v3053_v49, %v3054_v52  ;;  %v1571_v32 = vpop.f32.mrf.mxu0  ;;  %2122 = vmatmul.mubr.bf16.gmra.mxu0 %v4349_v46  ;;  %v4354_v46 = vld [vmem:[%s6093_s0 + $0x208] ss:$16 sps:$4 sm:$0xff]  }
 0x183   :  { %v3057_v51 = vmax.f32 %v2861_v62, 0.0  ;;  %v1852_v39 = vpop.f32.mrf.mxu1  ;;  %2403 = vmatmul.mubr.bf16.gmra.mxu1 %v4350_v47  ;;  %2131 = vmatprep.mubr.bf16.mxu0 %v4351_v14 }
 0x184   :  { %v3058_v16 = vmax.f32 %v2862_v33, 0.0  ;;  %v2865_v37 = vadd.f32 %v5268_v11, %v2647_v24  ;;  %v2648_v26 = vmul.f32 %v5270_v35, %v1849_v27  ;;  %v1853_v54 = vadd.f32 %v1852_v39, %v1571_v32  ;;  %2412 = vmatprep.mubr.bf16.mxu1 %v4352_v15  ;;  %v1573_v17 = vpop.f32.mrf.mxu0  ;;  %v4353_v39 = vld [vmem:[%s6093_s0 + $0x200] ss:$16 sps:$4 sm:$0xff]  }
 0x185   :  { %v1854_v30 = vpop.f32.mrf.mxu1 }
 0x186   :  { %v5555_v40 = vmax.f32 %v3057_v51, %v3058_v16  ;;  %v2866_v20 = vadd.f32 %v5279_v12, %v2648_v26  ;;  %v2651_v31 = vmul.f32 %v5264_v0, %v1853_v54  ;;  %v1855_v41 = vadd.f32 %v1854_v30, %v1573_v17  ;;  %v1575_v19 = vpop.f32.mrf.mxu0  ;;  %v4355_v26 = vld [vmem:[%s6093_s0 + $0x224] ss:$16 sps:$4 sm:$0xff]   ;;  %v4356_v54 = vld [vmem:[%s6093_s0 + $0x22c] ss:$16 sps:$4 sm:$0xff]  }
 0x187   :  { %v1856_v43 = vpop.f32.mrf.mxu1  ;;  %v3061_v3 = vmax.f32 %v2865_v37, 0.0 }
 0x188   :  { %v3062_v62 = vmax.f32 %v2866_v20, 0.0  ;;  %v1857_v13 = vadd.f32 %v1856_v43, %v1575_v19  ;;  %v2869_v34 = vadd.f32 %v5268_v11, %v2651_v31  ;;  %v2652_v49 = vmul.f32 %v5270_v35, %v1855_v41  ;;  %v1577_v52 = vpop.f32.mrf.mxu0 }
 0x189   :  { %v1858_v58 = vpop.f32.mrf.mxu1 }
 0x18a   :  { %v5561_v7 = vmax.f32 %v3061_v3, %v3062_v62  ;;  %v2655_v33 = vmul.f32 %v5264_v0, %v1857_v13  ;;  %v1859_v24 = vadd.f32 %v1858_v58, %v1577_v52  ;;  %v2870_v27 = vadd.f32 %v5279_v12, %v2652_v49  ;;  %v1581_v51 = vpop.f32.mrf.mxu0  ;;  %2132 = vmatmul.mubr.bf16.gmra.mxu0 %v4353_v39 }
 0x18b   :  { %v1862_v32 = vpop.f32.mrf.mxu1  ;;  %2413 = vmatmul.mubr.bf16.gmra.mxu1 %v4354_v46  ;;  %2141 = vmatprep.mubr.bf16.mxu0 %v4355_v26  ;;  %v3065_v14 = vmax.f32 %v2869_v34, 0.0 }
 0x18c   :  { %v2873_v47 = vadd.f32 %v5268_v11, %v2655_v33  ;;  %v2656_v16 = vmul.f32 %v5270_v35, %v1859_v24  ;;  %v1863_v37 = vadd.f32 %v1862_v32, %v1581_v51  ;;  %2422 = vmatprep.mubr.bf16.mxu1 %v4356_v54  ;;  %v3066_v15 = vmax.f32 %v2870_v27, 0.0  ;;  %v1583_v17 = vpop.f32.mrf.mxu0 }
 0x18d   :  { %v1864_v30 = vpop.f32.mrf.mxu1 }
 0x18e   :  { %v2874_v20 = vadd.f32 %v5279_v12, %v2656_v16  ;;  %v2659_v31 = vmul.f32 %v5264_v0, %v1863_v37  ;;  %v1865_v41 = vadd.f32 %v1864_v30, %v1583_v17  ;;  %v5581_v19 = vmax.f32 %v3065_v14, %v3066_v15  ;;  %v1585_v3 = vpop.f32.mrf.mxu0  ;;  %v4358_v16 = vld [vmem:[%s6093_s0 + $0x228] ss:$16 sps:$4 sm:$0xff]   ;;  %v4359_v14 = vld [vmem:[%s6093_s0 + $0x244] ss:$16 sps:$4 sm:$0xff]   ;;  %v4360_v15 = vld [vmem:[%s6093_s0 + $0x24c] ss:$16 sps:$4 sm:$0xff]  }
 0x18f   :  { %v3069_v43 = vmax.f32 %v2873_v47, 0.0  ;;  %v1866_v62 = vpop.f32.mrf.mxu1  ;;  %v4357_v47 = vld [vmem:[%s6093_s0 + $0x220] ss:$16 sps:$4 sm:$0xff]  }
 0x190   :  { %v3070_v13 = vmax.f32 %v2874_v20, 0.0  ;;  %v2877_v49 = vadd.f32 %v5268_v11, %v2659_v31  ;;  %v2660_v52 = vmul.f32 %v5270_v35, %v1865_v41  ;;  %v1867_v58 = vadd.f32 %v1866_v62, %v1585_v3  ;;  %v1587_v34 = vpop.f32.mrf.mxu0 }
 0x191   :  { %v1868_v33 = vpop.f32.mrf.mxu1 }
 0x192   :  { %v5585_v24 = vmax.f32 %v3069_v43, %v3070_v13  ;;  %v2878_v27 = vadd.f32 %v5279_v12, %v2660_v52  ;;  %v2663_v51 = vmul.f32 %v5264_v0, %v1867_v58  ;;  %v1869_v32 = vadd.f32 %v1868_v33, %v1587_v34  ;;  %v1591_v39 = vpop.f32.mrf.mxu0  ;;  %2142 = vmatmul.mubr.bf16.gmra.mxu0 %v4357_v47 }
 0x193   :  { %v1872_v46 = vpop.f32.mrf.mxu1  ;;  %2423 = vmatmul.mubr.bf16.gmra.mxu1 %v4358_v16  ;;  %v3073_v37 = vmax.f32 %v2877_v49, 0.0  ;;  %2151 = vmatprep.mubr.bf16.mxu0 %v4359_v14  ;;  %v4361_v14 = vld [vmem:[%s6093_s0 + $0x240] ss:$16 sps:$4 sm:$0xff]  }
 0x194   :  { %v3074_v26 = vmax.f32 %v2878_v27, 0.0  ;;  %v1873_v54 = vadd.f32 %v1872_v46, %v1591_v39  ;;  %2432 = vmatprep.mubr.bf16.mxu1 %v4360_v15  ;;  %v2881_v17 = vadd.f32 %v5268_v11, %v2663_v51  ;;  %v2664_v30 = vmul.f32 %v5270_v35, %v1869_v32  ;;  %v1593_v20 = vpop.f32.mrf.mxu0  ;;  %v4362_v15 = vld [vmem:[%s6093_s0 + $0x248] ss:$16 sps:$4 sm:$0xff]  }
 0x195   :  { %v1874_v31 = vpop.f32.mrf.mxu1 }
 0x196   :  { %v5603_v41 = vmax.f32 %v3073_v37, %v3074_v26  ;;  %v2667_v43 = vmul.f32 %v5264_v0, %v1873_v54  ;;  %v1875_v3 = vadd.f32 %v1874_v31, %v1593_v20  ;;  %v2882_v62 = vadd.f32 %v5279_v12, %v2664_v30  ;;  %v1595_v13 = vpop.f32.mrf.mxu0 }
 0x197   :  { %v1876_v49 = vpop.f32.mrf.mxu1  ;;  %v3077_v33 = vmax.f32 %v2881_v17, 0.0 }
 0x198   :  { %v2885_v52 = vadd.f32 %v5268_v11, %v2667_v43  ;;  %v2668_v58 = vmul.f32 %v5270_v35, %v1875_v3  ;;  %v1877_v34 = vadd.f32 %v1876_v49, %v1595_v13  ;;  %v3078_v27 = vmax.f32 %v2882_v62, 0.0  ;;  %v1597_v51 = vpop.f32.mrf.mxu0  ;;  %v4363_v43 = vld [vmem:[%s6093_s0 + $0x264] ss:$16 sps:$4 sm:$0xff]   ;;  %v4364_v3 = vld [vmem:[%s6093_s0 + $0x26c] ss:$16 sps:$4 sm:$0xff]  }
 0x199   :  { %v1878_v32 = vpop.f32.mrf.mxu1 }
 0x19a   :  { %v2886_v39 = vadd.f32 %v5279_v12, %v2668_v58  ;;  %v2671_v46 = vmul.f32 %v5264_v0, %v1877_v34  ;;  %v1879_v47 = vadd.f32 %v1878_v32, %v1597_v51  ;;  %v5611_v16 = vmax.f32 %v3077_v33, %v3078_v27  ;;  %v1601_v26 = vpop.f32.mrf.mxu0  ;;  %2152 = vmatmul.mubr.bf16.gmra.mxu0 %v4361_v14 }
 0x19b   :  { %v3081_v37 = vmax.f32 %v2885_v52, 0.0  ;;  %v1882_v54 = vpop.f32.mrf.mxu1  ;;  %2433 = vmatmul.mubr.bf16.gmra.mxu1 %v4362_v15  ;;  %2161 = vmatprep.mubr.bf16.mxu0 %v4363_v43  ;;  %v4366_v43 = vld [vmem:[%s6093_s0 + $0x268] ss:$16 sps:$4 sm:$0xff]  }
 0x19c   :  { %v3082_v17 = vmax.f32 %v2886_v39, 0.0  ;;  %v2889_v30 = vadd.f32 %v5268_v11, %v2671_v46  ;;  %v2672_v20 = vmul.f32 %v5270_v35, %v1879_v47  ;;  %v1883_v31 = vadd.f32 %v1882_v54, %v1601_v26  ;;  %2442 = vmatprep.mubr.bf16.mxu1 %v4364_v3  ;;  %v1603_v62 = vpop.f32.mrf.mxu0 }
 0x19d   :  { %v1884_v13 = vpop.f32.mrf.mxu1 }
 0x19e   :  { %v5627_v49 = vmax.f32 %v3081_v37, %v3082_v17  ;;  %v2890_v52 = vadd.f32 %v5279_v12, %v2672_v20  ;;  %v2675_v58 = vmul.f32 %v5264_v0, %v1883_v31  ;;  %v1885_v34 = vadd.f32 %v1884_v13, %v1603_v62  ;;  %v1605_v33 = vpop.f32.mrf.mxu0 }
 0x19f   :  { %v1886_v27 = vpop.f32.mrf.mxu1  ;;  %v3085_v51 = vmax.f32 %v2889_v30, 0.0  ;;  %v4365_v30 = vld [vmem:[%s6093_s0 + $0x260] ss:$16 sps:$4 sm:$0xff]  }
 0x1a0   :  { %v3086_v32 = vmax.f32 %v2890_v52, 0.0  ;;  %v1887_v39 = vadd.f32 %v1886_v27, %v1605_v33  ;;  %v2893_v46 = vadd.f32 %v5268_v11, %v2675_v58  ;;  %v2676_v47 = vmul.f32 %v5270_v35, %v1885_v34  ;;  %v1607_v26 = vpop.f32.mrf.mxu0  ;;  %v4367_v52 = vld [vmem:[%s6093_s0 + $0x284] ss:$16 sps:$4 sm:$0xff]   ;;  %v4368_v58 = vld [vmem:[%s6093_s0 + $0x28c] ss:$16 sps:$4 sm:$0xff]  }
 0x1a1   :  { %v1888_v54 = vpop.f32.mrf.mxu1 }
 0x1a2   :  { %v5633_v14 = vmax.f32 %v3085_v51, %v3086_v32  ;;  %v2679_v37 = vmul.f32 %v5264_v0, %v1887_v39  ;;  %v1889_v15 = vadd.f32 %v1888_v54, %v1607_v26  ;;  %v2894_v17 = vadd.f32 %v5279_v12, %v2676_v47  ;;  %v1611_v20 = vpop.f32.mrf.mxu0  ;;  %2162 = vmatmul.mubr.bf16.gmra.mxu0 %v4365_v30 }
 0x1a3   :  { %v1892_v31 = vpop.f32.mrf.mxu1  ;;  %2443 = vmatmul.mubr.bf16.gmra.mxu1 %v4366_v43  ;;  %2171 = vmatprep.mubr.bf16.mxu0 %v4367_v52  ;;  %v3089_v34 = vmax.f32 %v2893_v46, 0.0 }
 0x1a4   :  { %6141 = vst [vmem:[#allocation2_spill] sm:$0xff] %v5633_v14  ;;  %v2897_v3 = vadd.f32 %v5268_v11, %v2679_v37  ;;  %v2680_v62 = vmul.f32 %v5270_v35, %v1889_v15  ;;  %v1893_v13 = vadd.f32 %v1892_v31, %v1611_v20  ;;  %2452 = vmatprep.mubr.bf16.mxu1 %v4368_v58  ;;  %v3090_v33 = vmax.f32 %v2894_v17, 0.0  ;;  %v1613_v27 = vpop.f32.mrf.mxu0 }
 0x1a5   :  { %v1894_v51 = vpop.f32.mrf.mxu1 }
 0x1a6   :  { %v2898_v32 = vadd.f32 %v5279_v12, %v2680_v62  ;;  %v2683_v39 = vmul.f32 %v5264_v0, %v1893_v13  ;;  %v1895_v47 = vadd.f32 %v1894_v51, %v1613_v27  ;;  %v5653_v26 = vmax.f32 %v3089_v34, %v3090_v33  ;;  %v1615_v37 = vpop.f32.mrf.mxu0  ;;  %v4370_v27 = vld [vmem:[%s6093_s0 + $0x288] ss:$16 sps:$4 sm:$0xff]  }
 0x1a7   :  { %v3093_v54 = vmax.f32 %v2897_v3, 0.0  ;;  %v1896_v15 = vpop.f32.mrf.mxu1  ;;  %v4369_v3 = vld [vmem:[%s6093_s0 + $0x280] ss:$16 sps:$4 sm:$0xff]  }
 0x1a8   :  { %6142 = vst [vmem:[#allocation3_spill] sm:$0xff] %v5653_v26  ;;  %v3094_v20 = vmax.f32 %v2898_v32, 0.0  ;;  %v2901_v31 = vadd.f32 %v5268_v11, %v2683_v39  ;;  %v2684_v30 = vmul.f32 %v5270_v35, %v1895_v47  ;;  %v1897_v43 = vadd.f32 %v1896_v15, %v1615_v37  ;;  %v1617_v46 = vpop.f32.mrf.mxu0  ;;  %v4371_v47 = vld [vmem:[%s6093_s0 + $0x2a4] ss:$16 sps:$4 sm:$0xff]  }
 0x1a9   :  { %v1898_v17 = vpop.f32.mrf.mxu1 }
 0x1aa   :  { %v5657_v52 = vmax.f32 %v3093_v54, %v3094_v20  ;;  %v2902_v62 = vadd.f32 %v5279_v12, %v2684_v30  ;;  %v2687_v13 = vmul.f32 %v5264_v0, %v1897_v43  ;;  %v1899_v58 = vadd.f32 %v1898_v17, %v1617_v46  ;;  %v1621_v34 = vpop.f32.mrf.mxu0  ;;  %2172 = vmatmul.mubr.bf16.gmra.mxu0 %v4369_v3  ;;  %v4372_v54 = vld [vmem:[%s6093_s0 + $0x2ac] ss:$16 sps:$4 sm:$0xff]  }
 0x1ab   :  { %v1902_v33 = vpop.f32.mrf.mxu1  ;;  %2453 = vmatmul.mubr.bf16.gmra.mxu1 %v4370_v27  ;;  %v3097_v51 = vmax.f32 %v2901_v31, 0.0  ;;  %2181 = vmatprep.mubr.bf16.mxu0 %v4371_v47 }
 0x1ac   :  { %6143 = vst [vmem:[#allocation4_spill] sm:$0xff] %v5657_v52  ;;  %v3098_v32 = vmax.f32 %v2902_v62, 0.0  ;;  %v1903_v39 = vadd.f32 %v1902_v33, %v1621_v34  ;;  %2462 = vmatprep.mubr.bf16.mxu1 %v4372_v54  ;;  %v2905_v37 = vadd.f32 %v5268_v11, %v2687_v13  ;;  %v2688_v15 = vmul.f32 %v5270_v35, %v1899_v58  ;;  %v1623_v20 = vpop.f32.mrf.mxu0 }
 0x1ad   :  { %v1904_v30 = vpop.f32.mrf.mxu1 }
 0x1ae   :  { %v5675_v43 = vmax.f32 %v3097_v51, %v3098_v32  ;;  %v2691_v31 = vmul.f32 %v5264_v0, %v1903_v39  ;;  %v1905_v46 = vadd.f32 %v1904_v30, %v1623_v20  ;;  %v2906_v17 = vadd.f32 %v5279_v12, %v2688_v15  ;;  %v1625_v62 = vpop.f32.mrf.mxu0 }
 0x1af   :  { %v1906_v34 = vpop.f32.mrf.mxu1  ;;  %v3101_v47 = vmax.f32 %v2905_v37, 0.0  ;;  %v4374_v37 = vld [vmem:[%s6093_s0 + $0x2a8] ss:$16 sps:$4 sm:$0xff]  }
 0x1b0   :  { %6144 = vst [vmem:[#allocation5_spill] sm:$0xff] %v5675_v43  ;;  %v2909_v33 = vadd.f32 %v5268_v11, %v2691_v31  ;;  %v2692_v3 = vmul.f32 %v5270_v35, %v1905_v46  ;;  %v1907_v27 = vadd.f32 %v1906_v34, %v1625_v62  ;;  %v3102_v13 = vmax.f32 %v2906_v17, 0.0  ;;  %v1627_v54 = vpop.f32.mrf.mxu0  ;;  %v4373_v31 = vld [vmem:[%s6093_s0 + $0x2a0] ss:$16 sps:$4 sm:$0xff]  }
 0x1b1   :  { %v1908_v58 = vpop.f32.mrf.mxu1 }
 0x1b2   :  { %v2910_v52 = vadd.f32 %v5279_v12, %v2692_v3  ;;  %v2695_v51 = vmul.f32 %v5264_v0, %v1907_v27  ;;  %v1909_v32 = vadd.f32 %v1908_v58, %v1627_v54  ;;  %v5683_v39 = vmax.f32 %v3101_v47, %v3102_v13  ;;  %v1631_v15 = vpop.f32.mrf.mxu0  ;;  %2182 = vmatmul.mubr.bf16.gmra.mxu0 %v4373_v31  ;;  %v4376_v3 = vld [vmem:[%s6093_s0 + $0x2cc] ss:$16 sps:$4 sm:$0xff]  }
 0x1b3   :  { %v3105_v20 = vmax.f32 %v2909_v33, 0.0  ;;  %v1912_v30 = vpop.f32.mrf.mxu1  ;;  %2463 = vmatmul.mubr.bf16.gmra.mxu1 %v4374_v37  ;;  %v4375_v33 = vld [vmem:[%s6093_s0 + $0x2c4] ss:$16 sps:$4 sm:$0xff]  }
 0x1b4   :  { %6145 = vst [vmem:[#allocation6_spill] sm:$0xff] %v5683_v39  ;;  %v3106_v46 = vmax.f32 %v2910_v52, 0.0  ;;  %v2913_v17 = vadd.f32 %v5268_v11, %v2695_v51  ;;  %v2696_v62 = vmul.f32 %v5270_v35, %v1909_v32  ;;  %v1913_v34 = vadd.f32 %v1912_v30, %v1631_v15  ;;  %2191 = vmatprep.mubr.bf16.mxu0 %v4375_v33  ;;  %v1633_v27 = vpop.f32.mrf.mxu0 }
 0x1b5   :  { %2472 = vmatprep.mubr.bf16.mxu1 %v4376_v3  ;;  %v1914_v47 = vpop.f32.mrf.mxu1 }
 0x1b6   :  { %v5699_v13 = vmax.f32 %v3105_v20, %v3106_v46  ;;  %v2914_v52 = vadd.f32 %v5279_v12, %v2696_v62  ;;  %v2699_v54 = vmul.f32 %v5264_v0, %v1913_v34  ;;  %v1915_v58 = vadd.f32 %v1914_v47, %v1633_v27  ;;  %v1635_v51 = vpop.f32.mrf.mxu0  ;;  %v4378_v47 = vld [vmem:[%s6093_s0 + $0x2c8] ss:$16 sps:$4 sm:$0xff]  }
 0x1b7   :  { %v1916_v32 = vpop.f32.mrf.mxu1  ;;  %v3109_v15 = vmax.f32 %v2913_v17, 0.0  ;;  %v4377_v17 = vld [vmem:[%s6093_s0 + $0x2c0] ss:$16 sps:$4 sm:$0xff]  }
 0x1b8   :  { %6146 = vst [vmem:[#allocation7_spill] sm:$0xff] %v5699_v13  ;;  %v3110_v30 = vmax.f32 %v2914_v52, 0.0  ;;  %v1917_v31 = vadd.f32 %v1916_v32, %v1635_v51  ;;  %v2917_v37 = vadd.f32 %v5268_v11, %v2699_v54  ;;  %v2700_v33 = vmul.f32 %v5270_v35, %v1915_v58  ;;  %v1637_v39 = vpop.f32.mrf.mxu0  ;;  %v4380_v51 = vld [vmem:[%s6093_s0 + $0x2ec] ss:$16 sps:$4 sm:$0xff]  }
 0x1b9   :  { %v1918_v3 = vpop.f32.mrf.mxu1 }
 0x1ba   :  { %v5705_v43 = vmax.f32 %v3109_v15, %v3110_v30  ;;  %v2703_v20 = vmul.f32 %v5264_v0, %v1917_v31  ;;  %v1919_v46 = vadd.f32 %v1918_v3, %v1637_v39  ;;  %v2918_v62 = vadd.f32 %v5279_v12, %v2700_v33  ;;  %v1641_v34 = vpop.f32.mrf.mxu0  ;;  %2192 = vmatmul.mubr.bf16.gmra.mxu0 %v4377_v17  ;;  %v4379_v39 = vld [vmem:[%s6093_s0 + $0x2e4] ss:$16 sps:$4 sm:$0xff]  }
 0x1bb   :  { %v1922_v27 = vpop.f32.mrf.mxu1  ;;  %2473 = vmatmul.mubr.bf16.gmra.mxu1 %v4378_v47  ;;  %2201 = vmatprep.mubr.bf16.mxu0 %v4379_v39  ;;  %v3113_v32 = vmax.f32 %v2917_v37, 0.0 }
 0x1bc   :  { %6147 = vst [vmem:[#allocation8_spill] sm:$0xff] %v5705_v43  ;;  %v2921_v52 = vadd.f32 %v5268_v11, %v2703_v20  ;;  %v2704_v54 = vmul.f32 %v5270_v35, %v1919_v46  ;;  %v1923_v58 = vadd.f32 %v1922_v27, %v1641_v34  ;;  %2482 = vmatprep.mubr.bf16.mxu1 %v4380_v51  ;;  %v3114_v15 = vmax.f32 %v2918_v62, 0.0  ;;  %v1643_v30 = vpop.f32.mrf.mxu0 }
 0x1bd   :  { %v1924_v31 = vpop.f32.mrf.mxu1 }
 0x1be   :  { %v2922_v33 = vadd.f32 %v5279_v12, %v2704_v54  ;;  %v2707_v3 = vmul.f32 %v5264_v0, %v1923_v58  ;;  %v1925_v20 = vadd.f32 %v1924_v31, %v1643_v30  ;;  %v5725_v46 = vmax.f32 %v3113_v32, %v3114_v15  ;;  %v1645_v27 = vpop.f32.mrf.mxu0  ;;  %v4382_v31 = vld [vmem:[%s6093_s0 + $0x2e8] ss:$16 sps:$4 sm:$0xff]  }
 0x1bf   :  { %v3117_v34 = vmax.f32 %v2921_v52, 0.0  ;;  %v1926_v17 = vpop.f32.mrf.mxu1  ;;  %v4381_v52 = vld [vmem:[%s6093_s0 + $0x2e0] ss:$16 sps:$4 sm:$0xff]  }
 0x1c0   :  { %6148 = vst [vmem:[#allocation9_spill] sm:$0xff] %v5725_v46  ;;  %v3118_v47 = vmax.f32 %v2922_v33, 0.0  ;;  %v2925_v39 = vadd.f32 %v5268_v11, %v2707_v3  ;;  %v2708_v43 = vmul.f32 %v5270_v35, %v1925_v20  ;;  %v1927_v51 = vadd.f32 %v1926_v17, %v1645_v27  ;;  %v1647_v37 = vpop.f32.mrf.mxu0 }
 0x1c1   :  { %v1928_v62 = vpop.f32.mrf.mxu1 }
 0x1c2   :  { %v5729_v13 = vmax.f32 %v3117_v34, %v3118_v47  ;;  %v2926_v54 = vadd.f32 %v5279_v12, %v2708_v43  ;;  %v2711_v58 = vmul.f32 %v5264_v0, %v1927_v51  ;;  %v1929_v30 = vadd.f32 %v1928_v62, %v1647_v37  ;;  %v1651_v32 = vpop.f32.mrf.mxu0  ;;  %2202 = vmatmul.mubr.bf16.gmra.mxu0 %v4381_v52  ;;  %v6150_v34 = vld [vmem:[#allocation13_spill] sm:$0xff]  ;;  %v6151_v43 = vld [vmem:[#allocation14_spill] sm:$0xff] }
 0x1c3   :  { %v1932_v15 = vpop.f32.mrf.mxu1  ;;  %2483 = vmatmul.mubr.bf16.gmra.mxu1 %v4382_v31  ;;  %v3121_v33 = vmax.f32 %v2925_v39, 0.0  ;;  %2211 = vmatprep.mubr.bf16.mxu0 %v6150_v34 }
 0x1c4   :  { %6149 = vst [vmem:[#allocation10_spill] sm:$0xff] %v5729_v13  ;;  %v3122_v3 = vmax.f32 %v2926_v54, 0.0  ;;  %v1933_v20 = vadd.f32 %v1932_v15, %v1651_v32  ;;  %2492 = vmatprep.mubr.bf16.mxu1 %v6151_v43  ;;  %v2929_v27 = vadd.f32 %v5268_v11, %v2711_v58  ;;  %v2712_v17 = vmul.f32 %v5270_v35, %v1929_v30  ;;  %v1653_v47 = vpop.f32.mrf.mxu0  ;;  %v6153_v13 = vld [vmem:[#allocation15_spill] sm:$0xff] }
 0x1c5   :  { %v1934_v51 = vpop.f32.mrf.mxu1  ;;  %v2513_v31 = vsub.s32 2, %v6153_v13  ;;  %v2517_v58 = vsub.s32 3, %v6153_v13 }
 0x1c6   :  { %v5743_v37 = vmax.f32 %v3121_v33, %v3122_v3  ;;  %v2715_v62 = vmul.f32 %v5264_v0, %v1933_v20  ;;  %v1935_v52 = vadd.f32 %v1934_v51, %v1653_v47  ;;  %v2930_v39 = vadd.f32 %v5279_v12, %v2712_v17  ;;  %v1655_v54 = vpop.f32.mrf.mxu0  ;;  %v4383_v0 = vld [vmem:[%s6094_s2] sm:$0xf]  ;;  %v6156_v51 = vld [vmem:[#allocation17_spill] sm:$0xff] }
 0x1c7   :  { %v1936_v32 = vpop.f32.mrf.mxu1  ;;  %v3125_v30 = vmax.f32 %v2929_v27, 0.0  ;;  %v5755_v20 = vrot.slane %v4383_v0, %v2513_v31 }
 0x1c8   :  { %6152 = vst [vmem:[#allocation11_spill] sm:$0xff] %v5743_v37  ;;  %v2933_v15 = vadd.f32 %v5268_v11, %v2715_v62  ;;  %v2716_v34 = vmul.f32 %v5270_v35, %v1935_v52  ;;  %v3126_v43 = vmax.f32 %v2930_v39, 0.0  ;;  %v1656_v46 = vpop.f32.mrf.mxu0  ;;  %v6155_v11 = vld [vmem:[#allocation16_spill] sm:$0xff]  ;;  %v5761_v62 = vrot.slane %v4383_v0, %v2517_v58 }
 0x1c9   :  { %v1937_v33 = vpop.f32.mrf.mxu1 }
 0x1ca   :  { %v2934_v3 = vadd.f32 %v5279_v12, %v2716_v34  ;;  %v5757_v17 = vmax.f32 %v3125_v30, %v3126_v43  ;;  %v1973_v47 = vpop.f32.mrf.mxu0  ;;  %2212 = vmatmul.mubr.bf16.gmra.mxu0 %v6155_v11  ;;  %v3129_v13 = vmax.f32 %v2933_v15, 0.0  ;;  %v4384_v12 = vld [vmem:[%s6095_s3] sm:$0xf] }
 0x1cb   :  { %v2254_v35 = vpop.f32.mrf.mxu1  ;;  %2493 = vmatmul.mubr.bf16.gmra.mxu1 %v6156_v51  ;;  %v5766_v52 = vrot.slane %v4384_v12, %v2513_v31  ;;  %v5771_v43 = vrot.slane %v4384_v12, %v2517_v58 }
 0x1cc   :  { %6154 = vst [vmem:[#allocation12_spill] sm:$0xff] %v5757_v17  ;;  %v3130_v27 = vmax.f32 %v2934_v3, 0.0  ;;  %v2255_v46 = vadd.f32 %v2254_v35, %v1973_v47  ;;  %v1975_v39 = vpop.f32.mrf.mxu0 }
 0x1cd   :  { %v2256_v54 = vpop.f32.mrf.mxu1 }
 0x1ce   :  { %v5768_v32 = vmax.f32 %v3129_v13, %v3130_v27  ;;  %v2525_v34 = vmul.f32 %v5755_v20, %v2255_v46  ;;  %v2257_v30 = vadd.f32 %v2256_v54, %v1975_v39  ;;  %v1977_v15 = vpop.f32.mrf.mxu0 }
 0x1cf   :  { %v2258_v33 = vpop.f32.mrf.mxu1 }
 0x1d0   :  { %6157 = vst [vmem:[#allocation13_spill] sm:$0xff] %v5768_v32  ;;  %v2526_v3 = vmul.f32 %v5761_v62, %v2257_v30  ;;  %v2259_v0 = vadd.f32 %v2258_v33, %v1977_v15  ;;  %v2743_v47 = vadd.f32 %v5766_v52, %v2525_v34  ;;  %v1979_v11 = vpop.f32.mrf.mxu0 }
 0x1d1   :  { %v2260_v35 = vpop.f32.mrf.mxu1 }
 0x1d2   :  { %v2744_v31 = vadd.f32 %v5771_v43, %v2526_v3  ;;  %v2529_v51 = vmul.f32 %v5755_v20, %v2259_v0  ;;  %v2261_v13 = vadd.f32 %v2260_v35, %v1979_v11  ;;  %v1983_v27 = vpop.f32.mrf.mxu0  ;;  %v2939_v54 = vmax.f32 %v2743_v47, 0.0 }
 0x1d3   :  { %v2264_v32 = vpop.f32.mrf.mxu1 }
 0x1d4   :  { %v2940_v46 = vmax.f32 %v2744_v31, 0.0  ;;  %v2747_v58 = vadd.f32 %v5766_v52, %v2529_v51  ;;  %v2530_v12 = vmul.f32 %v5761_v62, %v2261_v13  ;;  %v2265_v39 = vadd.f32 %v2264_v32, %v1983_v27  ;;  %v1985_v30 = vpop.f32.mrf.mxu0 }
 0x1d5   :  { %v2266_v15 = vpop.f32.mrf.mxu1 }
 0x1d6   :  { %v2748_v34 = vadd.f32 %v5771_v43, %v2530_v12  ;;  %v2533_v33 = vmul.f32 %v5755_v20, %v2265_v39  ;;  %v3182_v17 = vmax.f32 %v2939_v54, %v2940_v46  ;;  %v2267_v3 = vadd.f32 %v2266_v15, %v1985_v30  ;;  %v1987_v37 = vpop.f32.mrf.mxu0 }
 0x1d7   :  { %v2268_v0 = vpop.f32.mrf.mxu1  ;;  %v2943_v11 = vmax.f32 %v2747_v58, 0.0 }
 0x1d8   :  { %v2944_v35 = vmax.f32 %v2748_v34, 0.0  ;;  %v2269_v26 = vadd.f32 %v2268_v0, %v1987_v37  ;;  %v2751_v31 = vadd.f32 %v5766_v52, %v2533_v33  ;;  %v2534_v51 = vmul.f32 %v5761_v62, %v2267_v3  ;;  %v1989_v13 = vpop.f32.mrf.mxu0 }
 0x1d9   :  { %v2270_v32 = vpop.f32.mrf.mxu1  ;;  %v3231_v12 = vmax.f32 %v5291_v23, %v3182_v17 }
 0x1da   :  { %v3183_v47 = vmax.f32 %v2943_v11, %v2944_v35  ;;  %v2537_v27 = vmul.f32 %v5755_v20, %v2269_v26  ;;  %v2271_v14 = vadd.f32 %v2270_v32, %v1989_v13  ;;  %v2752_v46 = vadd.f32 %v5771_v43, %v2534_v51  ;;  %v1993_v39 = vpop.f32.mrf.mxu0 }
 0x1db   :  { %v2274_v54 = vpop.f32.mrf.mxu1  ;;  %v2947_v34 = vmax.f32 %v2751_v31, 0.0 }
 0x1dc   :  { %v3232_v58 = vmax.f32 %v5297_v56, %v3183_v47  ;;  %v2755_v37 = vadd.f32 %v5766_v52, %v2537_v27  ;;  %v2538_v30 = vmul.f32 %v5761_v62, %v2271_v14  ;;  %v2275_v15 = vadd.f32 %v2274_v54, %v1993_v39  ;;  %v1995_v3 = vpop.f32.mrf.mxu0 }
 0x1dd   :  { %v2948_v33 = vmax.f32 %v2752_v46, 0.0  ;;  %v2276_v0 = vpop.f32.mrf.mxu1 }
 0x1de   :  { %v3859_v11 = vpack.c.bf16 %v3232_v58, %v3231_v12  ;;  %v2756_v26 = vadd.f32 %v5771_v43, %v2538_v30  ;;  %v2541_v23 = vmul.f32 %v5755_v20, %v2275_v15  ;;  %v2277_v35 = vadd.f32 %v2276_v0, %v1995_v3  ;;  %v1997_v51 = vpop.f32.mrf.mxu0 }
 0x1df   :  { %v3184_v17 = vmax.f32 %v2947_v34, %v2948_v33  ;;  %v2278_v13 = vpop.f32.mrf.mxu1  ;;  %v2951_v56 = vmax.f32 %v2755_v37, 0.0 }
 0x1e0   :  { %3860 = vst [vmem:[%s6096_s4] sm:$0xff] %v3859_v11   ;;  %v2952_v14 = vmax.f32 %v2756_v26, 0.0  ;;  %v2279_v32 = vadd.f32 %v2278_v13, %v1997_v51  ;;  %v2759_v31 = vadd.f32 %v5766_v52, %v2541_v23  ;;  %v2542_v47 = vmul.f32 %v5761_v62, %v2277_v35  ;;  %v1999_v27 = vpop.f32.mrf.mxu0 }
 0x1e1   :  { %v2280_v12 = vpop.f32.mrf.mxu1  ;;  %v3233_v58 = vmax.f32 %v5309_v45, %v3184_v17 }
 0x1e2   :  { %v3185_v46 = vmax.f32 %v2951_v56, %v2952_v14  ;;  %v2545_v39 = vmul.f32 %v5755_v20, %v2279_v32  ;;  %v2281_v54 = vadd.f32 %v2280_v12, %v1999_v27  ;;  %v2760_v30 = vadd.f32 %v5771_v43, %v2542_v47  ;;  %v2003_v15 = vpop.f32.mrf.mxu0 }
 0x1e3   :  { %v2284_v34 = vpop.f32.mrf.mxu1  ;;  %v2955_v11 = vmax.f32 %v2759_v31, 0.0 }
 0x1e4   :  { %v3234_v37 = vmax.f32 %v5313_v63, %v3185_v46  ;;  %v2763_v33 = vadd.f32 %v5766_v52, %v2545_v39  ;;  %v2546_v3 = vmul.f32 %v5761_v62, %v2281_v54  ;;  %v2285_v0 = vadd.f32 %v2284_v34, %v2003_v15  ;;  %v2005_v23 = vpop.f32.mrf.mxu0 }
 0x1e5   :  { %v2956_v26 = vmax.f32 %v2760_v30, 0.0  ;;  %v2286_v35 = vpop.f32.mrf.mxu1 }
 0x1e6   :  { %v3864_v51 = vpack.c.bf16 %v3234_v37, %v3233_v58  ;;  %v2764_v13 = vadd.f32 %v5771_v43, %v2546_v3  ;;  %v2549_v45 = vmul.f32 %v5755_v20, %v2285_v0  ;;  %v2287_v56 = vadd.f32 %v2286_v35, %v2005_v23  ;;  %v2007_v14 = vpop.f32.mrf.mxu0 }
 0x1e7   :  { %v3186_v17 = vmax.f32 %v2955_v11, %v2956_v26  ;;  %v2288_v32 = vpop.f32.mrf.mxu1  ;;  %v2959_v63 = vmax.f32 %v2763_v33, 0.0 }
 0x1e8   :  { %3976 = vst [vmem:[%s6096_s4 + $0x8] sm:$0xff] %v3864_v51   ;;  %v2960_v47 = vmax.f32 %v2764_v13, 0.0  ;;  %v2289_v27 = vadd.f32 %v2288_v32, %v2007_v14  ;;  %v2767_v31 = vadd.f32 %v5766_v52, %v2549_v45  ;;  %v2550_v12 = vmul.f32 %v5761_v62, %v2287_v56  ;;  %v2009_v46 = vpop.f32.mrf.mxu0 }
 0x1e9   :  { %v2290_v39 = vpop.f32.mrf.mxu1  ;;  %v3235_v15 = vmax.f32 %v5323_v22, %v3186_v17 }
 0x1ea   :  { %v3187_v54 = vmax.f32 %v2959_v63, %v2960_v47  ;;  %v2553_v58 = vmul.f32 %v5755_v20, %v2289_v27  ;;  %v2291_v30 = vadd.f32 %v2290_v39, %v2009_v46  ;;  %v2768_v34 = vadd.f32 %v5771_v43, %v2550_v12  ;;  %v2013_v37 = vpop.f32.mrf.mxu0 }
 0x1eb   :  { %v2294_v3 = vpop.f32.mrf.mxu1  ;;  %v2963_v23 = vmax.f32 %v2767_v31, 0.0 }
 0x1ec   :  { %v3236_v33 = vmax.f32 %v5331_v55, %v3187_v54  ;;  %v2771_v0 = vadd.f32 %v5766_v52, %v2553_v58  ;;  %v2554_v11 = vmul.f32 %v5761_v62, %v2291_v30  ;;  %v2295_v26 = vadd.f32 %v2294_v3, %v2013_v37  ;;  %v2015_v51 = vpop.f32.mrf.mxu0 }
 0x1ed   :  { %v2964_v35 = vmax.f32 %v2768_v34, 0.0  ;;  %v2296_v13 = vpop.f32.mrf.mxu1 }
 0x1ee   :  { %v3869_v45 = vpack.c.bf16 %v3236_v33, %v3235_v15  ;;  %v2772_v56 = vadd.f32 %v5771_v43, %v2554_v11  ;;  %v2557_v22 = vmul.f32 %v5755_v20, %v2295_v26  ;;  %v2297_v14 = vadd.f32 %v2296_v13, %v2015_v51  ;;  %v2017_v32 = vpop.f32.mrf.mxu0 }
 0x1ef   :  { %v3188_v17 = vmax.f32 %v2963_v23, %v2964_v35  ;;  %v2298_v63 = vpop.f32.mrf.mxu1  ;;  %v2967_v55 = vmax.f32 %v2771_v0, 0.0 }
 0x1f0   :  { %3977 = vst [vmem:[%s6096_s4 + $0x10] sm:$0xff] %v3869_v45   ;;  %v2968_v47 = vmax.f32 %v2772_v56, 0.0  ;;  %v2299_v27 = vadd.f32 %v2298_v63, %v2017_v32  ;;  %v2775_v31 = vadd.f32 %v5766_v52, %v2557_v22  ;;  %v2558_v12 = vmul.f32 %v5761_v62, %v2297_v14  ;;  %v2019_v46 = vpop.f32.mrf.mxu0 }
 0x1f1   :  { %v2300_v39 = vpop.f32.mrf.mxu1  ;;  %v3237_v15 = vmax.f32 %v5339_v5, %v3188_v17 }
 0x1f2   :  { %v3189_v54 = vmax.f32 %v2967_v55, %v2968_v47  ;;  %v2561_v58 = vmul.f32 %v5755_v20, %v2299_v27  ;;  %v2301_v30 = vadd.f32 %v2300_v39, %v2019_v46  ;;  %v2776_v34 = vadd.f32 %v5771_v43, %v2558_v12  ;;  %v2023_v37 = vpop.f32.mrf.mxu0 }
 0x1f3   :  { %v2304_v3 = vpop.f32.mrf.mxu1  ;;  %v2971_v23 = vmax.f32 %v2775_v31, 0.0 }
 0x1f4   :  { %v3238_v33 = vmax.f32 %v5345_v8, %v3189_v54  ;;  %v2779_v0 = vadd.f32 %v5766_v52, %v2561_v58  ;;  %v2562_v11 = vmul.f32 %v5761_v62, %v2301_v30  ;;  %v2305_v26 = vadd.f32 %v2304_v3, %v2023_v37  ;;  %v2025_v51 = vpop.f32.mrf.mxu0 }
 0x1f5   :  { %v2972_v35 = vmax.f32 %v2776_v34, 0.0  ;;  %v2306_v13 = vpop.f32.mrf.mxu1 }
 0x1f6   :  { %v3874_v45 = vpack.c.bf16 %v3238_v33, %v3237_v15  ;;  %v2780_v56 = vadd.f32 %v5771_v43, %v2562_v11  ;;  %v2565_v5 = vmul.f32 %v5755_v20, %v2305_v26  ;;  %v2307_v17 = vadd.f32 %v2306_v13, %v2025_v51  ;;  %v2027_v14 = vpop.f32.mrf.mxu0 }
 0x1f7   :  { %v3190_v22 = vmax.f32 %v2971_v23, %v2972_v35  ;;  %v2308_v32 = vpop.f32.mrf.mxu1  ;;  %v2975_v8 = vmax.f32 %v2779_v0, 0.0 }
 0x1f8   :  { %3978 = vst [vmem:[%s6096_s4 + $0x18] sm:$0xff] %v3874_v45   ;;  %v2976_v63 = vmax.f32 %v2780_v56, 0.0  ;;  %v2309_v55 = vadd.f32 %v2308_v32, %v2027_v14  ;;  %v2783_v47 = vadd.f32 %v5766_v52, %v2565_v5  ;;  %v2566_v27 = vmul.f32 %v5761_v62, %v2307_v17  ;;  %v2029_v31 = vpop.f32.mrf.mxu0 }
 0x1f9   :  { %v2310_v12 = vpop.f32.mrf.mxu1  ;;  %v3239_v58 = vmax.f32 %v5357_v57, %v3190_v22 }
 0x1fa   :  { %v3191_v46 = vmax.f32 %v2975_v8, %v2976_v63  ;;  %v2569_v39 = vmul.f32 %v5755_v20, %v2309_v55  ;;  %v2311_v54 = vadd.f32 %v2310_v12, %v2029_v31  ;;  %v2784_v30 = vadd.f32 %v5771_v43, %v2566_v27  ;;  %v2033_v15 = vpop.f32.mrf.mxu0 }
 0x1fb   :  { %v2314_v34 = vpop.f32.mrf.mxu1  ;;  %v2979_v11 = vmax.f32 %v2783_v47, 0.0 }
 0x1fc   :  { %v3240_v37 = vmax.f32 %v5361_v50, %v3191_v46  ;;  %v2787_v3 = vadd.f32 %v5766_v52, %v2569_v39  ;;  %v2570_v33 = vmul.f32 %v5761_v62, %v2311_v54  ;;  %v2315_v0 = vadd.f32 %v2314_v34, %v2033_v15  ;;  %v2035_v23 = vpop.f32.mrf.mxu0 }
 0x1fd   :  { %v2980_v26 = vmax.f32 %v2784_v30, 0.0  ;;  %v2316_v35 = vpop.f32.mrf.mxu1 }
 0x1fe   :  { %v3879_v51 = vpack.c.bf16 %v3240_v37, %v3239_v58  ;;  %v2788_v13 = vadd.f32 %v5771_v43, %v2570_v33  ;;  %v2573_v57 = vmul.f32 %v5755_v20, %v2315_v0  ;;  %v2317_v56 = vadd.f32 %v2316_v35, %v2035_v23  ;;  %v2037_v5 = vpop.f32.mrf.mxu0 }
 0x1ff   :  { %v3192_v45 = vmax.f32 %v2979_v11, %v2980_v26  ;;  %v2318_v22 = vpop.f32.mrf.mxu1  ;;  %v2983_v50 = vmax.f32 %v2787_v3, 0.0 }
 0x200   :  { %3979 = vst [vmem:[%s6096_s4 + $0x20] sm:$0xff] %v3879_v51   ;;  %v2984_v17 = vmax.f32 %v2788_v13, 0.0  ;;  %v2319_v14 = vadd.f32 %v2318_v22, %v2037_v5  ;;  %v2791_v32 = vadd.f32 %v5766_v52, %v2573_v57  ;;  %v2574_v8 = vmul.f32 %v5761_v62, %v2317_v56  ;;  %v2039_v63 = vpop.f32.mrf.mxu0 }
 0x201   :  { %v2320_v55 = vpop.f32.mrf.mxu1  ;;  %v3241_v12 = vmax.f32 %v5371_v36, %v3192_v45 }
 0x202   :  { %v3193_v47 = vmax.f32 %v2983_v50, %v2984_v17  ;;  %v2577_v27 = vmul.f32 %v5755_v20, %v2319_v14  ;;  %v2321_v31 = vadd.f32 %v2320_v55, %v2039_v63  ;;  %v2792_v46 = vadd.f32 %v5771_v43, %v2574_v8  ;;  %v2043_v39 = vpop.f32.mrf.mxu0 }
 0x203   :  { %v2324_v54 = vpop.f32.mrf.mxu1  ;;  %v2987_v37 = vmax.f32 %v2791_v32, 0.0 }
 0x204   :  { %v3242_v58 = vmax.f32 %v5379_v38, %v3193_v47  ;;  %v2795_v30 = vadd.f32 %v5766_v52, %v2577_v27  ;;  %v2578_v15 = vmul.f32 %v5761_v62, %v2321_v31  ;;  %v2325_v34 = vadd.f32 %v2324_v54, %v2043_v39  ;;  %v2045_v33 = vpop.f32.mrf.mxu0 }
 0x205   :  { %v2988_v3 = vmax.f32 %v2792_v46, 0.0  ;;  %v2326_v0 = vpop.f32.mrf.mxu1 }
 0x206   :  { %v3884_v11 = vpack.c.bf16 %v3242_v58, %v3241_v12  ;;  %v2796_v26 = vadd.f32 %v5771_v43, %v2578_v15  ;;  %v2581_v36 = vmul.f32 %v5755_v20, %v2325_v34  ;;  %v2327_v35 = vadd.f32 %v2326_v0, %v2045_v33  ;;  %v2047_v51 = vpop.f32.mrf.mxu0 }
 0x207   :  { %v3194_v23 = vmax.f32 %v2987_v37, %v2988_v3  ;;  %v2328_v13 = vpop.f32.mrf.mxu1  ;;  %v2991_v38 = vmax.f32 %v2795_v30, 0.0 }
 0x208   :  { %3980 = vst [vmem:[%s6096_s4 + $0x28] sm:$0xff] %v3884_v11   ;;  %v2992_v57 = vmax.f32 %v2796_v26, 0.0  ;;  %v2329_v45 = vadd.f32 %v2328_v13, %v2047_v51  ;;  %v2799_v56 = vadd.f32 %v5766_v52, %v2581_v36  ;;  %v2582_v5 = vmul.f32 %v5761_v62, %v2327_v35  ;;  %v2049_v22 = vpop.f32.mrf.mxu0 }
 0x209   :  { %v2330_v50 = vpop.f32.mrf.mxu1  ;;  %v3243_v8 = vmax.f32 %v5387_v1, %v3194_v23 }
 0x20a   :  { %v3195_v17 = vmax.f32 %v2991_v38, %v2992_v57  ;;  %v2585_v14 = vmul.f32 %v5755_v20, %v2329_v45  ;;  %v2331_v32 = vadd.f32 %v2330_v50, %v2049_v22  ;;  %v2800_v63 = vadd.f32 %v5771_v43, %v2582_v5  ;;  %v2053_v55 = vpop.f32.mrf.mxu0 }
 0x20b   :  { %v2334_v47 = vpop.f32.mrf.mxu1  ;;  %v2995_v39 = vmax.f32 %v2799_v56, 0.0 }
 0x20c   :  { %v3244_v27 = vmax.f32 %v5393_v59, %v3195_v17  ;;  %v2803_v31 = vadd.f32 %v5766_v52, %v2585_v14  ;;  %v2586_v12 = vmul.f32 %v5761_v62, %v2331_v32  ;;  %v2335_v46 = vadd.f32 %v2334_v47, %v2053_v55  ;;  %v2055_v58 = vpop.f32.mrf.mxu0 }
 0x20d   :  { %v2996_v54 = vmax.f32 %v2800_v63, 0.0  ;;  %v2336_v30 = vpop.f32.mrf.mxu1 }
 0x20e   :  { %v3889_v15 = vpack.c.bf16 %v3244_v27, %v3243_v8  ;;  %v2804_v34 = vadd.f32 %v5771_v43, %v2586_v12  ;;  %v2589_v1 = vmul.f32 %v5755_v20, %v2335_v46  ;;  %v2337_v3 = vadd.f32 %v2336_v30, %v2055_v58  ;;  %v2057_v33 = vpop.f32.mrf.mxu0 }
 0x20f   :  { %v3196_v37 = vmax.f32 %v2995_v39, %v2996_v54  ;;  %v2338_v0 = vpop.f32.mrf.mxu1  ;;  %v2999_v59 = vmax.f32 %v2803_v31, 0.0 }
 0x210   :  { %3981 = vst [vmem:[%s6096_s4 + $0x30] sm:$0xff] %v3889_v15   ;;  %v3000_v11 = vmax.f32 %v2804_v34, 0.0  ;;  %v2339_v26 = vadd.f32 %v2338_v0, %v2057_v33  ;;  %v2807_v36 = vadd.f32 %v5766_v52, %v2589_v1  ;;  %v2590_v23 = vmul.f32 %v5761_v62, %v2337_v3  ;;  %v2059_v35 = vpop.f32.mrf.mxu0 }
 0x211   :  { %v2340_v51 = vpop.f32.mrf.mxu1  ;;  %v3245_v45 = vmax.f32 %v5405_v29, %v3196_v37 }
 0x212   :  { %v3197_v13 = vmax.f32 %v2999_v59, %v3000_v11  ;;  %v2593_v38 = vmul.f32 %v5755_v20, %v2339_v26  ;;  %v2341_v57 = vadd.f32 %v2340_v51, %v2059_v35  ;;  %v2808_v56 = vadd.f32 %v5771_v43, %v2590_v23  ;;  %v2063_v5 = vpop.f32.mrf.mxu0 }
 0x213   :  { %v2344_v22 = vpop.f32.mrf.mxu1  ;;  %v3003_v8 = vmax.f32 %v2807_v36, 0.0 }
 0x214   :  { %v3246_v50 = vmax.f32 %v5409_v18, %v3197_v13  ;;  %v2811_v17 = vadd.f32 %v5766_v52, %v2593_v38  ;;  %v2594_v14 = vmul.f32 %v5761_v62, %v2341_v57  ;;  %v2345_v32 = vadd.f32 %v2344_v22, %v2063_v5  ;;  %v2065_v55 = vpop.f32.mrf.mxu0 }
 0x215   :  { %v3004_v63 = vmax.f32 %v2808_v56, 0.0  ;;  %v2346_v47 = vpop.f32.mrf.mxu1 }
 0x216   :  { %v3894_v27 = vpack.c.bf16 %v3246_v50, %v3245_v45  ;;  %v2812_v31 = vadd.f32 %v5771_v43, %v2594_v14  ;;  %v2597_v29 = vmul.f32 %v5755_v20, %v2345_v32  ;;  %v2347_v46 = vadd.f32 %v2346_v47, %v2065_v55  ;;  %v2067_v39 = vpop.f32.mrf.mxu0 }
 0x217   :  { %v3198_v12 = vmax.f32 %v3003_v8, %v3004_v63  ;;  %v2348_v54 = vpop.f32.mrf.mxu1  ;;  %v3007_v18 = vmax.f32 %v2811_v17, 0.0 }
 0x218   :  { %3982 = vst [vmem:[%s6096_s4 + $0x38] sm:$0xff] %v3894_v27   ;;  %v3008_v58 = vmax.f32 %v2812_v31, 0.0  ;;  %v2349_v30 = vadd.f32 %v2348_v54, %v2067_v39  ;;  %v2815_v15 = vadd.f32 %v5766_v52, %v2597_v29  ;;  %v2598_v34 = vmul.f32 %v5761_v62, %v2347_v46  ;;  %v2069_v1 = vpop.f32.mrf.mxu0 }
 0x219   :  { %v2350_v37 = vpop.f32.mrf.mxu1  ;;  %v3247_v59 = vmax.f32 %v5419_v25, %v3198_v12 }
 0x21a   :  { %v3199_v3 = vmax.f32 %v3007_v18, %v3008_v58  ;;  %v2601_v33 = vmul.f32 %v5755_v20, %v2349_v30  ;;  %v2351_v0 = vadd.f32 %v2350_v37, %v2069_v1  ;;  %v2816_v11 = vadd.f32 %v5771_v43, %v2598_v34  ;;  %v2073_v26 = vpop.f32.mrf.mxu0 }
 0x21b   :  { %v2354_v36 = vpop.f32.mrf.mxu1  ;;  %v3011_v38 = vmax.f32 %v2815_v15, 0.0 }
 0x21c   :  { %v3248_v23 = vmax.f32 %v5427_v53, %v3199_v3  ;;  %v2819_v35 = vadd.f32 %v5766_v52, %v2601_v33  ;;  %v2602_v51 = vmul.f32 %v5761_v62, %v2351_v0  ;;  %v2355_v13 = vadd.f32 %v2354_v36, %v2073_v26  ;;  %v2075_v45 = vpop.f32.mrf.mxu0 }
 0x21d   :  { %v3012_v57 = vmax.f32 %v2816_v11, 0.0  ;;  %v2356_v56 = vpop.f32.mrf.mxu1 }
 0x21e   :  { %v3899_v5 = vpack.c.bf16 %v3248_v23, %v3247_v59  ;;  %v2820_v22 = vadd.f32 %v5771_v43, %v2602_v51  ;;  %v2605_v25 = vmul.f32 %v5755_v20, %v2355_v13  ;;  %v2357_v17 = vadd.f32 %v2356_v56, %v2075_v45  ;;  %v2077_v14 = vpop.f32.mrf.mxu0 }
 0x21f   :  { %v3200_v50 = vmax.f32 %v3011_v38, %v3012_v57  ;;  %v2358_v32 = vpop.f32.mrf.mxu1  ;;  %v3015_v53 = vmax.f32 %v2819_v35, 0.0 }
 0x220   :  { %3983 = vst [vmem:[%s6096_s4 + $0x40] sm:$0xff] %v3899_v5   ;;  %v3016_v8 = vmax.f32 %v2820_v22, 0.0  ;;  %v2359_v63 = vadd.f32 %v2358_v32, %v2077_v14  ;;  %v2823_v55 = vadd.f32 %v5766_v52, %v2605_v25  ;;  %v2606_v47 = vmul.f32 %v5761_v62, %v2357_v17  ;;  %v2079_v27 = vpop.f32.mrf.mxu0 }
 0x221   :  { %v2360_v31 = vpop.f32.mrf.mxu1  ;;  %v3249_v39 = vmax.f32 %v5435_v42, %v3200_v50 }
 0x222   :  { %v3201_v29 = vmax.f32 %v3015_v53, %v3016_v8  ;;  %v2609_v12 = vmul.f32 %v5755_v20, %v2359_v63  ;;  %v2361_v46 = vadd.f32 %v2360_v31, %v2079_v27  ;;  %v2824_v54 = vadd.f32 %v5771_v43, %v2606_v47  ;;  %v2083_v18 = vpop.f32.mrf.mxu0 }
 0x223   :  { %v2364_v58 = vpop.f32.mrf.mxu1  ;;  %v3019_v37 = vmax.f32 %v2823_v55, 0.0 }
 0x224   :  { %v3250_v30 = vmax.f32 %v5441_v6, %v3201_v29  ;;  %v2827_v15 = vadd.f32 %v5766_v52, %v2609_v12  ;;  %v2610_v34 = vmul.f32 %v5761_v62, %v2361_v46  ;;  %v2365_v1 = vadd.f32 %v2364_v58, %v2083_v18  ;;  %v2085_v33 = vpop.f32.mrf.mxu0 }
 0x225   :  { %v3020_v3 = vmax.f32 %v2824_v54, 0.0  ;;  %v2366_v0 = vpop.f32.mrf.mxu1 }
 0x226   :  { %v3904_v59 = vpack.c.bf16 %v3250_v30, %v3249_v39  ;;  %v2828_v11 = vadd.f32 %v5771_v43, %v2610_v34  ;;  %v2613_v42 = vmul.f32 %v5755_v20, %v2365_v1  ;;  %v2367_v36 = vadd.f32 %v2366_v0, %v2085_v33  ;;  %v2087_v23 = vpop.f32.mrf.mxu0 }
 0x227   :  { %v3202_v26 = vmax.f32 %v3019_v37, %v3020_v3  ;;  %v2368_v35 = vpop.f32.mrf.mxu1  ;;  %v3023_v6 = vmax.f32 %v2827_v15, 0.0 }
 0x228   :  { %3984 = vst [vmem:[%s6096_s4 + $0x48] sm:$0xff] %v3904_v59   ;;  %v3024_v51 = vmax.f32 %v2828_v11, 0.0  ;;  %v2369_v13 = vadd.f32 %v2368_v35, %v2087_v23  ;;  %v2831_v38 = vadd.f32 %v5766_v52, %v2613_v42  ;;  %v2614_v57 = vmul.f32 %v5761_v62, %v2367_v36  ;;  %v2089_v45 = vpop.f32.mrf.mxu0 }
 0x229   :  { %v2370_v56 = vpop.f32.mrf.mxu1  ;;  %v3251_v50 = vmax.f32 %v5453_v48, %v3202_v26 }
 0x22a   :  { %v3203_v5 = vmax.f32 %v3023_v6, %v3024_v51  ;;  %v2617_v22 = vmul.f32 %v5755_v20, %v2369_v13  ;;  %v2371_v25 = vadd.f32 %v2370_v56, %v2089_v45  ;;  %v2832_v17 = vadd.f32 %v5771_v43, %v2614_v57  ;;  %v2093_v14 = vpop.f32.mrf.mxu0 }
 0x22b   :  { %v2374_v32 = vpop.f32.mrf.mxu1  ;;  %v3027_v47 = vmax.f32 %v2831_v38, 0.0 }
 0x22c   :  { %v3252_v53 = vmax.f32 %v5457_v2, %v3203_v5  ;;  %v2835_v8 = vadd.f32 %v5766_v52, %v2617_v22  ;;  %v2618_v63 = vmul.f32 %v5761_v62, %v2371_v25  ;;  %v2375_v55 = vadd.f32 %v2374_v32, %v2093_v14  ;;  %v2095_v31 = vpop.f32.mrf.mxu0 }
 0x22d   :  { %v3028_v27 = vmax.f32 %v2832_v17, 0.0  ;;  %v2376_v29 = vpop.f32.mrf.mxu1 }
 0x22e   :  { %v3909_v12 = vpack.c.bf16 %v3252_v53, %v3251_v50  ;;  %v2836_v46 = vadd.f32 %v5771_v43, %v2618_v63  ;;  %v2621_v48 = vmul.f32 %v5755_v20, %v2375_v55  ;;  %v2377_v54 = vadd.f32 %v2376_v29, %v2095_v31  ;;  %v2097_v18 = vpop.f32.mrf.mxu0 }
 0x22f   :  { %v3204_v39 = vmax.f32 %v3027_v47, %v3028_v27  ;;  %v2378_v58 = vpop.f32.mrf.mxu1  ;;  %v3031_v2 = vmax.f32 %v2835_v8, 0.0 }
 0x230   :  { %3985 = vst [vmem:[%s6096_s4 + $0x50] sm:$0xff] %v3909_v12   ;;  %v3032_v30 = vmax.f32 %v2836_v46, 0.0  ;;  %v2379_v15 = vadd.f32 %v2378_v58, %v2097_v18  ;;  %v2839_v34 = vadd.f32 %v5766_v52, %v2621_v48  ;;  %v2622_v1 = vmul.f32 %v5761_v62, %v2377_v54  ;;  %v2099_v37 = vpop.f32.mrf.mxu0 }
 0x231   :  { %v2380_v3 = vpop.f32.mrf.mxu1  ;;  %v3253_v11 = vmax.f32 %v5467_v28, %v3204_v39 }
 0x232   :  { %v3205_v33 = vmax.f32 %v3031_v2, %v3032_v30  ;;  %v2625_v0 = vmul.f32 %v5755_v20, %v2379_v15  ;;  %v2381_v59 = vadd.f32 %v2380_v3, %v2099_v37  ;;  %v2840_v42 = vadd.f32 %v5771_v43, %v2622_v1  ;;  %v2103_v26 = vpop.f32.mrf.mxu0 }
 0x233   :  { %v2384_v36 = vpop.f32.mrf.mxu1  ;;  %v3035_v13 = vmax.f32 %v2839_v34, 0.0 }
 0x234   :  { %v3254_v23 = vmax.f32 %v5475_v10, %v3205_v33  ;;  %v2843_v35 = vadd.f32 %v5766_v52, %v2625_v0  ;;  %v2626_v6 = vmul.f32 %v5761_v62, %v2381_v59  ;;  %v2385_v51 = vadd.f32 %v2384_v36, %v2103_v26  ;;  %v2105_v57 = vpop.f32.mrf.mxu0 }
 0x235   :  { %v3036_v38 = vmax.f32 %v2840_v42, 0.0  ;;  %v2386_v45 = vpop.f32.mrf.mxu1 }
 0x236   :  { %v3914_v56 = vpack.c.bf16 %v3254_v23, %v3253_v11  ;;  %v2844_v5 = vadd.f32 %v5771_v43, %v2626_v6  ;;  %v2629_v28 = vmul.f32 %v5755_v20, %v2385_v51  ;;  %v2387_v25 = vadd.f32 %v2386_v45, %v2105_v57  ;;  %v2107_v50 = vpop.f32.mrf.mxu0 }
 0x237   :  { %v3206_v22 = vmax.f32 %v3035_v13, %v3036_v38  ;;  %v2388_v17 = vpop.f32.mrf.mxu1  ;;  %v3039_v10 = vmax.f32 %v2843_v35, 0.0 }
 0x238   :  { %3986 = vst [vmem:[%s6096_s4 + $0x58] sm:$0xff] %v3914_v56   ;;  %v3040_v14 = vmax.f32 %v2844_v5, 0.0  ;;  %v2389_v32 = vadd.f32 %v2388_v17, %v2107_v50  ;;  %v2847_v53 = vadd.f32 %v5766_v52, %v2629_v28  ;;  %v2630_v8 = vmul.f32 %v5761_v62, %v2387_v25  ;;  %v2109_v63 = vpop.f32.mrf.mxu0 }
 0x239   :  { %v2390_v55 = vpop.f32.mrf.mxu1  ;;  %v3255_v29 = vmax.f32 %v5483_v44, %v3206_v22 }
 0x23a   :  { %v3207_v47 = vmax.f32 %v3039_v10, %v3040_v14  ;;  %v2633_v27 = vmul.f32 %v5755_v20, %v2389_v32  ;;  %v2391_v31 = vadd.f32 %v2390_v55, %v2109_v63  ;;  %v2848_v12 = vadd.f32 %v5771_v43, %v2630_v8  ;;  %v2113_v46 = vpop.f32.mrf.mxu0 }
 0x23b   :  { %v2394_v48 = vpop.f32.mrf.mxu1  ;;  %v3043_v2 = vmax.f32 %v2847_v53, 0.0 }
 0x23c   :  { %v3256_v39 = vmax.f32 %v5489_v4, %v3207_v47  ;;  %v2851_v54 = vadd.f32 %v5766_v52, %v2633_v27  ;;  %v2634_v18 = vmul.f32 %v5761_v62, %v2391_v31  ;;  %v2395_v58 = vadd.f32 %v2394_v48, %v2113_v46  ;;  %v2115_v15 = vpop.f32.mrf.mxu0 }
 0x23d   :  { %v3044_v30 = vmax.f32 %v2848_v12, 0.0  ;;  %v2396_v34 = vpop.f32.mrf.mxu1 }
 0x23e   :  { %v3919_v1 = vpack.c.bf16 %v3256_v39, %v3255_v29  ;;  %v2852_v37 = vadd.f32 %v5771_v43, %v2634_v18  ;;  %v2637_v44 = vmul.f32 %v5755_v20, %v2395_v58  ;;  %v2397_v33 = vadd.f32 %v2396_v34, %v2115_v15  ;;  %v2117_v0 = vpop.f32.mrf.mxu0 }
 0x23f   :  { %v3208_v3 = vmax.f32 %v3043_v2, %v3044_v30  ;;  %v2398_v59 = vpop.f32.mrf.mxu1  ;;  %v3047_v4 = vmax.f32 %v2851_v54, 0.0 }
 0x240   :  { %3987 = vst [vmem:[%s6096_s4 + $0x60] sm:$0xff] %v3919_v1   ;;  %v3048_v11 = vmax.f32 %v2852_v37, 0.0  ;;  %v2399_v42 = vadd.f32 %v2398_v59, %v2117_v0  ;;  %v2855_v26 = vadd.f32 %v5766_v52, %v2637_v44  ;;  %v2638_v36 = vmul.f32 %v5761_v62, %v2397_v33  ;;  %v2119_v23 = vpop.f32.mrf.mxu0 }
 0x241   :  { %v2400_v35 = vpop.f32.mrf.mxu1  ;;  %v3257_v38 = vmax.f32 %v5509_v9, %v3208_v3 }
 0x242   :  { %v3209_v6 = vmax.f32 %v3047_v4, %v3048_v11  ;;  %v2641_v51 = vmul.f32 %v5755_v20, %v2399_v42  ;;  %v2401_v13 = vadd.f32 %v2400_v35, %v2119_v23  ;;  %v2856_v57 = vadd.f32 %v5771_v43, %v2638_v36  ;;  %v2123_v45 = vpop.f32.mrf.mxu0 }
 0x243   :  { %v2404_v56 = vpop.f32.mrf.mxu1  ;;  %v3051_v50 = vmax.f32 %v2855_v26, 0.0 }
 0x244   :  { %v3258_v5 = vmax.f32 %v5513_v60, %v3209_v6  ;;  %v2859_v28 = vadd.f32 %v5766_v52, %v2641_v51  ;;  %v2642_v22 = vmul.f32 %v5761_v62, %v2401_v13  ;;  %v2405_v25 = vadd.f32 %v2404_v56, %v2123_v45  ;;  %v2125_v10 = vpop.f32.mrf.mxu0 }
 0x245   :  { %v3052_v17 = vmax.f32 %v2856_v57, 0.0  ;;  %v2406_v14 = vpop.f32.mrf.mxu1 }
 0x246   :  { %v3924_v32 = vpack.c.bf16 %v3258_v5, %v3257_v38  ;;  %v2860_v53 = vadd.f32 %v5771_v43, %v2642_v22  ;;  %v2645_v9 = vmul.f32 %v5755_v20, %v2405_v25  ;;  %v2407_v63 = vadd.f32 %v2406_v14, %v2125_v10  ;;  %v2127_v55 = vpop.f32.mrf.mxu0 }
 0x247   :  { %v3210_v8 = vmax.f32 %v3051_v50, %v3052_v17  ;;  %v2408_v47 = vpop.f32.mrf.mxu1  ;;  %v3055_v60 = vmax.f32 %v2859_v28, 0.0 }
 0x248   :  { %3988 = vst [vmem:[%s6096_s4 + $0x68] sm:$0xff] %v3924_v32   ;;  %v3056_v27 = vmax.f32 %v2860_v53, 0.0  ;;  %v2409_v31 = vadd.f32 %v2408_v47, %v2127_v55  ;;  %v2863_v29 = vadd.f32 %v5766_v52, %v2645_v9  ;;  %v2646_v12 = vmul.f32 %v5761_v62, %v2407_v63  ;;  %v2129_v46 = vpop.f32.mrf.mxu0 }
 0x249   :  { %v2410_v48 = vpop.f32.mrf.mxu1  ;;  %v3259_v58 = vmax.f32 %v5531_v21, %v3210_v8 }
 0x24a   :  { %v3211_v39 = vmax.f32 %v3055_v60, %v3056_v27  ;;  %v2649_v54 = vmul.f32 %v5755_v20, %v2409_v31  ;;  %v2411_v18 = vadd.f32 %v2410_v48, %v2129_v46  ;;  %v2864_v2 = vadd.f32 %v5771_v43, %v2646_v12  ;;  %v2133_v30 = vpop.f32.mrf.mxu0 }
 0x24b   :  { %v2414_v15 = vpop.f32.mrf.mxu1  ;;  %v3059_v3 = vmax.f32 %v2863_v29, 0.0 }
 0x24c   :  { %v3260_v34 = vmax.f32 %v5539_v61, %v3211_v39  ;;  %v2867_v1 = vadd.f32 %v5766_v52, %v2649_v54  ;;  %v2650_v37 = vmul.f32 %v5761_v62, %v2411_v18  ;;  %v2415_v44 = vadd.f32 %v2414_v15, %v2133_v30  ;;  %v2135_v0 = vpop.f32.mrf.mxu0 }
 0x24d   :  { %v3060_v33 = vmax.f32 %v2864_v2, 0.0  ;;  %v2416_v59 = vpop.f32.mrf.mxu1 }
 0x24e   :  { %v3929_v4 = vpack.c.bf16 %v3260_v34, %v3259_v58  ;;  %v2868_v11 = vadd.f32 %v5771_v43, %v2650_v37  ;;  %v2653_v21 = vmul.f32 %v5755_v20, %v2415_v44  ;;  %v2417_v26 = vadd.f32 %v2416_v59, %v2135_v0  ;;  %v2137_v36 = vpop.f32.mrf.mxu0 }
 0x24f   :  { %v3212_v42 = vmax.f32 %v3059_v3, %v3060_v33  ;;  %v2418_v23 = vpop.f32.mrf.mxu1  ;;  %v3063_v61 = vmax.f32 %v2867_v1, 0.0 }
 0x250   :  { %3989 = vst [vmem:[%s6096_s4 + $0x70] sm:$0xff] %v3929_v4   ;;  %v3064_v35 = vmax.f32 %v2868_v11, 0.0  ;;  %v2419_v6 = vadd.f32 %v2418_v23, %v2137_v36  ;;  %v2871_v51 = vadd.f32 %v5766_v52, %v2653_v21  ;;  %v2654_v13 = vmul.f32 %v5761_v62, %v2417_v26  ;;  %v2139_v38 = vpop.f32.mrf.mxu0 }
 0x251   :  { %v2420_v57 = vpop.f32.mrf.mxu1  ;;  %v3261_v28 = vmax.f32 %v5555_v40, %v3212_v42 }
 0x252   :  { %v3213_v45 = vmax.f32 %v3063_v61, %v3064_v35  ;;  %v2657_v56 = vmul.f32 %v5755_v20, %v2419_v6  ;;  %v2421_v5 = vadd.f32 %v2420_v57, %v2139_v38  ;;  %v2872_v22 = vadd.f32 %v5771_v43, %v2654_v13  ;;  %v2143_v25 = vpop.f32.mrf.mxu0 }
 0x253   :  { %v2424_v50 = vpop.f32.mrf.mxu1  ;;  %v3067_v53 = vmax.f32 %v2871_v51, 0.0 }
 0x254   :  { %v3262_v17 = vmax.f32 %v5561_v7, %v3213_v45  ;;  %v2875_v10 = vadd.f32 %v5766_v52, %v2657_v56  ;;  %v2658_v14 = vmul.f32 %v5761_v62, %v2421_v5  ;;  %v2425_v32 = vadd.f32 %v2424_v50, %v2143_v25  ;;  %v2145_v8 = vpop.f32.mrf.mxu0 }
 0x255   :  { %v3068_v9 = vmax.f32 %v2872_v22, 0.0  ;;  %v2426_v63 = vpop.f32.mrf.mxu1 }
 0x256   :  { %v3934_v55 = vpack.c.bf16 %v3262_v17, %v3261_v28  ;;  %v2876_v47 = vadd.f32 %v5771_v43, %v2658_v14  ;;  %v2661_v40 = vmul.f32 %v5755_v20, %v2425_v32  ;;  %v2427_v27 = vadd.f32 %v2426_v63, %v2145_v8  ;;  %v2147_v31 = vpop.f32.mrf.mxu0 }
 0x257   :  { %v3214_v60 = vmax.f32 %v3067_v53, %v3068_v9  ;;  %v2428_v29 = vpop.f32.mrf.mxu1  ;;  %v3071_v7 = vmax.f32 %v2875_v10, 0.0 }
 0x258   :  { %3990 = vst [vmem:[%s6096_s4 + $0x78] sm:$0xff] %v3934_v55   ;;  %v3072_v12 = vmax.f32 %v2876_v47, 0.0  ;;  %v2429_v46 = vadd.f32 %v2428_v29, %v2147_v31  ;;  %v2879_v48 = vadd.f32 %v5766_v52, %v2661_v40  ;;  %v2662_v39 = vmul.f32 %v5761_v62, %v2427_v27  ;;  %v2149_v54 = vpop.f32.mrf.mxu0 }
 0x259   :  { %v2430_v18 = vpop.f32.mrf.mxu1  ;;  %v3263_v15 = vmax.f32 %v5581_v19, %v3214_v60 }
 0x25a   :  { %v3215_v58 = vmax.f32 %v3071_v7, %v3072_v12  ;;  %v2665_v2 = vmul.f32 %v5755_v20, %v2429_v46  ;;  %v2431_v30 = vadd.f32 %v2430_v18, %v2149_v54  ;;  %v2880_v34 = vadd.f32 %v5771_v43, %v2662_v39  ;;  %v2153_v1 = vpop.f32.mrf.mxu0 }
 0x25b   :  { %v2434_v37 = vpop.f32.mrf.mxu1  ;;  %v3075_v59 = vmax.f32 %v2879_v48, 0.0 }
 0x25c   :  { %v3264_v44 = vmax.f32 %v5585_v24, %v3215_v58  ;;  %v2883_v3 = vadd.f32 %v5766_v52, %v2665_v2  ;;  %v2666_v33 = vmul.f32 %v5761_v62, %v2431_v30  ;;  %v2435_v0 = vadd.f32 %v2434_v37, %v2153_v1  ;;  %v2155_v11 = vpop.f32.mrf.mxu0  ;;  %v6158_v37 = vld [vmem:[#allocation2_spill] sm:$0xff] }
 0x25d   :  { %v3076_v4 = vmax.f32 %v2880_v34, 0.0  ;;  %v2436_v21 = vpop.f32.mrf.mxu1 }
 0x25e   :  { %v3939_v42 = vpack.c.bf16 %v3264_v44, %v3263_v15  ;;  %v2884_v26 = vadd.f32 %v5771_v43, %v2666_v33  ;;  %v2669_v19 = vmul.f32 %v5755_v20, %v2435_v0  ;;  %v2437_v23 = vadd.f32 %v2436_v21, %v2155_v11  ;;  %v2157_v61 = vpop.f32.mrf.mxu0 }
 0x25f   :  { %v3216_v36 = vmax.f32 %v3075_v59, %v3076_v4  ;;  %v2438_v35 = vpop.f32.mrf.mxu1  ;;  %v3079_v24 = vmax.f32 %v2883_v3, 0.0 }
 0x260   :  { %3991 = vst [vmem:[%s6096_s4 + $0x80] sm:$0xff] %v3939_v42   ;;  %v3080_v6 = vmax.f32 %v2884_v26, 0.0  ;;  %v2439_v51 = vadd.f32 %v2438_v35, %v2157_v61  ;;  %v2887_v13 = vadd.f32 %v5766_v52, %v2669_v19  ;;  %v2670_v38 = vmul.f32 %v5761_v62, %v2437_v23  ;;  %v2159_v57 = vpop.f32.mrf.mxu0 }
 0x261   :  { %v2440_v45 = vpop.f32.mrf.mxu1  ;;  %v3265_v22 = vmax.f32 %v5603_v41, %v3216_v36 }
 0x262   :  { %v3217_v56 = vmax.f32 %v3079_v24, %v3080_v6  ;;  %v2673_v5 = vmul.f32 %v5755_v20, %v2439_v51  ;;  %v2441_v28 = vadd.f32 %v2440_v45, %v2159_v57  ;;  %v2888_v25 = vadd.f32 %v5771_v43, %v2670_v38  ;;  %v2163_v50 = vpop.f32.mrf.mxu0 }
 0x263   :  { %v2444_v17 = vpop.f32.mrf.mxu1  ;;  %v3083_v9 = vmax.f32 %v2887_v13, 0.0 }
 0x264   :  { %v3266_v10 = vmax.f32 %v5611_v16, %v3217_v56  ;;  %v2891_v14 = vadd.f32 %v5766_v52, %v2673_v5  ;;  %v2674_v32 = vmul.f32 %v5761_v62, %v2441_v28  ;;  %v2445_v53 = vadd.f32 %v2444_v17, %v2163_v50  ;;  %v2165_v63 = vpop.f32.mrf.mxu0  ;;  %v6159_v28 = vld [vmem:[#allocation3_spill] sm:$0xff] }
 0x265   :  { %v3084_v8 = vmax.f32 %v2888_v25, 0.0  ;;  %v2446_v55 = vpop.f32.mrf.mxu1 }
 0x266   :  { %v3944_v47 = vpack.c.bf16 %v3266_v10, %v3265_v22  ;;  %v2892_v40 = vadd.f32 %v5771_v43, %v2674_v32  ;;  %v2677_v41 = vmul.f32 %v5755_v20, %v2445_v53  ;;  %v2447_v27 = vadd.f32 %v2446_v55, %v2165_v63  ;;  %v2167_v31 = vpop.f32.mrf.mxu0  ;;  %v6160_v10 = vld [vmem:[#allocation4_spill] sm:$0xff] }
 0x267   :  { %v3218_v60 = vmax.f32 %v3083_v9, %v3084_v8  ;;  %v2448_v29 = vpop.f32.mrf.mxu1  ;;  %v3087_v16 = vmax.f32 %v2891_v14, 0.0 }
 0x268   :  { %3992 = vst [vmem:[%s6096_s4 + $0x88] sm:$0xff] %v3944_v47   ;;  %v3088_v7 = vmax.f32 %v2892_v40, 0.0  ;;  %v2449_v12 = vadd.f32 %v2448_v29, %v2167_v31  ;;  %v2895_v46 = vadd.f32 %v5766_v52, %v2677_v41  ;;  %v2678_v48 = vmul.f32 %v5761_v62, %v2447_v27  ;;  %v2169_v39 = vpop.f32.mrf.mxu0 }
 0x269   :  { %v2450_v54 = vpop.f32.mrf.mxu1  ;;  %v3267_v30 = vmax.f32 %v5627_v49, %v3218_v60 }
 0x26a   :  { %v3219_v18 = vmax.f32 %v3087_v16, %v3088_v7  ;;  %v2681_v58 = vmul.f32 %v5755_v20, %v2449_v12  ;;  %v2451_v2 = vadd.f32 %v2450_v54, %v2169_v39  ;;  %v2896_v15 = vadd.f32 %v5771_v43, %v2678_v48  ;;  %v2173_v34 = vpop.f32.mrf.mxu0 }
 0x26b   :  { %v2454_v1 = vpop.f32.mrf.mxu1  ;;  %v3091_v59 = vmax.f32 %v2895_v46, 0.0 }
 0x26c   :  { %v3268_v44 = vmax.f32 %v6158_v37, %v3219_v18  ;;  %v2899_v3 = vadd.f32 %v5766_v52, %v2681_v58  ;;  %v2682_v33 = vmul.f32 %v5761_v62, %v2451_v2  ;;  %v2455_v0 = vadd.f32 %v2454_v1, %v2173_v34  ;;  %v2175_v11 = vpop.f32.mrf.mxu0 }
 0x26d   :  { %v3092_v4 = vmax.f32 %v2896_v15, 0.0  ;;  %v2456_v21 = vpop.f32.mrf.mxu1  ;;  %v6161_v15 = vld [vmem:[#allocation5_spill] sm:$0xff] }
 0x26e   :  { %v3949_v42 = vpack.c.bf16 %v3268_v44, %v3267_v30  ;;  %v2900_v26 = vadd.f32 %v5771_v43, %v2682_v33  ;;  %v2685_v49 = vmul.f32 %v5755_v20, %v2455_v0  ;;  %v2457_v36 = vadd.f32 %v2456_v21, %v2175_v11  ;;  %v2177_v23 = vpop.f32.mrf.mxu0 }
 0x26f   :  { %v3220_v19 = vmax.f32 %v3091_v59, %v3092_v4  ;;  %v2458_v61 = vpop.f32.mrf.mxu1  ;;  %v3095_v35 = vmax.f32 %v2899_v3, 0.0  ;;  %v6162_v3 = vld [vmem:[#allocation6_spill] sm:$0xff] }
 0x270   :  { %3993 = vst [vmem:[%s6096_s4 + $0x90] sm:$0xff] %v3949_v42   ;;  %v3096_v24 = vmax.f32 %v2900_v26, 0.0  ;;  %v2459_v6 = vadd.f32 %v2458_v61, %v2177_v23  ;;  %v2903_v51 = vadd.f32 %v5766_v52, %v2685_v49  ;;  %v2686_v13 = vmul.f32 %v5761_v62, %v2457_v36  ;;  %v2179_v38 = vpop.f32.mrf.mxu0 }
 0x271   :  { %v2460_v57 = vpop.f32.mrf.mxu1  ;;  %v3269_v22 = vmax.f32 %v6159_v28, %v3220_v19 }
 0x272   :  { %v3221_v45 = vmax.f32 %v3095_v35, %v3096_v24  ;;  %v2689_v56 = vmul.f32 %v5755_v20, %v2459_v6  ;;  %v2461_v5 = vadd.f32 %v2460_v57, %v2179_v38  ;;  %v2904_v25 = vadd.f32 %v5771_v43, %v2686_v13  ;;  %v2183_v50 = vpop.f32.mrf.mxu0 }
 0x273   :  { %v2464_v17 = vpop.f32.mrf.mxu1  ;;  %v3099_v8 = vmax.f32 %v2903_v51, 0.0 }
 0x274   :  { %v3270_v14 = vmax.f32 %v6160_v10, %v3221_v45  ;;  %v2907_v32 = vadd.f32 %v5766_v52, %v2689_v56  ;;  %v2690_v53 = vmul.f32 %v5761_v62, %v2461_v5  ;;  %v2465_v9 = vadd.f32 %v2464_v17, %v2183_v50  ;;  %v2185_v55 = vpop.f32.mrf.mxu0 }
 0x275   :  { %v3100_v63 = vmax.f32 %v2904_v25, 0.0  ;;  %v2466_v47 = vpop.f32.mrf.mxu1  ;;  %v6163_v25 = vld [vmem:[#allocation7_spill] sm:$0xff] }
 0x276   :  { %v3954_v40 = vpack.c.bf16 %v3270_v14, %v3269_v22  ;;  %v2908_v41 = vadd.f32 %v5771_v43, %v2690_v53  ;;  %v2693_v60 = vmul.f32 %v5755_v20, %v2465_v9  ;;  %v2467_v31 = vadd.f32 %v2466_v47, %v2185_v55  ;;  %v2187_v29 = vpop.f32.mrf.mxu0 }
 0x277   :  { %v3222_v27 = vmax.f32 %v3099_v8, %v3100_v63  ;;  %v2468_v16 = vpop.f32.mrf.mxu1  ;;  %v3103_v7 = vmax.f32 %v2907_v32, 0.0  ;;  %v6164_v32 = vld [vmem:[#allocation8_spill] sm:$0xff] }
 0x278   :  { %3994 = vst [vmem:[%s6096_s4 + $0x98] sm:$0xff] %v3954_v40   ;;  %v3104_v12 = vmax.f32 %v2908_v41, 0.0  ;;  %v2469_v46 = vadd.f32 %v2468_v16, %v2187_v29  ;;  %v2911_v48 = vadd.f32 %v5766_v52, %v2693_v60  ;;  %v2694_v39 = vmul.f32 %v5761_v62, %v2467_v31  ;;  %v2189_v54 = vpop.f32.mrf.mxu0 }
 0x279   :  { %v2470_v18 = vpop.f32.mrf.mxu1  ;;  %v3271_v34 = vmax.f32 %v6161_v15, %v3222_v27 }
 0x27a   :  { %v3223_v58 = vmax.f32 %v3103_v7, %v3104_v12  ;;  %v2697_v2 = vmul.f32 %v5755_v20, %v2469_v46  ;;  %v2471_v30 = vadd.f32 %v2470_v18, %v2189_v54  ;;  %v2912_v1 = vadd.f32 %v5771_v43, %v2694_v39  ;;  %v2193_v37 = vpop.f32.mrf.mxu0 }
 0x27b   :  { %v2474_v44 = vpop.f32.mrf.mxu1  ;;  %v3107_v11 = vmax.f32 %v2911_v48, 0.0 }
 0x27c   :  { %v3272_v33 = vmax.f32 %v6162_v3, %v3223_v58  ;;  %v2915_v0 = vadd.f32 %v5766_v52, %v2697_v2  ;;  %v2698_v59 = vmul.f32 %v5761_v62, %v2471_v30  ;;  %v2475_v4 = vadd.f32 %v2474_v44, %v2193_v37  ;;  %v2195_v42 = vpop.f32.mrf.mxu0 }
 0x27d   :  { %v3108_v21 = vmax.f32 %v2912_v1, 0.0  ;;  %v2476_v26 = vpop.f32.mrf.mxu1  ;;  %v6165_v1 = vld [vmem:[#allocation9_spill] sm:$0xff] }
 0x27e   :  { %v3959_v49 = vpack.c.bf16 %v3272_v33, %v3271_v34  ;;  %v2916_v19 = vadd.f32 %v5771_v43, %v2698_v59  ;;  %v2701_v36 = vmul.f32 %v5755_v20, %v2475_v4  ;;  %v2477_v61 = vadd.f32 %v2476_v26, %v2195_v42  ;;  %v2197_v35 = vpop.f32.mrf.mxu0 }
 0x27f   :  { %v3224_v23 = vmax.f32 %v3107_v11, %v3108_v21  ;;  %v2478_v24 = vpop.f32.mrf.mxu1  ;;  %v3111_v6 = vmax.f32 %v2915_v0, 0.0  ;;  %v6166_v0 = vld [vmem:[#allocation10_spill] sm:$0xff] }
 0x280   :  { %3995 = vst [vmem:[%s6096_s4 + $0xa0] sm:$0xff] %v3959_v49   ;;  %v3112_v51 = vmax.f32 %v2916_v19, 0.0  ;;  %v2479_v13 = vadd.f32 %v2478_v24, %v2197_v35  ;;  %v2919_v38 = vadd.f32 %v5766_v52, %v2701_v36  ;;  %v2702_v57 = vmul.f32 %v5761_v62, %v2477_v61  ;;  %v2199_v45 = vpop.f32.mrf.mxu0 }
 0x281   :  { %v2480_v56 = vpop.f32.mrf.mxu1  ;;  %v3273_v50 = vmax.f32 %v6163_v25, %v3224_v23 }
 0x282   :  { %v3225_v5 = vmax.f32 %v3111_v6, %v3112_v51  ;;  %v2705_v28 = vmul.f32 %v5755_v20, %v2479_v13  ;;  %v2481_v22 = vadd.f32 %v2480_v56, %v2199_v45  ;;  %v2920_v17 = vadd.f32 %v5771_v43, %v2702_v57  ;;  %v2203_v10 = vpop.f32.mrf.mxu0 }
 0x283   :  { %v2484_v14 = vpop.f32.mrf.mxu1  ;;  %v3115_v55 = vmax.f32 %v2919_v38, 0.0 }
 0x284   :  { %v3274_v53 = vmax.f32 %v6164_v32, %v3225_v5  ;;  %v2923_v9 = vadd.f32 %v5766_v52, %v2705_v28  ;;  %v2706_v8 = vmul.f32 %v5761_v62, %v2481_v22  ;;  %v2485_v63 = vadd.f32 %v2484_v14, %v2203_v10  ;;  %v2205_v40 = vpop.f32.mrf.mxu0 }
 0x285   :  { %v3116_v47 = vmax.f32 %v2920_v17, 0.0  ;;  %v2486_v41 = vpop.f32.mrf.mxu1 }
 0x286   :  { %v3964_v60 = vpack.c.bf16 %v3274_v53, %v3273_v50  ;;  %v2924_v27 = vadd.f32 %v5771_v43, %v2706_v8  ;;  %v2709_v31 = vmul.f32 %v5755_v20, %v2485_v63  ;;  %v2487_v16 = vadd.f32 %v2486_v41, %v2205_v40  ;;  %v2207_v7 = vpop.f32.mrf.mxu0  ;;  %v6168_v50 = vld [vmem:[#allocation12_spill] sm:$0xff] }
 0x287   :  { %v3226_v29 = vmax.f32 %v3115_v55, %v3116_v47  ;;  %v2488_v12 = vpop.f32.mrf.mxu1  ;;  %v3119_v46 = vmax.f32 %v2923_v9, 0.0 }
 0x288   :  { %3996 = vst [vmem:[%s6096_s4 + $0xa8] sm:$0xff] %v3964_v60   ;;  %v3120_v48 = vmax.f32 %v2924_v27, 0.0  ;;  %v2489_v39 = vadd.f32 %v2488_v12, %v2207_v7  ;;  %v2710_v54 = vmul.f32 %v5761_v62, %v2487_v16  ;;  %v2209_v18 = vpop.f32.mrf.mxu0  ;;  %v2927_v30 = vadd.f32 %v5766_v52, %v2709_v31 }
 0x289   :  { %v2490_v58 = vpop.f32.mrf.mxu1  ;;  %v3275_v37 = vmax.f32 %v6165_v1, %v3226_v29 }
 0x28a   :  { %v3227_v2 = vmax.f32 %v3119_v46, %v3120_v48  ;;  %v2713_v15 = vmul.f32 %v5755_v20, %v2489_v39  ;;  %v2491_v34 = vadd.f32 %v2490_v58, %v2209_v18  ;;  %v2928_v44 = vadd.f32 %v5771_v43, %v2710_v54  ;;  %v2213_v3 = vpop.f32.mrf.mxu0 }
 0x28b   :  { %v2494_v33 = vpop.f32.mrf.mxu1  ;;  %v3123_v36 = vmax.f32 %v2927_v30, 0.0 }
 0x28c   :  { %v3276_v59 = vmax.f32 %v6166_v0, %v3227_v2  ;;  %v2931_v4 = vadd.f32 %v5766_v52, %v2713_v15  ;;  %v2714_v11 = vmul.f32 %v5761_v62, %v2491_v34  ;;  %v2495_v21 = vadd.f32 %v2494_v33, %v2213_v3  ;;  %v2215_v26 = vpop.f32.mrf.mxu0 }
 0x28d   :  { %v3124_v42 = vmax.f32 %v2928_v44, 0.0  ;;  %v2496_v49 = vpop.f32.mrf.mxu1 }
 0x28e   :  { %v3969_v19 = vpack.c.bf16 %v3276_v59, %v3275_v37  ;;  %v2932_v23 = vadd.f32 %v5771_v43, %v2714_v11  ;;  %v2717_v61 = vmul.f32 %v5755_v20, %v2495_v21  ;;  %v2497_v35 = vadd.f32 %v2496_v49, %v2215_v26  ;;  %v2217_v24 = vpop.f32.mrf.mxu0  ;;  %v6167_v20 = vld [vmem:[#allocation11_spill] sm:$0xff] }
 0x28f   :  { %v2498_v6 = vpop.f32.mrf.mxu1  ;;  %v3228_v51 = vmax.f32 %v3123_v36, %v3124_v42  ;;  %v3127_v13 = vmax.f32 %v2931_v4, 0.0 }
 0x290   :  { %3997 = vst [vmem:[%s6096_s4 + $0xb0] sm:$0xff] %v3969_v19   ;;  %v3128_v38 = vmax.f32 %v2932_v23, 0.0  ;;  %v2935_v57 = vadd.f32 %v5766_v52, %v2717_v61  ;;  %v2718_v45 = vmul.f32 %v5761_v62, %v2497_v35  ;;  %v2218_v56 = vpop.f32.mrf.mxu0  ;;  %v6169_v52 = vld [vmem:[#allocation13_spill] sm:$0xff] }
 0x291   :  { %v2499_v5 = vpop.f32.mrf.mxu1  ;;  %v3277_v25 = vmax.f32 %v6167_v20, %v3228_v51 }
 0x292   :  { %v3229_v28 = vmax.f32 %v3127_v13, %v3128_v38  ;;  %v2936_v22 = vadd.f32 %v5771_v43, %v2718_v45  ;;  %v3131_v10 = vmax.f32 %v2935_v57, 0.0 }
 0x294   :  { %v3278_v17 = vmax.f32 %v6168_v50, %v3229_v28  ;;  %v3132_v14 = vmax.f32 %v2936_v22, 0.0 }
 0x296   :  { %v3974_v32 = vpack.c.bf16 %v3278_v17, %v3277_v25  ;;  %v3230_v53 = vmax.f32 %v3131_v10, %v3132_v14 }
 0x298   :  { %3998 = vst [vmem:[%s6096_s4 + $0xb8] sm:$0xff] %v3974_v32   ;;  %v3279_v9 = vmax.f32 %v6169_v52, %v3230_v53 }
 0x29a   :  { %v3855_v62 = vpack.c.bf16 %v3279_v9, %v3279_v9 }
 0x29c   :  { %3525 = vst [vmem:[%s6096_s4 + $0xc0] sm:$0xf] %v3855_v62 }

// kernel: custom_cnn_forward.9
= control target key start
LH: loop header
LB: loop body
LE: loop exit
PB: predicated region body
PF: predicated region fallthrough
CT: control target
= control target key end

     0   :  { %vm1487_vm0 = vmmov 0   ;;  %s1850_s0 = inlined_call_operand.vmem [shape: bf16[8,1152], index: 0, kind: input, shape index: {}]   ;;  %s1851_s1 = inlined_call_operand.vmem [shape: bf16[1152,128], index: 1, kind: input, shape index: {}]   ;;  %s1852_s2 = inlined_call_operand.vmem [shape: f32[1,128], index: 2, kind: input, shape index: {}]   ;;  %s1853_s3 = inlined_call_operand.vmem [shape: bf16[128,128], index: 3, kind: input, shape index: {}]   ;;  %s1854_s4 = inlined_call_operand.vmem [shape: f32[1,128], index: 4, kind: input, shape index: {}]   ;;  %s1855_s5 = inlined_call_operand.vmem [shape: bf16[128,128], index: 5, kind: input, shape index: {}]   ;;  %s1856_s6 = inlined_call_operand.vmem [shape: f32[1,128], index: 6, kind: input, shape index: {}]   ;;  %s1857_s7 = inlined_call_operand.hbm [shape: f32[8,128], index: 7, kind: output, shape index: {}]  }
   0x1   :  { %v1367_v0 = vld [vmem:[%s1851_s1 + $0x78] sm:$0xff]   ;;  %v1371_v4 = vld [vmem:[%s1851_s1 + $0x70] sm:$0xff]   ;;  %v1375_v8 = vld [vmem:[%s1851_s1 + $0x68] sm:$0xff]  }
   0x2   :  { %v1368_v1 = vld [vmem:[%s1851_s1 + $0x38] sm:$0xff]   ;;  %1189 = vmatprep.subr.bf16.mxu0 %v1367_v0  ;;  %v1372_v5 = vld [vmem:[%s1851_s1 + $0x30] sm:$0xff]   ;;  %v1376_v9 = vld [vmem:[%s1851_s1 + $0x28] sm:$0xff]  }
   0x3   :  { %v1369_v2 = vld [vmem:[%s1851_s1 + $0xf8] sm:$0xff]   ;;  %1190 = vmatpush3.bf16.msra.mxu0 %v1368_v1  ;;  %v1373_v6 = vld [vmem:[%s1851_s1 + $0xf0] sm:$0xff]   ;;  %v1377_v10 = vld [vmem:[%s1851_s1 + $0xe8] sm:$0xff]  }
   0x4   :  { %v1370_v3 = vld [vmem:[%s1851_s1 + $0xb8] sm:$0xff]   ;;  %1211 = vmatprep.subr.bf16.mxu1 %v1369_v2  ;;  %1191 = vmatprep.subr.bf16.mxu0 %v1371_v4  ;;  %v1374_v7 = vld [vmem:[%s1851_s1 + $0xb0] sm:$0xff]   ;;  %v1378_v11 = vld [vmem:[%s1851_s1 + $0xa8] sm:$0xff]  }
   0x5   :  { %1212 = vmatpush3.bf16.msra.mxu1 %v1370_v3  ;;  %v1379_v12 = vld [vmem:[%s1851_s1 + $0x60] sm:$0xff]   ;;  %v1383_v16 = vld [vmem:[%s1851_s1 + $0x58] sm:$0xff]   ;;  %v1387_v20 = vld [vmem:[%s1851_s1 + $0x50] sm:$0xff]  }
   0x6   :  { %1213 = vmatprep.subr.bf16.mxu1 %v1373_v6  ;;  %v1380_v13 = vld [vmem:[%s1851_s1 + $0x20] sm:$0xff]   ;;  %v1384_v17 = vld [vmem:[%s1851_s1 + $0x18] sm:$0xff]   ;;  %v1388_v21 = vld [vmem:[%s1851_s1 + $0x10] sm:$0xff]  }
   0x7   :  { %1192 = vmatpush3.bf16.msra.mxu0 %v1372_v5  ;;  %v1381_v14 = vld [vmem:[%s1851_s1 + $0xe0] sm:$0xff]   ;;  %v1385_v18 = vld [vmem:[%s1851_s1 + $0xd8] sm:$0xff]   ;;  %v1389_v22 = vld [vmem:[%s1851_s1 + $0xd0] sm:$0xff]  }
   0x8   :  { %1193 = vmatprep.subr.bf16.mxu0 %v1375_v8  ;;  %v1382_v15 = vld [vmem:[%s1851_s1 + $0xa0] sm:$0xff]   ;;  %v1386_v19 = vld [vmem:[%s1851_s1 + $0x98] sm:$0xff]   ;;  %v1390_v23 = vld [vmem:[%s1851_s1 + $0x90] sm:$0xff]  }
   0x9   :  { %1214 = vmatpush3.bf16.msra.mxu1 %v1374_v7  ;;  %v1391_v24 = vld [vmem:[%s1851_s1 + $0x48] sm:$0xff]   ;;  %v1395_v28 = vld [vmem:[%s1851_s1 + $0x40] sm:$0xff]   ;;  %v1401_v35 = vld [vmem:[%s1851_s1 + $0x178] sm:$0xff]  }
   0xa   :  { %1215 = vmatprep.subr.bf16.mxu1 %v1377_v10  ;;  %v1392_v25 = vld [vmem:[%s1851_s1 + $0x8] sm:$0xff]   ;;  %v1396_v29 = vld [vmem:[%s1851_s1] sm:$0xff]   ;;  %v1404_v39 = vld [vmem:[%s1851_s1 + $0x138] sm:$0xff]  }
   0xb   :  { %1194 = vmatpush3.bf16.msra.mxu0 %v1376_v9  ;;  %v1393_v26 = vld [vmem:[%s1851_s1 + $0xc8] sm:$0xff]   ;;  %v1397_v30 = vld [vmem:[%s1851_s1 + $0xc0] sm:$0xff]   ;;  %v1405_v40 = vld [vmem:[%s1851_s1 + $0x1f8] sm:$0xff]   ;;  %v1486_v9 = vmov 0.0  }
   0xc   :  { %1195 = vmatprep.subr.bf16.mxu0 %v1379_v12  ;;  %v1394_v27 = vld [vmem:[%s1851_s1 + $0x88] sm:$0xff]   ;;  %v28_v31 = vld [vmem:[%s1850_s0] sm:$0xff]  ;;  %v1406_v41 = vld [vmem:[%s1851_s1 + $0x1b8] sm:$0xff]  }
   0xd   :  { %1216 = vmatpush3.bf16.msra.mxu1 %v1378_v11  ;;  %v1090_v32 = vcombine.low %v28_v31, %v28_v31  ;;  %v1091_v33 = vcombine.high %v28_v31, %v28_v31  ;;  %v1400_v34 = vld [vmem:[%s1851_s1 + $0x80] sm:$0xff]   ;;  %v29_v36 = vld [vmem:[%s1850_s0 + $0x8] sm:$0xff]  ;;  %v1407_v42 = vld [vmem:[%s1851_s1 + $0x170] sm:$0xff]  }
   0xe   :  { %1217 = vmatprep.subr.bf16.mxu1 %v1381_v14  ;;  %v1092_v37 = vcombine.low %v29_v36, %v29_v36  ;;  %v1093_v38 = vcombine.high %v29_v36, %v29_v36  ;;  %v1408_v43 = vld [vmem:[%s1851_s1 + $0x130] sm:$0xff]   ;;  %v1411_v46 = vld [vmem:[%s1851_s1 + $0x168] sm:$0xff]   ;;  %v1415_v50 = vld [vmem:[%s1851_s1 + $0x160] sm:$0xff]  }
   0xf   :  { %1196 = vmatpush3.bf16.msra.mxu0 %v1380_v13  ;;  %680 = vmatprep.mubr.bf16.mxu0 %v1091_v33  ;;  %v1409_v44 = vld [vmem:[%s1851_s1 + $0x1f0] sm:$0xff]   ;;  %v1412_v47 = vld [vmem:[%s1851_s1 + $0x128] sm:$0xff]   ;;  %v1416_v51 = vld [vmem:[%s1851_s1 + $0x120] sm:$0xff]  }
  0x10   :  { %1197 = vmatprep.subr.bf16.mxu0 %v1383_v16  ;;  %720 = vmatprep.mubr.bf16.mxu1 %v1093_v38  ;;  %v1410_v45 = vld [vmem:[%s1851_s1 + $0x1b0] sm:$0xff]   ;;  %v1413_v48 = vld [vmem:[%s1851_s1 + $0x1e8] sm:$0xff]   ;;  %v1417_v52 = vld [vmem:[%s1851_s1 + $0x1e0] sm:$0xff]  }
  0x11   :  { %1218 = vmatpush3.bf16.msra.mxu1 %v1382_v15  ;;  %v1414_v49 = vld [vmem:[%s1851_s1 + $0x1a8] sm:$0xff]   ;;  %v1418_v53 = vld [vmem:[%s1851_s1 + $0x1a0] sm:$0xff]   ;;  %v1419_v54 = vld [vmem:[%s1851_s1 + $0x158] sm:$0xff]  }
  0x12   :  { %1219 = vmatprep.subr.bf16.mxu1 %v1385_v18  ;;  %v1420_v55 = vld [vmem:[%s1851_s1 + $0x118] sm:$0xff]   ;;  %v1423_v58 = vld [vmem:[%s1851_s1 + $0x150] sm:$0xff]   ;;  %v1427_v62 = vld [vmem:[%s1851_s1 + $0x148] sm:$0xff]  }
  0x13   :  { %1198 = vmatpush3.bf16.msra.mxu0 %v1384_v17  ;;  %v1421_v56 = vld [vmem:[%s1851_s1 + $0x1d8] sm:$0xff]   ;;  %v1424_v59 = vld [vmem:[%s1851_s1 + $0x110] sm:$0xff]   ;;  %v1428_v63 = vld [vmem:[%s1851_s1 + $0x108] sm:$0xff]  }
  0x14   :  { %1199 = vmatprep.subr.bf16.mxu0 %v1387_v20  ;;  %v1422_v57 = vld [vmem:[%s1851_s1 + $0x198] sm:$0xff]   ;;  %v1425_v60 = vld [vmem:[%s1851_s1 + $0x1d0] sm:$0xff]   ;;  %v1429_v0 = vld [vmem:[%s1851_s1 + $0x1c8] sm:$0xff]  }
  0x15   :  { %1220 = vmatpush3.bf16.msra.mxu1 %v1386_v19  ;;  %v1426_v61 = vld [vmem:[%s1851_s1 + $0x190] sm:$0xff]   ;;  %v1430_v1 = vld [vmem:[%s1851_s1 + $0x188] sm:$0xff]   ;;  %v1431_v2 = vld [vmem:[%s1851_s1 + $0x140] sm:$0xff]  }
  0x16   :  { %1221 = vmatprep.subr.bf16.mxu1 %v1389_v22  ;;  %v1432_v3 = vld [vmem:[%s1851_s1 + $0x100] sm:$0xff]   ;;  %v30_v5 = vld [vmem:[%s1850_s0 + $0x10] sm:$0xff]  ;;  %v31_v10 = vld [vmem:[%s1850_s0 + $0x18] sm:$0xff] }
  0x17   :  { %1200 = vmatpush3.bf16.msra.mxu0 %v1388_v21  ;;  %v1433_v4 = vld [vmem:[%s1851_s1 + $0x1c0] sm:$0xff]   ;;  %v1094_v6 = vcombine.low %v30_v5, %v30_v5  ;;  %v1095_v7 = vcombine.high %v30_v5, %v30_v5  ;;  %v1096_v11 = vcombine.low %v31_v10, %v31_v10  ;;  %v1097_v12 = vcombine.high %v31_v10, %v31_v10  ;;  %v1439_v13 = vld [vmem:[%s1851_s1 + $0x238] sm:$0xff]   ;;  %v1440_v14 = vld [vmem:[%s1851_s1 + $0x230] sm:$0xff]  }
  0x18   :  { %1201 = vmatprep.subr.bf16.mxu0 %v1391_v24  ;;  %v1436_v8 = vld [vmem:[%s1851_s1 + $0x180] sm:$0xff]   ;;  %v1441_v15 = vld [vmem:[%s1851_s1 + $0x228] sm:$0xff]   ;;  %v1443_v17 = vld [vmem:[%s1851_s1 + $0x218] sm:$0xff]  }
  0x19   :  { %1222 = vmatpush3.bf16.msra.mxu1 %v1390_v23  ;;  %v1442_v16 = vld [vmem:[%s1851_s1 + $0x220] sm:$0xff]   ;;  %v1444_v18 = vld [vmem:[%s1851_s1 + $0x210] sm:$0xff]  }
  0x1a   :  { %1223 = vmatprep.subr.bf16.mxu1 %v1393_v26 }
  0x1b   :  { %1202 = vmatpush3.bf16.msra.mxu0 %v1392_v25 }
  0x1c   :  { %1203 = vmatprep.subr.bf16.mxu0 %v1395_v28 }
  0x1d   :  { %1224 = vmatpush3.bf16.msra.mxu1 %v1394_v27 }
  0x1e   :  { %1225 = vmatprep.subr.bf16.mxu1 %v1397_v30 }
  0x1f   :  { %1204 = vmatpush3.bf16.msra.mxu0 %v1396_v29 }
  0x20   :  { %1233 = vmatprep.subr.bf16.mxu0 %v1401_v35 }
  0x21   :  { %1226 = vmatpush3.bf16.msra.mxu1 %v1400_v34 }
  0x22   :  { %681 = vmatmul.mubr.bf16.vlgmr.msra.gmra.mxu0 %v1090_v32  ;;  %1255 = vmatprep.subr.bf16.mxu1 %v1405_v40 }
  0x23   :  { %1234 = vmatpush3.bf16.msra.mxu0 %v1404_v39  ;;  %760 = vmatprep.mubr.bf16.mxu0 %v1095_v7 }
  0x24   :  { %721 = vmatmul.mubr.bf16.vlgmr.msra.gmra.mxu1 %v1092_v37  ;;  %1235 = vmatprep.subr.bf16.mxu0 %v1407_v42 }
  0x25   :  { %1256 = vmatpush3.bf16.msra.mxu1 %v1406_v41  ;;  %800 = vmatprep.mubr.bf16.mxu1 %v1097_v12 }
  0x26   :  { %1257 = vmatprep.subr.bf16.mxu1 %v1409_v44 }
  0x27   :  { %1236 = vmatpush3.bf16.msra.mxu0 %v1408_v43 }
  0x28   :  { %1237 = vmatprep.subr.bf16.mxu0 %v1411_v46 }
  0x29   :  { %1258 = vmatpush3.bf16.msra.mxu1 %v1410_v45 }
  0x2a   :  { %1259 = vmatprep.subr.bf16.mxu1 %v1413_v48 }
  0x2b   :  { %1238 = vmatpush3.bf16.msra.mxu0 %v1412_v47 }
  0x2c   :  { %1239 = vmatprep.subr.bf16.mxu0 %v1415_v50 }
  0x2d   :  { %1260 = vmatpush3.bf16.msra.mxu1 %v1414_v49 }
  0x2e   :  { %1261 = vmatprep.subr.bf16.mxu1 %v1417_v52 }
  0x2f   :  { %1240 = vmatpush3.bf16.msra.mxu0 %v1416_v51 }
  0x30   :  { %1241 = vmatprep.subr.bf16.mxu0 %v1419_v54 }
  0x31   :  { %1262 = vmatpush3.bf16.msra.mxu1 %v1418_v53 }
  0x32   :  { %1263 = vmatprep.subr.bf16.mxu1 %v1421_v56 }
  0x33   :  { %1242 = vmatpush3.bf16.msra.mxu0 %v1420_v55 }
  0x34   :  { %1243 = vmatprep.subr.bf16.mxu0 %v1423_v58 }
  0x35   :  { %1264 = vmatpush3.bf16.msra.mxu1 %v1422_v57 }
  0x36   :  { %1265 = vmatprep.subr.bf16.mxu1 %v1425_v60 }
  0x37   :  { %1244 = vmatpush3.bf16.msra.mxu0 %v1424_v59 }
  0x38   :  { %1245 = vmatprep.subr.bf16.mxu0 %v1427_v62 }
  0x39   :  { %1266 = vmatpush3.bf16.msra.mxu1 %v1426_v61 }
  0x3a   :  { %1267 = vmatprep.subr.bf16.mxu1 %v1429_v0 }
  0x3b   :  { %1246 = vmatpush3.bf16.msra.mxu0 %v1428_v63 }
  0x3c   :  { %1247 = vmatprep.subr.bf16.mxu0 %v1431_v2 }
  0x3d   :  { %1268 = vmatpush3.bf16.msra.mxu1 %v1430_v1 }
  0x3e   :  { %1269 = vmatprep.subr.bf16.mxu1 %v1433_v4 }
  0x3f   :  { %1248 = vmatpush3.bf16.msra.mxu0 %v1432_v3 }
  0x40   :  { %1304 = vmatprep.subr.bf16.mxu0 %v1486_v9 }
  0x41   :  { %1270 = vmatpush3.bf16.msra.mxu1 %v1436_v8 }
  0x42   :  { %761 = vmatmul.mubr.bf16.vlgmr.msra.gmra.mxu0 %v1094_v6  ;;  %1324 = vmatprep.subr.bf16.mxu1 %v1486_v9 }
  0x43   :  { %1305 = vmatpush3.bf16.msra.mxu0 %v1439_v13  ;;  %1320 = vmatprep.mubr.msk.bf16.mxu0 %vm1487_vm0, %v1486_v9 }
  0x44   :  { %801 = vmatmul.mubr.bf16.vlgmr.msra.gmra.mxu1 %v1096_v11  ;;  %1306 = vmatprep.subr.bf16.mxu0 %v1486_v9 }
  0x45   :  { %1340 = vmatprep.mubr.msk.bf16.mxu1 %vm1487_vm0, %v1486_v9 }
  0x47   :  { %1307 = vmatpush3.bf16.msra.mxu0 %v1440_v14 }
  0x48   :  { %1308 = vmatprep.subr.bf16.mxu0 %v1486_v9 }
  0x4b   :  { %1309 = vmatpush3.bf16.msra.mxu0 %v1441_v15 }
  0x4c   :  { %1310 = vmatprep.subr.bf16.mxu0 %v1486_v9 }
  0x4f   :  { %1311 = vmatpush3.bf16.msra.mxu0 %v1442_v16 }
  0x50   :  { %1312 = vmatprep.subr.bf16.mxu0 %v1486_v9 }
  0x53   :  { %1313 = vmatpush3.bf16.msra.mxu0 %v1443_v17 }
  0x54   :  { %12 = vsyncpa [#allocation3], 0  ;;  %1314 = vmatprep.subr.bf16.mxu0 %v1486_v9  ;;  %v1445_v19 = vld [vmem:[%s1851_s1 + $0x208] sm:$0xff]   ;;  %v1446_v20 = vld [vmem:[%s1851_s1 + $0x200] sm:$0xff]   ;;  %s1488_s26 = smov [#allocation2]  }
  0x55   :  { %v1447_v21 = vld [vmem:[%s1850_s0 + $0x20] ss:$0 sps:$4 sm:$0xff]   ;;  %v1448_v22 = vld [vmem:[%s1853_s3 + $0x38] sm:$0xff]   ;;  %v1449_v23 = vld [vmem:[%s1853_s3 + $0x30] sm:$0xff]   ;;  %s1081_s27 = sshll.u32 %s1488_s26, 4  ;;  %s1082_s27 = int_to_ptr.vmem [resolvable:$true] %s1081_s27 }
  0x56   :  { %1325 = vmatpush3.bf16.msra.mxu1 %v1448_v22  ;;  %v1450_v24 = vld [vmem:[%s1853_s3 + $0x28] sm:$0xff]   ;;  %v1451_v25 = vld [vmem:[%s1853_s3 + $0x20] sm:$0xff]   ;;  %v1452_v26 = vld [vmem:[%s1853_s3 + $0x18] sm:$0xff]   ;;  %p1469_p1 = scmp.lt.s32.totalorder %s1082_s27, %s1082_s27 }
  0x57   :  { %1315 = vmatpush3.bf16.msra.mxu0 %v1444_v18  ;;  %1326 = vmatprep.subr.bf16.mxu1 %v1486_v9  ;;  %v1453_v27 = vld [vmem:[%s1853_s3 + $0x10] sm:$0xff]   ;;  %v1454_v28 = vld [vmem:[%s1853_s3 + $0x8] sm:$0xff]   ;;  %v1455_v29 = vld [vmem:[%s1853_s3] sm:$0xff]  }
  0x58   :  { %1316 = vmatprep.subr.bf16.mxu0 %v1486_v9  ;;  %v1456_v30 = vld [vmem:[%s1855_s5 + $0x38] sm:$0xff]   ;;  %v1457_v31 = vld [vmem:[%s1855_s5 + $0x30] sm:$0xff]   ;;  %v1458_v32 = vld [vmem:[%s1855_s5 + $0x28] sm:$0xff]  }
  0x59   :  { %v1459_v33 = vld [vmem:[%s1855_s5 + $0x20] sm:$0xff]   ;;  %v1460_v34 = vld [vmem:[%s1855_s5 + $0x18] sm:$0xff]   ;;  %v1461_v35 = vld [vmem:[%s1855_s5 + $0x10] sm:$0xff]  }
  0x5a   :  { %1327 = vmatpush3.bf16.msra.mxu1 %v1449_v23  ;;  %v1089_v53 = vld [vmem:[%s1852_s2] ss:$0 sm:$0xff]  ;;  %v1462_v4 = vld [vmem:[%s1855_s5 + $0x8] sm:$0xff]  }
  0x5b   :  { %1317 = vmatpush3.bf16.msra.mxu0 %v1445_v19  ;;  %1328 = vmatprep.subr.bf16.mxu1 %v1486_v9  ;;  %v1463_v5 = vld [vmem:[%s1855_s5] sm:$0xff]  }
  0x5c   :  { %1318 = vmatprep.subr.bf16.mxu0 %v1486_v9  ;;  %v1171_v6 = vld [vmem:[%s1854_s4] ss:$0 sm:$0xff]  ;;  %s1464_s4 = scalar_lea.vmem %s1082_s27, 128 }
  0x5d   :  { %p1465_p0 = scmp.ne.s32.totalorder %s1082_s27, %s1464_s4  ;;  %p1470_p2 = scmp.lt.s32.totalorder %s1464_s4, %s1464_s4 }
  0x5e   :  { %1329 = vmatpush3.bf16.msra.mxu1 %v1450_v24 }
  0x5f   :  { %1319 = vmatpush3.bf16.msra.mxu0 %v1446_v20  ;;  %1330 = vmatprep.subr.bf16.mxu1 %v1486_v9  ;;  %p1471_p3 = por %p1470_p2, %p1469_p1 }
  0x60   :  { %1344 = vmatprep.subr.bf16.mxu0 %v1486_v9 }
  0x61   :  { %p1472_p4 = pnand %p1471_p3, %p1465_p0 }
  0x62   :  { %1321 = vmatmul.mubr.bf16.vlgmr.msra.gmra.mxu0 %v1447_v21  ;;  %1331 = vmatpush3.bf16.msra.mxu1 %v1451_v25 }
  0x63   :  { %1360 = vmatprep.mubr.msk.bf16.mxu0 %vm1487_vm0, %v1486_v9  ;;  %1332 = vmatprep.subr.bf16.mxu1 %v1486_v9 }
  0x64   :  { %1345 = vmatpush3.bf16.msra.mxu0 %v1456_v30 }
  0x65   :  { %1346 = vmatprep.subr.bf16.mxu0 %v1486_v9 }
  0x66   :  { %1333 = vmatpush3.bf16.msra.mxu1 %v1452_v26 }
  0x67   :  { %1334 = vmatprep.subr.bf16.mxu1 %v1486_v9 }
  0x68   :  { %1347 = vmatpush3.bf16.msra.mxu0 %v1457_v31 }
  0x69   :  { %1348 = vmatprep.subr.bf16.mxu0 %v1486_v9 }
  0x6a   :  { %1335 = vmatpush3.bf16.msra.mxu1 %v1453_v27 }
  0x6b   :  { %1336 = vmatprep.subr.bf16.mxu1 %v1486_v9 }
  0x6c   :  { %1349 = vmatpush3.bf16.msra.mxu0 %v1458_v32 }
  0x6d   :  { %1350 = vmatprep.subr.bf16.mxu0 %v1486_v9 }
  0x6e   :  { %1337 = vmatpush3.bf16.msra.mxu1 %v1454_v28 }
  0x6f   :  { %1338 = vmatprep.subr.bf16.mxu1 %v1486_v9 }
  0x70   :  { %1351 = vmatpush3.bf16.msra.mxu0 %v1459_v33 }
  0x71   :  { %1352 = vmatprep.subr.bf16.mxu0 %v1486_v9 }
  0x72   :  { %1339 = vmatpush3.bf16.msra.mxu1 %v1455_v29 }
  0x74   :  { %1353 = vmatpush3.bf16.msra.mxu0 %v1460_v34 }
  0x75   :  { %1354 = vmatprep.subr.bf16.mxu0 %v1486_v9 }
  0x78   :  { %1355 = vmatpush3.bf16.msra.mxu0 %v1461_v35 }
  0x79   :  { %1356 = vmatprep.subr.bf16.mxu0 %v1486_v9 }
  0x7c   :  { %1357 = vmatpush3.bf16.msra.mxu0 %v1462_v4 }
  0x7d   :  { %1358 = vmatprep.subr.bf16.mxu0 %v1486_v9  ;;  %v1180_v9 = vld [vmem:[%s1856_s6] ss:$0 sm:$0xff] }
  0x80   :  { %1359 = vmatpush3.bf16.msra.mxu0 %v1463_v5 }
  0xe2   :  { %v1205_v36 = vpop.f32.mrf.mxu0 }
  0xe4   :  { %v1206_v37 = vpop.f32.mrf.mxu0  ;;  %v1227_v38 = vpop.f32.mrf.mxu1 }
  0xe5   :  { %v1207_v52 = vadd.f32 %v1206_v37, %v1205_v36 }
  0xe6   :  { %v1208_v39 = vpop.f32.mrf.mxu0  ;;  %v1228_v40 = vpop.f32.mrf.mxu1 }
  0xe7   :  { %v683_v54 = vadd.f32 %v1207_v52, %v1089_v53  ;;  %v1229_v55 = vadd.f32 %v1228_v40, %v1227_v38 }
  0xe8   :  { %v1209_v41 = vpop.f32.mrf.mxu0  ;;  %v1230_v42 = vpop.f32.mrf.mxu1 }
  0xe9   :  { %v723_v57 = vadd.f32 %v1229_v55, %v683_v54 }
  0xea   :  { %v1231_v43 = vpop.f32.mrf.mxu1 }
 0x102   :  { %v1249_v44 = vpop.f32.mrf.mxu0 }
 0x104   :  { %v1250_v45 = vpop.f32.mrf.mxu0  ;;  %v1271_v46 = vpop.f32.mrf.mxu1 }
 0x105   :  { %v1251_v56 = vadd.f32 %v1250_v45, %v1249_v44 }
 0x106   :  { %v1252_v47 = vpop.f32.mrf.mxu0  ;;  %v1272_v48 = vpop.f32.mrf.mxu1 }
 0x107   :  { %v763_v58 = vadd.f32 %v1251_v56, %v723_v57  ;;  %v1273_v59 = vadd.f32 %v1272_v48, %v1271_v46 }
 0x108   :  { %v1253_v49 = vpop.f32.mrf.mxu0  ;;  %v1274_v50 = vpop.f32.mrf.mxu1 }
 0x109   :  { %v803_v60 = vadd.f32 %v1273_v59, %v763_v58 }
 0x10a   :  { %v1275_v51 = vpop.f32.mrf.mxu1 }
 0x122   :  { %v842_v61 = vpop.f32.mrf.mxu0 }
 0x123   :  { %v843_v62 = vadd.f32 %v842_v61, %v803_v60 }
 0x124   :  { %v1322_v63 = vpop.f32.mrf.mxu0 }
 0x125   :  { %v848_v0 = vmax.f32 %v843_v62, 0.0 }
 0x126   :  { %v845_v1 = vpop.f32.mrf.mxu0 }
 0x127   :  { %v849_v2 = vpack.c.bf16 %v848_v0, %v848_v0 }
 0x128   :  { %v1323_v3 = vpop.f32.mrf.mxu0 }
 0x129   :  { %1341 = vmatmul.mubr.bf16.vlgmr.msra.gmra.mxu1 %v849_v2 }
 0x1e9   :  { %v955_v7 = vpop.f32.mrf.mxu1 }
 0x1ea   :  { %v956_v8 = vadd.f32 %v1171_v6, %v955_v7 }
 0x1eb   :  { %v1342_v10 = vpop.f32.mrf.mxu1 }
 0x1ec   :  { %v961_v11 = vmax.f32 %v956_v8, 0.0 }
 0x1ed   :  { %v958_v12 = vpop.f32.mrf.mxu1 }
 0x1ee   :  { %v962_v13 = vpack.c.bf16 %v961_v11, %v961_v11 }
 0x1ef   :  { %v1343_v14 = vpop.f32.mrf.mxu1 }
 0x1f0   :  { %1361 = vmatmul.mubr.bf16.vlgmr.msra.gmra.mxu0 %v962_v13 }
 0x2b0   :  { %v1068_v15 = vpop.f32.mrf.mxu0 }
 0x2b1   :  { %v1069_v16 = vadd.f32 %v1180_v9, %v1068_v15 }
 0x2b2   :  { %v1362_v17 = vpop.f32.mrf.mxu0 }
 0x2b3   :  { %1074 = vst [vmem:[#allocation2] sm:$0xff] %v1069_v16 }
 0x2b4   :  { %v1071_v18 = vpop.f32.mrf.mxu0 }
 0x2b5   :  { %1475 = shalt.err (!%p1472_p4)
}
 0x2b6   :  { %1084 = dma.vmem_to_hbm [thread:$0]  %s1082_s27, 128, %s1857_s7, [#allocation3]   ;;  %v1363_v19 = vpop.f32.mrf.mxu0 }
 0x2b7   :  { %1484 = dma.done.wait [#allocation3], 128  }
 0x2b8   :  { %1485 = vsyncadd [#allocation3], 4294967168 }
 0x2b9   :  { %1088 = vsyncpa [#allocation3], 1 }

// kernel: custom_cnn_forward.8
= control target key start
LH: loop header
LB: loop body
LE: loop exit
PB: predicated region body
PF: predicated region fallthrough
CT: control target
= control target key end

     0   :  { %s4725_s1 = inlined_call_operand.vmem [shape: bf16[1024,512], index: 1, kind: input, shape index: {}]   ;;  %s4726_s0 = inlined_call_operand.vmem [shape: bf16[72,1024], index: 0, kind: input, shape index: {}]   ;;  %s4727_s2 = inlined_call_operand.vmem [shape: f32[1,512], index: 2, kind: input, shape index: {}]   ;;  %s4728_s3 = inlined_call_operand.vmem [shape: f32[1,512], index: 3, kind: input, shape index: {}]   ;;  %s4729_s4 = inlined_call_operand.vmem [shape: bf16[72,128], index: 4, kind: output, shape index: {}]  }
   0x1   :  { %v2991_v0 = vld [vmem:[%s4725_s1 + $0xe4] ss:$16 sps:$4 sm:$0xff]   ;;  %v2995_v2 = vld [vmem:[%s4725_s1 + $0xe0] ss:$16 sps:$4 sm:$0xff]   ;;  %v18_v50 = vld [vmem:[%s4726_s0 + $0x8] sm:$0xff] }
   0x2   :  { %v2993_v1 = vld [vmem:[%s4725_s1 + $0x2e4] ss:$16 sps:$4 sm:$0xff]   ;;  %1777 = vmatprep.subr.bf16.mxu0 %v2991_v0  ;;  %v2996_v3 = vld [vmem:[%s4725_s1 + $0x2e0] ss:$16 sps:$4 sm:$0xff]   ;;  %v22_v51 = vld [vmem:[%s4726_s0 + $0x28] sm:$0xff] }
   0x3   :  { %1858 = vmatprep.subr.bf16.mxu1 %v2993_v1  ;;  %v2997_v4 = vld [vmem:[%s4725_s1 + $0xc4] ss:$16 sps:$4 sm:$0xff]   ;;  %1778 = vmatpush1.bf16.msra.mxu0 %v2995_v2  ;;  %v3001_v6 = vld [vmem:[%s4725_s1 + $0xc0] ss:$16 sps:$4 sm:$0xff]   ;;  %v3572_v55 = vcombine.high %v18_v50, %v22_v51 }
   0x4   :  { %1859 = vmatpush1.bf16.msra.mxu1 %v2996_v3  ;;  %v2999_v5 = vld [vmem:[%s4725_s1 + $0x2c4] ss:$16 sps:$4 sm:$0xff]   ;;  %1779 = vmatprep.subr.bf16.mxu0 %v2997_v4  ;;  %v3002_v7 = vld [vmem:[%s4725_s1 + $0x2c0] ss:$16 sps:$4 sm:$0xff]  }
   0x5   :  { %1860 = vmatprep.subr.bf16.mxu1 %v2999_v5  ;;  %v3003_v8 = vld [vmem:[%s4725_s1 + $0xa4] ss:$16 sps:$4 sm:$0xff]   ;;  %v3007_v10 = vld [vmem:[%s4725_s1 + $0xa0] ss:$16 sps:$4 sm:$0xff]   ;;  %1890 = vmatprep.mubr.bf16.mxu1 %v3572_v55 }
   0x6   :  { %v3005_v9 = vld [vmem:[%s4725_s1 + $0x2a4] ss:$16 sps:$4 sm:$0xff]   ;;  %v3008_v11 = vld [vmem:[%s4725_s1 + $0x2a0] ss:$16 sps:$4 sm:$0xff]  }
   0x7   :  { %1780 = vmatpush1.bf16.msra.mxu0 %v3001_v6  ;;  %v3009_v12 = vld [vmem:[%s4725_s1 + $0x84] ss:$16 sps:$4 sm:$0xff]   ;;  %v3013_v14 = vld [vmem:[%s4725_s1 + $0x80] ss:$16 sps:$4 sm:$0xff]  }
   0x8   :  { %1861 = vmatpush1.bf16.msra.mxu1 %v3002_v7  ;;  %1781 = vmatprep.subr.bf16.mxu0 %v3003_v8  ;;  %v3011_v13 = vld [vmem:[%s4725_s1 + $0x284] ss:$16 sps:$4 sm:$0xff]   ;;  %v3014_v15 = vld [vmem:[%s4725_s1 + $0x280] ss:$16 sps:$4 sm:$0xff]  }
   0x9   :  { %1862 = vmatprep.subr.bf16.mxu1 %v3005_v9  ;;  %v3015_v16 = vld [vmem:[%s4725_s1 + $0x64] ss:$16 sps:$4 sm:$0xff]   ;;  %v3019_v18 = vld [vmem:[%s4725_s1 + $0x60] ss:$16 sps:$4 sm:$0xff]  }
   0xa   :  { %v3017_v17 = vld [vmem:[%s4725_s1 + $0x264] ss:$16 sps:$4 sm:$0xff]   ;;  %v3020_v19 = vld [vmem:[%s4725_s1 + $0x260] ss:$16 sps:$4 sm:$0xff]  }
   0xb   :  { %1782 = vmatpush1.bf16.msra.mxu0 %v3007_v10  ;;  %v3021_v20 = vld [vmem:[%s4725_s1 + $0x44] ss:$16 sps:$4 sm:$0xff]   ;;  %v3025_v22 = vld [vmem:[%s4725_s1 + $0x40] ss:$16 sps:$4 sm:$0xff]  }
   0xc   :  { %1863 = vmatpush1.bf16.msra.mxu1 %v3008_v11  ;;  %1783 = vmatprep.subr.bf16.mxu0 %v3009_v12  ;;  %v3023_v21 = vld [vmem:[%s4725_s1 + $0x244] ss:$16 sps:$4 sm:$0xff]   ;;  %v3026_v23 = vld [vmem:[%s4725_s1 + $0x240] ss:$16 sps:$4 sm:$0xff]   ;;  %v3635_v12 = vcombine.low %v18_v50, %v22_v51 }
   0xd   :  { %1864 = vmatprep.subr.bf16.mxu1 %v3011_v13  ;;  %v3027_v24 = vld [vmem:[%s4725_s1 + $0x24] ss:$16 sps:$4 sm:$0xff]   ;;  %v3031_v26 = vld [vmem:[%s4725_s1 + $0x20] ss:$16 sps:$4 sm:$0xff]  }
   0xe   :  { %v3029_v25 = vld [vmem:[%s4725_s1 + $0x224] ss:$16 sps:$4 sm:$0xff]   ;;  %v3032_v27 = vld [vmem:[%s4725_s1 + $0x220] ss:$16 sps:$4 sm:$0xff]  }
   0xf   :  { %1784 = vmatpush1.bf16.msra.mxu0 %v3013_v14  ;;  %v3033_v28 = vld [vmem:[%s4725_s1 + $0x4] ss:$16 sps:$4 sm:$0xff]   ;;  %v3037_v30 = vld [vmem:[%s4725_s1] ss:$16 sps:$4 sm:$0xff]   ;;  %v26_v14 = vld [vmem:[%s4726_s0 + $0x48] sm:$0xff] }
  0x10   :  { %1865 = vmatpush1.bf16.msra.mxu1 %v3014_v15  ;;  %1785 = vmatprep.subr.bf16.mxu0 %v3015_v16  ;;  %v3035_v29 = vld [vmem:[%s4725_s1 + $0x204] ss:$16 sps:$4 sm:$0xff]   ;;  %v3038_v31 = vld [vmem:[%s4725_s1 + $0x200] ss:$16 sps:$4 sm:$0xff]   ;;  %v30_v15 = vld [vmem:[%s4726_s0 + $0x68] sm:$0xff] }
  0x11   :  { %1866 = vmatprep.subr.bf16.mxu1 %v3017_v17  ;;  %v3039_v32 = vld [vmem:[%s4725_s1 + $0x1e4] ss:$16 sps:$4 sm:$0xff]   ;;  %v3043_v34 = vld [vmem:[%s4725_s1 + $0x1e0] ss:$16 sps:$4 sm:$0xff]  }
  0x12   :  { %v3041_v33 = vld [vmem:[%s4725_s1 + $0x3e4] ss:$16 sps:$4 sm:$0xff]   ;;  %v3044_v35 = vld [vmem:[%s4725_s1 + $0x3e0] ss:$16 sps:$4 sm:$0xff]  }
  0x13   :  { %1786 = vmatpush1.bf16.msra.mxu0 %v3019_v18  ;;  %v3045_v36 = vld [vmem:[%s4725_s1 + $0x1c4] ss:$16 sps:$4 sm:$0xff]   ;;  %v3049_v38 = vld [vmem:[%s4725_s1 + $0x1c0] ss:$16 sps:$4 sm:$0xff]  }
  0x14   :  { %1867 = vmatpush1.bf16.msra.mxu1 %v3020_v19  ;;  %1787 = vmatprep.subr.bf16.mxu0 %v3021_v20  ;;  %v3047_v37 = vld [vmem:[%s4725_s1 + $0x3c4] ss:$16 sps:$4 sm:$0xff]   ;;  %v3050_v39 = vld [vmem:[%s4725_s1 + $0x3c0] ss:$16 sps:$4 sm:$0xff]   ;;  %v3654_v19 = vcombine.high %v26_v14, %v30_v15 }
  0x15   :  { %1868 = vmatprep.subr.bf16.mxu1 %v3023_v21  ;;  %v3051_v40 = vld [vmem:[%s4725_s1 + $0x1a4] ss:$16 sps:$4 sm:$0xff]   ;;  %v3055_v42 = vld [vmem:[%s4725_s1 + $0x1a0] ss:$16 sps:$4 sm:$0xff]  }
  0x16   :  { %v3053_v41 = vld [vmem:[%s4725_s1 + $0x3a4] ss:$16 sps:$4 sm:$0xff]   ;;  %v3056_v43 = vld [vmem:[%s4725_s1 + $0x3a0] ss:$16 sps:$4 sm:$0xff]  }
  0x17   :  { %1788 = vmatpush1.bf16.msra.mxu0 %v3025_v22  ;;  %v3057_v44 = vld [vmem:[%s4725_s1 + $0x184] ss:$16 sps:$4 sm:$0xff]   ;;  %v3061_v46 = vld [vmem:[%s4725_s1 + $0x180] ss:$16 sps:$4 sm:$0xff]  }
  0x18   :  { %1869 = vmatpush1.bf16.msra.mxu1 %v3026_v23  ;;  %1789 = vmatprep.subr.bf16.mxu0 %v3027_v24  ;;  %v3059_v45 = vld [vmem:[%s4725_s1 + $0x384] ss:$16 sps:$4 sm:$0xff]   ;;  %v3062_v47 = vld [vmem:[%s4725_s1 + $0x380] ss:$16 sps:$4 sm:$0xff]  }
  0x19   :  { %1870 = vmatprep.subr.bf16.mxu1 %v3029_v25  ;;  %v17_v48 = vld [vmem:[%s4726_s0] sm:$0xff] }
  0x1a   :  { %v21_v49 = vld [vmem:[%s4726_s0 + $0x20] sm:$0xff] }
  0x1b   :  { %1790 = vmatpush1.bf16.msra.mxu0 %v3031_v26  ;;  %v3063_v52 = vld [vmem:[%s4725_s1 + $0x164] ss:$16 sps:$4 sm:$0xff]   ;;  %v3567_v53 = vcombine.high %v17_v48, %v21_v49  ;;  %v3067_v56 = vld [vmem:[%s4725_s1 + $0x160] ss:$16 sps:$4 sm:$0xff]   ;;  %v3633_v11 = vcombine.low %v17_v48, %v21_v49 }
  0x1c   :  { %1871 = vmatpush1.bf16.msra.mxu1 %v3032_v27  ;;  %1791 = vmatprep.subr.bf16.mxu0 %v3033_v28  ;;  %v3065_v54 = vld [vmem:[%s4725_s1 + $0x364] ss:$16 sps:$4 sm:$0xff]   ;;  %v3068_v57 = vld [vmem:[%s4725_s1 + $0x360] ss:$16 sps:$4 sm:$0xff]  }
  0x1d   :  { %1872 = vmatprep.subr.bf16.mxu1 %v3035_v29  ;;  %1809 = vmatprep.mubr.bf16.mxu0 %v3567_v53  ;;  %v3069_v58 = vld [vmem:[%s4725_s1 + $0x144] ss:$16 sps:$4 sm:$0xff]   ;;  %v3073_v60 = vld [vmem:[%s4725_s1 + $0x140] ss:$16 sps:$4 sm:$0xff]   ;;  %v3686_v29 = vcombine.low %v26_v14, %v30_v15  ;;  %v3832_v15 = vld [vmem:[%s4726_s0 + $0x38] sm:$0xff] }
  0x1e   :  { %v3071_v59 = vld [vmem:[%s4725_s1 + $0x344] ss:$16 sps:$4 sm:$0xff]   ;;  %v3074_v61 = vld [vmem:[%s4725_s1 + $0x340] ss:$16 sps:$4 sm:$0xff]  }
  0x1f   :  { %1792 = vmatpush1.bf16.msra.mxu0 %v3037_v30  ;;  %v3075_v62 = vld [vmem:[%s4725_s1 + $0x124] ss:$16 sps:$4 sm:$0xff]   ;;  %v3079_v0 = vld [vmem:[%s4725_s1 + $0x120] ss:$16 sps:$4 sm:$0xff]   ;;  %v34_v30 = vld [vmem:[%s4726_s0 + $0x88] sm:$0xff] }
  0x20   :  { %1873 = vmatpush1.bf16.msra.mxu1 %v3038_v31  ;;  %1793 = vmatprep.subr.bf16.mxu0 %v3039_v32  ;;  %v3077_v63 = vld [vmem:[%s4725_s1 + $0x324] ss:$16 sps:$4 sm:$0xff]   ;;  %v3080_v1 = vld [vmem:[%s4725_s1 + $0x320] ss:$16 sps:$4 sm:$0xff]   ;;  %v38_v31 = vld [vmem:[%s4726_s0 + $0xa8] sm:$0xff] }
  0x21   :  { %1874 = vmatprep.subr.bf16.mxu1 %v3041_v33  ;;  %v3081_v2 = vld [vmem:[%s4725_s1 + $0x104] ss:$16 sps:$4 sm:$0xff]   ;;  %v3085_v4 = vld [vmem:[%s4725_s1 + $0x100] ss:$16 sps:$4 sm:$0xff]  }
  0x22   :  { %v3083_v3 = vld [vmem:[%s4725_s1 + $0x304] ss:$16 sps:$4 sm:$0xff]   ;;  %v3086_v5 = vld [vmem:[%s4725_s1 + $0x300] ss:$16 sps:$4 sm:$0xff]  }
  0x23   :  { %1794 = vmatpush2.bf16.msra.mxu0 %v3043_v34  ;;  %v3089_v6 = vld [vmem:[%s4725_s1 + $0x4e4] ss:$16 sps:$4 sm:$0xff]   ;;  %v3087_v8 = vld [vmem:[%s4725_s1 + $0x4e0] ss:$16 sps:$4 sm:$0xff]  }
  0x24   :  { %1875 = vmatpush2.bf16.msra.mxu1 %v3044_v35  ;;  %1795 = vmatprep.subr.bf16.mxu0 %v3045_v36  ;;  %v3092_v7 = vld [vmem:[%s4725_s1 + $0x6e4] ss:$16 sps:$4 sm:$0xff]   ;;  %v3090_v9 = vld [vmem:[%s4725_s1 + $0x6e0] ss:$16 sps:$4 sm:$0xff]   ;;  %v3702_v35 = vcombine.high %v34_v30, %v38_v31 }
  0x25   :  { %1876 = vmatprep.subr.bf16.mxu1 %v3047_v37  ;;  %v25_v10 = vld [vmem:[%s4726_s0 + $0x40] sm:$0xff] }
  0x26   :  { %v29_v13 = vld [vmem:[%s4726_s0 + $0x60] sm:$0xff] }
  0x27   :  { %1796 = vmatpush2.bf16.msra.mxu0 %v3049_v38  ;;  %v3095_v16 = vld [vmem:[%s4725_s1 + $0x4c4] ss:$16 sps:$4 sm:$0xff]   ;;  %v3652_v18 = vcombine.high %v25_v10, %v29_v13  ;;  %v3093_v20 = vld [vmem:[%s4725_s1 + $0x4c0] ss:$16 sps:$4 sm:$0xff]   ;;  %v3684_v28 = vcombine.low %v25_v10, %v29_v13  ;;  %v3823_v10 = vld [vmem:[%s4726_s0 + $0x18] sm:$0xff] }
  0x28   :  { %1877 = vmatpush2.bf16.msra.mxu1 %v3050_v39  ;;  %1797 = vmatprep.subr.bf16.mxu0 %v3051_v40  ;;  %v3098_v17 = vld [vmem:[%s4725_s1 + $0x6c4] ss:$16 sps:$4 sm:$0xff]   ;;  %v3096_v21 = vld [vmem:[%s4725_s1 + $0x6c0] ss:$16 sps:$4 sm:$0xff]  }
  0x29   :  { %1878 = vmatprep.subr.bf16.mxu1 %v3053_v41  ;;  %v3101_v22 = vld [vmem:[%s4725_s1 + $0x4a4] ss:$16 sps:$4 sm:$0xff]   ;;  %v3099_v24 = vld [vmem:[%s4725_s1 + $0x4a0] ss:$16 sps:$4 sm:$0xff]  }
  0x2a   :  { %v3104_v23 = vld [vmem:[%s4725_s1 + $0x6a4] ss:$16 sps:$4 sm:$0xff]   ;;  %v3102_v25 = vld [vmem:[%s4725_s1 + $0x6a0] ss:$16 sps:$4 sm:$0xff]  }
  0x2b   :  { %1798 = vmatpush2.bf16.msra.mxu0 %v3055_v42  ;;  %v33_v26 = vld [vmem:[%s4726_s0 + $0x80] sm:$0xff] }
  0x2c   :  { %1879 = vmatpush2.bf16.msra.mxu1 %v3056_v43  ;;  %1799 = vmatprep.subr.bf16.mxu0 %v3057_v44  ;;  %v37_v27 = vld [vmem:[%s4726_s0 + $0xa0] sm:$0xff] }
  0x2d   :  { %1880 = vmatprep.subr.bf16.mxu1 %v3059_v45  ;;  %v3107_v32 = vld [vmem:[%s4725_s1 + $0x484] ss:$16 sps:$4 sm:$0xff]   ;;  %v3700_v34 = vcombine.high %v33_v26, %v37_v27  ;;  %v3105_v36 = vld [vmem:[%s4725_s1 + $0x480] ss:$16 sps:$4 sm:$0xff]   ;;  %v3732_v44 = vcombine.low %v33_v26, %v37_v27  ;;  %v3734_v45 = vcombine.low %v34_v30, %v38_v31 }
  0x2e   :  { %v3110_v33 = vld [vmem:[%s4725_s1 + $0x684] ss:$16 sps:$4 sm:$0xff]   ;;  %v3108_v37 = vld [vmem:[%s4725_s1 + $0x680] ss:$16 sps:$4 sm:$0xff]  }
  0x2f   :  { %1800 = vmatpush2.bf16.msra.mxu0 %v3061_v46  ;;  %v3113_v38 = vld [vmem:[%s4725_s1 + $0x464] ss:$16 sps:$4 sm:$0xff]   ;;  %v3111_v40 = vld [vmem:[%s4725_s1 + $0x460] ss:$16 sps:$4 sm:$0xff]   ;;  %v42_v46 = vld [vmem:[%s4726_s0 + $0xc8] sm:$0xff] }
  0x30   :  { %1881 = vmatpush2.bf16.msra.mxu1 %v3062_v47  ;;  %1801 = vmatprep.subr.bf16.mxu0 %v3063_v52  ;;  %v3116_v39 = vld [vmem:[%s4725_s1 + $0x664] ss:$16 sps:$4 sm:$0xff]   ;;  %v3114_v41 = vld [vmem:[%s4725_s1 + $0x660] ss:$16 sps:$4 sm:$0xff]   ;;  %v46_v47 = vld [vmem:[%s4726_s0 + $0xe8] sm:$0xff] }
  0x31   :  { %1882 = vmatprep.subr.bf16.mxu1 %v3065_v54  ;;  %v41_v42 = vld [vmem:[%s4726_s0 + $0xc0] sm:$0xff]  ;;  %v3750_v51 = vcombine.high %v42_v46, %v46_v47 }
  0x32   :  { %v45_v43 = vld [vmem:[%s4726_s0 + $0xe0] sm:$0xff] }
  0x33   :  { %1802 = vmatpush2.bf16.msra.mxu0 %v3067_v56  ;;  %v3119_v48 = vld [vmem:[%s4725_s1 + $0x444] ss:$16 sps:$4 sm:$0xff]   ;;  %v3748_v50 = vcombine.high %v41_v42, %v45_v43  ;;  %v3117_v52 = vld [vmem:[%s4725_s1 + $0x440] ss:$16 sps:$4 sm:$0xff]  }
  0x34   :  { %1883 = vmatpush2.bf16.msra.mxu1 %v3068_v57  ;;  %1803 = vmatprep.subr.bf16.mxu0 %v3069_v58  ;;  %v3122_v49 = vld [vmem:[%s4725_s1 + $0x644] ss:$16 sps:$4 sm:$0xff]   ;;  %v3120_v54 = vld [vmem:[%s4725_s1 + $0x640] ss:$16 sps:$4 sm:$0xff]  }
  0x35   :  { %1884 = vmatprep.subr.bf16.mxu1 %v3071_v59  ;;  %v3125_v56 = vld [vmem:[%s4725_s1 + $0x424] ss:$16 sps:$4 sm:$0xff]   ;;  %v3771_v59 = vcombine.low %v41_v42, %v45_v43  ;;  %v3147_v30 = vld [vmem:[%s4725_s1 + $0x5a0] ss:$16 sps:$4 sm:$0xff]  }
  0x36   :  { %v3128_v57 = vld [vmem:[%s4725_s1 + $0x624] ss:$16 sps:$4 sm:$0xff]   ;;  %v3150_v31 = vld [vmem:[%s4725_s1 + $0x7a0] ss:$16 sps:$4 sm:$0xff]  }
  0x37   :  { %1804 = vmatpush2.bf16.msra.mxu0 %v3073_v60  ;;  %v49_v58 = vld [vmem:[%s4726_s0 + $0x100] sm:$0xff]  ;;  %v3773_v60 = vcombine.low %v42_v46, %v46_v47 }
  0x38   :  { %1885 = vmatpush2.bf16.msra.mxu1 %v3074_v61  ;;  %1805 = vmatprep.subr.bf16.mxu0 %v3075_v62  ;;  %v50_v61 = vld [vmem:[%s4726_s0 + $0x108] sm:$0xff]  ;;  %v3123_v62 = vld [vmem:[%s4725_s1 + $0x420] ss:$16 sps:$4 sm:$0xff]   ;;  %v3825_v13 = vcombine.low %v49_v58, %v49_v58  ;;  %v3149_v26 = vld [vmem:[%s4725_s1 + $0x5a4] ss:$16 sps:$4 sm:$0xff]  }
  0x39   :  { %1886 = vmatprep.subr.bf16.mxu1 %v3077_v63  ;;  %v3126_v63 = vld [vmem:[%s4725_s1 + $0x620] ss:$16 sps:$4 sm:$0xff]   ;;  %v3827_v14 = vcombine.low %v50_v61, %v50_v61  ;;  %v3152_v27 = vld [vmem:[%s4725_s1 + $0x7a4] ss:$16 sps:$4 sm:$0xff]  }
  0x3a   :  { %v3170_v42 = vld [vmem:[%s4725_s1 + $0x544] ss:$16 sps:$4 sm:$0xff]   ;;  %v3168_v46 = vld [vmem:[%s4725_s1 + $0x540] ss:$16 sps:$4 sm:$0xff]  }
  0x3b   :  { %1806 = vmatpush2.bf16.msra.mxu0 %v3079_v0  ;;  %v3131_v0 = vld [vmem:[%s4725_s1 + $0x404] ss:$16 sps:$4 sm:$0xff]   ;;  %v3171_v47 = vld [vmem:[%s4725_s1 + $0x740] ss:$16 sps:$4 sm:$0xff]  }
  0x3c   :  { %1887 = vmatpush2.bf16.msra.mxu1 %v3080_v1  ;;  %1807 = vmatprep.subr.bf16.mxu0 %v3081_v2  ;;  %v3134_v1 = vld [vmem:[%s4725_s1 + $0x604] ss:$16 sps:$4 sm:$0xff]   ;;  %v3790_v2 = vcombine.high %v49_v58, %v49_v58  ;;  %v3181_v58 = vld [vmem:[%s4725_s1 + $0x500] ss:$16 sps:$4 sm:$0xff]  }
  0x3d   :  { %1888 = vmatprep.subr.bf16.mxu1 %v3083_v3  ;;  %v3792_v3 = vcombine.high %v50_v61, %v50_v61  ;;  %v3173_v43 = vld [vmem:[%s4725_s1 + $0x744] ss:$16 sps:$4 sm:$0xff]   ;;  %v3184_v61 = vld [vmem:[%s4725_s1 + $0x700] ss:$16 sps:$4 sm:$0xff]  }
  0x3f   :  { %1808 = vmatpush2.bf16.msra.mxu0 %v3085_v4  ;;  %v3129_v4 = vld [vmem:[%s4725_s1 + $0x400] ss:$16 sps:$4 sm:$0xff]  }
  0x40   :  { %1889 = vmatpush2.bf16.msra.mxu1 %v3086_v5  ;;  %1939 = vmatprep.subr.bf16.mxu0 %v3089_v6  ;;  %v3132_v5 = vld [vmem:[%s4725_s1 + $0x600] ss:$16 sps:$4 sm:$0xff]   ;;  %v3137_v6 = vld [vmem:[%s4725_s1 + $0x5e4] ss:$16 sps:$4 sm:$0xff]  }
  0x41   :  { %2020 = vmatprep.subr.bf16.mxu1 %v3092_v7  ;;  %v3140_v7 = vld [vmem:[%s4725_s1 + $0x7e4] ss:$16 sps:$4 sm:$0xff]  }
  0x42   :  { %1810 = vmatmul.mubr.bf16.vlgmr.msra.gmra.mxu0 %v3633_v11 }
  0x43   :  { %1891 = vmatmul.mubr.bf16.vlgmr.msra.gmra.mxu1 %v3635_v12  ;;  %1940 = vmatpush1.bf16.msra.mxu0 %v3087_v8  ;;  %v3811_v8 = vld [vmem:[%s4726_s0 + $0x10] sm:$0xff] }
  0x44   :  { %2021 = vmatpush1.bf16.msra.mxu1 %v3090_v9  ;;  %1941 = vmatprep.subr.bf16.mxu0 %v3095_v16  ;;  %v3816_v9 = vld [vmem:[%s4726_s0 + $0x30] sm:$0xff] }
  0x45   :  { %2022 = vmatprep.subr.bf16.mxu1 %v3098_v17  ;;  %1819 = vmatprep.mubr.bf16.mxu0 %v3652_v18  ;;  %v3135_v16 = vld [vmem:[%s4725_s1 + $0x5e0] ss:$16 sps:$4 sm:$0xff]  }
  0x46   :  { %1900 = vmatprep.mubr.bf16.mxu1 %v3654_v19  ;;  %v3138_v17 = vld [vmem:[%s4725_s1 + $0x7e0] ss:$16 sps:$4 sm:$0xff]  }
  0x47   :  { %1942 = vmatpush1.bf16.msra.mxu0 %v3093_v20  ;;  %v3143_v20 = vld [vmem:[%s4725_s1 + $0x5c4] ss:$16 sps:$4 sm:$0xff]  }
  0x48   :  { %2023 = vmatpush1.bf16.msra.mxu1 %v3096_v21  ;;  %1943 = vmatprep.subr.bf16.mxu0 %v3101_v22  ;;  %v3146_v21 = vld [vmem:[%s4725_s1 + $0x7c4] ss:$16 sps:$4 sm:$0xff]   ;;  %v3848_v22 = vcombine.high %v3811_v8, %v3816_v9 }
  0x49   :  { %2024 = vmatprep.subr.bf16.mxu1 %v3104_v23  ;;  %v3852_v23 = vcombine.high %v3823_v10, %v3832_v15 }
  0x4a   :  { %1820 = vmatmul.mubr.bf16.gmra.mxu0 %v3684_v28 }
  0x4b   :  { %1901 = vmatmul.mubr.bf16.gmra.mxu1 %v3686_v29  ;;  %1944 = vmatpush1.bf16.msra.mxu0 %v3099_v24  ;;  %v3141_v24 = vld [vmem:[%s4725_s1 + $0x5c0] ss:$16 sps:$4 sm:$0xff]  }
  0x4c   :  { %2025 = vmatpush1.bf16.msra.mxu1 %v3102_v25  ;;  %1945 = vmatprep.subr.bf16.mxu0 %v3107_v32  ;;  %v3144_v25 = vld [vmem:[%s4725_s1 + $0x7c0] ss:$16 sps:$4 sm:$0xff]   ;;  %v3155_v32 = vld [vmem:[%s4725_s1 + $0x584] ss:$16 sps:$4 sm:$0xff]  }
  0x4d   :  { %2026 = vmatprep.subr.bf16.mxu1 %v3110_v33  ;;  %1829 = vmatprep.mubr.bf16.mxu0 %v3700_v34  ;;  %v3158_v33 = vld [vmem:[%s4725_s1 + $0x784] ss:$16 sps:$4 sm:$0xff]  }
  0x4e   :  { %1910 = vmatprep.mubr.bf16.mxu1 %v3702_v35 }
  0x4f   :  { %1946 = vmatpush1.bf16.msra.mxu0 %v3105_v36  ;;  %v3153_v36 = vld [vmem:[%s4725_s1 + $0x580] ss:$16 sps:$4 sm:$0xff]  }
  0x50   :  { %2027 = vmatpush1.bf16.msra.mxu1 %v3108_v37  ;;  %1947 = vmatprep.subr.bf16.mxu0 %v3113_v38  ;;  %v3156_v37 = vld [vmem:[%s4725_s1 + $0x780] ss:$16 sps:$4 sm:$0xff]   ;;  %v3161_v38 = vld [vmem:[%s4725_s1 + $0x564] ss:$16 sps:$4 sm:$0xff]  }
  0x51   :  { %2028 = vmatprep.subr.bf16.mxu1 %v3116_v39  ;;  %v3164_v39 = vld [vmem:[%s4725_s1 + $0x764] ss:$16 sps:$4 sm:$0xff]  }
  0x52   :  { %1830 = vmatmul.mubr.bf16.gmra.mxu0 %v3732_v44 }
  0x53   :  { %1911 = vmatmul.mubr.bf16.gmra.mxu1 %v3734_v45  ;;  %1948 = vmatpush1.bf16.msra.mxu0 %v3111_v40  ;;  %v3159_v40 = vld [vmem:[%s4725_s1 + $0x560] ss:$16 sps:$4 sm:$0xff]  }
  0x54   :  { %2029 = vmatpush1.bf16.msra.mxu1 %v3114_v41  ;;  %1949 = vmatprep.subr.bf16.mxu0 %v3119_v48  ;;  %v3162_v41 = vld [vmem:[%s4725_s1 + $0x760] ss:$16 sps:$4 sm:$0xff]   ;;  %v3177_v48 = vld [vmem:[%s4725_s1 + $0x524] ss:$16 sps:$4 sm:$0xff]  }
  0x55   :  { %2030 = vmatprep.subr.bf16.mxu1 %v3122_v49  ;;  %1839 = vmatprep.mubr.bf16.mxu0 %v3748_v50  ;;  %v3180_v49 = vld [vmem:[%s4725_s1 + $0x724] ss:$16 sps:$4 sm:$0xff]  }
  0x56   :  { %1920 = vmatprep.mubr.bf16.mxu1 %v3750_v51 }
  0x57   :  { %1950 = vmatpush1.bf16.msra.mxu0 %v3117_v52  ;;  %v3175_v52 = vld [vmem:[%s4725_s1 + $0x520] ss:$16 sps:$4 sm:$0xff]  }
  0x58   :  { %2031 = vmatpush1.bf16.msra.mxu1 %v3120_v54  ;;  %1951 = vmatprep.subr.bf16.mxu0 %v3125_v56  ;;  %v3178_v54 = vld [vmem:[%s4725_s1 + $0x720] ss:$16 sps:$4 sm:$0xff]   ;;  %v3183_v56 = vld [vmem:[%s4725_s1 + $0x504] ss:$16 sps:$4 sm:$0xff]  }
  0x59   :  { %2032 = vmatprep.subr.bf16.mxu1 %v3128_v57  ;;  %v3186_v57 = vld [vmem:[%s4725_s1 + $0x704] ss:$16 sps:$4 sm:$0xff]  }
  0x5a   :  { %1840 = vmatmul.mubr.bf16.gmra.mxu0 %v3771_v59 }
  0x5b   :  { %1921 = vmatmul.mubr.bf16.gmra.mxu1 %v3773_v60  ;;  %1952 = vmatpush1.bf16.msra.mxu0 %v3123_v62  ;;  %v3189_v62 = vld [vmem:[%s4725_s1 + $0xec] ss:$16 sps:$4 sm:$0xff]  }
  0x5c   :  { %2033 = vmatpush1.bf16.msra.mxu1 %v3126_v63  ;;  %1953 = vmatprep.subr.bf16.mxu0 %v3131_v0  ;;  %v3192_v63 = vld [vmem:[%s4725_s1 + $0x2ec] ss:$16 sps:$4 sm:$0xff]   ;;  %v3187_v0 = vld [vmem:[%s4725_s1 + $0xe8] ss:$16 sps:$4 sm:$0xff]  }
  0x5d   :  { %2034 = vmatprep.subr.bf16.mxu1 %v3134_v1  ;;  %1849 = vmatprep.mubr.bf16.mxu0 %v3790_v2  ;;  %v3190_v1 = vld [vmem:[%s4725_s1 + $0x2e8] ss:$16 sps:$4 sm:$0xff]  }
  0x5e   :  { %1930 = vmatprep.mubr.bf16.mxu1 %v3792_v3 }
  0x5f   :  { %1954 = vmatpush1.bf16.msra.mxu0 %v3129_v4  ;;  %v27_v4 = vld [vmem:[%s4726_s0 + $0x50] sm:$0xff] }
  0x60   :  { %2035 = vmatpush1.bf16.msra.mxu1 %v3132_v5  ;;  %1955 = vmatprep.subr.bf16.mxu0 %v3137_v6  ;;  %v31_v5 = vld [vmem:[%s4726_s0 + $0x70] sm:$0xff]  ;;  %v3956_v6 = vcombine.low %v3811_v8, %v3816_v9  ;;  %v3198_v8 = vld [vmem:[%s4725_s1 + $0x2cc] ss:$16 sps:$4 sm:$0xff]  }
  0x61   :  { %2036 = vmatprep.subr.bf16.mxu1 %v3140_v7  ;;  %v3960_v7 = vcombine.low %v3823_v10, %v3832_v15  ;;  %v3974_v9 = vcombine.high %v27_v4, %v31_v5  ;;  %v3193_v15 = vld [vmem:[%s4725_s1 + $0xc8] ss:$16 sps:$4 sm:$0xff]  }
  0x62   :  { %1850 = vmatmul.mubr.bf16.gmra.mxu0 %v3825_v13 }
  0x63   :  { %1931 = vmatmul.mubr.bf16.gmra.mxu1 %v3827_v14  ;;  %1956 = vmatpush2.bf16.msra.mxu0 %v3135_v16  ;;  %v28_v16 = vld [vmem:[%s4726_s0 + $0x58] sm:$0xff] }
  0x64   :  { %2037 = vmatpush2.bf16.msra.mxu1 %v3138_v17  ;;  %1957 = vmatprep.subr.bf16.mxu0 %v3143_v20  ;;  %v32_v17 = vld [vmem:[%s4726_s0 + $0x78] sm:$0xff] }
  0x65   :  { %2038 = vmatprep.subr.bf16.mxu1 %v3146_v21  ;;  %1971 = vmatprep.mubr.bf16.mxu0 %v3848_v22  ;;  %v3195_v20 = vld [vmem:[%s4725_s1 + $0xcc] ss:$16 sps:$4 sm:$0xff]   ;;  %v3976_v10 = vcombine.high %v28_v16, %v32_v17  ;;  %v3196_v21 = vld [vmem:[%s4725_s1 + $0x2c8] ss:$16 sps:$4 sm:$0xff]  }
  0x66   :  { %2052 = vmatprep.mubr.bf16.mxu1 %v3852_v23 }
  0x67   :  { %1958 = vmatpush2.bf16.msra.mxu0 %v3141_v24  ;;  %v3201_v24 = vld [vmem:[%s4725_s1 + $0xac] ss:$16 sps:$4 sm:$0xff]  }
  0x68   :  { %2039 = vmatpush2.bf16.msra.mxu1 %v3144_v25  ;;  %1959 = vmatprep.subr.bf16.mxu0 %v3149_v26  ;;  %v3204_v25 = vld [vmem:[%s4725_s1 + $0x2ac] ss:$16 sps:$4 sm:$0xff]   ;;  %v3199_v26 = vld [vmem:[%s4725_s1 + $0xa8] ss:$16 sps:$4 sm:$0xff]  }
  0x69   :  { %2040 = vmatprep.subr.bf16.mxu1 %v3152_v27  ;;  %v3202_v27 = vld [vmem:[%s4725_s1 + $0x2a8] ss:$16 sps:$4 sm:$0xff]  }
  0x6b   :  { %1960 = vmatpush2.bf16.msra.mxu0 %v3147_v30  ;;  %v35_v30 = vld [vmem:[%s4726_s0 + $0x90] sm:$0xff] }
  0x6c   :  { %2041 = vmatpush2.bf16.msra.mxu1 %v3150_v31  ;;  %1961 = vmatprep.subr.bf16.mxu0 %v3155_v32  ;;  %v39_v31 = vld [vmem:[%s4726_s0 + $0xb0] sm:$0xff]  ;;  %v4006_v32 = vcombine.low %v27_v4, %v31_v5  ;;  %v3217_v4 = vld [vmem:[%s4725_s1 + $0x48] ss:$16 sps:$4 sm:$0xff]  }
  0x6d   :  { %2042 = vmatprep.subr.bf16.mxu1 %v3158_v33  ;;  %v4008_v33 = vcombine.low %v28_v16, %v32_v17  ;;  %v3220_v5 = vld [vmem:[%s4725_s1 + $0x248] ss:$16 sps:$4 sm:$0xff]   ;;  %v3225_v16 = vld [vmem:[%s4725_s1 + $0x2c] ss:$16 sps:$4 sm:$0xff]  }
  0x6e   :  { %v3228_v17 = vld [vmem:[%s4725_s1 + $0x22c] ss:$16 sps:$4 sm:$0xff]  }
  0x6f   :  { %1962 = vmatpush2.bf16.msra.mxu0 %v3153_v36  ;;  %v36_v36 = vld [vmem:[%s4726_s0 + $0x98] sm:$0xff] }
  0x70   :  { %2043 = vmatpush2.bf16.msra.mxu1 %v3156_v37  ;;  %1963 = vmatprep.subr.bf16.mxu0 %v3161_v38  ;;  %v40_v37 = vld [vmem:[%s4726_s0 + $0xb8] sm:$0xff] }
  0x71   :  { %2044 = vmatprep.subr.bf16.mxu1 %v3164_v39  ;;  %v3207_v38 = vld [vmem:[%s4725_s1 + $0x8c] ss:$16 sps:$4 sm:$0xff]  }
  0x72   :  { %v3210_v39 = vld [vmem:[%s4725_s1 + $0x28c] ss:$16 sps:$4 sm:$0xff]  }
  0x73   :  { %1964 = vmatpush2.bf16.msra.mxu0 %v3159_v40  ;;  %v4022_v40 = vcombine.high %v35_v30, %v39_v31 }
  0x74   :  { %2045 = vmatpush2.bf16.msra.mxu1 %v3162_v41  ;;  %1965 = vmatprep.subr.bf16.mxu0 %v3170_v42  ;;  %v4024_v41 = vcombine.high %v36_v36, %v40_v37  ;;  %v3205_v42 = vld [vmem:[%s4725_s1 + $0x88] ss:$16 sps:$4 sm:$0xff]  }
  0x75   :  { %2046 = vmatprep.subr.bf16.mxu1 %v3173_v43  ;;  %v3208_v43 = vld [vmem:[%s4725_s1 + $0x288] ss:$16 sps:$4 sm:$0xff]  }
  0x77   :  { %1966 = vmatpush2.bf16.msra.mxu0 %v3168_v46  ;;  %v3213_v46 = vld [vmem:[%s4725_s1 + $0x6c] ss:$16 sps:$4 sm:$0xff]  }
  0x78   :  { %2047 = vmatpush2.bf16.msra.mxu1 %v3171_v47  ;;  %1967 = vmatprep.subr.bf16.mxu0 %v3177_v48  ;;  %v3216_v47 = vld [vmem:[%s4725_s1 + $0x26c] ss:$16 sps:$4 sm:$0xff]   ;;  %v3211_v48 = vld [vmem:[%s4725_s1 + $0x68] ss:$16 sps:$4 sm:$0xff]  }
  0x79   :  { %2048 = vmatprep.subr.bf16.mxu1 %v3180_v49  ;;  %v3214_v49 = vld [vmem:[%s4725_s1 + $0x268] ss:$16 sps:$4 sm:$0xff]  }
  0x7b   :  { %1968 = vmatpush2.bf16.msra.mxu0 %v3175_v52  ;;  %v43_v52 = vld [vmem:[%s4726_s0 + $0xd0] sm:$0xff] }
  0x7c   :  { %2049 = vmatpush2.bf16.msra.mxu1 %v3178_v54  ;;  %1969 = vmatprep.subr.bf16.mxu0 %v3183_v56  ;;  %v47_v54 = vld [vmem:[%s4726_s0 + $0xf0] sm:$0xff]  ;;  %v4054_v56 = vcombine.low %v35_v30, %v39_v31 }
  0x7d   :  { %2050 = vmatprep.subr.bf16.mxu1 %v3186_v57  ;;  %v4056_v57 = vcombine.low %v36_v36, %v40_v37  ;;  %v3229_v36 = vld [vmem:[%s4725_s1 + $0x8] ss:$16 sps:$4 sm:$0xff]  }
  0x7e   :  { %v3232_v37 = vld [vmem:[%s4725_s1 + $0x208] ss:$16 sps:$4 sm:$0xff]  }
  0x7f   :  { %1970 = vmatpush2.bf16.msra.mxu0 %v3181_v58  ;;  %v44_v58 = vld [vmem:[%s4726_s0 + $0xd8] sm:$0xff] }
  0x80   :  { %2051 = vmatpush2.bf16.msra.mxu1 %v3184_v61  ;;  %2101 = vmatprep.subr.bf16.mxu0 %v3189_v62  ;;  %v48_v61 = vld [vmem:[%s4726_s0 + $0xf8] sm:$0xff] }
  0x81   :  { %2182 = vmatprep.subr.bf16.mxu1 %v3192_v63  ;;  %v3219_v62 = vld [vmem:[%s4725_s1 + $0x4c] ss:$16 sps:$4 sm:$0xff]  }
  0x82   :  { %1972 = vmatmul.mubr.bf16.vlgmr.msra.gmra.mxu0 %v3956_v6  ;;  %v3222_v63 = vld [vmem:[%s4725_s1 + $0x24c] ss:$16 sps:$4 sm:$0xff]  }
  0x83   :  { %2053 = vmatmul.mubr.bf16.vlgmr.msra.gmra.mxu1 %v3960_v7  ;;  %2102 = vmatpush1.bf16.msra.mxu0 %v3187_v0  ;;  %v4070_v0 = vcombine.high %v43_v52, %v47_v54 }
  0x84   :  { %2183 = vmatpush1.bf16.msra.mxu1 %v3190_v1  ;;  %2103 = vmatprep.subr.bf16.mxu0 %v3195_v20  ;;  %v4072_v1 = vcombine.high %v44_v58, %v48_v61  ;;  %v3223_v20 = vld [vmem:[%s4725_s1 + $0x28] ss:$16 sps:$4 sm:$0xff]  }
  0x85   :  { %2184 = vmatprep.subr.bf16.mxu1 %v3198_v8  ;;  %1981 = vmatprep.mubr.bf16.mxu0 %v3974_v9  ;;  %v3226_v8 = vld [vmem:[%s4725_s1 + $0x228] ss:$16 sps:$4 sm:$0xff]  }
  0x86   :  { %2062 = vmatprep.mubr.bf16.mxu1 %v3976_v10 }
  0x87   :  { %2104 = vmatpush1.bf16.msra.mxu0 %v3193_v15  ;;  %v4096_v15 = vcombine.low %v43_v52, %v47_v54  ;;  %v3245_v52 = vld [vmem:[%s4725_s1 + $0x1c8] ss:$16 sps:$4 sm:$0xff]  }
  0x88   :  { %2185 = vmatpush1.bf16.msra.mxu1 %v3196_v21  ;;  %2105 = vmatprep.subr.bf16.mxu0 %v3201_v24  ;;  %v4098_v21 = vcombine.low %v44_v58, %v48_v61  ;;  %v51_v24 = vld [vmem:[%s4726_s0 + $0x110] sm:$0xff]  ;;  %v3248_v54 = vld [vmem:[%s4725_s1 + $0x3c8] ss:$16 sps:$4 sm:$0xff]   ;;  %v3253_v58 = vld [vmem:[%s4725_s1 + $0x1ac] ss:$16 sps:$4 sm:$0xff]  }
  0x89   :  { %2186 = vmatprep.subr.bf16.mxu1 %v3204_v25  ;;  %v52_v25 = vld [vmem:[%s4726_s0 + $0x118] sm:$0xff]  ;;  %v4112_v30 = vcombine.high %v51_v24, %v51_v24 }
  0x8a   :  { %1982 = vmatmul.mubr.bf16.gmra.mxu0 %v4006_v32  ;;  %v4114_v31 = vcombine.high %v52_v25, %v52_v25  ;;  %v3256_v61 = vld [vmem:[%s4725_s1 + $0x3ac] ss:$16 sps:$4 sm:$0xff]  }
  0x8b   :  { %2063 = vmatmul.mubr.bf16.gmra.mxu1 %v4008_v33  ;;  %2106 = vmatpush1.bf16.msra.mxu0 %v3199_v26  ;;  %v3231_v26 = vld [vmem:[%s4725_s1 + $0xc] ss:$16 sps:$4 sm:$0xff]  }
  0x8c   :  { %2187 = vmatpush1.bf16.msra.mxu1 %v3202_v27  ;;  %2107 = vmatprep.subr.bf16.mxu0 %v3207_v38  ;;  %v3234_v27 = vld [vmem:[%s4725_s1 + $0x20c] ss:$16 sps:$4 sm:$0xff]  }
  0x8d   :  { %2188 = vmatprep.subr.bf16.mxu1 %v3210_v39  ;;  %1991 = vmatprep.mubr.bf16.mxu0 %v4022_v40  ;;  %v3239_v38 = vld [vmem:[%s4725_s1 + $0x1ec] ss:$16 sps:$4 sm:$0xff]  }
  0x8e   :  { %2072 = vmatprep.mubr.bf16.mxu1 %v4024_v41  ;;  %v3242_v39 = vld [vmem:[%s4725_s1 + $0x3ec] ss:$16 sps:$4 sm:$0xff]  }
  0x8f   :  { %2108 = vmatpush1.bf16.msra.mxu0 %v3205_v42  ;;  %v4132_v42 = vcombine.low %v51_v24, %v51_v24  ;;  %v3271_v24 = vld [vmem:[%s4725_s1 + $0x14c] ss:$16 sps:$4 sm:$0xff]  }
  0x90   :  { %2189 = vmatpush1.bf16.msra.mxu1 %v3208_v43  ;;  %2109 = vmatprep.subr.bf16.mxu0 %v3213_v46  ;;  %v3237_v43 = vld [vmem:[%s4725_s1 + $0x1e8] ss:$16 sps:$4 sm:$0xff]  }
  0x91   :  { %2190 = vmatprep.subr.bf16.mxu1 %v3216_v47  ;;  %v3240_v46 = vld [vmem:[%s4725_s1 + $0x3e8] ss:$16 sps:$4 sm:$0xff]   ;;  %v4140_v47 = vcombine.low %v52_v25, %v52_v25  ;;  %v3274_v25 = vld [vmem:[%s4725_s1 + $0x34c] ss:$16 sps:$4 sm:$0xff]  }
  0x92   :  { %1992 = vmatmul.mubr.bf16.gmra.mxu0 %v4054_v56 }
  0x93   :  { %2073 = vmatmul.mubr.bf16.gmra.mxu1 %v4056_v57  ;;  %2110 = vmatpush1.bf16.msra.mxu0 %v3211_v48  ;;  %v3247_v48 = vld [vmem:[%s4725_s1 + $0x1cc] ss:$16 sps:$4 sm:$0xff]  }
  0x94   :  { %2191 = vmatpush1.bf16.msra.mxu1 %v3214_v49  ;;  %2111 = vmatprep.subr.bf16.mxu0 %v3219_v62  ;;  %v3250_v49 = vld [vmem:[%s4725_s1 + $0x3cc] ss:$16 sps:$4 sm:$0xff]   ;;  %v3251_v62 = vld [vmem:[%s4725_s1 + $0x1a8] ss:$16 sps:$4 sm:$0xff]  }
  0x95   :  { %2192 = vmatprep.subr.bf16.mxu1 %v3222_v63  ;;  %2001 = vmatprep.mubr.bf16.mxu0 %v4070_v0  ;;  %v3254_v63 = vld [vmem:[%s4725_s1 + $0x3a8] ss:$16 sps:$4 sm:$0xff]  }
  0x96   :  { %2082 = vmatprep.mubr.bf16.mxu1 %v4072_v1 }
  0x97   :  { %2112 = vmatpush1.bf16.msra.mxu0 %v3217_v4  ;;  %v3259_v4 = vld [vmem:[%s4725_s1 + $0x18c] ss:$16 sps:$4 sm:$0xff]  }
  0x98   :  { %2193 = vmatpush1.bf16.msra.mxu1 %v3220_v5  ;;  %2113 = vmatprep.subr.bf16.mxu0 %v3225_v16  ;;  %v3260_v5 = vld [vmem:[%s4725_s1 + $0x388] ss:$16 sps:$4 sm:$0xff]   ;;  %v3265_v16 = vld [vmem:[%s4725_s1 + $0x16c] ss:$16 sps:$4 sm:$0xff]  }
  0x99   :  { %2194 = vmatprep.subr.bf16.mxu1 %v3228_v17  ;;  %v3268_v17 = vld [vmem:[%s4725_s1 + $0x36c] ss:$16 sps:$4 sm:$0xff]  }
  0x9a   :  { %2002 = vmatmul.mubr.bf16.gmra.mxu0 %v4096_v15 }
  0x9b   :  { %2083 = vmatmul.mubr.bf16.gmra.mxu1 %v4098_v21  ;;  %2114 = vmatpush1.bf16.msra.mxu0 %v3223_v20  ;;  %v3263_v20 = vld [vmem:[%s4725_s1 + $0x168] ss:$16 sps:$4 sm:$0xff]  }
  0x9c   :  { %2195 = vmatpush1.bf16.msra.mxu1 %v3226_v8  ;;  %2115 = vmatprep.subr.bf16.mxu0 %v3231_v26  ;;  %v3266_v8 = vld [vmem:[%s4725_s1 + $0x368] ss:$16 sps:$4 sm:$0xff]  }
  0x9d   :  { %2196 = vmatprep.subr.bf16.mxu1 %v3234_v27  ;;  %2011 = vmatprep.mubr.bf16.mxu0 %v4112_v30  ;;  %v3269_v26 = vld [vmem:[%s4725_s1 + $0x148] ss:$16 sps:$4 sm:$0xff]  }
  0x9e   :  { %2092 = vmatprep.mubr.bf16.mxu1 %v4114_v31  ;;  %v3272_v27 = vld [vmem:[%s4725_s1 + $0x348] ss:$16 sps:$4 sm:$0xff]  }
  0x9f   :  { %2116 = vmatpush1.bf16.msra.mxu0 %v3229_v36  ;;  %v3277_v36 = vld [vmem:[%s4725_s1 + $0x12c] ss:$16 sps:$4 sm:$0xff]  }
  0xa0   :  { %2197 = vmatpush1.bf16.msra.mxu1 %v3232_v37  ;;  %2117 = vmatprep.subr.bf16.mxu0 %v3239_v38  ;;  %v3280_v37 = vld [vmem:[%s4725_s1 + $0x32c] ss:$16 sps:$4 sm:$0xff]   ;;  %v3275_v38 = vld [vmem:[%s4725_s1 + $0x128] ss:$16 sps:$4 sm:$0xff]  }
  0xa1   :  { %2198 = vmatprep.subr.bf16.mxu1 %v3242_v39  ;;  %v3278_v39 = vld [vmem:[%s4725_s1 + $0x328] ss:$16 sps:$4 sm:$0xff]  }
  0xa2   :  { %2012 = vmatmul.mubr.bf16.gmra.mxu0 %v4132_v42 }
  0xa3   :  { %2093 = vmatmul.mubr.bf16.gmra.mxu1 %v4140_v47  ;;  %2118 = vmatpush2.bf16.msra.mxu0 %v3237_v43  ;;  %v3283_v43 = vld [vmem:[%s4725_s1 + $0x10c] ss:$16 sps:$4 sm:$0xff]  }
  0xa4   :  { %2199 = vmatpush2.bf16.msra.mxu1 %v3240_v46  ;;  %2119 = vmatprep.subr.bf16.mxu0 %v3247_v48  ;;  %v3286_v46 = vld [vmem:[%s4725_s1 + $0x30c] ss:$16 sps:$4 sm:$0xff]   ;;  %v3281_v48 = vld [vmem:[%s4725_s1 + $0x108] ss:$16 sps:$4 sm:$0xff]  }
  0xa5   :  { %2200 = vmatprep.subr.bf16.mxu1 %v3250_v49  ;;  %2133 = vmatprep.mubr.bf16.mxu0 %v3567_v53  ;;  %v3262_v53 = vld [vmem:[%s4725_s1 + $0x38c] ss:$16 sps:$4 sm:$0xff]   ;;  %v3284_v49 = vld [vmem:[%s4725_s1 + $0x308] ss:$16 sps:$4 sm:$0xff]  }
  0xa6   :  { %2214 = vmatprep.mubr.bf16.mxu1 %v3572_v55  ;;  %v3257_v55 = vld [vmem:[%s4725_s1 + $0x188] ss:$16 sps:$4 sm:$0xff]  }
  0xa7   :  { %2120 = vmatpush2.bf16.msra.mxu0 %v3245_v52  ;;  %v3289_v52 = vld [vmem:[%s4725_s1 + $0x4ec] ss:$16 sps:$4 sm:$0xff]  }
  0xa8   :  { %2201 = vmatpush2.bf16.msra.mxu1 %v3248_v54  ;;  %2121 = vmatprep.subr.bf16.mxu0 %v3253_v58  ;;  %v3292_v54 = vld [vmem:[%s4725_s1 + $0x6ec] ss:$16 sps:$4 sm:$0xff]   ;;  %v3287_v58 = vld [vmem:[%s4725_s1 + $0x4e8] ss:$16 sps:$4 sm:$0xff]  }
  0xa9   :  { %2202 = vmatprep.subr.bf16.mxu1 %v3256_v61  ;;  %v3290_v61 = vld [vmem:[%s4725_s1 + $0x6e8] ss:$16 sps:$4 sm:$0xff]  }
  0xab   :  { %2122 = vmatpush2.bf16.msra.mxu0 %v3251_v62  ;;  %v3295_v62 = vld [vmem:[%s4725_s1 + $0x4cc] ss:$16 sps:$4 sm:$0xff]  }
  0xac   :  { %2203 = vmatpush2.bf16.msra.mxu1 %v3254_v63  ;;  %2123 = vmatprep.subr.bf16.mxu0 %v3259_v4  ;;  %v3298_v63 = vld [vmem:[%s4725_s1 + $0x6cc] ss:$16 sps:$4 sm:$0xff]   ;;  %v3293_v4 = vld [vmem:[%s4725_s1 + $0x4c8] ss:$16 sps:$4 sm:$0xff]  }
  0xad   :  { %2204 = vmatprep.subr.bf16.mxu1 %v3262_v53  ;;  %v3296_v53 = vld [vmem:[%s4725_s1 + $0x6c8] ss:$16 sps:$4 sm:$0xff]  }
  0xaf   :  { %2124 = vmatpush2.bf16.msra.mxu0 %v3257_v55  ;;  %v3301_v55 = vld [vmem:[%s4725_s1 + $0x4ac] ss:$16 sps:$4 sm:$0xff]  }
  0xb0   :  { %2205 = vmatpush2.bf16.msra.mxu1 %v3260_v5  ;;  %2125 = vmatprep.subr.bf16.mxu0 %v3265_v16  ;;  %v3302_v5 = vld [vmem:[%s4725_s1 + $0x6a8] ss:$16 sps:$4 sm:$0xff]   ;;  %v3307_v16 = vld [vmem:[%s4725_s1 + $0x48c] ss:$16 sps:$4 sm:$0xff]  }
  0xb1   :  { %2206 = vmatprep.subr.bf16.mxu1 %v3268_v17  ;;  %v3308_v17 = vld [vmem:[%s4725_s1 + $0x688] ss:$16 sps:$4 sm:$0xff]  }
  0xb3   :  { %2126 = vmatpush2.bf16.msra.mxu0 %v3263_v20  ;;  %v3313_v20 = vld [vmem:[%s4725_s1 + $0x46c] ss:$16 sps:$4 sm:$0xff]  }
  0xb4   :  { %2207 = vmatpush2.bf16.msra.mxu1 %v3266_v8  ;;  %2127 = vmatprep.subr.bf16.mxu0 %v3271_v24  ;;  %v3314_v8 = vld [vmem:[%s4725_s1 + $0x668] ss:$16 sps:$4 sm:$0xff]   ;;  %v3319_v24 = vld [vmem:[%s4725_s1 + $0x44c] ss:$16 sps:$4 sm:$0xff]  }
  0xb5   :  { %2208 = vmatprep.subr.bf16.mxu1 %v3274_v25  ;;  %v3320_v25 = vld [vmem:[%s4725_s1 + $0x648] ss:$16 sps:$4 sm:$0xff]  }
  0xb7   :  { %2128 = vmatpush2.bf16.msra.mxu0 %v3269_v26  ;;  %v3325_v26 = vld [vmem:[%s4725_s1 + $0x42c] ss:$16 sps:$4 sm:$0xff]  }
  0xb8   :  { %2209 = vmatpush2.bf16.msra.mxu1 %v3272_v27  ;;  %2129 = vmatprep.subr.bf16.mxu0 %v3277_v36  ;;  %v3326_v27 = vld [vmem:[%s4725_s1 + $0x628] ss:$16 sps:$4 sm:$0xff]   ;;  %v3331_v36 = vld [vmem:[%s4725_s1 + $0x40c] ss:$16 sps:$4 sm:$0xff]  }
  0xb9   :  { %2210 = vmatprep.subr.bf16.mxu1 %v3280_v37  ;;  %v3332_v37 = vld [vmem:[%s4725_s1 + $0x608] ss:$16 sps:$4 sm:$0xff]  }
  0xbb   :  { %2130 = vmatpush2.bf16.msra.mxu0 %v3275_v38  ;;  %v3337_v38 = vld [vmem:[%s4725_s1 + $0x5ec] ss:$16 sps:$4 sm:$0xff]  }
  0xbc   :  { %2211 = vmatpush2.bf16.msra.mxu1 %v3278_v39  ;;  %2131 = vmatprep.subr.bf16.mxu0 %v3283_v43  ;;  %v3338_v39 = vld [vmem:[%s4725_s1 + $0x7e8] ss:$16 sps:$4 sm:$0xff]   ;;  %v3343_v43 = vld [vmem:[%s4725_s1 + $0x5cc] ss:$16 sps:$4 sm:$0xff]  }
  0xbd   :  { %2212 = vmatprep.subr.bf16.mxu1 %v3286_v46  ;;  %v3344_v46 = vld [vmem:[%s4725_s1 + $0x7c8] ss:$16 sps:$4 sm:$0xff]  }
  0xbf   :  { %2132 = vmatpush2.bf16.msra.mxu0 %v3281_v48  ;;  %v3349_v48 = vld [vmem:[%s4725_s1 + $0x5ac] ss:$16 sps:$4 sm:$0xff]  }
  0xc0   :  { %2213 = vmatpush2.bf16.msra.mxu1 %v3284_v49  ;;  %2263 = vmatprep.subr.bf16.mxu0 %v3289_v52  ;;  %v3350_v49 = vld [vmem:[%s4725_s1 + $0x7a8] ss:$16 sps:$4 sm:$0xff]   ;;  %v3355_v52 = vld [vmem:[%s4725_s1 + $0x58c] ss:$16 sps:$4 sm:$0xff]  }
  0xc1   :  { %2344 = vmatprep.subr.bf16.mxu1 %v3292_v54  ;;  %v3356_v54 = vld [vmem:[%s4725_s1 + $0x788] ss:$16 sps:$4 sm:$0xff]  }
  0xc2   :  { %2134 = vmatmul.mubr.bf16.vlgmr.msra.gmra.mxu0 %v3633_v11  ;;  %v3304_v11 = vld [vmem:[%s4725_s1 + $0x6ac] ss:$16 sps:$4 sm:$0xff]  }
  0xc3   :  { %2215 = vmatmul.mubr.bf16.vlgmr.msra.gmra.mxu1 %v3635_v12  ;;  %2264 = vmatpush1.bf16.msra.mxu0 %v3287_v58  ;;  %v3299_v12 = vld [vmem:[%s4725_s1 + $0x4a8] ss:$16 sps:$4 sm:$0xff]   ;;  %v3361_v58 = vld [vmem:[%s4725_s1 + $0x56c] ss:$16 sps:$4 sm:$0xff]  }
  0xc4   :  { %2345 = vmatpush1.bf16.msra.mxu1 %v3290_v61  ;;  %2265 = vmatprep.subr.bf16.mxu0 %v3295_v62  ;;  %v3364_v61 = vld [vmem:[%s4725_s1 + $0x76c] ss:$16 sps:$4 sm:$0xff]   ;;  %v3359_v62 = vld [vmem:[%s4725_s1 + $0x568] ss:$16 sps:$4 sm:$0xff]  }
  0xc5   :  { %2346 = vmatprep.subr.bf16.mxu1 %v3298_v63  ;;  %2143 = vmatprep.mubr.bf16.mxu0 %v3652_v18  ;;  %v3310_v18 = vld [vmem:[%s4725_s1 + $0x68c] ss:$16 sps:$4 sm:$0xff]   ;;  %v3362_v63 = vld [vmem:[%s4725_s1 + $0x768] ss:$16 sps:$4 sm:$0xff]  }
  0xc6   :  { %2224 = vmatprep.mubr.bf16.mxu1 %v3654_v19  ;;  %v3305_v19 = vld [vmem:[%s4725_s1 + $0x488] ss:$16 sps:$4 sm:$0xff]  }
  0xc7   :  { %2266 = vmatpush1.bf16.msra.mxu0 %v3293_v4  ;;  %v3367_v4 = vld [vmem:[%s4725_s1 + $0x54c] ss:$16 sps:$4 sm:$0xff]  }
  0xc8   :  { %2347 = vmatpush1.bf16.msra.mxu1 %v3296_v53  ;;  %2267 = vmatprep.subr.bf16.mxu0 %v3301_v55  ;;  %v3370_v53 = vld [vmem:[%s4725_s1 + $0x74c] ss:$16 sps:$4 sm:$0xff]   ;;  %v3365_v55 = vld [vmem:[%s4725_s1 + $0x548] ss:$16 sps:$4 sm:$0xff]  }
  0xc9   :  { %2348 = vmatprep.subr.bf16.mxu1 %v3304_v11  ;;  %v3368_v11 = vld [vmem:[%s4725_s1 + $0x748] ss:$16 sps:$4 sm:$0xff]  }
  0xca   :  { %2144 = vmatmul.mubr.bf16.gmra.mxu0 %v3684_v28  ;;  %v3316_v28 = vld [vmem:[%s4725_s1 + $0x66c] ss:$16 sps:$4 sm:$0xff]  }
  0xcb   :  { %2225 = vmatmul.mubr.bf16.gmra.mxu1 %v3686_v29  ;;  %2268 = vmatpush1.bf16.msra.mxu0 %v3299_v12  ;;  %v3311_v29 = vld [vmem:[%s4725_s1 + $0x468] ss:$16 sps:$4 sm:$0xff]   ;;  %v3373_v12 = vld [vmem:[%s4725_s1 + $0x52c] ss:$16 sps:$4 sm:$0xff]  }
  0xcc   :  { %2349 = vmatpush1.bf16.msra.mxu1 %v3302_v5  ;;  %2269 = vmatprep.subr.bf16.mxu0 %v3307_v16  ;;  %v3376_v5 = vld [vmem:[%s4725_s1 + $0x72c] ss:$16 sps:$4 sm:$0xff]   ;;  %v3371_v16 = vld [vmem:[%s4725_s1 + $0x528] ss:$16 sps:$4 sm:$0xff]  }
  0xcd   :  { %2350 = vmatprep.subr.bf16.mxu1 %v3310_v18  ;;  %2153 = vmatprep.mubr.bf16.mxu0 %v3700_v34  ;;  %v3322_v34 = vld [vmem:[%s4725_s1 + $0x64c] ss:$16 sps:$4 sm:$0xff]   ;;  %v3374_v18 = vld [vmem:[%s4725_s1 + $0x728] ss:$16 sps:$4 sm:$0xff]  }
  0xce   :  { %2234 = vmatprep.mubr.bf16.mxu1 %v3702_v35  ;;  %v3317_v35 = vld [vmem:[%s4725_s1 + $0x448] ss:$16 sps:$4 sm:$0xff]  }
  0xcf   :  { %2270 = vmatpush1.bf16.msra.mxu0 %v3305_v19  ;;  %v3379_v19 = vld [vmem:[%s4725_s1 + $0x50c] ss:$16 sps:$4 sm:$0xff]  }
  0xd0   :  { %2351 = vmatpush1.bf16.msra.mxu1 %v3308_v17  ;;  %2271 = vmatprep.subr.bf16.mxu0 %v3313_v20  ;;  %v3382_v17 = vld [vmem:[%s4725_s1 + $0x70c] ss:$16 sps:$4 sm:$0xff]   ;;  %v3377_v20 = vld [vmem:[%s4725_s1 + $0x508] ss:$16 sps:$4 sm:$0xff]  }
  0xd1   :  { %2352 = vmatprep.subr.bf16.mxu1 %v3316_v28  ;;  %v3380_v28 = vld [vmem:[%s4725_s1 + $0x708] ss:$16 sps:$4 sm:$0xff]  }
  0xd2   :  { %2154 = vmatmul.mubr.bf16.gmra.mxu0 %v3732_v44  ;;  %v3328_v44 = vld [vmem:[%s4725_s1 + $0x62c] ss:$16 sps:$4 sm:$0xff]  }
  0xd3   :  { %2235 = vmatmul.mubr.bf16.gmra.mxu1 %v3734_v45  ;;  %2272 = vmatpush1.bf16.msra.mxu0 %v3311_v29  ;;  %v3323_v45 = vld [vmem:[%s4725_s1 + $0x428] ss:$16 sps:$4 sm:$0xff]  }
  0xd4   :  { %2353 = vmatpush1.bf16.msra.mxu1 %v3314_v8  ;;  %2273 = vmatprep.subr.bf16.mxu0 %v3319_v24 }
  0xd5   :  { %2354 = vmatprep.subr.bf16.mxu1 %v3322_v34  ;;  %2163 = vmatprep.mubr.bf16.mxu0 %v3748_v50  ;;  %v3334_v50 = vld [vmem:[%s4725_s1 + $0x60c] ss:$16 sps:$4 sm:$0xff]  }
  0xd6   :  { %2244 = vmatprep.mubr.bf16.mxu1 %v3750_v51  ;;  %v3329_v51 = vld [vmem:[%s4725_s1 + $0x408] ss:$16 sps:$4 sm:$0xff]  }
  0xd7   :  { %2274 = vmatpush1.bf16.msra.mxu0 %v3317_v35 }
  0xd8   :  { %2355 = vmatpush1.bf16.msra.mxu1 %v3320_v25  ;;  %2275 = vmatprep.subr.bf16.mxu0 %v3325_v26 }
  0xd9   :  { %2356 = vmatprep.subr.bf16.mxu1 %v3328_v44 }
  0xda   :  { %2164 = vmatmul.mubr.bf16.gmra.mxu0 %v3771_v59  ;;  %v3340_v59 = vld [vmem:[%s4725_s1 + $0x7ec] ss:$16 sps:$4 sm:$0xff]  }
  0xdb   :  { %2245 = vmatmul.mubr.bf16.gmra.mxu1 %v3773_v60  ;;  %2276 = vmatpush1.bf16.msra.mxu0 %v3323_v45  ;;  %v3335_v60 = vld [vmem:[%s4725_s1 + $0x5e8] ss:$16 sps:$4 sm:$0xff]  }
  0xdc   :  { %2357 = vmatpush1.bf16.msra.mxu1 %v3326_v27  ;;  %2277 = vmatprep.subr.bf16.mxu0 %v3331_v36 }
  0xdd   :  { %2358 = vmatprep.subr.bf16.mxu1 %v3334_v50  ;;  %2173 = vmatprep.mubr.bf16.mxu0 %v3790_v2  ;;  %v3346_v2 = vld [vmem:[%s4725_s1 + $0x7cc] ss:$16 sps:$4 sm:$0xff]  }
  0xde   :  { %2254 = vmatprep.mubr.bf16.mxu1 %v3792_v3  ;;  %v3341_v3 = vld [vmem:[%s4725_s1 + $0x5c8] ss:$16 sps:$4 sm:$0xff]  }
  0xdf   :  { %2278 = vmatpush1.bf16.msra.mxu0 %v3329_v51 }
  0xe0   :  { %2359 = vmatpush1.bf16.msra.mxu1 %v3332_v37  ;;  %2279 = vmatprep.subr.bf16.mxu0 %v3337_v38 }
  0xe1   :  { %2360 = vmatprep.subr.bf16.mxu1 %v3340_v59 }
  0xe2   :  { %2174 = vmatmul.mubr.bf16.gmra.mxu0 %v3825_v13  ;;  %v3352_v13 = vld [vmem:[%s4725_s1 + $0x7ac] ss:$16 sps:$4 sm:$0xff]  }
  0xe3   :  { %2255 = vmatmul.mubr.bf16.gmra.mxu1 %v3827_v14  ;;  %2280 = vmatpush2.bf16.msra.mxu0 %v3335_v60  ;;  %v3347_v14 = vld [vmem:[%s4725_s1 + $0x5a8] ss:$16 sps:$4 sm:$0xff]  }
  0xe4   :  { %2361 = vmatpush2.bf16.msra.mxu1 %v3338_v39  ;;  %2281 = vmatprep.subr.bf16.mxu0 %v3343_v43 }
  0xe5   :  { %2362 = vmatprep.subr.bf16.mxu1 %v3346_v2  ;;  %2295 = vmatprep.mubr.bf16.mxu0 %v3848_v22  ;;  %v3358_v22 = vld [vmem:[%s4725_s1 + $0x78c] ss:$16 sps:$4 sm:$0xff]  }
  0xe6   :  { %2376 = vmatprep.mubr.bf16.mxu1 %v3852_v23  ;;  %v3353_v23 = vld [vmem:[%s4725_s1 + $0x588] ss:$16 sps:$4 sm:$0xff]  }
  0xe7   :  { %2282 = vmatpush2.bf16.msra.mxu0 %v3341_v3 }
  0xe8   :  { %2363 = vmatpush2.bf16.msra.mxu1 %v3344_v46  ;;  %2283 = vmatprep.subr.bf16.mxu0 %v3349_v48 }
  0xe9   :  { %2364 = vmatprep.subr.bf16.mxu1 %v3352_v13 }
  0xeb   :  { %2284 = vmatpush2.bf16.msra.mxu0 %v3347_v14 }
  0xec   :  { %2365 = vmatpush2.bf16.msra.mxu1 %v3350_v49  ;;  %2285 = vmatprep.subr.bf16.mxu0 %v3355_v52 }
  0xed   :  { %2366 = vmatprep.subr.bf16.mxu1 %v3358_v22 }
  0xef   :  { %2286 = vmatpush2.bf16.msra.mxu0 %v3353_v23 }
  0xf0   :  { %2367 = vmatpush2.bf16.msra.mxu1 %v3356_v54  ;;  %2287 = vmatprep.subr.bf16.mxu0 %v3361_v58 }
  0xf1   :  { %2368 = vmatprep.subr.bf16.mxu1 %v3364_v61 }
  0xf3   :  { %2288 = vmatpush2.bf16.msra.mxu0 %v3359_v62 }
  0xf4   :  { %2369 = vmatpush2.bf16.msra.mxu1 %v3362_v63  ;;  %2289 = vmatprep.subr.bf16.mxu0 %v3367_v4 }
  0xf5   :  { %2370 = vmatprep.subr.bf16.mxu1 %v3370_v53 }
  0xf7   :  { %2290 = vmatpush2.bf16.msra.mxu0 %v3365_v55 }
  0xf8   :  { %2371 = vmatpush2.bf16.msra.mxu1 %v3368_v11  ;;  %2291 = vmatprep.subr.bf16.mxu0 %v3373_v12 }
  0xf9   :  { %2372 = vmatprep.subr.bf16.mxu1 %v3376_v5 }
  0xfb   :  { %2292 = vmatpush2.bf16.msra.mxu0 %v3371_v16 }
  0xfc   :  { %2373 = vmatpush2.bf16.msra.mxu1 %v3374_v18  ;;  %2293 = vmatprep.subr.bf16.mxu0 %v3379_v19  ;;  %v2427_v19 = vlaneseq }
  0xfd   :  { %2374 = vmatprep.subr.bf16.mxu1 %v3382_v17 }
  0xfe   :  { %v4496_v17 = vshrl.u32 %v2427_v19, 7 }
  0xff   :  { %2294 = vmatpush2.bf16.msra.mxu0 %v3377_v20 }
 0x100   :  { %2375 = vmatpush2.bf16.msra.mxu1 %v3380_v28  ;;  %v2429_v20 = vsub.s32 0, %v4496_v17 }
 0x102   :  { %v1811_v29 = vpop.f32.mrf.mxu0  ;;  %2296 = vmatmul.mubr.bf16.vlgmr.msra.gmra.mxu0 %v3956_v6 }
 0x103   :  { %v1892_v8 = vpop.f32.mrf.mxu1  ;;  %2377 = vmatmul.mubr.bf16.vlgmr.msra.gmra.mxu1 %v3960_v7  ;;  %2305 = vmatprep.mubr.bf16.mxu0 %v3974_v9 }
 0x104   :  { %v4444_v24 = vadd.f32 %v1892_v8, %v1811_v29  ;;  %2386 = vmatprep.mubr.bf16.mxu1 %v3976_v10  ;;  %v1813_v34 = vpop.f32.mrf.mxu0  ;;  %v4508_v8 = vld [vmem:[%s4728_s3] sm:$0xf] }
 0x105   :  { %v1894_v35 = vpop.f32.mrf.mxu1 }
 0x106   :  { %v4448_v25 = vadd.f32 %v1894_v35, %v1813_v34  ;;  %v1815_v26 = vpop.f32.mrf.mxu0 }
 0x107   :  { %v1896_v44 = vpop.f32.mrf.mxu1 }
 0x108   :  { %v4450_v45 = vadd.f32 %v1896_v44, %v1815_v26  ;;  %v1817_v27 = vpop.f32.mrf.mxu0 }
 0x109   :  { %v1898_v36 = vpop.f32.mrf.mxu1 }
 0x10a   :  { %v4452_v50 = vadd.f32 %v1898_v36, %v1817_v27  ;;  %2306 = vmatmul.mubr.bf16.gmra.mxu0 %v4006_v32  ;;  %v1821_v6 = vpop.f32.mrf.mxu0  ;;  %v4515_v36 = vrot.slane %v4508_v8, %v2429_v20 }
 0x10b   :  { %2387 = vmatmul.mubr.bf16.gmra.mxu1 %v4008_v33  ;;  %v1902_v7 = vpop.f32.mrf.mxu1  ;;  %2315 = vmatprep.mubr.bf16.mxu0 %v4022_v40 }
 0x10c   :  { %2396 = vmatprep.mubr.bf16.mxu1 %v4024_v41  ;;  %v4458_v9 = vadd.f32 %v1902_v7, %v1821_v6  ;;  %v1823_v10 = vpop.f32.mrf.mxu0 }
 0x10d   :  { %v1904_v51 = vpop.f32.mrf.mxu1 }
 0x10e   :  { %v4460_v37 = vadd.f32 %v1904_v51, %v1823_v10  ;;  %v1825_v38 = vpop.f32.mrf.mxu0 }
 0x10f   :  { %v1906_v59 = vpop.f32.mrf.mxu1 }
 0x110   :  { %v4462_v60 = vadd.f32 %v1906_v59, %v1825_v38  ;;  %v1827_v39 = vpop.f32.mrf.mxu0 }
 0x111   :  { %v1908_v32 = vpop.f32.mrf.mxu1 }
 0x112   :  { %v4464_v43 = vadd.f32 %v1908_v32, %v1827_v39  ;;  %2316 = vmatmul.mubr.bf16.gmra.mxu0 %v4054_v56  ;;  %v1831_v33 = vpop.f32.mrf.mxu0 }
 0x113   :  { %2397 = vmatmul.mubr.bf16.gmra.mxu1 %v4056_v57  ;;  %v1912_v40 = vpop.f32.mrf.mxu1  ;;  %2325 = vmatprep.mubr.bf16.mxu0 %v4070_v0 }
 0x114   :  { %2406 = vmatprep.mubr.bf16.mxu1 %v4072_v1  ;;  %v4470_v41 = vadd.f32 %v1912_v40, %v1831_v33  ;;  %v1833_v2 = vpop.f32.mrf.mxu0 }
 0x115   :  { %v1914_v3 = vpop.f32.mrf.mxu1 }
 0x116   :  { %v4472_v46 = vadd.f32 %v1914_v3, %v1833_v2  ;;  %v1835_v48 = vpop.f32.mrf.mxu0 }
 0x117   :  { %v1916_v13 = vpop.f32.mrf.mxu1 }
 0x118   :  { %v4474_v14 = vadd.f32 %v1916_v13, %v1835_v48  ;;  %v1837_v49 = vpop.f32.mrf.mxu0 }
 0x119   :  { %v1918_v56 = vpop.f32.mrf.mxu1 }
 0x11a   :  { %v4476_v52 = vadd.f32 %v1918_v56, %v1837_v49  ;;  %2326 = vmatmul.mubr.bf16.gmra.mxu0 %v4096_v15  ;;  %v1841_v57 = vpop.f32.mrf.mxu0 }
 0x11b   :  { %2407 = vmatmul.mubr.bf16.gmra.mxu1 %v4098_v21  ;;  %v1922_v0 = vpop.f32.mrf.mxu1  ;;  %2335 = vmatprep.mubr.bf16.mxu0 %v4112_v30 }
 0x11c   :  { %2416 = vmatprep.mubr.bf16.mxu1 %v4114_v31  ;;  %v4482_v1 = vadd.f32 %v1922_v0, %v1841_v57  ;;  %v1843_v22 = vpop.f32.mrf.mxu0 }
 0x11d   :  { %v1924_v23 = vpop.f32.mrf.mxu1 }
 0x11e   :  { %v4484_v54 = vadd.f32 %v1924_v23, %v1843_v22  ;;  %v1845_v58 = vpop.f32.mrf.mxu0 }
 0x11f   :  { %v1926_v61 = vpop.f32.mrf.mxu1 }
 0x120   :  { %v4486_v62 = vadd.f32 %v1926_v61, %v1845_v58  ;;  %v1847_v63 = vpop.f32.mrf.mxu0 }
 0x121   :  { %v1928_v15 = vpop.f32.mrf.mxu1 }
 0x122   :  { %v4488_v4 = vadd.f32 %v1928_v15, %v1847_v63  ;;  %2336 = vmatmul.mubr.bf16.gmra.mxu0 %v4132_v42  ;;  %v1851_v21 = vpop.f32.mrf.mxu0  ;;  %v4502_v42 = vld [vmem:[%s4727_s2] sm:$0xf] }
 0x123   :  { %2417 = vmatmul.mubr.bf16.gmra.mxu1 %v4140_v47  ;;  %v1932_v30 = vpop.f32.mrf.mxu1  ;;  %v2433_v47 = vsub.s32 1, %v4496_v17  ;;  %v4512_v35 = vrot.slane %v4502_v42, %v2429_v20 }
 0x124   :  { %v4492_v31 = vadd.f32 %v1932_v30, %v1851_v21  ;;  %v1853_v53 = vpop.f32.mrf.mxu0 }
 0x125   :  { %v1934_v55 = vpop.f32.mrf.mxu1  ;;  %v4519_v7 = vrot.slane %v4502_v42, %v2433_v47 }
 0x126   :  { %v4494_v11 = vadd.f32 %v1934_v55, %v1853_v53  ;;  %v1855_v12 = vpop.f32.mrf.mxu0 }
 0x127   :  { %v1936_v5 = vpop.f32.mrf.mxu1 }
 0x128   :  { %v1856_v16 = vpop.f32.mrf.mxu0 }
 0x129   :  { %v1937_v18 = vpop.f32.mrf.mxu1 }
 0x142   :  { %v1973_v28 = vpop.f32.mrf.mxu0 }
 0x143   :  { %v2054_v29 = vpop.f32.mrf.mxu1  ;;  %v1974_v34 = vadd.f32 %v1973_v28, %v4444_v24  ;;  %v4523_v24 = vrot.slane %v4508_v8, %v2433_v47 }
 0x144   :  { %v1975_v26 = vpop.f32.mrf.mxu0 }
 0x145   :  { %v2056_v44 = vpop.f32.mrf.mxu1  ;;  %v2055_v27 = vadd.f32 %v2054_v29, %v1974_v34  ;;  %v1976_v6 = vadd.f32 %v1975_v26, %v4448_v25 }
 0x146   :  { %v1977_v10 = vpop.f32.mrf.mxu0 }
 0x147   :  { %v2058_v51 = vpop.f32.mrf.mxu1  ;;  %v2447_v38 = vmul.f32 %v4512_v35, %v2055_v27  ;;  %v2057_v59 = vadd.f32 %v2056_v44, %v1976_v6  ;;  %v1978_v39 = vadd.f32 %v1977_v10, %v4450_v45 }
 0x148   :  { %v1979_v32 = vpop.f32.mrf.mxu0 }
 0x149   :  { %v2060_v33 = vpop.f32.mrf.mxu1  ;;  %v2505_v40 = vadd.f32 %v4515_v36, %v2447_v38  ;;  %v2448_v2 = vmul.f32 %v4519_v7, %v2057_v59  ;;  %v2059_v25 = vadd.f32 %v2058_v51, %v1978_v39  ;;  %v1980_v3 = vadd.f32 %v1979_v32, %v4452_v50 }
 0x14a   :  { %v1983_v48 = vpop.f32.mrf.mxu0 }
 0x14b   :  { %v2064_v13 = vpop.f32.mrf.mxu1  ;;  %v2506_v49 = vadd.f32 %v4523_v24, %v2448_v2  ;;  %v2451_v56 = vmul.f32 %v4512_v35, %v2059_v25  ;;  %v2061_v57 = vadd.f32 %v2060_v33, %v1980_v3  ;;  %v2541_v0 = vmax.f32 %v2505_v40, 0.0 }
 0x14c   :  { %v1984_v22 = vadd.f32 %v1983_v48, %v4458_v9  ;;  %v1985_v45 = vpop.f32.mrf.mxu0 }
 0x14d   :  { %v2066_v23 = vpop.f32.mrf.mxu1  ;;  %v2542_v58 = vmax.f32 %v2506_v49, 0.0  ;;  %v2509_v61 = vadd.f32 %v4515_v36, %v2451_v56  ;;  %v2452_v63 = vmul.f32 %v4519_v7, %v2061_v57  ;;  %v1986_v15 = vadd.f32 %v1985_v45, %v4460_v37 }
 0x14e   :  { %v2065_v50 = vadd.f32 %v2064_v13, %v1984_v22  ;;  %v1987_v21 = vpop.f32.mrf.mxu0 }
 0x14f   :  { %v2068_v30 = vpop.f32.mrf.mxu1  ;;  %v4535_v53 = vmax.f32 %v2541_v0, %v2542_v58  ;;  %v2510_v55 = vadd.f32 %v4523_v24, %v2452_v63  ;;  %v1988_v12 = vadd.f32 %v1987_v21, %v4462_v60  ;;  %v2067_v5 = vadd.f32 %v2066_v23, %v1986_v15 }
 0x150   :  { %v2455_v9 = vmul.f32 %v4512_v35, %v2065_v50  ;;  %v1989_v16 = vpop.f32.mrf.mxu0  ;;  %v2545_v19 = vmax.f32 %v2509_v61, 0.0 }
 0x151   :  { %v2070_v18 = vpop.f32.mrf.mxu1  ;;  %v2546_v20 = vmax.f32 %v2510_v55, 0.0  ;;  %v1990_v47 = vadd.f32 %v1989_v16, %v4464_v43  ;;  %v2069_v28 = vadd.f32 %v2068_v30, %v1988_v12  ;;  %v2456_v29 = vmul.f32 %v4519_v7, %v2067_v5 }
 0x152   :  { %v2513_v37 = vadd.f32 %v4515_v36, %v2455_v9  ;;  %v1993_v34 = vpop.f32.mrf.mxu0 }
 0x153   :  { %v2074_v26 = vpop.f32.mrf.mxu1  ;;  %v4543_v44 = vmax.f32 %v2545_v19, %v2546_v20  ;;  %v2459_v60 = vmul.f32 %v4512_v35, %v2069_v28  ;;  %v1994_v27 = vadd.f32 %v1993_v34, %v4470_v41  ;;  %v2071_v6 = vadd.f32 %v2070_v18, %v1990_v47 }
 0x154   :  { %v2514_v10 = vadd.f32 %v4523_v24, %v2456_v29  ;;  %v1995_v51 = vpop.f32.mrf.mxu0  ;;  %v2549_v33 = vmax.f32 %v2513_v37, 0.0 }
 0x155   :  { %v2076_v38 = vpop.f32.mrf.mxu1  ;;  %v2517_v43 = vadd.f32 %v4515_v36, %v2459_v60  ;;  %v2460_v59 = vmul.f32 %v4519_v7, %v2071_v6  ;;  %v1996_v39 = vadd.f32 %v1995_v51, %v4472_v46  ;;  %v2075_v32 = vadd.f32 %v2074_v26, %v1994_v27 }
 0x156   :  { %v2550_v40 = vmax.f32 %v2514_v10, 0.0  ;;  %v1997_v2 = vpop.f32.mrf.mxu0 }
 0x157   :  { %v2078_v25 = vpop.f32.mrf.mxu1  ;;  %v2518_v3 = vadd.f32 %v4523_v24, %v2460_v59  ;;  %v2463_v41 = vmul.f32 %v4512_v35, %v2075_v32  ;;  %v1998_v48 = vadd.f32 %v1997_v2, %v4474_v14  ;;  %v2077_v49 = vadd.f32 %v2076_v38, %v1996_v39 }
 0x158   :  { %v4554_v13 = vmax.f32 %v2549_v33, %v2550_v40  ;;  %v1999_v56 = vpop.f32.mrf.mxu0  ;;  %v2553_v0 = vmax.f32 %v2517_v43, 0.0 }
 0x159   :  { %v2080_v57 = vpop.f32.mrf.mxu1  ;;  %v2554_v22 = vmax.f32 %v2518_v3, 0.0  ;;  %v2000_v46 = vadd.f32 %v1999_v56, %v4476_v52  ;;  %v2079_v45 = vadd.f32 %v2078_v25, %v1998_v48  ;;  %v2521_v23 = vadd.f32 %v4515_v36, %v2463_v41 }
 0x15a   :  { %v2464_v58 = vmul.f32 %v4519_v7, %v2077_v49  ;;  %v2003_v61 = vpop.f32.mrf.mxu0 }
 0x15b   :  { %v2084_v63 = vpop.f32.mrf.mxu1  ;;  %v4559_v15 = vmax.f32 %v2553_v0, %v2554_v22  ;;  %v2467_v14 = vmul.f32 %v4512_v35, %v2079_v45  ;;  %v2004_v50 = vadd.f32 %v2003_v61, %v4482_v1  ;;  %v2081_v30 = vadd.f32 %v2080_v57, %v2000_v46 }
 0x15c   :  { %v2522_v21 = vadd.f32 %v4523_v24, %v2464_v58  ;;  %v2005_v55 = vpop.f32.mrf.mxu0  ;;  %v2557_v5 = vmax.f32 %v2521_v23, 0.0 }
 0x15d   :  { %v2086_v12 = vpop.f32.mrf.mxu1  ;;  %v2006_v52 = vadd.f32 %v2005_v55, %v4484_v54  ;;  %v2085_v9 = vadd.f32 %v2084_v63, %v2004_v50  ;;  %v2525_v18 = vadd.f32 %v4515_v36, %v2467_v14  ;;  %v2468_v19 = vmul.f32 %v4519_v7, %v2081_v30 }
 0x15e   :  { %v2558_v16 = vmax.f32 %v2522_v21, 0.0  ;;  %v2007_v20 = vpop.f32.mrf.mxu0 }
 0x15f   :  { %v2088_v47 = vpop.f32.mrf.mxu1  ;;  %v2471_v28 = vmul.f32 %v4512_v35, %v2085_v9  ;;  %v2008_v1 = vadd.f32 %v2007_v20, %v4486_v62  ;;  %v2087_v37 = vadd.f32 %v2086_v12, %v2006_v52  ;;  %v2526_v34 = vadd.f32 %v4523_v24, %v2468_v19 }
 0x160   :  { %v4569_v29 = vmax.f32 %v2557_v5, %v2558_v16  ;;  %v2009_v26 = vpop.f32.mrf.mxu0  ;;  %v2561_v51 = vmax.f32 %v2525_v18, 0.0 }
 0x161   :  { %v2090_v54 = vpop.f32.mrf.mxu1  ;;  %v2529_v60 = vadd.f32 %v4515_v36, %v2471_v28  ;;  %v2472_v27 = vmul.f32 %v4519_v7, %v2087_v37  ;;  %v2010_v6 = vadd.f32 %v2009_v26, %v4488_v4  ;;  %v2089_v10 = vadd.f32 %v2088_v47, %v2008_v1 }
 0x162   :  { %v2562_v38 = vmax.f32 %v2526_v34, 0.0  ;;  %v2013_v43 = vpop.f32.mrf.mxu0 }
 0x163   :  { %v2094_v59 = vpop.f32.mrf.mxu1  ;;  %v2530_v62 = vadd.f32 %v4523_v24, %v2472_v27  ;;  %v2475_v39 = vmul.f32 %v4512_v35, %v2089_v10  ;;  %v2014_v32 = vadd.f32 %v2013_v43, %v4492_v31  ;;  %v2091_v40 = vadd.f32 %v2090_v54, %v2010_v6 }
 0x164   :  { %v4578_v33 = vmax.f32 %v2561_v51, %v2562_v38  ;;  %v2015_v2 = vpop.f32.mrf.mxu0  ;;  %v2565_v3 = vmax.f32 %v2529_v60, 0.0 }
 0x165   :  { %v2096_v25 = vpop.f32.mrf.mxu1  ;;  %v2566_v41 = vmax.f32 %v2530_v62, 0.0  ;;  %v2016_v4 = vadd.f32 %v2015_v2, %v4494_v11  ;;  %v2095_v48 = vadd.f32 %v2094_v59, %v2014_v32  ;;  %v2533_v49 = vadd.f32 %v4515_v36, %v2475_v39 }
 0x166   :  { %v2476_v56 = vmul.f32 %v4519_v7, %v2091_v40  ;;  %v2017_v57 = vpop.f32.mrf.mxu0 }
 0x167   :  { %v2098_v0 = vpop.f32.mrf.mxu1  ;;  %v4583_v22 = vmax.f32 %v2565_v3, %v2566_v41  ;;  %v2479_v31 = vmul.f32 %v4512_v35, %v2095_v48  ;;  %v2097_v46 = vadd.f32 %v2096_v25, %v2016_v4  ;;  %v2569_v63 = vmax.f32 %v2533_v49, 0.0 }
 0x168   :  { %v2534_v45 = vadd.f32 %v4523_v24, %v2476_v56  ;;  %v2018_v23 = vpop.f32.mrf.mxu0 }
 0x169   :  { %v2099_v58 = vpop.f32.mrf.mxu1  ;;  %v2537_v61 = vadd.f32 %v4515_v36, %v2479_v31  ;;  %v2480_v11 = vmul.f32 %v4519_v7, %v2097_v46 }
 0x16a   :  { %v2570_v14 = vmax.f32 %v2534_v45, 0.0 }
 0x16b   :  { %v2538_v50 = vadd.f32 %v4523_v24, %v2480_v11  ;;  %v2573_v30 = vmax.f32 %v2537_v61, 0.0 }
 0x16c   :  { %v4590_v21 = vmax.f32 %v2569_v63, %v2570_v14 }
 0x16d   :  { %v2574_v55 = vmax.f32 %v2538_v50, 0.0 }
 0x16f   :  { %v4592_v12 = vmax.f32 %v2573_v30, %v2574_v55 }
 0x182   :  { %v2135_v35 = vpop.f32.mrf.mxu0 }
 0x183   :  { %v2216_v52 = vpop.f32.mrf.mxu1 }
 0x184   :  { %v2217_v9 = vadd.f32 %v2216_v52, %v2135_v35  ;;  %v2137_v5 = vpop.f32.mrf.mxu0  ;;  %v2437_v52 = vsub.s32 2, %v4496_v17 }
 0x185   :  { %v2218_v16 = vpop.f32.mrf.mxu1 }
 0x186   :  { %v2219_v18 = vadd.f32 %v2218_v16, %v2137_v5  ;;  %v2139_v19 = vpop.f32.mrf.mxu0  ;;  %v2441_v5 = vsub.s32 3, %v4496_v17 }
 0x187   :  { %v2220_v36 = vpop.f32.mrf.mxu1 }
 0x188   :  { %v4594_v20 = vadd.f32 %v2220_v36, %v2139_v19  ;;  %v2141_v7 = vpop.f32.mrf.mxu0 }
 0x189   :  { %v2222_v47 = vpop.f32.mrf.mxu1 }
 0x18a   :  { %v2145_v28 = vpop.f32.mrf.mxu0 }
 0x18b   :  { %v2226_v24 = vpop.f32.mrf.mxu1 }
 0x18c   :  { %v4596_v1 = vadd.f32 %v2226_v24, %v2145_v28  ;;  %v2147_v37 = vpop.f32.mrf.mxu0  ;;  %v4635_v28 = vrot.slane %v4502_v42, %v2437_v52 }
 0x18d   :  { %v2228_v34 = vpop.f32.mrf.mxu1 }
 0x18e   :  { %v4598_v26 = vadd.f32 %v2228_v34, %v2147_v37  ;;  %v2149_v54 = vpop.f32.mrf.mxu0 }
 0x18f   :  { %v2230_v60 = vpop.f32.mrf.mxu1 }
 0x190   :  { %v4600_v27 = vadd.f32 %v2230_v60, %v2149_v54  ;;  %v4602_v6 = vpop.f32.mrf.mxu0  ;;  %v4638_v54 = vrot.slane %v4508_v8, %v2437_v52 }
 0x191   :  { %v4604_v10 = vpop.f32.mrf.mxu1 }
 0x192   :  { %v2155_v51 = vpop.f32.mrf.mxu0 }
 0x193   :  { %v2236_v38 = vpop.f32.mrf.mxu1 }
 0x194   :  { %v4606_v43 = vadd.f32 %v2236_v38, %v2155_v51  ;;  %v2157_v59 = vpop.f32.mrf.mxu0  ;;  %v4641_v51 = vrot.slane %v4502_v42, %v2441_v5  ;;  %v4644_v38 = vrot.slane %v4508_v8, %v2441_v5 }
 0x195   :  { %v2238_v62 = vpop.f32.mrf.mxu1 }
 0x196   :  { %v4608_v39 = vadd.f32 %v2238_v62, %v2157_v59  ;;  %v2159_v32 = vpop.f32.mrf.mxu0  ;;  %v2223_v62 = vadd.f32 %v2222_v47, %v2141_v7 }
 0x197   :  { %v2240_v40 = vpop.f32.mrf.mxu1 }
 0x198   :  { %v4610_v2 = vadd.f32 %v2240_v40, %v2159_v32  ;;  %v4612_v25 = vpop.f32.mrf.mxu0 }
 0x199   :  { %v4614_v3 = vpop.f32.mrf.mxu1 }
 0x19a   :  { %v2165_v41 = vpop.f32.mrf.mxu0 }
 0x19b   :  { %v2246_v4 = vpop.f32.mrf.mxu1 }
 0x19c   :  { %v4616_v48 = vadd.f32 %v2246_v4, %v2165_v41  ;;  %v2167_v49 = vpop.f32.mrf.mxu0 }
 0x19d   :  { %v2248_v56 = vpop.f32.mrf.mxu1 }
 0x19e   :  { %v4618_v57 = vadd.f32 %v2248_v56, %v2167_v49  ;;  %v2169_v0 = vpop.f32.mrf.mxu0 }
 0x19f   :  { %v2250_v31 = vpop.f32.mrf.mxu1 }
 0x1a0   :  { %v4620_v46 = vadd.f32 %v2250_v31, %v2169_v0  ;;  %v4622_v45 = vpop.f32.mrf.mxu0 }
 0x1a1   :  { %v4624_v23 = vpop.f32.mrf.mxu1 }
 0x1a2   :  { %v2175_v58 = vpop.f32.mrf.mxu0 }
 0x1a3   :  { %v2256_v61 = vpop.f32.mrf.mxu1 }
 0x1a4   :  { %v4626_v11 = vadd.f32 %v2256_v61, %v2175_v58  ;;  %v4628_v63 = vpop.f32.mrf.mxu0 }
 0x1a5   :  { %v4630_v14 = vpop.f32.mrf.mxu1 }
 0x1a6   :  { %v2179_v50 = vpop.f32.mrf.mxu0 }
 0x1a7   :  { %v2260_v30 = vpop.f32.mrf.mxu1 }
 0x1a8   :  { %v2180_v55 = vpop.f32.mrf.mxu0 }
 0x1a9   :  { %v2261_v35 = vpop.f32.mrf.mxu1 }
 0x1c2   :  { %v2297_v16 = vpop.f32.mrf.mxu0 }
 0x1c3   :  { %v2378_v19 = vpop.f32.mrf.mxu1  ;;  %v2298_v36 = vadd.f32 %v2297_v16, %v2217_v9 }
 0x1c4   :  { %v2299_v24 = vpop.f32.mrf.mxu0 }
 0x1c5   :  { %v2380_v37 = vpop.f32.mrf.mxu1  ;;  %v2379_v34 = vadd.f32 %v2378_v19, %v2298_v36  ;;  %v2300_v60 = vadd.f32 %v2299_v24, %v2219_v18  ;;  %v2233_v36 = vadd.f32 %v4604_v10, %v4602_v6 }
 0x1c6   :  { %v2301_v17 = vpop.f32.mrf.mxu0 }
 0x1c7   :  { %v2382_v59 = vpop.f32.mrf.mxu1  ;;  %v2449_v9 = vmul.f32 %v4635_v28, %v2379_v34  ;;  %v2381_v32 = vadd.f32 %v2380_v37, %v2300_v60  ;;  %v2302_v40 = vadd.f32 %v2301_v17, %v4594_v20 }
 0x1c8   :  { %v2303_v41 = vpop.f32.mrf.mxu0 }
 0x1c9   :  { %v2384_v4 = vpop.f32.mrf.mxu1  ;;  %v2507_v49 = vadd.f32 %v4638_v54, %v2449_v9  ;;  %v2450_v18 = vmul.f32 %v4641_v51, %v2381_v32  ;;  %v2383_v56 = vadd.f32 %v2382_v59, %v2302_v40  ;;  %v2304_v42 = vadd.f32 %v2303_v41, %v2223_v62 }
 0x1ca   :  { %v2307_v0 = vpop.f32.mrf.mxu0 }
 0x1cb   :  { %v2388_v31 = vpop.f32.mrf.mxu1  ;;  %v2508_v8 = vadd.f32 %v4644_v38, %v2450_v18  ;;  %v2453_v58 = vmul.f32 %v4635_v28, %v2383_v56  ;;  %v2385_v7 = vadd.f32 %v2384_v4, %v2304_v42  ;;  %v2543_v47 = vmax.f32 %v2507_v49, 0.0 }
 0x1cc   :  { %v2308_v61 = vadd.f32 %v2307_v0, %v4596_v1  ;;  %v2309_v50 = vpop.f32.mrf.mxu0 }
 0x1cd   :  { %v2390_v20 = vpop.f32.mrf.mxu1  ;;  %v2544_v30 = vmax.f32 %v2508_v8, 0.0  ;;  %v2511_v55 = vadd.f32 %v4638_v54, %v2453_v58  ;;  %v2454_v35 = vmul.f32 %v4641_v51, %v2385_v7  ;;  %v2310_v52 = vadd.f32 %v2309_v50, %v4598_v26 }
 0x1ce   :  { %v2389_v5 = vadd.f32 %v2388_v31, %v2308_v61  ;;  %v2311_v16 = vpop.f32.mrf.mxu0  ;;  %v2243_v61 = vadd.f32 %v4614_v3, %v4612_v25 }
 0x1cf   :  { %v2392_v19 = vpop.f32.mrf.mxu1  ;;  %v2586_v24 = vmax.f32 %v2543_v47, %v2544_v30  ;;  %v2512_v37 = vadd.f32 %v4644_v38, %v2454_v35  ;;  %v2391_v34 = vadd.f32 %v2390_v20, %v2310_v52  ;;  %v2547_v1 = vmax.f32 %v2511_v55, 0.0 }
 0x1d0   :  { %v2457_v60 = vmul.f32 %v4635_v28, %v2389_v5  ;;  %v2312_v17 = vadd.f32 %v2311_v16, %v4600_v27  ;;  %v2313_v59 = vpop.f32.mrf.mxu0 }
 0x1d1   :  { %v2394_v62 = vpop.f32.mrf.mxu1  ;;  %v2595_v9 = vmax.f32 %v4535_v53, %v2586_v24  ;;  %v2548_v26 = vmax.f32 %v2512_v37, 0.0  ;;  %v2458_v32 = vmul.f32 %v4641_v51, %v2391_v34  ;;  %v2314_v40 = vadd.f32 %v2313_v59, %v2233_v36 }
 0x1d2   :  { %v2515_v41 = vadd.f32 %v4638_v54, %v2457_v60  ;;  %v2393_v6 = vadd.f32 %v2392_v19, %v2312_v17  ;;  %v2317_v10 = vpop.f32.mrf.mxu0 }
 0x1d3   :  { %v2398_v4 = vpop.f32.mrf.mxu1  ;;  %v2587_v49 = vmax.f32 %v2547_v1, %v2548_v26  ;;  %v2516_v18 = vadd.f32 %v4644_v38, %v2458_v32  ;;  %v2395_v56 = vadd.f32 %v2394_v62, %v2314_v40  ;;  %v2318_v42 = vadd.f32 %v2317_v10, %v4606_v43 }
 0x1d4   :  { %v2551_v27 = vmax.f32 %v2515_v41, 0.0  ;;  %v2461_v0 = vmul.f32 %v4635_v28, %v2393_v6  ;;  %v2319_v31 = vpop.f32.mrf.mxu0 }
 0x1d5   :  { %v2400_v53 = vpop.f32.mrf.mxu1  ;;  %v2596_v8 = vmax.f32 %v4543_v44, %v2587_v49  ;;  %v2552_v58 = vmax.f32 %v2516_v18, 0.0  ;;  %v2462_v7 = vmul.f32 %v4641_v51, %v2395_v56  ;;  %v2399_v47 = vadd.f32 %v2398_v4, %v2318_v42 }
 0x1d6   :  { %v2519_v50 = vadd.f32 %v4638_v54, %v2461_v0  ;;  %v2320_v20 = vadd.f32 %v2319_v31, %v4608_v39  ;;  %v2321_v30 = vpop.f32.mrf.mxu0  ;;  %v2253_v4 = vadd.f32 %v4624_v23, %v4622_v45 }
 0x1d7   :  { %v2402_v43 = vpop.f32.mrf.mxu1  ;;  %v2971_v55 = vpack.c.bf16 %v2596_v8, %v2595_v9  ;;  %v2588_v35 = vmax.f32 %v2551_v27, %v2552_v58  ;;  %v2520_v52 = vadd.f32 %v4644_v38, %v2462_v7  ;;  %v2465_v5 = vmul.f32 %v4635_v28, %v2399_v47 }
 0x1d8   :  { %v2401_v44 = vadd.f32 %v2400_v53, %v2320_v20  ;;  %v2322_v16 = vadd.f32 %v2321_v30, %v4610_v2  ;;  %v2323_v19 = vpop.f32.mrf.mxu0  ;;  %v2555_v39 = vmax.f32 %v2519_v50, 0.0 }
 0x1d9   :  { %v2404_v36 = vpop.f32.mrf.mxu1  ;;  %2972 = vst [vmem:[%s4729_s4] sm:$0xff] %v2971_v55   ;;  %v2597_v25 = vmax.f32 %v4554_v13, %v2588_v35  ;;  %v2556_v3 = vmax.f32 %v2520_v52, 0.0  ;;  %v2324_v24 = vadd.f32 %v2323_v19, %v2243_v61  ;;  %v2523_v37 = vadd.f32 %v4638_v54, %v2465_v5 }
 0x1da   :  { %v2466_v34 = vmul.f32 %v4641_v51, %v2401_v44  ;;  %v2403_v1 = vadd.f32 %v2402_v43, %v2322_v16  ;;  %v2327_v60 = vpop.f32.mrf.mxu0 }
 0x1db   :  { %v2408_v17 = vpop.f32.mrf.mxu1  ;;  %v2589_v59 = vmax.f32 %v2555_v39, %v2556_v3  ;;  %v2405_v2 = vadd.f32 %v2404_v36, %v2324_v24  ;;  %v2328_v62 = vadd.f32 %v2327_v60, %v4616_v48  ;;  %v2559_v49 = vmax.f32 %v2523_v37, 0.0 }
 0x1dc   :  { %v2524_v9 = vadd.f32 %v4644_v38, %v2466_v34  ;;  %v2469_v26 = vmul.f32 %v4635_v28, %v2403_v1  ;;  %v2329_v32 = vpop.f32.mrf.mxu0 }
 0x1dd   :  { %v2410_v13 = vpop.f32.mrf.mxu1  ;;  %v2598_v40 = vmax.f32 %v4559_v15, %v2589_v59  ;;  %v2470_v41 = vmul.f32 %v4641_v51, %v2405_v2  ;;  %v2409_v6 = vadd.f32 %v2408_v17, %v2328_v62  ;;  %v2330_v10 = vadd.f32 %v2329_v32, %v4618_v57 }
 0x1de   :  { %v2560_v18 = vmax.f32 %v2524_v9, 0.0  ;;  %v2527_v48 = vadd.f32 %v4638_v54, %v2469_v26  ;;  %v2331_v56 = vpop.f32.mrf.mxu0 }
 0x1df   :  { %v2412_v42 = vpop.f32.mrf.mxu1  ;;  %v2976_v27 = vpack.c.bf16 %v2598_v40, %v2597_v25  ;;  %v2528_v0 = vadd.f32 %v4644_v38, %v2470_v41  ;;  %v2473_v31 = vmul.f32 %v4635_v28, %v2409_v6  ;;  %v2411_v15 = vadd.f32 %v2410_v13, %v2330_v10 }
 0x1e0   :  { %v2590_v53 = vmax.f32 %v2559_v49, %v2560_v18  ;;  %v2563_v8 = vmax.f32 %v2527_v48, 0.0  ;;  %v2332_v58 = vadd.f32 %v2331_v56, %v4620_v46  ;;  %v2333_v57 = vpop.f32.mrf.mxu0  ;;  %v2259_v46 = vadd.f32 %v4630_v14, %v4628_v63 }
 0x1e1   :  { %v2414_v7 = vpop.f32.mrf.mxu1  ;;  %2988 = vst [vmem:[%s4729_s4 + $0x8] sm:$0xff] %v2976_v27   ;;  %v2564_v45 = vmax.f32 %v2528_v0, 0.0  ;;  %v2531_v23 = vadd.f32 %v4638_v54, %v2473_v31  ;;  %v2474_v47 = vmul.f32 %v4641_v51, %v2411_v15  ;;  %v2334_v61 = vadd.f32 %v2333_v57, %v2253_v4 }
 0x1e2   :  { %v2599_v50 = vmax.f32 %v4569_v29, %v2590_v53  ;;  %v2413_v20 = vadd.f32 %v2412_v42, %v2332_v58  ;;  %v2337_v30 = vpop.f32.mrf.mxu0 }
 0x1e3   :  { %v2418_v43 = vpop.f32.mrf.mxu1  ;;  %v2591_v55 = vmax.f32 %v2563_v8, %v2564_v45  ;;  %v2532_v35 = vadd.f32 %v4644_v38, %v2474_v47  ;;  %v2415_v52 = vadd.f32 %v2414_v7, %v2334_v61  ;;  %v2567_v5 = vmax.f32 %v2531_v23, 0.0 }
 0x1e4   :  { %v2477_v44 = vmul.f32 %v4635_v28, %v2413_v20  ;;  %v2338_v16 = vadd.f32 %v2337_v30, %v4626_v11  ;;  %v2339_v19 = vpop.f32.mrf.mxu0 }
 0x1e5   :  { %v2420_v36 = vpop.f32.mrf.mxu1  ;;  %v2600_v25 = vmax.f32 %v4578_v33, %v2591_v55  ;;  %v2568_v29 = vmax.f32 %v2532_v35, 0.0  ;;  %v2478_v39 = vmul.f32 %v4641_v51, %v2415_v52  ;;  %v2340_v3 = vadd.f32 %v2339_v19, %v2259_v46 }
 0x1e6   :  { %v2535_v24 = vadd.f32 %v4638_v54, %v2477_v44  ;;  %v2419_v63 = vadd.f32 %v2418_v43, %v2338_v16  ;;  %v2341_v14 = vpop.f32.mrf.mxu0 }
 0x1e7   :  { %v2422_v37 = vpop.f32.mrf.mxu1  ;;  %v2981_v34 = vpack.c.bf16 %v2600_v25, %v2599_v50  ;;  %v2592_v1 = vmax.f32 %v2567_v5, %v2568_v29  ;;  %v2536_v60 = vadd.f32 %v4644_v38, %v2478_v39  ;;  %v2421_v17 = vadd.f32 %v2420_v36, %v2340_v3 }
 0x1e8   :  { %v2481_v11 = vmul.f32 %v4635_v28, %v2419_v63  ;;  %v2342_v59 = vpop.f32.mrf.mxu0  ;;  %v2571_v62 = vmax.f32 %v2535_v24, 0.0 }
 0x1e9   :  { %v2423_v2 = vpop.f32.mrf.mxu1  ;;  %2989 = vst [vmem:[%s4729_s4 + $0x10] sm:$0xff] %v2981_v34   ;;  %v2601_v33 = vmax.f32 %v4583_v22, %v2592_v1  ;;  %v2572_v9 = vmax.f32 %v2536_v60, 0.0  ;;  %v2482_v26 = vmul.f32 %v4641_v51, %v2421_v17 }
 0x1ea   :  { %v2539_v32 = vadd.f32 %v4638_v54, %v2481_v11 }
 0x1eb   :  { %v2593_v13 = vmax.f32 %v2571_v62, %v2572_v9  ;;  %v2540_v40 = vadd.f32 %v4644_v38, %v2482_v26 }
 0x1ec   :  { %v2575_v28 = vmax.f32 %v2539_v32, 0.0 }
 0x1ed   :  { %v2602_v41 = vmax.f32 %v4590_v21, %v2593_v13  ;;  %v2576_v6 = vmax.f32 %v2540_v40, 0.0 }
 0x1ef   :  { %v2986_v10 = vpack.c.bf16 %v2602_v41, %v2601_v33  ;;  %v2594_v4 = vmax.f32 %v2575_v28, %v2576_v6 }
 0x1f1   :  { %2990 = vst [vmem:[%s4729_s4 + $0x18] sm:$0xff] %v2986_v10   ;;  %v2603_v22 = vmax.f32 %v4592_v12, %v2594_v4 }
 0x1f3   :  { %v2967_v49 = vpack.c.bf16 %v2603_v22, %v2603_v22 }
 0x1f5   :  { %2649 = vst [vmem:[%s4729_s4 + $0x20] sm:$0xf] %v2967_v49 }

</bundles_post_ra>
